<compile_context>
chip_gen: v6e
topology: v6e:2x2x1
jax: 0.10.0
libtpu: 0.0.40
codegen_flags: <defaults>
</compile_context>

<pallas_src>
import functools

import numpy as np
import jax
import jax.numpy as jnp
from jax.experimental import pallas as pl
from jax.experimental.pallas import tpu as pltpu


# ------------------------------ fused kernel ---------------------------------


def _make_fused_kernel(H, W, Cin):
    """Whole SmallResNet forward for one image per grid step."""
    HW = H * W
    Ho, Wo = H // 2, W // 2
    HWo = Ho * Wo

    def conv3x3(act, w_ref, b_ref, ah, aw, sel=None):
        """3x3 pad-1 conv.

        act: (ah*aw, C) bf16 activation (flat row-major spatial).
        w_ref: (9, C, Cout) bf16 folded weight, b_ref: (1, Cout) f32 bias.
        If `sel` ((ah*aw)//4, ah*aw) bf16 one-hot rows is given, the conv is
        stride 2 (taps are gathered through the selection matmul).
        Returns the f32 pre-activation (rows, Cout).
        """
        hw = ah * aw
        C = act.shape[1]
        P = aw + 1  # enough zero rows for any |dy*aw + dx| <= aw + 1
        zpad = jnp.zeros((P, C), act.dtype)
        act_pad = jnp.concatenate([zpad, act, zpad], axis=0)  # (hw + 2P, C)

        # boundary masks (aw is a power of two -> bit ops, no integer div)
        row = jax.lax.broadcasted_iota(jnp.int32, (hw, 1), 0)
        col = row & (aw - 1)
        top = row < aw
        bot = row >= hw - aw
        left = col == 0
        right = col == aw - 1

        acc = b_ref[...]  # (1, Cout) f32; broadcasts over output rows
        t = 0
        for dy in (-1, 0, 1):
            for dx in (-1, 0, 1):
                s = dy * aw + dx
                # tap[p] = act[p + s] (zero outside [0, hw))
                tap = act_pad[P + s:P + s + hw, :]
                bad = None
                for cond in (
                    top if dy < 0 else (bot if dy > 0 else None),
                    left if dx < 0 else (right if dx > 0 else None),
                ):
                    if cond is not None:
                        bad = cond if bad is None else jnp.logical_or(bad, cond)
                if bad is not None:
                    tap = jnp.where(bad, jnp.zeros_like(tap), tap)
                if sel is not None:
                    # stride-2: pick full-res rows 2*aw*i + 2*j (one-hot matmul)
                    tap = jnp.dot(
                        sel, tap, preferred_element_type=jnp.float32
                    ).astype(jnp.bfloat16)
                acc = acc + jnp.dot(
                    tap, w_ref[t], preferred_element_type=jnp.float32
                )
                t += 1
        return acc

    def kernel(x_ref, sel_ref, w1_ref, b1_ref, wf_ref, bf_ref,
               w2_ref, b2_ref, w3_ref, b3_ref, w4_ref, b4_ref,
               fcw_ref, fcb_ref, out_ref):
        x = x_ref[0]  # (HW, Cin) bf16

        # conv1: 3x3 s1 + folded BN + ReLU
        a1 = jnp.maximum(conv3x3(x, w1_ref, b1_ref, H, W), 0.0)
        a1 = a1.astype(jnp.bfloat16)

        # block 1: main 3x3 stride-2 conv fused with the 1x1 stride-2
        # projection shortcut (lanes [0:64] = main pre-act, [64:128] = shortcut)
        ds = conv3x3(a1, wf_ref, bf_ref, H, W, sel=sel_ref[...])  # (HWo,128) f32
        h = jnp.maximum(ds[:, :64], 0.0).astype(jnp.bfloat16)
        sc = ds[:, 64:]  # f32 shortcut

        r = conv3x3(h, w2_ref, b2_ref, Ho, Wo)  # (HWo, 64) f32
        out1 = jnp.maximum(r + sc, 0.0)         # f32 residual add + ReLU
        out1_b = out1.astype(jnp.bfloat16)

        # block 2 (identity shortcut)
        h2 = jnp.maximum(conv3x3(out1_b, w3_ref, b3_ref, Ho, Wo), 0.0)
        h2 = h2.astype(jnp.bfloat16)
        out2 = jnp.maximum(conv3x3(h2, w4_ref, b4_ref, Ho, Wo) + out1, 0.0)

        # global average pool + fc (classes padded to 128 lanes)
        pooled = jnp.sum(out2, axis=0, keepdims=True) * (1.0 / HWo)  # (1,64) f32
        logits = jnp.dot(
            pooled.astype(jnp.bfloat16), fcw_ref[...],
            preferred_element_type=jnp.float32,
        ) + fcb_ref[...]                                             # (1,128) f32
        out_ref[0] = jnp.broadcast_to(logits, (8, 128))

    return kernel


# --------------------------- one-time weight prep -----------------------------


def prepare_params(p, *, H=16, W=16, num_classes=1):
    """Fold BN, embed the 1x1 projection, pack weights as (9,Cin,Cout) bf16,
    pad the FC to 128 lanes and build the stride-2 selection matrix.
    Runs once, outside jit."""
    assert num_classes <= 128

    def fold(w, scale, shift):
        return w * scale[None, None, None, :], shift

    def pack(w, b, cin, cout):
        return (w.reshape(9, cin, cout).astype(jnp.bfloat16),
                jnp.asarray(b, jnp.float32).reshape(1, cout))

    prep = {}
    w1, b1 = fold(p["conv1_w"], p["conv1_scale"], p["conv1_shift"])
    prep["w1"], prep["b1"] = pack(w1, b1, 3, 64)

    wa, ba = fold(p["b1_c1_w"], p["b1_c1_scale"], p["b1_c1_shift"])
    wsc, bsc = fold(p["b1_sc_w"], p["b1_sc_scale"], p["b1_sc_shift"])
    wsc3 = jnp.zeros((3, 3, 64, 64), jnp.float32).at[1, 1].set(wsc[0, 0])
    prep["wf"], prep["bf"] = pack(
        jnp.concatenate([wa, wsc3], axis=-1),
        jnp.concatenate([ba, bsc], axis=0), 64, 128)

    for name, src in (("2", "b1_c2"), ("3", "b2_c1"), ("4", "b2_c2")):
        w, b = fold(p[src + "_w"], p[src + "_scale"], p[src + "_shift"])
        prep["w" + name], prep["b" + name] = pack(w, b, 64, 64)

    fcw = jnp.zeros((64, 128), jnp.float32).at[:, :num_classes].set(p["fc_w"])
    fcb = jnp.zeros((1, 128), jnp.float32).at[0, :num_classes].set(p["fc_b"])
    prep["fcw"], prep["fcb"] = fcw.astype(jnp.bfloat16), fcb

    # one-hot stride-2 row selection: ds row (i*Wo + j) <- full row (2*i*W + 2*j)
    Ho, Wo = H // 2, W // 2
    rows = np.arange(Ho * Wo)
    cols = 2 * W * (rows // Wo) + 2 * (rows % Wo)
    sel = np.zeros((Ho * Wo, H * W), np.float32)
    sel[rows, cols] = 1.0
    prep["sel"] = jnp.asarray(sel, jnp.bfloat16)
    return prep


# ------------------------------ forward pass ----------------------------------


def small_resnet_forward(x_nchw, prep, num_classes=1):
    N, Cin, H, W = x_nchw.shape
    assert W & (W - 1) == 0 and H % 2 == 0 and W % 2 == 0, "see TODO(synk)"
    HW = H * W
    Ho, Wo = H // 2, W // 2

    # NCHW -> flat NHWC (channels on lanes), bf16 for the MXU taps.
    x = jnp.transpose(x_nchw, (0, 2, 3, 1)).reshape(N, HW, Cin)
    x = x.astype(jnp.bfloat16)

    def c2(shape):  # constant (grid-invariant) 2-D operand
        return pl.BlockSpec(shape, lambda n: (0, 0))

    def c3(shape):  # constant (grid-invariant) 3-D operand
        return pl.BlockSpec(shape, lambda n: (0, 0, 0))

    out = pl.pallas_call(
        _make_fused_kernel(H, W, Cin),
        grid=(N,),
        in_specs=[
            pl.BlockSpec((1, HW, Cin), lambda n: (n, 0, 0)),   # image n
            c2((Ho * Wo, HW)),                                 # stride-2 sel
            c3((9, Cin, 64)), c2((1, 64)),                     # conv1
            c3((9, 64, 128)), c2((1, 128)),                    # blk1 conv1+proj
            c3((9, 64, 64)), c2((1, 64)),                      # blk1 conv2
            c3((9, 64, 64)), c2((1, 64)),                      # blk2 conv1
            c3((9, 64, 64)), c2((1, 64)),                      # blk2 conv2
            c2((64, 128)), c2((1, 128)),                       # fc (padded)
        ],
        out_specs=pl.BlockSpec((1, 8, 128), lambda n: (n, 0, 0)),
        out_shape=jax.ShapeDtypeStruct((N, 8, 128), jnp.float32),
        compiler_params=pltpu.CompilerParams(dimension_semantics=("parallel",)),
    )(x, prep["sel"], prep["w1"], prep["b1"], prep["wf"], prep["bf"],
      prep["w2"], prep["b2"], prep["w3"], prep["b3"], prep["w4"], prep["b4"],
      prep["fcw"], prep["fcb"])

    return out[:, 0, :num_classes]


# ------------------------------ parameters -----------------------------------


def _conv_w(key, kh, kw, cin, cout):
    fan_in = kh * kw * cin
    return jax.random.normal(key, (kh, kw, cin, cout), jnp.float32) * jnp.sqrt(
        2.0 / fan_in
    )


def _bn_params(key, c, eps=1e-5):
    k1, k2, k3, k4 = jax.random.split(key, 4)
    gamma = 1.0 + 0.1 * jax.random.normal(k1, (c,), jnp.float32)
    beta = 0.1 * jax.random.normal(k2, (c,), jnp.float32)
    mean = 0.1 * jax.random.normal(k3, (c,), jnp.float32)
    var = 1.0 + 0.1 * jax.random.uniform(k4, (c,), jnp.float32)
    scale = gamma / jnp.sqrt(var + eps)
    shift = beta - mean * scale
    return scale, shift


def init_params(key, num_classes=1):
    keys = jax.random.split(key, 16)
    p = {}
    # conv1: Conv2d(3, 64, 3, pad=1, bias=False) + BN + ReLU
    p["conv1_w"] = _conv_w(keys[0], 3, 3, 3, 64)
    p["conv1_scale"], p["conv1_shift"] = _bn_params(keys[1], 64)
    # conv5_x: 2 BasicBlocks(64 -> 64), first with stride 2 (projection shortcut)
    p["b1_c1_w"] = _conv_w(keys[2], 3, 3, 64, 64)
    p["b1_c1_scale"], p["b1_c1_shift"] = _bn_params(keys[3], 64)
    p["b1_c2_w"] = _conv_w(keys[4], 3, 3, 64, 64)
    p["b1_c2_scale"], p["b1_c2_shift"] = _bn_params(keys[5], 64)
    p["b1_sc_w"] = _conv_w(keys[6], 1, 1, 64, 64)  # 1x1 stride-2 projection
    p["b1_sc_scale"], p["b1_sc_shift"] = _bn_params(keys[7], 64)
    p["b2_c1_w"] = _conv_w(keys[8], 3, 3, 64, 64)
    p["b2_c1_scale"], p["b2_c1_shift"] = _bn_params(keys[9], 64)
    p["b2_c2_w"] = _conv_w(keys[10], 3, 3, 64, 64)
    p["b2_c2_scale"], p["b2_c2_shift"] = _bn_params(keys[11], 64)
    # fc: Linear(64 * expansion, num_classes)
    p["fc_w"] = jax.random.normal(
        keys[12], (64, num_classes), jnp.float32
    ) * jnp.sqrt(1.0 / 64)
    p["fc_b"] = 0.01 * jax.random.normal(keys[13], (num_classes,), jnp.float32)
    return p


if __name__ == "__main__":
    key = jax.random.PRNGKey(0)
    kx, kp = jax.random.split(key)
    x = jax.random.normal(kx, (2, 3, 16, 16), jnp.float32)  # NCHW like PyTorch
    params = init_params(kp, num_classes=1)
    prep = prepare_params(params, H=16, W=16, num_classes=1)  # one-time prep

    fwd = jax.jit(functools.partial(small_resnet_forward, num_classes=1))
    out = jax.block_until_ready(fwd(x, prep))

    assert out.shape == (2, 1), out.shape
    assert bool(jnp.all(jnp.isfinite(out)))
    print("KERNEL_OK")
</pallas_src>

<mosaic_0001>
module attributes {stable_mosaic.version = 11 : i64} {
  func.func @kernel(%arg0: i32, %arg1: memref<1x256x3xbf16, #tpu.memory_space<vmem>>, %arg2: memref<64x256xbf16, #tpu.memory_space<vmem>>, %arg3: memref<9x3x64xbf16, #tpu.memory_space<vmem>>, %arg4: memref<1x64xf32, #tpu.memory_space<vmem>>, %arg5: memref<9x64x128xbf16, #tpu.memory_space<vmem>>, %arg6: memref<1x128xf32, #tpu.memory_space<vmem>>, %arg7: memref<9x64x64xbf16, #tpu.memory_space<vmem>>, %arg8: memref<1x64xf32, #tpu.memory_space<vmem>>, %arg9: memref<9x64x64xbf16, #tpu.memory_space<vmem>>, %arg10: memref<1x64xf32, #tpu.memory_space<vmem>>, %arg11: memref<9x64x64xbf16, #tpu.memory_space<vmem>>, %arg12: memref<1x64xf32, #tpu.memory_space<vmem>>, %arg13: memref<64x128xbf16, #tpu.memory_space<vmem>>, %arg14: memref<1x128xf32, #tpu.memory_space<vmem>>, %arg15: memref<1x8x128xf32, #tpu.memory_space<vmem>>) attributes {dimension_semantics = [#tpu.dimension_semantics<parallel>], iteration_bounds = array<i64: 2>, scalar_prefetch = 0 : i64, scratch_operands = 0 : i64, tpu.core_type = #tpu.core_type<tc>, window_params = [{transform_indices = @transform_0, window_bounds = array<i64: 1, 256, 3>}, {pipeline_mode = #tpu.pipeline_mode<synchronous>, transform_indices = @transform_1, window_bounds = array<i64: 64, 256>}, {pipeline_mode = #tpu.pipeline_mode<synchronous>, transform_indices = @transform_2, window_bounds = array<i64: 9, 3, 64>}, {pipeline_mode = #tpu.pipeline_mode<synchronous>, transform_indices = @transform_3, window_bounds = array<i64: 1, 64>}, {pipeline_mode = #tpu.pipeline_mode<synchronous>, transform_indices = @transform_4, window_bounds = array<i64: 9, 64, 128>}, {pipeline_mode = #tpu.pipeline_mode<synchronous>, transform_indices = @transform_5, window_bounds = array<i64: 1, 128>}, {pipeline_mode = #tpu.pipeline_mode<synchronous>, transform_indices = @transform_6, window_bounds = array<i64: 9, 64, 64>}, {pipeline_mode = #tpu.pipeline_mode<synchronous>, transform_indices = @transform_7, window_bounds = array<i64: 1, 64>}, {pipeline_mode = #tpu.pipeline_mode<synchronous>, transform_indices = @transform_8, window_bounds = array<i64: 9, 64, 64>}, {pipeline_mode = #tpu.pipeline_mode<synchronous>, transform_indices = @transform_9, window_bounds = array<i64: 1, 64>}, {pipeline_mode = #tpu.pipeline_mode<synchronous>, transform_indices = @transform_10, window_bounds = array<i64: 9, 64, 64>}, {pipeline_mode = #tpu.pipeline_mode<synchronous>, transform_indices = @transform_11, window_bounds = array<i64: 1, 64>}, {pipeline_mode = #tpu.pipeline_mode<synchronous>, transform_indices = @transform_12, window_bounds = array<i64: 64, 128>}, {pipeline_mode = #tpu.pipeline_mode<synchronous>, transform_indices = @transform_13, window_bounds = array<i64: 1, 128>}, {transform_indices = @transform_14, window_bounds = array<i64: 1, 8, 128>}]} {
    %c0 = arith.constant 0 : index
    %c0_0 = arith.constant 0 : index
    %c0_1 = arith.constant 0 : index
    %0 = vector.load %arg1[%c0, %c0_0, %c0_1] : memref<1x256x3xbf16, #tpu.memory_space<vmem>>, vector<1x256x3xbf16>
    %1 = vector.shape_cast %0 : vector<1x256x3xbf16> to vector<256x3xbf16>
    %cst = arith.constant 0.000000e+00 : bf16
    %2 = vector.broadcast %cst : bf16 to vector<17x3xbf16>
    %3 = tpu.concatenate %2, %1, %2 in 0 : vector<17x3xbf16>, vector<256x3xbf16>, vector<17x3xbf16> -> vector<290x3xbf16>
    %4 = tpu.iota {dimensions = array<i32: 0>} : vector<256x1xi32>
    %c15_i32 = arith.constant 15 : i32
    %5 = vector.broadcast %c15_i32 : i32 to vector<256x1xi32>
    %6 = arith.andi %4, %5 : vector<256x1xi32>
    %c16_i32 = arith.constant 16 : i32
    %7 = vector.broadcast %c16_i32 : i32 to vector<256x1xi32>
    %8 = arith.cmpi slt, %4, %7 : vector<256x1xi32>
    %c240_i32 = arith.constant 240 : i32
    %9 = vector.broadcast %c240_i32 : i32 to vector<256x1xi32>
    %10 = arith.cmpi sge, %4, %9 : vector<256x1xi32>
    %c0_i32 = arith.constant 0 : i32
    %11 = vector.broadcast %c0_i32 : i32 to vector<256x1xi32>
    %12 = arith.cmpi eq, %6, %11 : vector<256x1xi32>
    %c15_i32_2 = arith.constant 15 : i32
    %13 = vector.broadcast %c15_i32_2 : i32 to vector<256x1xi32>
    %14 = arith.cmpi eq, %6, %13 : vector<256x1xi32>
    %c0_3 = arith.constant 0 : index
    %c0_4 = arith.constant 0 : index
    %15 = vector.load %arg4[%c0_3, %c0_4] : memref<1x64xf32, #tpu.memory_space<vmem>>, vector<1x64xf32>
    %16 = vector.extract_strided_slice %3 {offsets = [0, 0], sizes = [256, 3], strides = [1, 1]} : vector<290x3xbf16> to vector<256x3xbf16>
    %17 = arith.ori %8, %12 : vector<256x1xi1>
    %cst_5 = arith.constant 0.000000e+00 : bf16
    %18 = vector.broadcast %cst_5 : bf16 to vector<256x3xbf16>
    %19 = vector.shape_cast %17 : vector<256x1xi1> to vector<256x1xi1>
    %20 = vector.broadcast %19 : vector<256x1xi1> to vector<256x3xi1>
    %21 = arith.select %20, %18, %16 : vector<256x3xi1>, vector<256x3xbf16>
    %c0_6 = arith.constant 0 : index
    %c0_7 = arith.constant 0 : index
    %c0_8 = arith.constant 0 : index
    %22 = vector.load %arg3[%c0_6, %c0_7, %c0_8] : memref<9x3x64xbf16, #tpu.memory_space<vmem>>, vector<1x3x64xbf16>
    %23 = vector.shape_cast %22 : vector<1x3x64xbf16> to vector<3x64xbf16>
    %cst_9 = arith.constant dense<0.000000e+00> : vector<256x64xf32>
    %24 = tpu.matmul %21, %23, %cst_9 {dimension_numbers = #tpu.dot_dimension_numbers<[1], [0], [0], [1], [0, 0, 1, 1], [], []>} : vector<256x3xbf16>, vector<3x64xbf16>, vector<256x64xf32> -> vector<256x64xf32>
    %25 = vector.broadcast %15 : vector<1x64xf32> to vector<256x64xf32>
    %26 = arith.addf %25, %24 : vector<256x64xf32>
    %27 = vector.extract_strided_slice %3 {offsets = [1, 0], sizes = [256, 3], strides = [1, 1]} : vector<290x3xbf16> to vector<256x3xbf16>
    %cst_10 = arith.constant 0.000000e+00 : bf16
    %28 = vector.broadcast %cst_10 : bf16 to vector<256x3xbf16>
    %29 = vector.shape_cast %8 : vector<256x1xi1> to vector<256x1xi1>
    %30 = vector.broadcast %29 : vector<256x1xi1> to vector<256x3xi1>
    %31 = arith.select %30, %28, %27 : vector<256x3xi1>, vector<256x3xbf16>
    %c1 = arith.constant 1 : index
    %c0_11 = arith.constant 0 : index
    %c0_12 = arith.constant 0 : index
    %32 = vector.load %arg3[%c1, %c0_11, %c0_12] : memref<9x3x64xbf16, #tpu.memory_space<vmem>>, vector<1x3x64xbf16>
    %33 = vector.shape_cast %32 : vector<1x3x64xbf16> to vector<3x64xbf16>
    %cst_13 = arith.constant dense<0.000000e+00> : vector<256x64xf32>
    %34 = tpu.matmul %31, %33, %cst_13 {dimension_numbers = #tpu.dot_dimension_numbers<[1], [0], [0], [1], [0, 0, 1, 1], [], []>} : vector<256x3xbf16>, vector<3x64xbf16>, vector<256x64xf32> -> vector<256x64xf32>
    %35 = arith.addf %26, %34 : vector<256x64xf32>
    %36 = vector.extract_strided_slice %3 {offsets = [2, 0], sizes = [256, 3], strides = [1, 1]} : vector<290x3xbf16> to vector<256x3xbf16>
    %37 = arith.ori %8, %14 : vector<256x1xi1>
    %cst_14 = arith.constant 0.000000e+00 : bf16
    %38 = vector.broadcast %cst_14 : bf16 to vector<256x3xbf16>
    %39 = vector.shape_cast %37 : vector<256x1xi1> to vector<256x1xi1>
    %40 = vector.broadcast %39 : vector<256x1xi1> to vector<256x3xi1>
    %41 = arith.select %40, %38, %36 : vector<256x3xi1>, vector<256x3xbf16>
    %c2 = arith.constant 2 : index
    %c0_15 = arith.constant 0 : index
    %c0_16 = arith.constant 0 : index
    %42 = vector.load %arg3[%c2, %c0_15, %c0_16] : memref<9x3x64xbf16, #tpu.memory_space<vmem>>, vector<1x3x64xbf16>
    %43 = vector.shape_cast %42 : vector<1x3x64xbf16> to vector<3x64xbf16>
    %cst_17 = arith.constant dense<0.000000e+00> : vector<256x64xf32>
    %44 = tpu.matmul %41, %43, %cst_17 {dimension_numbers = #tpu.dot_dimension_numbers<[1], [0], [0], [1], [0, 0, 1, 1], [], []>} : vector<256x3xbf16>, vector<3x64xbf16>, vector<256x64xf32> -> vector<256x64xf32>
    %45 = arith.addf %35, %44 : vector<256x64xf32>
    %46 = vector.extract_strided_slice %3 {offsets = [16, 0], sizes = [256, 3], strides = [1, 1]} : vector<290x3xbf16> to vector<256x3xbf16>
    %cst_18 = arith.constant 0.000000e+00 : bf16
    %47 = vector.broadcast %cst_18 : bf16 to vector<256x3xbf16>
    %48 = vector.shape_cast %12 : vector<256x1xi1> to vector<256x1xi1>
    %49 = vector.broadcast %48 : vector<256x1xi1> to vector<256x3xi1>
    %50 = arith.select %49, %47, %46 : vector<256x3xi1>, vector<256x3xbf16>
    %c3 = arith.constant 3 : index
    %c0_19 = arith.constant 0 : index
    %c0_20 = arith.constant 0 : index
    %51 = vector.load %arg3[%c3, %c0_19, %c0_20] : memref<9x3x64xbf16, #tpu.memory_space<vmem>>, vector<1x3x64xbf16>
    %52 = vector.shape_cast %51 : vector<1x3x64xbf16> to vector<3x64xbf16>
    %cst_21 = arith.constant dense<0.000000e+00> : vector<256x64xf32>
    %53 = tpu.matmul %50, %52, %cst_21 {dimension_numbers = #tpu.dot_dimension_numbers<[1], [0], [0], [1], [0, 0, 1, 1], [], []>} : vector<256x3xbf16>, vector<3x64xbf16>, vector<256x64xf32> -> vector<256x64xf32>
    %54 = arith.addf %45, %53 : vector<256x64xf32>
    %55 = vector.extract_strided_slice %3 {offsets = [17, 0], sizes = [256, 3], strides = [1, 1]} : vector<290x3xbf16> to vector<256x3xbf16>
    %c4 = arith.constant 4 : index
    %c0_22 = arith.constant 0 : index
    %c0_23 = arith.constant 0 : index
    %56 = vector.load %arg3[%c4, %c0_22, %c0_23] : memref<9x3x64xbf16, #tpu.memory_space<vmem>>, vector<1x3x64xbf16>
    %57 = vector.shape_cast %56 : vector<1x3x64xbf16> to vector<3x64xbf16>
    %cst_24 = arith.constant dense<0.000000e+00> : vector<256x64xf32>
    %58 = tpu.matmul %55, %57, %cst_24 {dimension_numbers = #tpu.dot_dimension_numbers<[1], [0], [0], [1], [0, 0, 1, 1], [], []>} : vector<256x3xbf16>, vector<3x64xbf16>, vector<256x64xf32> -> vector<256x64xf32>
    %59 = arith.addf %54, %58 : vector<256x64xf32>
    %60 = vector.extract_strided_slice %3 {offsets = [18, 0], sizes = [256, 3], strides = [1, 1]} : vector<290x3xbf16> to vector<256x3xbf16>
    %cst_25 = arith.constant 0.000000e+00 : bf16
    %61 = vector.broadcast %cst_25 : bf16 to vector<256x3xbf16>
    %62 = vector.shape_cast %14 : vector<256x1xi1> to vector<256x1xi1>
    %63 = vector.broadcast %62 : vector<256x1xi1> to vector<256x3xi1>
    %64 = arith.select %63, %61, %60 : vector<256x3xi1>, vector<256x3xbf16>
    %c5 = arith.constant 5 : index
    %c0_26 = arith.constant 0 : index
    %c0_27 = arith.constant 0 : index
    %65 = vector.load %arg3[%c5, %c0_26, %c0_27] : memref<9x3x64xbf16, #tpu.memory_space<vmem>>, vector<1x3x64xbf16>
    %66 = vector.shape_cast %65 : vector<1x3x64xbf16> to vector<3x64xbf16>
    %cst_28 = arith.constant dense<0.000000e+00> : vector<256x64xf32>
    %67 = tpu.matmul %64, %66, %cst_28 {dimension_numbers = #tpu.dot_dimension_numbers<[1], [0], [0], [1], [0, 0, 1, 1], [], []>} : vector<256x3xbf16>, vector<3x64xbf16>, vector<256x64xf32> -> vector<256x64xf32>
    %68 = arith.addf %59, %67 : vector<256x64xf32>
    %69 = vector.extract_strided_slice %3 {offsets = [32, 0], sizes = [256, 3], strides = [1, 1]} : vector<290x3xbf16> to vector<256x3xbf16>
    %70 = arith.ori %10, %12 : vector<256x1xi1>
    %cst_29 = arith.constant 0.000000e+00 : bf16
    %71 = vector.broadcast %cst_29 : bf16 to vector<256x3xbf16>
    %72 = vector.shape_cast %70 : vector<256x1xi1> to vector<256x1xi1>
    %73 = vector.broadcast %72 : vector<256x1xi1> to vector<256x3xi1>
    %74 = arith.select %73, %71, %69 : vector<256x3xi1>, vector<256x3xbf16>
    %c6 = arith.constant 6 : index
    %c0_30 = arith.constant 0 : index
    %c0_31 = arith.constant 0 : index
    %75 = vector.load %arg3[%c6, %c0_30, %c0_31] : memref<9x3x64xbf16, #tpu.memory_space<vmem>>, vector<1x3x64xbf16>
    %76 = vector.shape_cast %75 : vector<1x3x64xbf16> to vector<3x64xbf16>
    %cst_32 = arith.constant dense<0.000000e+00> : vector<256x64xf32>
    %77 = tpu.matmul %74, %76, %cst_32 {dimension_numbers = #tpu.dot_dimension_numbers<[1], [0], [0], [1], [0, 0, 1, 1], [], []>} : vector<256x3xbf16>, vector<3x64xbf16>, vector<256x64xf32> -> vector<256x64xf32>
    %78 = arith.addf %68, %77 : vector<256x64xf32>
    %79 = vector.extract_strided_slice %3 {offsets = [33, 0], sizes = [256, 3], strides = [1, 1]} : vector<290x3xbf16> to vector<256x3xbf16>
    %cst_33 = arith.constant 0.000000e+00 : bf16
    %80 = vector.broadcast %cst_33 : bf16 to vector<256x3xbf16>
    %81 = vector.shape_cast %10 : vector<256x1xi1> to vector<256x1xi1>
    %82 = vector.broadcast %81 : vector<256x1xi1> to vector<256x3xi1>
    %83 = arith.select %82, %80, %79 : vector<256x3xi1>, vector<256x3xbf16>
    %c7 = arith.constant 7 : index
    %c0_34 = arith.constant 0 : index
    %c0_35 = arith.constant 0 : index
    %84 = vector.load %arg3[%c7, %c0_34, %c0_35] : memref<9x3x64xbf16, #tpu.memory_space<vmem>>, vector<1x3x64xbf16>
    %85 = vector.shape_cast %84 : vector<1x3x64xbf16> to vector<3x64xbf16>
    %cst_36 = arith.constant dense<0.000000e+00> : vector<256x64xf32>
    %86 = tpu.matmul %83, %85, %cst_36 {dimension_numbers = #tpu.dot_dimension_numbers<[1], [0], [0], [1], [0, 0, 1, 1], [], []>} : vector<256x3xbf16>, vector<3x64xbf16>, vector<256x64xf32> -> vector<256x64xf32>
    %87 = arith.addf %78, %86 : vector<256x64xf32>
    %88 = vector.extract_strided_slice %3 {offsets = [34, 0], sizes = [256, 3], strides = [1, 1]} : vector<290x3xbf16> to vector<256x3xbf16>
    %89 = arith.ori %10, %14 : vector<256x1xi1>
    %cst_37 = arith.constant 0.000000e+00 : bf16
    %90 = vector.broadcast %cst_37 : bf16 to vector<256x3xbf16>
    %91 = vector.shape_cast %89 : vector<256x1xi1> to vector<256x1xi1>
    %92 = vector.broadcast %91 : vector<256x1xi1> to vector<256x3xi1>
    %93 = arith.select %92, %90, %88 : vector<256x3xi1>, vector<256x3xbf16>
    %c8 = arith.constant 8 : index
    %c0_38 = arith.constant 0 : index
    %c0_39 = arith.constant 0 : index
    %94 = vector.load %arg3[%c8, %c0_38, %c0_39] : memref<9x3x64xbf16, #tpu.memory_space<vmem>>, vector<1x3x64xbf16>
    %95 = vector.shape_cast %94 : vector<1x3x64xbf16> to vector<3x64xbf16>
    %cst_40 = arith.constant dense<0.000000e+00> : vector<256x64xf32>
    %96 = tpu.matmul %93, %95, %cst_40 {dimension_numbers = #tpu.dot_dimension_numbers<[1], [0], [0], [1], [0, 0, 1, 1], [], []>} : vector<256x3xbf16>, vector<3x64xbf16>, vector<256x64xf32> -> vector<256x64xf32>
    %97 = arith.addf %87, %96 : vector<256x64xf32>
    %cst_41 = arith.constant 0.000000e+00 : f32
    %98 = vector.broadcast %cst_41 : f32 to vector<256x64xf32>
    %99 = arith.maximumf %97, %98 : vector<256x64xf32>
    %100 = arith.truncf %99 : vector<256x64xf32> to vector<256x64xbf16>
    %c0_42 = arith.constant 0 : index
    %c0_43 = arith.constant 0 : index
    %101 = vector.load %arg2[%c0_42, %c0_43] : memref<64x256xbf16, #tpu.memory_space<vmem>>, vector<64x256xbf16>
    %cst_44 = arith.constant 0.000000e+00 : bf16
    %102 = vector.broadcast %cst_44 : bf16 to vector<17x64xbf16>
    %103 = tpu.concatenate %102, %100, %102 in 0 : vector<17x64xbf16>, vector<256x64xbf16>, vector<17x64xbf16> -> vector<290x64xbf16>
    %104 = tpu.iota {dimensions = array<i32: 0>} : vector<256x1xi32>
    %c15_i32_45 = arith.constant 15 : i32
    %105 = vector.broadcast %c15_i32_45 : i32 to vector<256x1xi32>
    %106 = arith.andi %104, %105 : vector<256x1xi32>
    %c16_i32_46 = arith.constant 16 : i32
    %107 = vector.broadcast %c16_i32_46 : i32 to vector<256x1xi32>
    %108 = arith.cmpi slt, %104, %107 : vector<256x1xi32>
    %c240_i32_47 = arith.constant 240 : i32
    %109 = vector.broadcast %c240_i32_47 : i32 to vector<256x1xi32>
    %110 = arith.cmpi sge, %104, %109 : vector<256x1xi32>
    %c0_i32_48 = arith.constant 0 : i32
    %111 = vector.broadcast %c0_i32_48 : i32 to vector<256x1xi32>
    %112 = arith.cmpi eq, %106, %111 : vector<256x1xi32>
    %c15_i32_49 = arith.constant 15 : i32
    %113 = vector.broadcast %c15_i32_49 : i32 to vector<256x1xi32>
    %114 = arith.cmpi eq, %106, %113 : vector<256x1xi32>
    %c0_50 = arith.constant 0 : index
    %c0_51 = arith.constant 0 : index
    %115 = vector.load %arg6[%c0_50, %c0_51] : memref<1x128xf32, #tpu.memory_space<vmem>>, vector<1x128xf32>
    %116 = vector.extract_strided_slice %103 {offsets = [0, 0], sizes = [256, 64], strides = [1, 1]} : vector<290x64xbf16> to vector<256x64xbf16>
    %117 = arith.ori %108, %112 : vector<256x1xi1>
    %cst_52 = arith.constant 0.000000e+00 : bf16
    %118 = vector.broadcast %cst_52 : bf16 to vector<256x64xbf16>
    %119 = vector.shape_cast %117 : vector<256x1xi1> to vector<256x1xi1>
    %120 = vector.broadcast %119 : vector<256x1xi1> to vector<256x64xi1>
    %121 = arith.select %120, %118, %116 : vector<256x64xi1>, vector<256x64xbf16>
    %cst_53 = arith.constant dense<0.000000e+00> : vector<64x64xf32>
    %122 = tpu.matmul %101, %121, %cst_53 {dimension_numbers = #tpu.dot_dimension_numbers<[1], [0], [0], [1], [0, 0, 1, 1], [], []>} : vector<64x256xbf16>, vector<256x64xbf16>, vector<64x64xf32> -> vector<64x64xf32>
    %123 = arith.truncf %122 : vector<64x64xf32> to vector<64x64xbf16>
    %c0_54 = arith.constant 0 : index
    %c0_55 = arith.constant 0 : index
    %c0_56 = arith.constant 0 : index
    %124 = vector.load %arg5[%c0_54, %c0_55, %c0_56] : memref<9x64x128xbf16, #tpu.memory_space<vmem>>, vector<1x64x128xbf16>
    %125 = vector.shape_cast %124 : vector<1x64x128xbf16> to vector<64x128xbf16>
    %cst_57 = arith.constant dense<0.000000e+00> : vector<64x128xf32>
    %126 = tpu.matmul %123, %125, %cst_57 {dimension_numbers = #tpu.dot_dimension_numbers<[1], [0], [0], [1], [0, 0, 1, 1], [], []>} : vector<64x64xbf16>, vector<64x128xbf16>, vector<64x128xf32> -> vector<64x128xf32>
    %127 = vector.broadcast %115 : vector<1x128xf32> to vector<64x128xf32>
    %128 = arith.addf %127, %126 : vector<64x128xf32>
    %129 = vector.extract_strided_slice %103 {offsets = [1, 0], sizes = [256, 64], strides = [1, 1]} : vector<290x64xbf16> to vector<256x64xbf16>
    %cst_58 = arith.constant 0.000000e+00 : bf16
    %130 = vector.broadcast %cst_58 : bf16 to vector<256x64xbf16>
    %131 = vector.shape_cast %108 : vector<256x1xi1> to vector<256x1xi1>
    %132 = vector.broadcast %131 : vector<256x1xi1> to vector<256x64xi1>
    %133 = arith.select %132, %130, %129 : vector<256x64xi1>, vector<256x64xbf16>
    %cst_59 = arith.constant dense<0.000000e+00> : vector<64x64xf32>
    %134 = tpu.matmul %101, %133, %cst_59 {dimension_numbers = #tpu.dot_dimension_numbers<[1], [0], [0], [1], [0, 0, 1, 1], [], []>} : vector<64x256xbf16>, vector<256x64xbf16>, vector<64x64xf32> -> vector<64x64xf32>
    %135 = arith.truncf %134 : vector<64x64xf32> to vector<64x64xbf16>
    %c1_60 = arith.constant 1 : index
    %c0_61 = arith.constant 0 : index
    %c0_62 = arith.constant 0 : index
    %136 = vector.load %arg5[%c1_60, %c0_61, %c0_62] : memref<9x64x128xbf16, #tpu.memory_space<vmem>>, vector<1x64x128xbf16>
    %137 = vector.shape_cast %136 : vector<1x64x128xbf16> to vector<64x128xbf16>
    %cst_63 = arith.constant dense<0.000000e+00> : vector<64x128xf32>
    %138 = tpu.matmul %135, %137, %cst_63 {dimension_numbers = #tpu.dot_dimension_numbers<[1], [0], [0], [1], [0, 0, 1, 1], [], []>} : vector<64x64xbf16>, vector<64x128xbf16>, vector<64x128xf32> -> vector<64x128xf32>
    %139 = arith.addf %128, %138 : vector<64x128xf32>
    %140 = vector.extract_strided_slice %103 {offsets = [2, 0], sizes = [256, 64], strides = [1, 1]} : vector<290x64xbf16> to vector<256x64xbf16>
    %141 = arith.ori %108, %114 : vector<256x1xi1>
    %cst_64 = arith.constant 0.000000e+00 : bf16
    %142 = vector.broadcast %cst_64 : bf16 to vector<256x64xbf16>
    %143 = vector.shape_cast %141 : vector<256x1xi1> to vector<256x1xi1>
    %144 = vector.broadcast %143 : vector<256x1xi1> to vector<256x64xi1>
    %145 = arith.select %144, %142, %140 : vector<256x64xi1>, vector<256x64xbf16>
    %cst_65 = arith.constant dense<0.000000e+00> : vector<64x64xf32>
    %146 = tpu.matmul %101, %145, %cst_65 {dimension_numbers = #tpu.dot_dimension_numbers<[1], [0], [0], [1], [0, 0, 1, 1], [], []>} : vector<64x256xbf16>, vector<256x64xbf16>, vector<64x64xf32> -> vector<64x64xf32>
    %147 = arith.truncf %146 : vector<64x64xf32> to vector<64x64xbf16>
    %c2_66 = arith.constant 2 : index
    %c0_67 = arith.constant 0 : index
    %c0_68 = arith.constant 0 : index
    %148 = vector.load %arg5[%c2_66, %c0_67, %c0_68] : memref<9x64x128xbf16, #tpu.memory_space<vmem>>, vector<1x64x128xbf16>
    %149 = vector.shape_cast %148 : vector<1x64x128xbf16> to vector<64x128xbf16>
    %cst_69 = arith.constant dense<0.000000e+00> : vector<64x128xf32>
    %150 = tpu.matmul %147, %149, %cst_69 {dimension_numbers = #tpu.dot_dimension_numbers<[1], [0], [0], [1], [0, 0, 1, 1], [], []>} : vector<64x64xbf16>, vector<64x128xbf16>, vector<64x128xf32> -> vector<64x128xf32>
    %151 = arith.addf %139, %150 : vector<64x128xf32>
    %152 = vector.extract_strided_slice %103 {offsets = [16, 0], sizes = [256, 64], strides = [1, 1]} : vector<290x64xbf16> to vector<256x64xbf16>
    %cst_70 = arith.constant 0.000000e+00 : bf16
    %153 = vector.broadcast %cst_70 : bf16 to vector<256x64xbf16>
    %154 = vector.shape_cast %112 : vector<256x1xi1> to vector<256x1xi1>
    %155 = vector.broadcast %154 : vector<256x1xi1> to vector<256x64xi1>
    %156 = arith.select %155, %153, %152 : vector<256x64xi1>, vector<256x64xbf16>
    %cst_71 = arith.constant dense<0.000000e+00> : vector<64x64xf32>
    %157 = tpu.matmul %101, %156, %cst_71 {dimension_numbers = #tpu.dot_dimension_numbers<[1], [0], [0], [1], [0, 0, 1, 1], [], []>} : vector<64x256xbf16>, vector<256x64xbf16>, vector<64x64xf32> -> vector<64x64xf32>
    %158 = arith.truncf %157 : vector<64x64xf32> to vector<64x64xbf16>
    %c3_72 = arith.constant 3 : index
    %c0_73 = arith.constant 0 : index
    %c0_74 = arith.constant 0 : index
    %159 = vector.load %arg5[%c3_72, %c0_73, %c0_74] : memref<9x64x128xbf16, #tpu.memory_space<vmem>>, vector<1x64x128xbf16>
    %160 = vector.shape_cast %159 : vector<1x64x128xbf16> to vector<64x128xbf16>
    %cst_75 = arith.constant dense<0.000000e+00> : vector<64x128xf32>
    %161 = tpu.matmul %158, %160, %cst_75 {dimension_numbers = #tpu.dot_dimension_numbers<[1], [0], [0], [1], [0, 0, 1, 1], [], []>} : vector<64x64xbf16>, vector<64x128xbf16>, vector<64x128xf32> -> vector<64x128xf32>
    %162 = arith.addf %151, %161 : vector<64x128xf32>
    %163 = vector.extract_strided_slice %103 {offsets = [17, 0], sizes = [256, 64], strides = [1, 1]} : vector<290x64xbf16> to vector<256x64xbf16>
    %cst_76 = arith.constant dense<0.000000e+00> : vector<64x64xf32>
    %164 = tpu.matmul %101, %163, %cst_76 {dimension_numbers = #tpu.dot_dimension_numbers<[1], [0], [0], [1], [0, 0, 1, 1], [], []>} : vector<64x256xbf16>, vector<256x64xbf16>, vector<64x64xf32> -> vector<64x64xf32>
    %165 = arith.truncf %164 : vector<64x64xf32> to vector<64x64xbf16>
    %c4_77 = arith.constant 4 : index
    %c0_78 = arith.constant 0 : index
    %c0_79 = arith.constant 0 : index
    %166 = vector.load %arg5[%c4_77, %c0_78, %c0_79] : memref<9x64x128xbf16, #tpu.memory_space<vmem>>, vector<1x64x128xbf16>
    %167 = vector.shape_cast %166 : vector<1x64x128xbf16> to vector<64x128xbf16>
    %cst_80 = arith.constant dense<0.000000e+00> : vector<64x128xf32>
    %168 = tpu.matmul %165, %167, %cst_80 {dimension_numbers = #tpu.dot_dimension_numbers<[1], [0], [0], [1], [0, 0, 1, 1], [], []>} : vector<64x64xbf16>, vector<64x128xbf16>, vector<64x128xf32> -> vector<64x128xf32>
    %169 = arith.addf %162, %168 : vector<64x128xf32>
    %170 = vector.extract_strided_slice %103 {offsets = [18, 0], sizes = [256, 64], strides = [1, 1]} : vector<290x64xbf16> to vector<256x64xbf16>
    %cst_81 = arith.constant 0.000000e+00 : bf16
    %171 = vector.broadcast %cst_81 : bf16 to vector<256x64xbf16>
    %172 = vector.shape_cast %114 : vector<256x1xi1> to vector<256x1xi1>
    %173 = vector.broadcast %172 : vector<256x1xi1> to vector<256x64xi1>
    %174 = arith.select %173, %171, %170 : vector<256x64xi1>, vector<256x64xbf16>
    %cst_82 = arith.constant dense<0.000000e+00> : vector<64x64xf32>
    %175 = tpu.matmul %101, %174, %cst_82 {dimension_numbers = #tpu.dot_dimension_numbers<[1], [0], [0], [1], [0, 0, 1, 1], [], []>} : vector<64x256xbf16>, vector<256x64xbf16>, vector<64x64xf32> -> vector<64x64xf32>
    %176 = arith.truncf %175 : vector<64x64xf32> to vector<64x64xbf16>
    %c5_83 = arith.constant 5 : index
    %c0_84 = arith.constant 0 : index
    %c0_85 = arith.constant 0 : index
    %177 = vector.load %arg5[%c5_83, %c0_84, %c0_85] : memref<9x64x128xbf16, #tpu.memory_space<vmem>>, vector<1x64x128xbf16>
    %178 = vector.shape_cast %177 : vector<1x64x128xbf16> to vector<64x128xbf16>
    %cst_86 = arith.constant dense<0.000000e+00> : vector<64x128xf32>
    %179 = tpu.matmul %176, %178, %cst_86 {dimension_numbers = #tpu.dot_dimension_numbers<[1], [0], [0], [1], [0, 0, 1, 1], [], []>} : vector<64x64xbf16>, vector<64x128xbf16>, vector<64x128xf32> -> vector<64x128xf32>
    %180 = arith.addf %169, %179 : vector<64x128xf32>
    %181 = vector.extract_strided_slice %103 {offsets = [32, 0], sizes = [256, 64], strides = [1, 1]} : vector<290x64xbf16> to vector<256x64xbf16>
    %182 = arith.ori %110, %112 : vector<256x1xi1>
    %cst_87 = arith.constant 0.000000e+00 : bf16
    %183 = vector.broadcast %cst_87 : bf16 to vector<256x64xbf16>
    %184 = vector.shape_cast %182 : vector<256x1xi1> to vector<256x1xi1>
    %185 = vector.broadcast %184 : vector<256x1xi1> to vector<256x64xi1>
    %186 = arith.select %185, %183, %181 : vector<256x64xi1>, vector<256x64xbf16>
    %cst_88 = arith.constant dense<0.000000e+00> : vector<64x64xf32>
    %187 = tpu.matmul %101, %186, %cst_88 {dimension_numbers = #tpu.dot_dimension_numbers<[1], [0], [0], [1], [0, 0, 1, 1], [], []>} : vector<64x256xbf16>, vector<256x64xbf16>, vector<64x64xf32> -> vector<64x64xf32>
    %188 = arith.truncf %187 : vector<64x64xf32> to vector<64x64xbf16>
    %c6_89 = arith.constant 6 : index
    %c0_90 = arith.constant 0 : index
    %c0_91 = arith.constant 0 : index
    %189 = vector.load %arg5[%c6_89, %c0_90, %c0_91] : memref<9x64x128xbf16, #tpu.memory_space<vmem>>, vector<1x64x128xbf16>
    %190 = vector.shape_cast %189 : vector<1x64x128xbf16> to vector<64x128xbf16>
    %cst_92 = arith.constant dense<0.000000e+00> : vector<64x128xf32>
    %191 = tpu.matmul %188, %190, %cst_92 {dimension_numbers = #tpu.dot_dimension_numbers<[1], [0], [0], [1], [0, 0, 1, 1], [], []>} : vector<64x64xbf16>, vector<64x128xbf16>, vector<64x128xf32> -> vector<64x128xf32>
    %192 = arith.addf %180, %191 : vector<64x128xf32>
    %193 = vector.extract_strided_slice %103 {offsets = [33, 0], sizes = [256, 64], strides = [1, 1]} : vector<290x64xbf16> to vector<256x64xbf16>
    %cst_93 = arith.constant 0.000000e+00 : bf16
    %194 = vector.broadcast %cst_93 : bf16 to vector<256x64xbf16>
    %195 = vector.shape_cast %110 : vector<256x1xi1> to vector<256x1xi1>
    %196 = vector.broadcast %195 : vector<256x1xi1> to vector<256x64xi1>
    %197 = arith.select %196, %194, %193 : vector<256x64xi1>, vector<256x64xbf16>
    %cst_94 = arith.constant dense<0.000000e+00> : vector<64x64xf32>
    %198 = tpu.matmul %101, %197, %cst_94 {dimension_numbers = #tpu.dot_dimension_numbers<[1], [0], [0], [1], [0, 0, 1, 1], [], []>} : vector<64x256xbf16>, vector<256x64xbf16>, vector<64x64xf32> -> vector<64x64xf32>
    %199 = arith.truncf %198 : vector<64x64xf32> to vector<64x64xbf16>
    %c7_95 = arith.constant 7 : index
    %c0_96 = arith.constant 0 : index
    %c0_97 = arith.constant 0 : index
    %200 = vector.load %arg5[%c7_95, %c0_96, %c0_97] : memref<9x64x128xbf16, #tpu.memory_space<vmem>>, vector<1x64x128xbf16>
    %201 = vector.shape_cast %200 : vector<1x64x128xbf16> to vector<64x128xbf16>
    %cst_98 = arith.constant dense<0.000000e+00> : vector<64x128xf32>
    %202 = tpu.matmul %199, %201, %cst_98 {dimension_numbers = #tpu.dot_dimension_numbers<[1], [0], [0], [1], [0, 0, 1, 1], [], []>} : vector<64x64xbf16>, vector<64x128xbf16>, vector<64x128xf32> -> vector<64x128xf32>
    %203 = arith.addf %192, %202 : vector<64x128xf32>
    %204 = vector.extract_strided_slice %103 {offsets = [34, 0], sizes = [256, 64], strides = [1, 1]} : vector<290x64xbf16> to vector<256x64xbf16>
    %205 = arith.ori %110, %114 : vector<256x1xi1>
    %cst_99 = arith.constant 0.000000e+00 : bf16
    %206 = vector.broadcast %cst_99 : bf16 to vector<256x64xbf16>
    %207 = vector.shape_cast %205 : vector<256x1xi1> to vector<256x1xi1>
    %208 = vector.broadcast %207 : vector<256x1xi1> to vector<256x64xi1>
    %209 = arith.select %208, %206, %204 : vector<256x64xi1>, vector<256x64xbf16>
    %cst_100 = arith.constant dense<0.000000e+00> : vector<64x64xf32>
    %210 = tpu.matmul %101, %209, %cst_100 {dimension_numbers = #tpu.dot_dimension_numbers<[1], [0], [0], [1], [0, 0, 1, 1], [], []>} : vector<64x256xbf16>, vector<256x64xbf16>, vector<64x64xf32> -> vector<64x64xf32>
    %211 = arith.truncf %210 : vector<64x64xf32> to vector<64x64xbf16>
    %c8_101 = arith.constant 8 : index
    %c0_102 = arith.constant 0 : index
    %c0_103 = arith.constant 0 : index
    %212 = vector.load %arg5[%c8_101, %c0_102, %c0_103] : memref<9x64x128xbf16, #tpu.memory_space<vmem>>, vector<1x64x128xbf16>
    %213 = vector.shape_cast %212 : vector<1x64x128xbf16> to vector<64x128xbf16>
    %cst_104 = arith.constant dense<0.000000e+00> : vector<64x128xf32>
    %214 = tpu.matmul %211, %213, %cst_104 {dimension_numbers = #tpu.dot_dimension_numbers<[1], [0], [0], [1], [0, 0, 1, 1], [], []>} : vector<64x64xbf16>, vector<64x128xbf16>, vector<64x128xf32> -> vector<64x128xf32>
    %215 = arith.addf %203, %214 : vector<64x128xf32>
    %216 = vector.extract_strided_slice %215 {offsets = [0, 0], sizes = [64, 64], strides = [1, 1]} : vector<64x128xf32> to vector<64x64xf32>
    %cst_105 = arith.constant 0.000000e+00 : f32
    %217 = vector.broadcast %cst_105 : f32 to vector<64x64xf32>
    %218 = arith.maximumf %216, %217 : vector<64x64xf32>
    %219 = arith.truncf %218 : vector<64x64xf32> to vector<64x64xbf16>
    %220 = vector.extract_strided_slice %215 {offsets = [0, 64], sizes = [64, 64], strides = [1, 1]} : vector<64x128xf32> to vector<64x64xf32>
    %cst_106 = arith.constant 0.000000e+00 : bf16
    %221 = vector.broadcast %cst_106 : bf16 to vector<9x64xbf16>
    %222 = tpu.concatenate %221, %219, %221 in 0 : vector<9x64xbf16>, vector<64x64xbf16>, vector<9x64xbf16> -> vector<82x64xbf16>
    %223 = tpu.iota {dimensions = array<i32: 0>} : vector<64x1xi32>
    %c7_i32 = arith.constant 7 : i32
    %224 = vector.broadcast %c7_i32 : i32 to vector<64x1xi32>
    %225 = arith.andi %223, %224 : vector<64x1xi32>
    %c8_i32 = arith.constant 8 : i32
    %226 = vector.broadcast %c8_i32 : i32 to vector<64x1xi32>
    %227 = arith.cmpi slt, %223, %226 : vector<64x1xi32>
    %c56_i32 = arith.constant 56 : i32
    %228 = vector.broadcast %c56_i32 : i32 to vector<64x1xi32>
    %229 = arith.cmpi sge, %223, %228 : vector<64x1xi32>
    %c0_i32_107 = arith.constant 0 : i32
    %230 = vector.broadcast %c0_i32_107 : i32 to vector<64x1xi32>
    %231 = arith.cmpi eq, %225, %230 : vector<64x1xi32>
    %c7_i32_108 = arith.constant 7 : i32
    %232 = vector.broadcast %c7_i32_108 : i32 to vector<64x1xi32>
    %233 = arith.cmpi eq, %225, %232 : vector<64x1xi32>
    %c0_109 = arith.constant 0 : index
    %c0_110 = arith.constant 0 : index
    %234 = vector.load %arg8[%c0_109, %c0_110] : memref<1x64xf32, #tpu.memory_space<vmem>>, vector<1x64xf32>
    %235 = vector.extract_strided_slice %222 {offsets = [0, 0], sizes = [64, 64], strides = [1, 1]} : vector<82x64xbf16> to vector<64x64xbf16>
    %236 = arith.ori %227, %231 : vector<64x1xi1>
    %cst_111 = arith.constant 0.000000e+00 : bf16
    %237 = vector.broadcast %cst_111 : bf16 to vector<64x64xbf16>
    %238 = vector.shape_cast %236 : vector<64x1xi1> to vector<64x1xi1>
    %239 = vector.broadcast %238 : vector<64x1xi1> to vector<64x64xi1>
    %240 = arith.select %239, %237, %235 : vector<64x64xi1>, vector<64x64xbf16>
    %c0_112 = arith.constant 0 : index
    %c0_113 = arith.constant 0 : index
    %c0_114 = arith.constant 0 : index
    %241 = vector.load %arg7[%c0_112, %c0_113, %c0_114] : memref<9x64x64xbf16, #tpu.memory_space<vmem>>, vector<1x64x64xbf16>
    %242 = vector.shape_cast %241 : vector<1x64x64xbf16> to vector<64x64xbf16>
    %cst_115 = arith.constant dense<0.000000e+00> : vector<64x64xf32>
    %243 = tpu.matmul %240, %242, %cst_115 {dimension_numbers = #tpu.dot_dimension_numbers<[1], [0], [0], [1], [0, 0, 1, 1], [], []>} : vector<64x64xbf16>, vector<64x64xbf16>, vector<64x64xf32> -> vector<64x64xf32>
    %244 = vector.broadcast %234 : vector<1x64xf32> to vector<64x64xf32>
    %245 = arith.addf %244, %243 : vector<64x64xf32>
    %246 = vector.extract_strided_slice %222 {offsets = [1, 0], sizes = [64, 64], strides = [1, 1]} : vector<82x64xbf16> to vector<64x64xbf16>
    %cst_116 = arith.constant 0.000000e+00 : bf16
    %247 = vector.broadcast %cst_116 : bf16 to vector<64x64xbf16>
    %248 = vector.shape_cast %227 : vector<64x1xi1> to vector<64x1xi1>
    %249 = vector.broadcast %248 : vector<64x1xi1> to vector<64x64xi1>
    %250 = arith.select %249, %247, %246 : vector<64x64xi1>, vector<64x64xbf16>
    %c1_117 = arith.constant 1 : index
    %c0_118 = arith.constant 0 : index
    %c0_119 = arith.constant 0 : index
    %251 = vector.load %arg7[%c1_117, %c0_118, %c0_119] : memref<9x64x64xbf16, #tpu.memory_space<vmem>>, vector<1x64x64xbf16>
    %252 = vector.shape_cast %251 : vector<1x64x64xbf16> to vector<64x64xbf16>
    %cst_120 = arith.constant dense<0.000000e+00> : vector<64x64xf32>
    %253 = tpu.matmul %250, %252, %cst_120 {dimension_numbers = #tpu.dot_dimension_numbers<[1], [0], [0], [1], [0, 0, 1, 1], [], []>} : vector<64x64xbf16>, vector<64x64xbf16>, vector<64x64xf32> -> vector<64x64xf32>
    %254 = arith.addf %245, %253 : vector<64x64xf32>
    %255 = vector.extract_strided_slice %222 {offsets = [2, 0], sizes = [64, 64], strides = [1, 1]} : vector<82x64xbf16> to vector<64x64xbf16>
    %256 = arith.ori %227, %233 : vector<64x1xi1>
    %cst_121 = arith.constant 0.000000e+00 : bf16
    %257 = vector.broadcast %cst_121 : bf16 to vector<64x64xbf16>
    %258 = vector.shape_cast %256 : vector<64x1xi1> to vector<64x1xi1>
    %259 = vector.broadcast %258 : vector<64x1xi1> to vector<64x64xi1>
    %260 = arith.select %259, %257, %255 : vector<64x64xi1>, vector<64x64xbf16>
    %c2_122 = arith.constant 2 : index
    %c0_123 = arith.constant 0 : index
    %c0_124 = arith.constant 0 : index
    %261 = vector.load %arg7[%c2_122, %c0_123, %c0_124] : memref<9x64x64xbf16, #tpu.memory_space<vmem>>, vector<1x64x64xbf16>
    %262 = vector.shape_cast %261 : vector<1x64x64xbf16> to vector<64x64xbf16>
    %cst_125 = arith.constant dense<0.000000e+00> : vector<64x64xf32>
    %263 = tpu.matmul %260, %262, %cst_125 {dimension_numbers = #tpu.dot_dimension_numbers<[1], [0], [0], [1], [0, 0, 1, 1], [], []>} : vector<64x64xbf16>, vector<64x64xbf16>, vector<64x64xf32> -> vector<64x64xf32>
    %264 = arith.addf %254, %263 : vector<64x64xf32>
    %265 = vector.extract_strided_slice %222 {offsets = [8, 0], sizes = [64, 64], strides = [1, 1]} : vector<82x64xbf16> to vector<64x64xbf16>
    %cst_126 = arith.constant 0.000000e+00 : bf16
    %266 = vector.broadcast %cst_126 : bf16 to vector<64x64xbf16>
    %267 = vector.shape_cast %231 : vector<64x1xi1> to vector<64x1xi1>
    %268 = vector.broadcast %267 : vector<64x1xi1> to vector<64x64xi1>
    %269 = arith.select %268, %266, %265 : vector<64x64xi1>, vector<64x64xbf16>
    %c3_127 = arith.constant 3 : index
    %c0_128 = arith.constant 0 : index
    %c0_129 = arith.constant 0 : index
    %270 = vector.load %arg7[%c3_127, %c0_128, %c0_129] : memref<9x64x64xbf16, #tpu.memory_space<vmem>>, vector<1x64x64xbf16>
    %271 = vector.shape_cast %270 : vector<1x64x64xbf16> to vector<64x64xbf16>
    %cst_130 = arith.constant dense<0.000000e+00> : vector<64x64xf32>
    %272 = tpu.matmul %269, %271, %cst_130 {dimension_numbers = #tpu.dot_dimension_numbers<[1], [0], [0], [1], [0, 0, 1, 1], [], []>} : vector<64x64xbf16>, vector<64x64xbf16>, vector<64x64xf32> -> vector<64x64xf32>
    %273 = arith.addf %264, %272 : vector<64x64xf32>
    %274 = vector.extract_strided_slice %222 {offsets = [9, 0], sizes = [64, 64], strides = [1, 1]} : vector<82x64xbf16> to vector<64x64xbf16>
    %c4_131 = arith.constant 4 : index
    %c0_132 = arith.constant 0 : index
    %c0_133 = arith.constant 0 : index
    %275 = vector.load %arg7[%c4_131, %c0_132, %c0_133] : memref<9x64x64xbf16, #tpu.memory_space<vmem>>, vector<1x64x64xbf16>
    %276 = vector.shape_cast %275 : vector<1x64x64xbf16> to vector<64x64xbf16>
    %cst_134 = arith.constant dense<0.000000e+00> : vector<64x64xf32>
    %277 = tpu.matmul %274, %276, %cst_134 {dimension_numbers = #tpu.dot_dimension_numbers<[1], [0], [0], [1], [0, 0, 1, 1], [], []>} : vector<64x64xbf16>, vector<64x64xbf16>, vector<64x64xf32> -> vector<64x64xf32>
    %278 = arith.addf %273, %277 : vector<64x64xf32>
    %279 = vector.extract_strided_slice %222 {offsets = [10, 0], sizes = [64, 64], strides = [1, 1]} : vector<82x64xbf16> to vector<64x64xbf16>
    %cst_135 = arith.constant 0.000000e+00 : bf16
    %280 = vector.broadcast %cst_135 : bf16 to vector<64x64xbf16>
    %281 = vector.shape_cast %233 : vector<64x1xi1> to vector<64x1xi1>
    %282 = vector.broadcast %281 : vector<64x1xi1> to vector<64x64xi1>
    %283 = arith.select %282, %280, %279 : vector<64x64xi1>, vector<64x64xbf16>
    %c5_136 = arith.constant 5 : index
    %c0_137 = arith.constant 0 : index
    %c0_138 = arith.constant 0 : index
    %284 = vector.load %arg7[%c5_136, %c0_137, %c0_138] : memref<9x64x64xbf16, #tpu.memory_space<vmem>>, vector<1x64x64xbf16>
    %285 = vector.shape_cast %284 : vector<1x64x64xbf16> to vector<64x64xbf16>
    %cst_139 = arith.constant dense<0.000000e+00> : vector<64x64xf32>
    %286 = tpu.matmul %283, %285, %cst_139 {dimension_numbers = #tpu.dot_dimension_numbers<[1], [0], [0], [1], [0, 0, 1, 1], [], []>} : vector<64x64xbf16>, vector<64x64xbf16>, vector<64x64xf32> -> vector<64x64xf32>
    %287 = arith.addf %278, %286 : vector<64x64xf32>
    %288 = vector.extract_strided_slice %222 {offsets = [16, 0], sizes = [64, 64], strides = [1, 1]} : vector<82x64xbf16> to vector<64x64xbf16>
    %289 = arith.ori %229, %231 : vector<64x1xi1>
    %cst_140 = arith.constant 0.000000e+00 : bf16
    %290 = vector.broadcast %cst_140 : bf16 to vector<64x64xbf16>
    %291 = vector.shape_cast %289 : vector<64x1xi1> to vector<64x1xi1>
    %292 = vector.broadcast %291 : vector<64x1xi1> to vector<64x64xi1>
    %293 = arith.select %292, %290, %288 : vector<64x64xi1>, vector<64x64xbf16>
    %c6_141 = arith.constant 6 : index
    %c0_142 = arith.constant 0 : index
    %c0_143 = arith.constant 0 : index
    %294 = vector.load %arg7[%c6_141, %c0_142, %c0_143] : memref<9x64x64xbf16, #tpu.memory_space<vmem>>, vector<1x64x64xbf16>
    %295 = vector.shape_cast %294 : vector<1x64x64xbf16> to vector<64x64xbf16>
    %cst_144 = arith.constant dense<0.000000e+00> : vector<64x64xf32>
    %296 = tpu.matmul %293, %295, %cst_144 {dimension_numbers = #tpu.dot_dimension_numbers<[1], [0], [0], [1], [0, 0, 1, 1], [], []>} : vector<64x64xbf16>, vector<64x64xbf16>, vector<64x64xf32> -> vector<64x64xf32>
    %297 = arith.addf %287, %296 : vector<64x64xf32>
    %298 = vector.extract_strided_slice %222 {offsets = [17, 0], sizes = [64, 64], strides = [1, 1]} : vector<82x64xbf16> to vector<64x64xbf16>
    %cst_145 = arith.constant 0.000000e+00 : bf16
    %299 = vector.broadcast %cst_145 : bf16 to vector<64x64xbf16>
    %300 = vector.shape_cast %229 : vector<64x1xi1> to vector<64x1xi1>
    %301 = vector.broadcast %300 : vector<64x1xi1> to vector<64x64xi1>
    %302 = arith.select %301, %299, %298 : vector<64x64xi1>, vector<64x64xbf16>
    %c7_146 = arith.constant 7 : index
    %c0_147 = arith.constant 0 : index
    %c0_148 = arith.constant 0 : index
    %303 = vector.load %arg7[%c7_146, %c0_147, %c0_148] : memref<9x64x64xbf16, #tpu.memory_space<vmem>>, vector<1x64x64xbf16>
    %304 = vector.shape_cast %303 : vector<1x64x64xbf16> to vector<64x64xbf16>
    %cst_149 = arith.constant dense<0.000000e+00> : vector<64x64xf32>
    %305 = tpu.matmul %302, %304, %cst_149 {dimension_numbers = #tpu.dot_dimension_numbers<[1], [0], [0], [1], [0, 0, 1, 1], [], []>} : vector<64x64xbf16>, vector<64x64xbf16>, vector<64x64xf32> -> vector<64x64xf32>
    %306 = arith.addf %297, %305 : vector<64x64xf32>
    %307 = vector.extract_strided_slice %222 {offsets = [18, 0], sizes = [64, 64], strides = [1, 1]} : vector<82x64xbf16> to vector<64x64xbf16>
    %308 = arith.ori %229, %233 : vector<64x1xi1>
    %cst_150 = arith.constant 0.000000e+00 : bf16
    %309 = vector.broadcast %cst_150 : bf16 to vector<64x64xbf16>
    %310 = vector.shape_cast %308 : vector<64x1xi1> to vector<64x1xi1>
    %311 = vector.broadcast %310 : vector<64x1xi1> to vector<64x64xi1>
    %312 = arith.select %311, %309, %307 : vector<64x64xi1>, vector<64x64xbf16>
    %c8_151 = arith.constant 8 : index
    %c0_152 = arith.constant 0 : index
    %c0_153 = arith.constant 0 : index
    %313 = vector.load %arg7[%c8_151, %c0_152, %c0_153] : memref<9x64x64xbf16, #tpu.memory_space<vmem>>, vector<1x64x64xbf16>
    %314 = vector.shape_cast %313 : vector<1x64x64xbf16> to vector<64x64xbf16>
    %cst_154 = arith.constant dense<0.000000e+00> : vector<64x64xf32>
    %315 = tpu.matmul %312, %314, %cst_154 {dimension_numbers = #tpu.dot_dimension_numbers<[1], [0], [0], [1], [0, 0, 1, 1], [], []>} : vector<64x64xbf16>, vector<64x64xbf16>, vector<64x64xf32> -> vector<64x64xf32>
    %316 = arith.addf %306, %315 : vector<64x64xf32>
    %317 = arith.addf %316, %220 : vector<64x64xf32>
    %cst_155 = arith.constant 0.000000e+00 : f32
    %318 = vector.broadcast %cst_155 : f32 to vector<64x64xf32>
    %319 = arith.maximumf %317, %318 : vector<64x64xf32>
    %320 = arith.truncf %319 : vector<64x64xf32> to vector<64x64xbf16>
    %cst_156 = arith.constant 0.000000e+00 : bf16
    %321 = vector.broadcast %cst_156 : bf16 to vector<9x64xbf16>
    %322 = tpu.concatenate %321, %320, %321 in 0 : vector<9x64xbf16>, vector<64x64xbf16>, vector<9x64xbf16> -> vector<82x64xbf16>
    %323 = tpu.iota {dimensions = array<i32: 0>} : vector<64x1xi32>
    %c7_i32_157 = arith.constant 7 : i32
    %324 = vector.broadcast %c7_i32_157 : i32 to vector<64x1xi32>
    %325 = arith.andi %323, %324 : vector<64x1xi32>
    %c8_i32_158 = arith.constant 8 : i32
    %326 = vector.broadcast %c8_i32_158 : i32 to vector<64x1xi32>
    %327 = arith.cmpi slt, %323, %326 : vector<64x1xi32>
    %c56_i32_159 = arith.constant 56 : i32
    %328 = vector.broadcast %c56_i32_159 : i32 to vector<64x1xi32>
    %329 = arith.cmpi sge, %323, %328 : vector<64x1xi32>
    %c0_i32_160 = arith.constant 0 : i32
    %330 = vector.broadcast %c0_i32_160 : i32 to vector<64x1xi32>
    %331 = arith.cmpi eq, %325, %330 : vector<64x1xi32>
    %c7_i32_161 = arith.constant 7 : i32
    %332 = vector.broadcast %c7_i32_161 : i32 to vector<64x1xi32>
    %333 = arith.cmpi eq, %325, %332 : vector<64x1xi32>
    %c0_162 = arith.constant 0 : index
    %c0_163 = arith.constant 0 : index
    %334 = vector.load %arg10[%c0_162, %c0_163] : memref<1x64xf32, #tpu.memory_space<vmem>>, vector<1x64xf32>
    %335 = vector.extract_strided_slice %322 {offsets = [0, 0], sizes = [64, 64], strides = [1, 1]} : vector<82x64xbf16> to vector<64x64xbf16>
    %336 = arith.ori %327, %331 : vector<64x1xi1>
    %cst_164 = arith.constant 0.000000e+00 : bf16
    %337 = vector.broadcast %cst_164 : bf16 to vector<64x64xbf16>
    %338 = vector.shape_cast %336 : vector<64x1xi1> to vector<64x1xi1>
    %339 = vector.broadcast %338 : vector<64x1xi1> to vector<64x64xi1>
    %340 = arith.select %339, %337, %335 : vector<64x64xi1>, vector<64x64xbf16>
    %c0_165 = arith.constant 0 : index
    %c0_166 = arith.constant 0 : index
    %c0_167 = arith.constant 0 : index
    %341 = vector.load %arg9[%c0_165, %c0_166, %c0_167] : memref<9x64x64xbf16, #tpu.memory_space<vmem>>, vector<1x64x64xbf16>
    %342 = vector.shape_cast %341 : vector<1x64x64xbf16> to vector<64x64xbf16>
    %cst_168 = arith.constant dense<0.000000e+00> : vector<64x64xf32>
    %343 = tpu.matmul %340, %342, %cst_168 {dimension_numbers = #tpu.dot_dimension_numbers<[1], [0], [0], [1], [0, 0, 1, 1], [], []>} : vector<64x64xbf16>, vector<64x64xbf16>, vector<64x64xf32> -> vector<64x64xf32>
    %344 = vector.broadcast %334 : vector<1x64xf32> to vector<64x64xf32>
    %345 = arith.addf %344, %343 : vector<64x64xf32>
    %346 = vector.extract_strided_slice %322 {offsets = [1, 0], sizes = [64, 64], strides = [1, 1]} : vector<82x64xbf16> to vector<64x64xbf16>
    %cst_169 = arith.constant 0.000000e+00 : bf16
    %347 = vector.broadcast %cst_169 : bf16 to vector<64x64xbf16>
    %348 = vector.shape_cast %327 : vector<64x1xi1> to vector<64x1xi1>
    %349 = vector.broadcast %348 : vector<64x1xi1> to vector<64x64xi1>
    %350 = arith.select %349, %347, %346 : vector<64x64xi1>, vector<64x64xbf16>
    %c1_170 = arith.constant 1 : index
    %c0_171 = arith.constant 0 : index
    %c0_172 = arith.constant 0 : index
    %351 = vector.load %arg9[%c1_170, %c0_171, %c0_172] : memref<9x64x64xbf16, #tpu.memory_space<vmem>>, vector<1x64x64xbf16>
    %352 = vector.shape_cast %351 : vector<1x64x64xbf16> to vector<64x64xbf16>
    %cst_173 = arith.constant dense<0.000000e+00> : vector<64x64xf32>
    %353 = tpu.matmul %350, %352, %cst_173 {dimension_numbers = #tpu.dot_dimension_numbers<[1], [0], [0], [1], [0, 0, 1, 1], [], []>} : vector<64x64xbf16>, vector<64x64xbf16>, vector<64x64xf32> -> vector<64x64xf32>
    %354 = arith.addf %345, %353 : vector<64x64xf32>
    %355 = vector.extract_strided_slice %322 {offsets = [2, 0], sizes = [64, 64], strides = [1, 1]} : vector<82x64xbf16> to vector<64x64xbf16>
    %356 = arith.ori %327, %333 : vector<64x1xi1>
    %cst_174 = arith.constant 0.000000e+00 : bf16
    %357 = vector.broadcast %cst_174 : bf16 to vector<64x64xbf16>
    %358 = vector.shape_cast %356 : vector<64x1xi1> to vector<64x1xi1>
    %359 = vector.broadcast %358 : vector<64x1xi1> to vector<64x64xi1>
    %360 = arith.select %359, %357, %355 : vector<64x64xi1>, vector<64x64xbf16>
    %c2_175 = arith.constant 2 : index
    %c0_176 = arith.constant 0 : index
    %c0_177 = arith.constant 0 : index
    %361 = vector.load %arg9[%c2_175, %c0_176, %c0_177] : memref<9x64x64xbf16, #tpu.memory_space<vmem>>, vector<1x64x64xbf16>
    %362 = vector.shape_cast %361 : vector<1x64x64xbf16> to vector<64x64xbf16>
    %cst_178 = arith.constant dense<0.000000e+00> : vector<64x64xf32>
    %363 = tpu.matmul %360, %362, %cst_178 {dimension_numbers = #tpu.dot_dimension_numbers<[1], [0], [0], [1], [0, 0, 1, 1], [], []>} : vector<64x64xbf16>, vector<64x64xbf16>, vector<64x64xf32> -> vector<64x64xf32>
    %364 = arith.addf %354, %363 : vector<64x64xf32>
    %365 = vector.extract_strided_slice %322 {offsets = [8, 0], sizes = [64, 64], strides = [1, 1]} : vector<82x64xbf16> to vector<64x64xbf16>
    %cst_179 = arith.constant 0.000000e+00 : bf16
    %366 = vector.broadcast %cst_179 : bf16 to vector<64x64xbf16>
    %367 = vector.shape_cast %331 : vector<64x1xi1> to vector<64x1xi1>
    %368 = vector.broadcast %367 : vector<64x1xi1> to vector<64x64xi1>
    %369 = arith.select %368, %366, %365 : vector<64x64xi1>, vector<64x64xbf16>
    %c3_180 = arith.constant 3 : index
    %c0_181 = arith.constant 0 : index
    %c0_182 = arith.constant 0 : index
    %370 = vector.load %arg9[%c3_180, %c0_181, %c0_182] : memref<9x64x64xbf16, #tpu.memory_space<vmem>>, vector<1x64x64xbf16>
    %371 = vector.shape_cast %370 : vector<1x64x64xbf16> to vector<64x64xbf16>
    %cst_183 = arith.constant dense<0.000000e+00> : vector<64x64xf32>
    %372 = tpu.matmul %369, %371, %cst_183 {dimension_numbers = #tpu.dot_dimension_numbers<[1], [0], [0], [1], [0, 0, 1, 1], [], []>} : vector<64x64xbf16>, vector<64x64xbf16>, vector<64x64xf32> -> vector<64x64xf32>
    %373 = arith.addf %364, %372 : vector<64x64xf32>
    %374 = vector.extract_strided_slice %322 {offsets = [9, 0], sizes = [64, 64], strides = [1, 1]} : vector<82x64xbf16> to vector<64x64xbf16>
    %c4_184 = arith.constant 4 : index
    %c0_185 = arith.constant 0 : index
    %c0_186 = arith.constant 0 : index
    %375 = vector.load %arg9[%c4_184, %c0_185, %c0_186] : memref<9x64x64xbf16, #tpu.memory_space<vmem>>, vector<1x64x64xbf16>
    %376 = vector.shape_cast %375 : vector<1x64x64xbf16> to vector<64x64xbf16>
    %cst_187 = arith.constant dense<0.000000e+00> : vector<64x64xf32>
    %377 = tpu.matmul %374, %376, %cst_187 {dimension_numbers = #tpu.dot_dimension_numbers<[1], [0], [0], [1], [0, 0, 1, 1], [], []>} : vector<64x64xbf16>, vector<64x64xbf16>, vector<64x64xf32> -> vector<64x64xf32>
    %378 = arith.addf %373, %377 : vector<64x64xf32>
    %379 = vector.extract_strided_slice %322 {offsets = [10, 0], sizes = [64, 64], strides = [1, 1]} : vector<82x64xbf16> to vector<64x64xbf16>
    %cst_188 = arith.constant 0.000000e+00 : bf16
    %380 = vector.broadcast %cst_188 : bf16 to vector<64x64xbf16>
    %381 = vector.shape_cast %333 : vector<64x1xi1> to vector<64x1xi1>
    %382 = vector.broadcast %381 : vector<64x1xi1> to vector<64x64xi1>
    %383 = arith.select %382, %380, %379 : vector<64x64xi1>, vector<64x64xbf16>
    %c5_189 = arith.constant 5 : index
    %c0_190 = arith.constant 0 : index
    %c0_191 = arith.constant 0 : index
    %384 = vector.load %arg9[%c5_189, %c0_190, %c0_191] : memref<9x64x64xbf16, #tpu.memory_space<vmem>>, vector<1x64x64xbf16>
    %385 = vector.shape_cast %384 : vector<1x64x64xbf16> to vector<64x64xbf16>
    %cst_192 = arith.constant dense<0.000000e+00> : vector<64x64xf32>
    %386 = tpu.matmul %383, %385, %cst_192 {dimension_numbers = #tpu.dot_dimension_numbers<[1], [0], [0], [1], [0, 0, 1, 1], [], []>} : vector<64x64xbf16>, vector<64x64xbf16>, vector<64x64xf32> -> vector<64x64xf32>
    %387 = arith.addf %378, %386 : vector<64x64xf32>
    %388 = vector.extract_strided_slice %322 {offsets = [16, 0], sizes = [64, 64], strides = [1, 1]} : vector<82x64xbf16> to vector<64x64xbf16>
    %389 = arith.ori %329, %331 : vector<64x1xi1>
    %cst_193 = arith.constant 0.000000e+00 : bf16
    %390 = vector.broadcast %cst_193 : bf16 to vector<64x64xbf16>
    %391 = vector.shape_cast %389 : vector<64x1xi1> to vector<64x1xi1>
    %392 = vector.broadcast %391 : vector<64x1xi1> to vector<64x64xi1>
    %393 = arith.select %392, %390, %388 : vector<64x64xi1>, vector<64x64xbf16>
    %c6_194 = arith.constant 6 : index
    %c0_195 = arith.constant 0 : index
    %c0_196 = arith.constant 0 : index
    %394 = vector.load %arg9[%c6_194, %c0_195, %c0_196] : memref<9x64x64xbf16, #tpu.memory_space<vmem>>, vector<1x64x64xbf16>
    %395 = vector.shape_cast %394 : vector<1x64x64xbf16> to vector<64x64xbf16>
    %cst_197 = arith.constant dense<0.000000e+00> : vector<64x64xf32>
    %396 = tpu.matmul %393, %395, %cst_197 {dimension_numbers = #tpu.dot_dimension_numbers<[1], [0], [0], [1], [0, 0, 1, 1], [], []>} : vector<64x64xbf16>, vector<64x64xbf16>, vector<64x64xf32> -> vector<64x64xf32>
    %397 = arith.addf %387, %396 : vector<64x64xf32>
    %398 = vector.extract_strided_slice %322 {offsets = [17, 0], sizes = [64, 64], strides = [1, 1]} : vector<82x64xbf16> to vector<64x64xbf16>
    %cst_198 = arith.constant 0.000000e+00 : bf16
    %399 = vector.broadcast %cst_198 : bf16 to vector<64x64xbf16>
    %400 = vector.shape_cast %329 : vector<64x1xi1> to vector<64x1xi1>
    %401 = vector.broadcast %400 : vector<64x1xi1> to vector<64x64xi1>
    %402 = arith.select %401, %399, %398 : vector<64x64xi1>, vector<64x64xbf16>
    %c7_199 = arith.constant 7 : index
    %c0_200 = arith.constant 0 : index
    %c0_201 = arith.constant 0 : index
    %403 = vector.load %arg9[%c7_199, %c0_200, %c0_201] : memref<9x64x64xbf16, #tpu.memory_space<vmem>>, vector<1x64x64xbf16>
    %404 = vector.shape_cast %403 : vector<1x64x64xbf16> to vector<64x64xbf16>
    %cst_202 = arith.constant dense<0.000000e+00> : vector<64x64xf32>
    %405 = tpu.matmul %402, %404, %cst_202 {dimension_numbers = #tpu.dot_dimension_numbers<[1], [0], [0], [1], [0, 0, 1, 1], [], []>} : vector<64x64xbf16>, vector<64x64xbf16>, vector<64x64xf32> -> vector<64x64xf32>
    %406 = arith.addf %397, %405 : vector<64x64xf32>
    %407 = vector.extract_strided_slice %322 {offsets = [18, 0], sizes = [64, 64], strides = [1, 1]} : vector<82x64xbf16> to vector<64x64xbf16>
    %408 = arith.ori %329, %333 : vector<64x1xi1>
    %cst_203 = arith.constant 0.000000e+00 : bf16
    %409 = vector.broadcast %cst_203 : bf16 to vector<64x64xbf16>
    %410 = vector.shape_cast %408 : vector<64x1xi1> to vector<64x1xi1>
    %411 = vector.broadcast %410 : vector<64x1xi1> to vector<64x64xi1>
    %412 = arith.select %411, %409, %407 : vector<64x64xi1>, vector<64x64xbf16>
    %c8_204 = arith.constant 8 : index
    %c0_205 = arith.constant 0 : index
    %c0_206 = arith.constant 0 : index
    %413 = vector.load %arg9[%c8_204, %c0_205, %c0_206] : memref<9x64x64xbf16, #tpu.memory_space<vmem>>, vector<1x64x64xbf16>
    %414 = vector.shape_cast %413 : vector<1x64x64xbf16> to vector<64x64xbf16>
    %cst_207 = arith.constant dense<0.000000e+00> : vector<64x64xf32>
    %415 = tpu.matmul %412, %414, %cst_207 {dimension_numbers = #tpu.dot_dimension_numbers<[1], [0], [0], [1], [0, 0, 1, 1], [], []>} : vector<64x64xbf16>, vector<64x64xbf16>, vector<64x64xf32> -> vector<64x64xf32>
    %416 = arith.addf %406, %415 : vector<64x64xf32>
    %cst_208 = arith.constant 0.000000e+00 : f32
    %417 = vector.broadcast %cst_208 : f32 to vector<64x64xf32>
    %418 = arith.maximumf %416, %417 : vector<64x64xf32>
    %419 = arith.truncf %418 : vector<64x64xf32> to vector<64x64xbf16>
    %cst_209 = arith.constant 0.000000e+00 : bf16
    %420 = vector.broadcast %cst_209 : bf16 to vector<9x64xbf16>
    %421 = tpu.concatenate %420, %419, %420 in 0 : vector<9x64xbf16>, vector<64x64xbf16>, vector<9x64xbf16> -> vector<82x64xbf16>
    %422 = tpu.iota {dimensions = array<i32: 0>} : vector<64x1xi32>
    %c7_i32_210 = arith.constant 7 : i32
    %423 = vector.broadcast %c7_i32_210 : i32 to vector<64x1xi32>
    %424 = arith.andi %422, %423 : vector<64x1xi32>
    %c8_i32_211 = arith.constant 8 : i32
    %425 = vector.broadcast %c8_i32_211 : i32 to vector<64x1xi32>
    %426 = arith.cmpi slt, %422, %425 : vector<64x1xi32>
    %c56_i32_212 = arith.constant 56 : i32
    %427 = vector.broadcast %c56_i32_212 : i32 to vector<64x1xi32>
    %428 = arith.cmpi sge, %422, %427 : vector<64x1xi32>
    %c0_i32_213 = arith.constant 0 : i32
    %429 = vector.broadcast %c0_i32_213 : i32 to vector<64x1xi32>
    %430 = arith.cmpi eq, %424, %429 : vector<64x1xi32>
    %c7_i32_214 = arith.constant 7 : i32
    %431 = vector.broadcast %c7_i32_214 : i32 to vector<64x1xi32>
    %432 = arith.cmpi eq, %424, %431 : vector<64x1xi32>
    %c0_215 = arith.constant 0 : index
    %c0_216 = arith.constant 0 : index
    %433 = vector.load %arg12[%c0_215, %c0_216] : memref<1x64xf32, #tpu.memory_space<vmem>>, vector<1x64xf32>
    %434 = vector.extract_strided_slice %421 {offsets = [0, 0], sizes = [64, 64], strides = [1, 1]} : vector<82x64xbf16> to vector<64x64xbf16>
    %435 = arith.ori %426, %430 : vector<64x1xi1>
    %cst_217 = arith.constant 0.000000e+00 : bf16
    %436 = vector.broadcast %cst_217 : bf16 to vector<64x64xbf16>
    %437 = vector.shape_cast %435 : vector<64x1xi1> to vector<64x1xi1>
    %438 = vector.broadcast %437 : vector<64x1xi1> to vector<64x64xi1>
    %439 = arith.select %438, %436, %434 : vector<64x64xi1>, vector<64x64xbf16>
    %c0_218 = arith.constant 0 : index
    %c0_219 = arith.constant 0 : index
    %c0_220 = arith.constant 0 : index
    %440 = vector.load %arg11[%c0_218, %c0_219, %c0_220] : memref<9x64x64xbf16, #tpu.memory_space<vmem>>, vector<1x64x64xbf16>
    %441 = vector.shape_cast %440 : vector<1x64x64xbf16> to vector<64x64xbf16>
    %cst_221 = arith.constant dense<0.000000e+00> : vector<64x64xf32>
    %442 = tpu.matmul %439, %441, %cst_221 {dimension_numbers = #tpu.dot_dimension_numbers<[1], [0], [0], [1], [0, 0, 1, 1], [], []>} : vector<64x64xbf16>, vector<64x64xbf16>, vector<64x64xf32> -> vector<64x64xf32>
    %443 = vector.broadcast %433 : vector<1x64xf32> to vector<64x64xf32>
    %444 = arith.addf %443, %442 : vector<64x64xf32>
    %445 = vector.extract_strided_slice %421 {offsets = [1, 0], sizes = [64, 64], strides = [1, 1]} : vector<82x64xbf16> to vector<64x64xbf16>
    %cst_222 = arith.constant 0.000000e+00 : bf16
    %446 = vector.broadcast %cst_222 : bf16 to vector<64x64xbf16>
    %447 = vector.shape_cast %426 : vector<64x1xi1> to vector<64x1xi1>
    %448 = vector.broadcast %447 : vector<64x1xi1> to vector<64x64xi1>
    %449 = arith.select %448, %446, %445 : vector<64x64xi1>, vector<64x64xbf16>
    %c1_223 = arith.constant 1 : index
    %c0_224 = arith.constant 0 : index
    %c0_225 = arith.constant 0 : index
    %450 = vector.load %arg11[%c1_223, %c0_224, %c0_225] : memref<9x64x64xbf16, #tpu.memory_space<vmem>>, vector<1x64x64xbf16>
    %451 = vector.shape_cast %450 : vector<1x64x64xbf16> to vector<64x64xbf16>
    %cst_226 = arith.constant dense<0.000000e+00> : vector<64x64xf32>
    %452 = tpu.matmul %449, %451, %cst_226 {dimension_numbers = #tpu.dot_dimension_numbers<[1], [0], [0], [1], [0, 0, 1, 1], [], []>} : vector<64x64xbf16>, vector<64x64xbf16>, vector<64x64xf32> -> vector<64x64xf32>
    %453 = arith.addf %444, %452 : vector<64x64xf32>
    %454 = vector.extract_strided_slice %421 {offsets = [2, 0], sizes = [64, 64], strides = [1, 1]} : vector<82x64xbf16> to vector<64x64xbf16>
    %455 = arith.ori %426, %432 : vector<64x1xi1>
    %cst_227 = arith.constant 0.000000e+00 : bf16
    %456 = vector.broadcast %cst_227 : bf16 to vector<64x64xbf16>
    %457 = vector.shape_cast %455 : vector<64x1xi1> to vector<64x1xi1>
    %458 = vector.broadcast %457 : vector<64x1xi1> to vector<64x64xi1>
    %459 = arith.select %458, %456, %454 : vector<64x64xi1>, vector<64x64xbf16>
    %c2_228 = arith.constant 2 : index
    %c0_229 = arith.constant 0 : index
    %c0_230 = arith.constant 0 : index
    %460 = vector.load %arg11[%c2_228, %c0_229, %c0_230] : memref<9x64x64xbf16, #tpu.memory_space<vmem>>, vector<1x64x64xbf16>
    %461 = vector.shape_cast %460 : vector<1x64x64xbf16> to vector<64x64xbf16>
    %cst_231 = arith.constant dense<0.000000e+00> : vector<64x64xf32>
    %462 = tpu.matmul %459, %461, %cst_231 {dimension_numbers = #tpu.dot_dimension_numbers<[1], [0], [0], [1], [0, 0, 1, 1], [], []>} : vector<64x64xbf16>, vector<64x64xbf16>, vector<64x64xf32> -> vector<64x64xf32>
    %463 = arith.addf %453, %462 : vector<64x64xf32>
    %464 = vector.extract_strided_slice %421 {offsets = [8, 0], sizes = [64, 64], strides = [1, 1]} : vector<82x64xbf16> to vector<64x64xbf16>
    %cst_232 = arith.constant 0.000000e+00 : bf16
    %465 = vector.broadcast %cst_232 : bf16 to vector<64x64xbf16>
    %466 = vector.shape_cast %430 : vector<64x1xi1> to vector<64x1xi1>
    %467 = vector.broadcast %466 : vector<64x1xi1> to vector<64x64xi1>
    %468 = arith.select %467, %465, %464 : vector<64x64xi1>, vector<64x64xbf16>
    %c3_233 = arith.constant 3 : index
    %c0_234 = arith.constant 0 : index
    %c0_235 = arith.constant 0 : index
    %469 = vector.load %arg11[%c3_233, %c0_234, %c0_235] : memref<9x64x64xbf16, #tpu.memory_space<vmem>>, vector<1x64x64xbf16>
    %470 = vector.shape_cast %469 : vector<1x64x64xbf16> to vector<64x64xbf16>
    %cst_236 = arith.constant dense<0.000000e+00> : vector<64x64xf32>
    %471 = tpu.matmul %468, %470, %cst_236 {dimension_numbers = #tpu.dot_dimension_numbers<[1], [0], [0], [1], [0, 0, 1, 1], [], []>} : vector<64x64xbf16>, vector<64x64xbf16>, vector<64x64xf32> -> vector<64x64xf32>
    %472 = arith.addf %463, %471 : vector<64x64xf32>
    %473 = vector.extract_strided_slice %421 {offsets = [9, 0], sizes = [64, 64], strides = [1, 1]} : vector<82x64xbf16> to vector<64x64xbf16>
    %c4_237 = arith.constant 4 : index
    %c0_238 = arith.constant 0 : index
    %c0_239 = arith.constant 0 : index
    %474 = vector.load %arg11[%c4_237, %c0_238, %c0_239] : memref<9x64x64xbf16, #tpu.memory_space<vmem>>, vector<1x64x64xbf16>
    %475 = vector.shape_cast %474 : vector<1x64x64xbf16> to vector<64x64xbf16>
    %cst_240 = arith.constant dense<0.000000e+00> : vector<64x64xf32>
    %476 = tpu.matmul %473, %475, %cst_240 {dimension_numbers = #tpu.dot_dimension_numbers<[1], [0], [0], [1], [0, 0, 1, 1], [], []>} : vector<64x64xbf16>, vector<64x64xbf16>, vector<64x64xf32> -> vector<64x64xf32>
    %477 = arith.addf %472, %476 : vector<64x64xf32>
    %478 = vector.extract_strided_slice %421 {offsets = [10, 0], sizes = [64, 64], strides = [1, 1]} : vector<82x64xbf16> to vector<64x64xbf16>
    %cst_241 = arith.constant 0.000000e+00 : bf16
    %479 = vector.broadcast %cst_241 : bf16 to vector<64x64xbf16>
    %480 = vector.shape_cast %432 : vector<64x1xi1> to vector<64x1xi1>
    %481 = vector.broadcast %480 : vector<64x1xi1> to vector<64x64xi1>
    %482 = arith.select %481, %479, %478 : vector<64x64xi1>, vector<64x64xbf16>
    %c5_242 = arith.constant 5 : index
    %c0_243 = arith.constant 0 : index
    %c0_244 = arith.constant 0 : index
    %483 = vector.load %arg11[%c5_242, %c0_243, %c0_244] : memref<9x64x64xbf16, #tpu.memory_space<vmem>>, vector<1x64x64xbf16>
    %484 = vector.shape_cast %483 : vector<1x64x64xbf16> to vector<64x64xbf16>
    %cst_245 = arith.constant dense<0.000000e+00> : vector<64x64xf32>
    %485 = tpu.matmul %482, %484, %cst_245 {dimension_numbers = #tpu.dot_dimension_numbers<[1], [0], [0], [1], [0, 0, 1, 1], [], []>} : vector<64x64xbf16>, vector<64x64xbf16>, vector<64x64xf32> -> vector<64x64xf32>
    %486 = arith.addf %477, %485 : vector<64x64xf32>
    %487 = vector.extract_strided_slice %421 {offsets = [16, 0], sizes = [64, 64], strides = [1, 1]} : vector<82x64xbf16> to vector<64x64xbf16>
    %488 = arith.ori %428, %430 : vector<64x1xi1>
    %cst_246 = arith.constant 0.000000e+00 : bf16
    %489 = vector.broadcast %cst_246 : bf16 to vector<64x64xbf16>
    %490 = vector.shape_cast %488 : vector<64x1xi1> to vector<64x1xi1>
    %491 = vector.broadcast %490 : vector<64x1xi1> to vector<64x64xi1>
    %492 = arith.select %491, %489, %487 : vector<64x64xi1>, vector<64x64xbf16>
    %c6_247 = arith.constant 6 : index
    %c0_248 = arith.constant 0 : index
    %c0_249 = arith.constant 0 : index
    %493 = vector.load %arg11[%c6_247, %c0_248, %c0_249] : memref<9x64x64xbf16, #tpu.memory_space<vmem>>, vector<1x64x64xbf16>
    %494 = vector.shape_cast %493 : vector<1x64x64xbf16> to vector<64x64xbf16>
    %cst_250 = arith.constant dense<0.000000e+00> : vector<64x64xf32>
    %495 = tpu.matmul %492, %494, %cst_250 {dimension_numbers = #tpu.dot_dimension_numbers<[1], [0], [0], [1], [0, 0, 1, 1], [], []>} : vector<64x64xbf16>, vector<64x64xbf16>, vector<64x64xf32> -> vector<64x64xf32>
    %496 = arith.addf %486, %495 : vector<64x64xf32>
    %497 = vector.extract_strided_slice %421 {offsets = [17, 0], sizes = [64, 64], strides = [1, 1]} : vector<82x64xbf16> to vector<64x64xbf16>
    %cst_251 = arith.constant 0.000000e+00 : bf16
    %498 = vector.broadcast %cst_251 : bf16 to vector<64x64xbf16>
    %499 = vector.shape_cast %428 : vector<64x1xi1> to vector<64x1xi1>
    %500 = vector.broadcast %499 : vector<64x1xi1> to vector<64x64xi1>
    %501 = arith.select %500, %498, %497 : vector<64x64xi1>, vector<64x64xbf16>
    %c7_252 = arith.constant 7 : index
    %c0_253 = arith.constant 0 : index
    %c0_254 = arith.constant 0 : index
    %502 = vector.load %arg11[%c7_252, %c0_253, %c0_254] : memref<9x64x64xbf16, #tpu.memory_space<vmem>>, vector<1x64x64xbf16>
    %503 = vector.shape_cast %502 : vector<1x64x64xbf16> to vector<64x64xbf16>
    %cst_255 = arith.constant dense<0.000000e+00> : vector<64x64xf32>
    %504 = tpu.matmul %501, %503, %cst_255 {dimension_numbers = #tpu.dot_dimension_numbers<[1], [0], [0], [1], [0, 0, 1, 1], [], []>} : vector<64x64xbf16>, vector<64x64xbf16>, vector<64x64xf32> -> vector<64x64xf32>
    %505 = arith.addf %496, %504 : vector<64x64xf32>
    %506 = vector.extract_strided_slice %421 {offsets = [18, 0], sizes = [64, 64], strides = [1, 1]} : vector<82x64xbf16> to vector<64x64xbf16>
    %507 = arith.ori %428, %432 : vector<64x1xi1>
    %cst_256 = arith.constant 0.000000e+00 : bf16
    %508 = vector.broadcast %cst_256 : bf16 to vector<64x64xbf16>
    %509 = vector.shape_cast %507 : vector<64x1xi1> to vector<64x1xi1>
    %510 = vector.broadcast %509 : vector<64x1xi1> to vector<64x64xi1>
    %511 = arith.select %510, %508, %506 : vector<64x64xi1>, vector<64x64xbf16>
    %c8_257 = arith.constant 8 : index
    %c0_258 = arith.constant 0 : index
    %c0_259 = arith.constant 0 : index
    %512 = vector.load %arg11[%c8_257, %c0_258, %c0_259] : memref<9x64x64xbf16, #tpu.memory_space<vmem>>, vector<1x64x64xbf16>
    %513 = vector.shape_cast %512 : vector<1x64x64xbf16> to vector<64x64xbf16>
    %cst_260 = arith.constant dense<0.000000e+00> : vector<64x64xf32>
    %514 = tpu.matmul %511, %513, %cst_260 {dimension_numbers = #tpu.dot_dimension_numbers<[1], [0], [0], [1], [0, 0, 1, 1], [], []>} : vector<64x64xbf16>, vector<64x64xbf16>, vector<64x64xf32> -> vector<64x64xf32>
    %515 = arith.addf %505, %514 : vector<64x64xf32>
    %516 = arith.addf %515, %319 : vector<64x64xf32>
    %cst_261 = arith.constant 0.000000e+00 : f32
    %517 = vector.broadcast %cst_261 : f32 to vector<64x64xf32>
    %518 = arith.maximumf %516, %517 : vector<64x64xf32>
    %cst_262 = arith.constant dense<0.000000e+00> : vector<64xf32>
    %519 = vector.multi_reduction <add>, %518, %cst_262 [0] : vector<64x64xf32> to vector<64xf32>
    %520 = vector.shape_cast %519 : vector<64xf32> to vector<1x64xf32>
    %cst_263 = arith.constant 1.562500e-02 : f32
    %521 = vector.broadcast %cst_263 : f32 to vector<1x64xf32>
    %522 = arith.mulf %520, %521 : vector<1x64xf32>
    %523 = arith.truncf %522 : vector<1x64xf32> to vector<1x64xbf16>
    %c0_264 = arith.constant 0 : index
    %c0_265 = arith.constant 0 : index
    %524 = vector.load %arg13[%c0_264, %c0_265] : memref<64x128xbf16, #tpu.memory_space<vmem>>, vector<64x128xbf16>
    %cst_266 = arith.constant dense<0.000000e+00> : vector<1x128xf32>
    %525 = tpu.matmul %523, %524, %cst_266 {dimension_numbers = #tpu.dot_dimension_numbers<[1], [0], [0], [1], [0, 0, 1, 1], [], []>} : vector<1x64xbf16>, vector<64x128xbf16>, vector<1x128xf32> -> vector<1x128xf32>
    %c0_267 = arith.constant 0 : index
    %c0_268 = arith.constant 0 : index
    %526 = vector.load %arg14[%c0_267, %c0_268] : memref<1x128xf32, #tpu.memory_space<vmem>>, vector<1x128xf32>
    %527 = arith.addf %525, %526 : vector<1x128xf32>
    %528 = vector.shape_cast %527 : vector<1x128xf32> to vector<1x128xf32>
    %529 = vector.broadcast %528 : vector<1x128xf32> to vector<8x128xf32>
    %c0_269 = arith.constant 0 : index
    %c0_270 = arith.constant 0 : index
    %c0_271 = arith.constant 0 : index
    %530 = vector.load %arg15[%c0_269, %c0_270, %c0_271] : memref<1x8x128xf32, #tpu.memory_space<vmem>>, vector<1x8x128xf32>
    %531 = vector.shape_cast %530 : vector<1x8x128xf32> to vector<8x128xf32>
    %532 = vector.shape_cast %529 : vector<8x128xf32> to vector<1x8x128xf32>
    tpu.vector_store %arg15[%c0_269, %c0_270, %c0_271], %532 {strides = array<i32>} : memref<1x8x128xf32, #tpu.memory_space<vmem>>, vector<1x8x128xf32>,
    return
  }
  func.func @transform_0(%arg0: i32) -> (i32, i32, i32) {
    %c0_i32 = arith.constant 0 : i32
    %c0_i32_0 = arith.constant 0 : i32
    %c0_i32_1 = arith.constant 0 : i32
    return %arg0, %c0_i32, %c0_i32_0 : i32, i32, i32
  }
  func.func @transform_1(%arg0: i32) -> (i32, i32) {
    %c0_i32 = arith.constant 0 : i32
    %c0_i32_0 = arith.constant 0 : i32
    %c0_i32_1 = arith.constant 0 : i32
    return %c0_i32, %c0_i32_0 : i32, i32
  }
  func.func @transform_2(%arg0: i32) -> (i32, i32, i32) {
    %c0_i32 = arith.constant 0 : i32
    %c0_i32_0 = arith.constant 0 : i32
    %c0_i32_1 = arith.constant 0 : i32
    %c0_i32_2 = arith.constant 0 : i32
    return %c0_i32, %c0_i32_0, %c0_i32_1 : i32, i32, i32
  }
  func.func @transform_3(%arg0: i32) -> (i32, i32) {
    %c0_i32 = arith.constant 0 : i32
    %c0_i32_0 = arith.constant 0 : i32
    %c0_i32_1 = arith.constant 0 : i32
    return %c0_i32, %c0_i32_0 : i32, i32
  }
  func.func @transform_4(%arg0: i32) -> (i32, i32, i32) {
    %c0_i32 = arith.constant 0 : i32
    %c0_i32_0 = arith.constant 0 : i32
    %c0_i32_1 = arith.constant 0 : i32
    %c0_i32_2 = arith.constant 0 : i32
    return %c0_i32, %c0_i32_0, %c0_i32_1 : i32, i32, i32
  }
  func.func @transform_5(%arg0: i32) -> (i32, i32) {
    %c0_i32 = arith.constant 0 : i32
    %c0_i32_0 = arith.constant 0 : i32
    %c0_i32_1 = arith.constant 0 : i32
    return %c0_i32, %c0_i32_0 : i32, i32
  }
  func.func @transform_6(%arg0: i32) -> (i32, i32, i32) {
    %c0_i32 = arith.constant 0 : i32
    %c0_i32_0 = arith.constant 0 : i32
    %c0_i32_1 = arith.constant 0 : i32
    %c0_i32_2 = arith.constant 0 : i32
    return %c0_i32, %c0_i32_0, %c0_i32_1 : i32, i32, i32
  }
  func.func @transform_7(%arg0: i32) -> (i32, i32) {
    %c0_i32 = arith.constant 0 : i32
    %c0_i32_0 = arith.constant 0 : i32
    %c0_i32_1 = arith.constant 0 : i32
    return %c0_i32, %c0_i32_0 : i32, i32
  }
  func.func @transform_8(%arg0: i32) -> (i32, i32, i32) {
    %c0_i32 = arith.constant 0 : i32
    %c0_i32_0 = arith.constant 0 : i32
    %c0_i32_1 = arith.constant 0 : i32
    %c0_i32_2 = arith.constant 0 : i32
    return %c0_i32, %c0_i32_0, %c0_i32_1 : i32, i32, i32
  }
  func.func @transform_9(%arg0: i32) -> (i32, i32) {
    %c0_i32 = arith.constant 0 : i32
    %c0_i32_0 = arith.constant 0 : i32
    %c0_i32_1 = arith.constant 0 : i32
    return %c0_i32, %c0_i32_0 : i32, i32
  }
  func.func @transform_10(%arg0: i32) -> (i32, i32, i32) {
    %c0_i32 = arith.constant 0 : i32
    %c0_i32_0 = arith.constant 0 : i32
    %c0_i32_1 = arith.constant 0 : i32
    %c0_i32_2 = arith.constant 0 : i32
    return %c0_i32, %c0_i32_0, %c0_i32_1 : i32, i32, i32
  }
  func.func @transform_11(%arg0: i32) -> (i32, i32) {
    %c0_i32 = arith.constant 0 : i32
    %c0_i32_0 = arith.constant 0 : i32
    %c0_i32_1 = arith.constant 0 : i32
    return %c0_i32, %c0_i32_0 : i32, i32
  }
  func.func @transform_12(%arg0: i32) -> (i32, i32) {
    %c0_i32 = arith.constant 0 : i32
    %c0_i32_0 = arith.constant 0 : i32
    %c0_i32_1 = arith.constant 0 : i32
    return %c0_i32, %c0_i32_0 : i32, i32
  }
  func.func @transform_13(%arg0: i32) -> (i32, i32) {
    %c0_i32 = arith.constant 0 : i32
    %c0_i32_0 = arith.constant 0 : i32
    %c0_i32_1 = arith.constant 0 : i32
    return %c0_i32, %c0_i32_0 : i32, i32
  }
  func.func @transform_14(%arg0: i32) -> (i32, i32, i32) {
    %c0_i32 = arith.constant 0 : i32
    %c0_i32_0 = arith.constant 0 : i32
    %c0_i32_1 = arith.constant 0 : i32
    return %arg0, %c0_i32, %c0_i32_0 : i32, i32, i32
  }
}

</mosaic_0001>

<bundles_post_ra>
// kernel: small_resnet_forward.1
= control target key start
LH: loop header
LB: loop body
LE: loop exit
PB: predicated region body
PF: predicated region fallthrough
CT: control target
= control target key end

     0   :  { %19 = vsyncpa [#allocation3], 0  ;;  %s20619_s0 = inlined_call_operand.vmem [shape: bf16[2,256,3], index: 0, kind: input, shape index: {}]   ;;  %s20620_s1 = inlined_call_operand.vmem [shape: bf16[64,256], index: 1, kind: input, shape index: {}]   ;;  %s20621_s2 = inlined_call_operand.vmem [shape: bf16[9,3,64], index: 2, kind: input, shape index: {}]   ;;  %s20622_s3 = inlined_call_operand.vmem [shape: f32[1,64], index: 3, kind: input, shape index: {}]   ;;  %s20623_s4 = inlined_call_operand.vmem [shape: bf16[9,64,128], index: 4, kind: input, shape index: {}]   ;;  %s20624_s5 = inlined_call_operand.vmem [shape: f32[1,128], index: 5, kind: input, shape index: {}]   ;;  %s20625_s6 = inlined_call_operand.hbm [shape: bf16[9,64,64], index: 6, kind: input, shape index: {}]   ;;  %s20626_s7 = inlined_call_operand.vmem [shape: f32[1,64], index: 7, kind: input, shape index: {}]   ;;  %s20627_s8 = inlined_call_operand.hbm [shape: bf16[9,64,64], index: 8, kind: input, shape index: {}]   ;;  %s20628_s9 = inlined_call_operand.vmem [shape: f32[1,64], index: 9, kind: input, shape index: {}]   ;;  %s20629_s10 = inlined_call_operand.hbm [shape: bf16[9,64,64], index: 10, kind: input, shape index: {}]   ;;  %s20630_s11 = inlined_call_operand.vmem [shape: f32[1,64], index: 11, kind: input, shape index: {}]   ;;  %s20631_s12 = inlined_call_operand.vmem [shape: bf16[64,128], index: 12, kind: input, shape index: {}]   ;;  %s20632_s13 = inlined_call_operand.vmem [shape: f32[1,128], index: 13, kind: input, shape index: {}]   ;;  %s20633_s14 = inlined_call_operand.vmem [shape: f32[2,8,128], index: 14, kind: output, shape index: {}]  }
   0x1   :  { %20 = vsyncpa [#allocation5], 0  ;;  %s16231_s29 = smov 0  }
   0x2 LB: > { %s16237_s30 = sadd.s32 4294967295, %s16143_s29   ;;  %p13311_p0 = scmp.ge.s32.totalorder %s16143_s29, 1  ;;  %s16143_s29 = sphi %s16231_s29, %s26_s29  }
   0x3   : > { %p356_p1 = scmp.lt.s32.totalorder %s16143_s29, 3  ;;  %p15839_p2 = scmp.eq.s32.totalorder %s16237_s30, 0 }
   0x4   : > { %s16145_s16 = smov [#allocation4]   ;;  %s16146_s18 = smov [#allocation2]  }
   0x5   : > { %p16242_p3 = pnand %p13311_p0, %p356_p1  ;;  %s399_s17 = sshll.u32 %s16145_s16, 4  ;;  %s400_s17 = int_to_ptr.vmem [resolvable:$true] %s399_s17 }
   0x6   : > { %s383_s19 = sshll.u32 %s16146_s18, 4  ;;  %s16147_s21 = smov [#allocation6]   ;;  %s384_s19 = int_to_ptr.vmem [resolvable:$true] %s383_s19 }
   0x7   : > { %p15829_p4 = pneg %p16242_p3  ;;  %s415_s22 = sshll.u32 %s16147_s21, 4  ;;  %s16254_s22 = int_to_ptr.vmem [resolvable:$true] %s415_s22 }
   0x8   : > { %s16062_s23 = scalar_lea.vmem %s400_s17, 4608  ;;  %p16070_p10 = scmp.lt.s32.totalorder %s400_s17, %s400_s17 }
   0x9   : > { %p16250_p5 = pnand %p15839_p2, %p15829_p4  ;;  %p16063_p7 = scmp.ne.s32.totalorder %s400_s17, %s16062_s23 }
   0xa   : > { %p16071_p11 = scmp.lt.s32.totalorder %s16062_s23, %s16062_s23 }
   0xb   : > { %p16053_p6 = pneg %p16250_p5 }
   0xc   : > { %p16072_p12 = por %p16071_p11, %p16070_p10 }
   0xd   : > { %p16065_p8 = pnand %p16063_p7, %p16053_p6 }
   0xf   : > { %p16066_p9 = pneg %p16065_p8 }
  0x11   : > { %p16073_p13 = pnand %p16072_p12, %p16066_p9 }
  0x13   : > { %16076 = shalt.err (!%p16073_p13)
}
  0x14   : > { %s16148_s24 = smov 64   ;;  %s16149_s25 = smov 4  }
  0x15   : > { %15835 = dma.hbm_to_vmem [thread:$0]  (!%p16250_p5), %s20627_s8, 4608, %s400_s17, [#allocation5], %s16148_s24, %s16148_s24, %s16149_s25  }
  0x16   : > { %s16088_s28 = scalar_lea.vmem %s384_s19, 4608  ;;  %p16096_p7 = scmp.lt.s32.totalorder %s384_s19, %s384_s19 }
  0x17   : > { %p16089_p0 = scmp.ne.s32.totalorder %s384_s19, %s16088_s28  ;;  %p16097_p8 = scmp.lt.s32.totalorder %s16088_s28, %s16088_s28 }
  0x19   : > { %p16091_p1 = pnand %p16089_p0, %p16053_p6  ;;  %p16098_p10 = por %p16097_p8, %p16096_p7 }
  0x1b   : > { %p16092_p4 = pneg %p16091_p1 }
  0x1d   : > { %p16099_p9 = pnand %p16098_p10, %p16092_p4 }
  0x1f   : > { %16102 = shalt.err (!%p16099_p9)
}
  0x20   : > { %15832 = dma.hbm_to_vmem [thread:$0]  (!%p16250_p5), %s20625_s6, 4608, %s384_s19, [#allocation3], %s16148_s24, %s16148_s24, %s16149_s25  }
  0x21   : > { %s16114_s17 = scalar_lea.vmem %s16254_s22, 4608  ;;  %p16122_p0 = scmp.lt.s32.totalorder %s16254_s22, %s16254_s22 }
  0x22   : > { %p16115_p11 = scmp.ne.s32.totalorder %s16254_s22, %s16114_s17  ;;  %p16123_p1 = scmp.lt.s32.totalorder %s16114_s17, %s16114_s17 }
  0x24   : > { %p16117_p12 = pnand %p16115_p11, %p16053_p6  ;;  %p16124_p4 = por %p16123_p1, %p16122_p0 }
  0x26   : > { %p16118_p13 = pneg %p16117_p12 }
  0x28   : > { %p16125_p7 = pnand %p16124_p4, %p16118_p13 }
  0x2a   : > { %16128 = shalt.err (!%p16125_p7)
}
  0x2b   : > { %15838 = dma.hbm_to_vmem [thread:$0]  (!%p16250_p5), %s20629_s10, 4608, %s16254_s22, [#allocation5], %s16148_s24, %s16148_s24, %s16149_s25  }
  0x2c   : > { %448 = sbr.rel (%p16242_p3) target bundleno = 3252 (0xcb4), region = 76 }
  0x31   : > { %16134 = dma.done.wait (%p15839_p2), [#allocation3], 4608  }
  0x32   : > { %16136 = vsyncadd (%p15839_p2), [#allocation3], 4294962688 }
  0x33   : > { %16138 = dma.done.wait (%p15839_p2), [#allocation5], 9216  }
  0x34   : > { %16140 = vsyncadd (%p15839_p2), [#allocation5], 4294958080  ;;  %vm20636_vm0 = vcmask 1040384   ;;  %v20640_v0 = vmov 0   ;;  %p501_p5 = scmp.lt.s32.totalorder %s16237_s30, 1  ;;  %v774_v1 = vlaneseq  ;;  %vm1244_vm1 = vcmask 1041408  }
  0x35   : > { %14925 = vmatprep.mubr.bf16.mxu0 %v20640_v0  ;;  %v16151_v2 = vmov 65535   ;;  %vm20634_vm2 = vmmov 0   ;;  %vm16153_vm4 = vmmov 1   ;;  %vm20644_vm6 = vsmask.f32 256  ;;  %s16154_s18 = smov 64  }
  0x36   : > { %v1245_v3 = vsel %vm20636_vm0, 4294967295, %v16151_v2  ;;  %s22256_s30 = smov (!%p501_p5, %s16237_s30), 1  ;;  %v16303_v4 = vshrl.u32 %v774_v1, 7  ;;  %vm1059_vm3 = vmpackc.low %vm20634_vm2, %vm20634_vm2  ;;  %v1193_v11 = vld [vmem:[%s20621_s2] sm:$0x3]  ;;  %vm20651_vm7 = vcmask 23552  }
  0x37   : > { %v16308_v5 = vsel %vm1059_vm3, 65537, %v20640_v0  ;;  %vm1513_vm5 = vmpackc.low %vm16153_vm4, %vm16153_vm4  ;;  %v16310_v6 = vsel %vm1244_vm1, %v1245_v3, 0  ;;  %s14116_s15 = sshll.u32 %s22256_s30, 7  ;;  %v13386_v16 = vld [vmem:[%s20621_s2 + $0x2] sm:$0x3]  ;;  %v20986_v32 = vmov 0 }
  0x38   : > { %20978 = vst [vmem:[#allocation9_spill] sm:$0xff] %v16303_v4  ;;  %20979 = vst [vmem:[#allocation10_spill] sm:$0xff] %v16308_v5  ;;  %v16314_v7 = vadd.s32 16, %v16303_v4  ;;  %v16317_v8 = vsel %vm1513_vm5, 65537, %v20640_v0  ;;  %v13371_v9 = vcombine.low %v16308_v5, %v16308_v5  ;;  %s16324_s22 = scalar_lea.vmem %s20619_s0, %s14116_s15  ;;  %v1248_v12 = vand.u32 %v16310_v6, %v1193_v11  ;;  %s13322_s23 = sshll.u32 %s22256_s30, 3 }
  0x39   : > { %20981 = vst [vmem:[#allocation12_spill] sm:$0xff] %v16317_v8  ;;  %v16328_v10 = vcombine.low %v16317_v8, %v16317_v8  ;;  %v15864_v13 = vld [vmem:[%s16324_s22] sm:$0xff]   ;;  %v15865_v15 = vld [vmem:[%s16324_s22 + $0x8] sm:$0xff]   ;;  %v16342_v19 = vadd.s32 32, %v16303_v4  ;;  %v1964_v22 = vand.u32 %v13386_v16, %v16310_v6  ;;  %v15866_v26 = vld [vmem:[%s16324_s22 + $0x10] sm:$0xff]   ;;  %v16359_v34 = vrot.slane %v20640_v0, 1  ;;  %s509_s20 = scalar_lea.vmem %s20633_s14, %s13322_s23 }
  0x3a   : > { %20980 = vst [vmem:[#allocation11_spill] sm:$0xff] %v16314_v7  ;;  %v809_v14 = vand.u32 15, %v16314_v7  ;;  %v1630_v18 = vshrl.u32 %v13371_v9, 16  ;;  %14923 = vmatprep.subr.bf16.mxu0 %v1248_v12  ;;  %v627_v20 = vshrl.u32 %v15864_v13, 16  ;;  %v630_v21 = vshll.u32 %v15864_v13, 16  ;;  %vm16353_vm11 = vmand %vm20636_vm0, %vm20644_vm6  ;;  %v15867_v52 = vld [vmem:[%s16324_s22 + $0x18] sm:$0xff]  }
  0x3b   : > { %20982 = vst [vmem:[#allocation13_spill] sm:$0xff] %v16328_v10  ;;  %v1626_v17 = vshrl.u32 %v16328_v10, 16  ;;  %20983 = vst [vmem:[#allocation14_spill] sm:$0xff] %v16342_v19  ;;  %14924 = vmatpush3.bf16.msra.mxu0 %v1248_v12  ;;  %v634_v23 = vshrl.u32 %v15865_v15, 16  ;;  %v637_v24 = vshll.u32 %v15865_v15, 16  ;;  %14957 = vmatprep.subr.bf16.mxu1 %v1964_v22  ;;  %v1633_v30 = vshll.u32 %v13371_v9, 16 }
  0x3c   : > { %vm905_vm8 = vcmp.eq.s32.totalorder %v809_v14, 0  ;;  %v629_v27 = vrot.slane %v627_v20, 7  ;;  %v16349_v29 = vrot.slane %v1630_v18, 7  ;;  %vm20637_vm10 = vsmask.f32 7424  ;;  %14958 = vmatpush3.bf16.msra.mxu1 %v1964_v22  ;;  %20989 = vst [vmem:[#allocation18_spill] sm:$0xff] %v16359_v34 }
  0x3d   : > { %vm1058_vm9 = vmpackc.low %vm905_vm8, %vm905_vm8  ;;  %v16345_v25 = vrot.slane %v1626_v17, 7  ;;  %v636_v31 = vrot.slane %v634_v23, 7  ;;  %v20987_v32 = vsel %vm16353_vm11, 4294967295, %v20986_v32  ;;  %v16362_v35 = vadd.s32 48, %v16303_v4  ;;  %v15868_v60 = vld [vmem:[%s16324_s22 + $0x20] sm:$0xff]  }
  0x3e   : > { %v1088_v28 = vsel %vm1058_vm9, 65537, %v20640_v0  ;;  %20985 = vst [vmem:[#allocation16_spill] sm:$0xff] %v16349_v29  ;;  %20988 = vst [vmem:[#allocation17_spill] sm:$0xff] %v20987_v32  ;;  %v632_v36 = vor.u32 %v630_v21, %v629_v27  ;;  %v16365_v37 = vor.u32 %v1633_v30, %v16349_v29  ;;  %v811_v38 = vand.u32 15, %v16342_v19 }
  0x3f   : > { %20984 = vst [vmem:[#allocation15_spill] sm:$0xff] %v16345_v25  ;;  %v13339_v33 = vcombine.low %v1088_v28, %v16308_v5  ;;  %20990 = vst [vmem:[#allocation19_spill] sm:$0xff] %v16362_v35  ;;  %v783_v39 = vadd.s32 64, %v16303_v4  ;;  %v639_v40 = vor.u32 %v637_v24, %v636_v31  ;;  %v20992_v41 = vmov 0  ;;  %v15869_v28 = vld [vmem:[%s16324_s22 + $0x28] sm:$0xff]  }
  0x40   : > { %20991 = vst [vmem:[#allocation20_spill] sm:$0xff] %v16365_v37  ;;  %v642_v42 = vshrl.u32 %v15866_v26, 16  ;;  %v16374_v43 = vadd.s32 80, %v16303_v4  ;;  %v16378_v44 = vsel %vm16353_vm11, 0, %v632_v36  ;;  %v16383_v45 = vsel %vm20644_vm6, %v16345_v25, %v16365_v37 }
  0x41   : > { %vm16369_vm12 = vcmp.ne.s16.totalorder %v13339_v33, 0  ;;  %20995 = vst [vmem:[#allocation22_spill] sm:$0xff] %v16383_v45  ;;  %v16388_v46 = vsel %vm20644_vm6, %v16349_v29, %v16365_v37  ;;  %vm907_vm13 = vcmp.eq.s32.totalorder %v811_v38, 0  ;;  %v16391_v47 = vsel %vm20644_vm6, %v629_v27, %v639_v40 }
  0x42   : > { %v20993_v41 = vsel %vm16369_vm12, 4294967295, %v20992_v41  ;;  %20996 = vst [vmem:[#allocation23_spill] sm:$0xff] %v16388_v46  ;;  %v1178_v48 = vsel %vm16369_vm12, 0, %v16378_v44  ;;  %vm20635_vm14 = vcmp.ne.s16.totalorder %v16383_v45, 0  ;;  %vm20650_vm15 = vcmp.ne.s16.totalorder %v16388_v46, 0  ;;  %vm1060_vm1 = vmpackc.low %vm907_vm13, %vm907_vm13 }
  0x43   : > { %20994 = vst [vmem:[#allocation21_spill] sm:$0xff] %v20993_v41  ;;  %14926 = vmatmul.mubr.msk.bf16.vlgmr.msra.gmra.mxu0 %vm20651_vm7, %v1178_v48  ;;  %v1765_v49 = vsel %vm20635_vm14, 0, %v16378_v44  ;;  %v1090_v50 = vsel %vm1060_vm1, 65537, %v20640_v0  ;;  %v1766_v51 = vsel %vm20650_vm15, 0, %v16391_v47  ;;  %v644_v57 = vrot.slane %v642_v42, 7 }
  0x44   : > { %v1791_v53 = vshll.u32 %v1765_v49, 16  ;;  %v1795_v54 = vshrl.u32 %v1765_v49, 16  ;;  %v13340_v55 = vcombine.low %v1090_v50, %v16308_v5  ;;  %v1799_v56 = vshll.u32 %v1766_v51, 16 }
  0x45   : > { %v645_v58 = vshll.u32 %v15866_v26, 16  ;;  %v813_v59 = vand.u32 15, %v16362_v35  ;;  %v20997_v62 = vmov 0  ;;  %v1803_v1 = vshrl.u32 %v1766_v51, 16 }
  0x46   : > { %v1793_v61 = vrot.slane %v1791_v53, 1  ;;  %vm16410_vm3 = vcmp.ne.s16.totalorder %v13340_v55, 0  ;;  %v1801_v63 = vrot.slane %v1799_v56, 1  ;;  %v650_v9 = vshrl.u32 %v15867_v52, 16 }
  0x47   : > { %v20998_v62 = vsel %vm16410_vm3, 4294967295, %v20997_v62  ;;  %v1179_v2 = vsel %vm16410_vm3, 0, %v16391_v47  ;;  %v647_v3 = vor.u32 %v645_v58, %v644_v57  ;;  %vm909_vm4 = vcmp.eq.s32.totalorder %v813_v59, 0  ;;  %v15870_v58 = vld [vmem:[%s16324_s22 + $0x30] sm:$0xff]  }
  0x48   : > { %20999 = vst [vmem:[#allocation24_spill] sm:$0xff] %v20998_v62  ;;  %v1794_v11 = vsel %vm20637_vm10, %v16359_v34, %v1793_v61  ;;  %v1797_v12 = vor.u32 %v1795_v54, %v1793_v61  ;;  %14929 = vmatprep.mubr.msk.bf16.mxu0 %vm20651_vm7, %v1179_v2  ;;  %vm1062_vm5 = vmpackc.low %vm909_vm4, %vm909_vm4  ;;  %v1805_v13 = vor.u32 %v1803_v1, %v1801_v63  ;;  %v653_v14 = vshll.u32 %v15867_v52, 16  ;;  %v15871_v1 = vld [vmem:[%s16324_s22 + $0x38] sm:$0xff]  }
  0x49   : > { %14959 = vmatprep.mubr.msk.bf16.mxu1 %vm20651_vm7, %v1794_v11  ;;  %v16422_v15 = vsel %vm20644_vm6, %v636_v31, %v647_v3  ;;  %v1092_v16 = vsel %vm1062_vm5, 65537, %v20640_v0  ;;  %v652_v17 = vrot.slane %v650_v9, 7  ;;  %v815_v18 = vand.u32 15, %v783_v39 }
  0x4a   : > { %v1802_v20 = vsel %vm20637_vm10, %v1797_v12, %v1801_v63  ;;  %v13341_v21 = vcombine.low %v1092_v16, %v16308_v5  ;;  %v1767_v22 = vsel %vm20650_vm15, 0, %v16422_v15  ;;  %v658_v23 = vshrl.u32 %v15868_v60, 16 }
  0x4b   : > { %14960 = vmatmul.mubr.msk.bf16.vlgmr.msra.gmra.mxu1 %vm20651_vm7, %v1802_v20  ;;  %v1807_v24 = vshll.u32 %v1767_v22, 16  ;;  %v655_v26 = vor.u32 %v653_v14, %v652_v17  ;;  %vm911_vm8 = vcmp.eq.s32.totalorder %v815_v18, 0  ;;  %v1811_v27 = vshrl.u32 %v1767_v22, 16  ;;  %v15872_v22 = vld [vmem:[%s16324_s22 + $0x40] sm:$0xff]  }
  0x4c   : > { %vm16432_vm9 = vcmp.ne.s16.totalorder %v13341_v21, 0  ;;  %v21000_v30 = vmov 0  ;;  %vm1064_vm13 = vmpackc.low %vm911_vm8, %vm911_vm8  ;;  %v660_v31 = vrot.slane %v658_v23, 7  ;;  %v661_v33 = vshll.u32 %v15868_v60, 16 }
  0x4d   : > { %v21001_v30 = vsel %vm16432_vm9, 4294967295, %v21000_v30  ;;  %v817_v36 = vand.u32 15, %v16374_v43  ;;  %v1180_v38 = vsel %vm16432_vm9, 0, %v16422_v15  ;;  %v16440_v39 = vrot.slane %v1807_v24, 1 }
  0x4e   : > { %21002 = vst [vmem:[#allocation25_spill] sm:$0xff] %v21001_v30  ;;  %v16443_v40 = vsel %vm20644_vm6, %v644_v57, %v655_v26  ;;  %v1094_v42 = vsel %vm1064_vm13, 65537, %v20640_v0  ;;  %14930 = vmatmul.mubr.msk.bf16.gmra.mxu0 %vm20651_vm7, %v1180_v38  ;;  %v663_v49 = vor.u32 %v661_v33, %v660_v31  ;;  %v21003_v54 = vmov 0 }
  0x4f   : > { %v13342_v48 = vcombine.low %v1094_v42, %v16308_v5  ;;  %v1768_v43 = vsel %vm20650_vm15, 0, %v16443_v40  ;;  %vm913_vm1 = vcmp.eq.s32.totalorder %v817_v36, 0  ;;  %v1810_v50 = vsel %vm20637_vm10, %v1805_v13, %v16440_v39 }
  0x50   : > { %v1813_v51 = vor.u32 %v1811_v27, %v16440_v39  ;;  %v1815_v52 = vshll.u32 %v1768_v43, 16  ;;  %vm1066_vm4 = vmpackc.low %vm913_vm1, %vm913_vm1  ;;  %v1819_v53 = vshrl.u32 %v1768_v43, 16  ;;  %14963 = vmatprep.mubr.msk.bf16.mxu1 %vm20651_vm7, %v1810_v50  ;;  %v16460_v55 = vsel %vm20644_vm6, %v652_v17, %v663_v49 }
  0x51   : > { %vm16455_vm5 = vcmp.ne.s16.totalorder %v13342_v48, 0  ;;  %v1096_v56 = vsel %vm1066_vm4, 65537, %v20640_v0  ;;  %v666_v57 = vshrl.u32 %v15869_v28, 16  ;;  %v1769_v63 = vsel %vm20650_vm15, 0, %v16460_v55 }
  0x52   : > { %v21004_v54 = vsel %vm16455_vm5, 4294967295, %v21003_v54  ;;  %v1181_v59 = vsel %vm16455_vm5, 0, %v16443_v40  ;;  %v1817_v60 = vrot.slane %v1815_v52, 1  ;;  %v13343_v61 = vcombine.low %v1096_v56, %v16308_v5 }
  0x53   : > { %21005 = vst [vmem:[#allocation26_spill] sm:$0xff] %v21004_v54  ;;  %14933 = vmatprep.mubr.msk.bf16.mxu0 %vm20651_vm7, %v1181_v59  ;;  %v1823_v2 = vshll.u32 %v1769_v63, 16  ;;  %v668_v3 = vrot.slane %v666_v57, 7  ;;  %v669_v9 = vshll.u32 %v15869_v28, 16  ;;  %v787_v11 = vadd.s32 96, %v16303_v4 }
  0x54   : > { %v16475_v12 = vsel %vm20637_vm10, %v1813_v51, %v1817_v60  ;;  %vm16477_vm8 = vcmp.ne.s16.totalorder %v13343_v61, 0  ;;  %v21006_v13 = vmov 0  ;;  %v1821_v14 = vor.u32 %v1819_v53, %v1817_v60 }
  0x55   : > { %v21007_v13 = vsel %vm16477_vm8, 4294967295, %v21006_v13  ;;  %v1827_v16 = vshrl.u32 %v1769_v63, 16  ;;  %14964 = vmatmul.mubr.msk.bf16.gmra.mxu1 %vm20651_vm7, %v16475_v12  ;;  %v1182_v17 = vsel %vm16477_vm8, 0, %v16460_v55  ;;  %v1825_v18 = vrot.slane %v1823_v2, 1 }
  0x56   : > { %21008 = vst [vmem:[#allocation27_spill] sm:$0xff] %v21007_v13  ;;  %v671_v20 = vor.u32 %v669_v9, %v668_v3  ;;  %v819_v21 = vand.u32 15, %v787_v11  ;;  %v674_v23 = vshrl.u32 %v15870_v58, 16  ;;  %v677_v24 = vshll.u32 %v15870_v58, 16  ;;  %14934 = vmatmul.mubr.msk.bf16.gmra.mxu0 %vm20651_vm7, %v1182_v17  ;;  %v13419_v9 = vld [vmem:[%s20621_s2 + $0x4] sm:$0x3] }
  0x57   : > { %v789_v26 = vadd.s32 112, %v16303_v4  ;;  %v682_v27 = vshrl.u32 %v15871_v1, 16  ;;  %v16490_v28 = vsel %vm20637_vm10, %v1821_v14, %v1825_v18  ;;  %v1829_v36 = vor.u32 %v1827_v16, %v1825_v18  ;;  %v15873_v17 = vld [vmem:[%s16324_s22 + $0x48] sm:$0xff]  }
  0x58   : > { %21009 = vst [vmem:[#allocation28_spill] sm:$0xff] %v16490_v28  ;;  %v16493_v33 = vsel %vm20644_vm6, %v660_v31, %v671_v20  ;;  %vm915_vm13 = vcmp.eq.s32.totalorder %v819_v21, 0  ;;  %14967 = vmatprep.mubr.msk.bf16.mxu1 %vm20651_vm7, %v16490_v28  ;;  %v676_v42 = vrot.slane %v674_v23, 7  ;;  %v685_v52 = vshll.u32 %v15871_v1, 16 }
  0x59   : > { %vm1068_vm1 = vmpackc.low %vm915_vm13, %vm915_vm13  ;;  %v1770_v38 = vsel %vm20650_vm15, 0, %v16493_v33  ;;  %v821_v48 = vand.u32 15, %v789_v26  ;;  %v684_v43 = vrot.slane %v682_v27, 7  ;;  %v791_v56 = vadd.s32 128, %v16303_v4 }
  0x5a   : > { %v1098_v49 = vsel %vm1068_vm1, 65537, %v20640_v0  ;;  %v1831_v50 = vshll.u32 %v1770_v38, 16  ;;  %v1835_v51 = vshrl.u32 %v1770_v38, 16  ;;  %v679_v53 = vor.u32 %v677_v24, %v676_v42 }
  0x5b   : > { %v13344_v31 = vcombine.low %v1098_v49, %v16308_v5  ;;  %vm917_vm4 = vcmp.eq.s32.totalorder %v821_v48, 0  ;;  %v687_v58 = vor.u32 %v685_v52, %v684_v43  ;;  %v690_v59 = vshrl.u32 %v15872_v22, 16  ;;  %v15874_v52 = vld [vmem:[%s16324_s22 + $0x50] sm:$0xff]  }
  0x5c   : > { %v1833_v57 = vrot.slane %v1831_v50, 1  ;;  %vm1070_vm13 = vmpackc.low %vm917_vm4, %vm917_vm4  ;;  %v693_v60 = vshll.u32 %v15872_v22, 16  ;;  %v21010_v61 = vmov 0  ;;  %v16508_v63 = vsel %vm20644_vm6, %v668_v3, %v679_v53 }
  0x5d   : > { %vm16503_vm2 = vcmp.ne.s16.totalorder %v13344_v31, 0  ;;  %v1100_v1 = vsel %vm1070_vm13, 65537, %v20640_v0  ;;  %v823_v2 = vand.u32 15, %v791_v56  ;;  %v1771_v3 = vsel %vm20650_vm15, 0, %v16508_v63 }
  0x5e   : > { %v21011_v61 = vsel %vm16503_vm2, 4294967295, %v21010_v61  ;;  %v1183_v11 = vsel %vm16503_vm2, 0, %v16493_v33  ;;  %v16518_v14 = vsel %vm20637_vm10, %v1829_v36, %v1833_v57  ;;  %v13345_v16 = vcombine.low %v1100_v1, %v16308_v5 }
  0x5f   : > { %21012 = vst [vmem:[#allocation29_spill] sm:$0xff] %v21011_v61  ;;  %21013 = vst [vmem:[#allocation30_spill] sm:$0xff] %v16518_v14  ;;  %14937 = vmatprep.mubr.msk.bf16.mxu0 %vm20651_vm7, %v1183_v11  ;;  %14968 = vmatmul.mubr.msk.bf16.gmra.mxu1 %vm20651_vm7, %v16518_v14  ;;  %v1837_v18 = vor.u32 %v1835_v51, %v1833_v57  ;;  %v1839_v20 = vshll.u32 %v1771_v3, 16  ;;  %v16529_v21 = vsel %vm20644_vm6, %v676_v42, %v687_v58  ;;  %v21014_v22 = vmov 0 }
  0x60   : > { %vm919_vm1 = vcmp.eq.s32.totalorder %v823_v2, 0  ;;  %vm16531_vm4 = vcmp.ne.s16.totalorder %v13345_v16, 0  ;;  %v1772_v23 = vsel %vm20650_vm15, 0, %v16529_v21  ;;  %v1843_v24 = vshrl.u32 %v1771_v3, 16  ;;  %v15875_v2 = vld [vmem:[%s16324_s22 + $0x58] sm:$0xff]  }
  0x61   : > { %v21015_v22 = vsel %vm16531_vm4, 4294967295, %v21014_v22  ;;  %vm1072_vm13 = vmpackc.low %vm919_vm1, %vm919_vm1  ;;  %v692_v26 = vrot.slane %v690_v59, 7  ;;  %v1184_v27 = vsel %vm16531_vm4, 0, %v16508_v63  ;;  %v1841_v36 = vrot.slane %v1839_v20, 1 }
  0x62   : > { %21016 = vst [vmem:[#allocation31_spill] sm:$0xff] %v21015_v22  ;;  %v1102_v38 = vsel %vm1072_vm13, 65537, %v20640_v0  ;;  %v1847_v42 = vshll.u32 %v1772_v23, 16  ;;  %14938 = vmatmul.mubr.msk.bf16.gmra.mxu0 %vm20651_vm7, %v1184_v27  ;;  %v793_v50 = vadd.s32 144, %v16303_v4  ;;  %v2532_v51 = vand.u32 %v13419_v9, %v16310_v6 }
  0x63   : > { %v13346_v48 = vcombine.low %v1102_v38, %v16308_v5  ;;  %v695_v49 = vor.u32 %v693_v60, %v692_v26  ;;  %v16548_v31 = vsel %vm20637_vm10, %v1837_v18, %v1841_v36  ;;  %v1845_v53 = vor.u32 %v1843_v24, %v1841_v36 }
  0x64   : > { %21017 = vst [vmem:[#allocation32_spill] sm:$0xff] %v16548_v31  ;;  %v1849_v56 = vrot.slane %v1847_v42, 1  ;;  %v1851_v57 = vshrl.u32 %v1772_v23, 16  ;;  %14971 = vmatprep.mubr.msk.bf16.mxu1 %vm20651_vm7, %v16548_v31  ;;  %v21018_v58 = vmov 0  ;;  %v825_v60 = vand.u32 15, %v793_v50  ;;  %14991 = vmatprep.subr.bf16.mxu0 %v2532_v51 }
  0x65   : > { %vm16552_vm1 = vcmp.ne.s16.totalorder %v13346_v48, 0  ;;  %v16557_v59 = vsel %vm20644_vm6, %v684_v43, %v695_v49  ;;  %v698_v1 = vshrl.u32 %v15873_v17, 16  ;;  %14992 = vmatpush3.bf16.msra.mxu0 %v2532_v51  ;;  %v701_v20 = vshll.u32 %v15873_v17, 16 }
  0x66   : > { %v21019_v58 = vsel %vm16552_vm1, 4294967295, %v21018_v58  ;;  %v1185_v9 = vsel %vm16552_vm1, 0, %v16529_v21  ;;  %v16564_v11 = vsel %vm20637_vm10, %v1845_v53, %v1849_v56  ;;  %v1773_v16 = vsel %vm20650_vm15, 0, %v16557_v59 }
  0x67   : > { %21020 = vst [vmem:[#allocation33_spill] sm:$0xff] %v21019_v58  ;;  %21021 = vst [vmem:[#allocation34_spill] sm:$0xff] %v16564_v11  ;;  %v1853_v3 = vor.u32 %v1851_v57, %v1849_v56  ;;  %14941 = vmatprep.mubr.msk.bf16.mxu0 %vm20651_vm7, %v1185_v9  ;;  %vm921_vm13 = vcmp.eq.s32.totalorder %v825_v60, 0  ;;  %v1855_v43 = vshll.u32 %v1773_v16, 16  ;;  %v700_v18 = vrot.slane %v698_v1, 7  ;;  %14972 = vmatmul.mubr.msk.bf16.gmra.mxu1 %vm20651_vm7, %v16564_v11 }
  0x68   : > { %vm1074_vm14 = vmpackc.low %vm921_vm13, %vm921_vm13  ;;  %v795_v23 = vadd.s32 160, %v16303_v4  ;;  %v1859_v24 = vshrl.u32 %v1773_v16, 16  ;;  %v706_v27 = vshrl.u32 %v15874_v52, 16  ;;  %v709_v36 = vshll.u32 %v15874_v52, 16 }
  0x69   : > { %v1104_v38 = vsel %vm1074_vm14, 65537, %v20640_v0  ;;  %v1857_v42 = vrot.slane %v1855_v43, 1  ;;  %v703_v48 = vor.u32 %v701_v20, %v700_v18  ;;  %v797_v49 = vadd.s32 176, %v16303_v4 }
  0x6a   : > { %v13347_v50 = vcombine.low %v1104_v38, %v16308_v5  ;;  %v827_v51 = vand.u32 15, %v795_v23  ;;  %v708_v53 = vrot.slane %v706_v27, 7  ;;  %v714_v17 = vshrl.u32 %v15875_v2, 16 }
  0x6b   : > { %v16577_v56 = vsel %vm20637_vm10, %v1853_v3, %v1857_v42  ;;  %v16580_v57 = vsel %vm20644_vm6, %v692_v26, %v703_v48  ;;  %v1861_v60 = vor.u32 %v1859_v24, %v1857_v42  ;;  %v829_v1 = vand.u32 15, %v797_v49  ;;  %v15876_v49 = vld [vmem:[%s16324_s22 + $0x60] sm:$0xff]  }
  0x6c   : > { %21022 = vst [vmem:[#allocation35_spill] sm:$0xff] %v16577_v56  ;;  %vm16582_vm13 = vcmp.ne.s16.totalorder %v13347_v50, 0  ;;  %v21023_v52 = vmov 0  ;;  %14975 = vmatprep.mubr.msk.bf16.mxu1 %vm20651_vm7, %v16577_v56  ;;  %vm923_vm14 = vcmp.eq.s32.totalorder %v827_v51, 0  ;;  %v1774_v9 = vsel %vm20650_vm15, 0, %v16580_v57 }
  0x6d   : > { %v21024_v52 = vsel %vm16582_vm13, 4294967295, %v21023_v52  ;;  %v711_v16 = vor.u32 %v709_v36, %v708_v53  ;;  %v1186_v26 = vsel %vm16582_vm13, 0, %v16557_v59  ;;  %vm1076_vm0 = vmpackc.low %vm923_vm14, %vm923_vm14  ;;  %v1863_v3 = vshll.u32 %v1774_v9, 16 }
  0x6e   : > { %21025 = vst [vmem:[#allocation36_spill] sm:$0xff] %v21024_v52  ;;  %vm925_vm10 = vcmp.eq.s32.totalorder %v829_v1, 0  ;;  %v1867_v43 = vshrl.u32 %v1774_v9, 16  ;;  %14942 = vmatmul.mubr.msk.bf16.gmra.mxu0 %vm20651_vm7, %v1186_v26  ;;  %v1106_v20 = vsel %vm1076_vm0, 65537, %v20640_v0  ;;  %v716_v24 = vrot.slane %v714_v17, 7  ;;  %v15877_v9 = vld [vmem:[%s16324_s22 + $0x68] sm:$0xff]  }
  0x6f   : > { %v16597_v23 = vsel %vm20644_vm6, %v700_v18, %v711_v16  ;;  %vm1078_vm11 = vmpackc.low %vm925_vm10, %vm925_vm10  ;;  %v717_v27 = vshll.u32 %v15875_v2, 16  ;;  %v13348_v36 = vcombine.low %v1106_v20, %v16308_v5  ;;  %v1865_v38 = vrot.slane %v1863_v3, 1 }
  0x70   : > { %v1108_v42 = vsel %vm1078_vm11, 65537, %v20640_v0  ;;  %v1775_v48 = vsel %vm20650_vm15, 0, %v16597_v23  ;;  %v799_v18 = vadd.s32 192, %v16303_v4  ;;  %v21026_v2 = vmov 0 }
  0x71   : > { %v13349_v50 = vcombine.low %v1108_v42, %v16308_v5  ;;  %v1871_v51 = vshll.u32 %v1775_v48, 16  ;;  %v719_v1 = vor.u32 %v717_v27, %v716_v24  ;;  %vm16608_vm0 = vcmp.ne.s16.totalorder %v13348_v36, 0  ;;  %v15878_v42 = vld [vmem:[%s16324_s22 + $0x70] sm:$0xff]  }
  0x72   : > { %v21027_v2 = vsel %vm16608_vm0, 4294967295, %v21026_v2  ;;  %vm21029_vm10 = vsmask.f32 7424  ;;  %v1869_v16 = vor.u32 %v1867_v43, %v1865_v38  ;;  %v1875_v26 = vshrl.u32 %v1775_v48, 16 }
  0x73   : > { %21028 = vst [vmem:[#allocation37_spill] sm:$0xff] %v21027_v2  ;;  %v16613_v17 = vsel %vm21029_vm10, %v1861_v60, %v1865_v38  ;;  %v1187_v3 = vsel %vm16608_vm0, 0, %v16580_v57  ;;  %vm16620_vm11 = vcmp.ne.s16.totalorder %v13349_v50, 0  ;;  %v21031_v20 = vmov 0  ;;  %vm21034_vm14 = vmmov %vm21029_vm10 }
  0x74   : > { %21030 = vst [vmem:[#allocation38_spill] sm:$0xff] %v16613_v17  ;;  %14976 = vmatmul.mubr.msk.bf16.gmra.mxu1 %vm20651_vm7, %v16613_v17  ;;  %v21032_v20 = vsel %vm16620_vm11, 4294967295, %v21031_v20  ;;  %v1873_v27 = vrot.slane %v1871_v51, 1  ;;  %v16625_v36 = vsel %vm20644_vm6, %v708_v53, %v719_v1  ;;  %14945 = vmatprep.mubr.msk.bf16.mxu0 %vm20651_vm7, %v1187_v3  ;;  %v1188_v60 = vsel %vm16620_vm11, 0, %v16597_v23 }
  0x75   : > { %21033 = vst [vmem:[#allocation39_spill] sm:$0xff] %v21032_v20  ;;  %v831_v43 = vand.u32 15, %v799_v18  ;;  %v1776_v38 = vsel %vm20650_vm15, 0, %v16625_v36  ;;  %v722_v48 = vshrl.u32 %v15876_v49, 16  ;;  %v725_v53 = vshll.u32 %v15876_v49, 16 }
  0x76   : > { %v16636_v50 = vsel %vm21034_vm14, %v1869_v16, %v1873_v27  ;;  %v1877_v51 = vor.u32 %v1875_v26, %v1873_v27  ;;  %v1879_v0 = vshll.u32 %v1776_v38, 16  ;;  %v801_v3 = vadd.s32 208, %v16303_v4  ;;  %14946 = vmatmul.mubr.msk.bf16.gmra.mxu0 %vm20651_vm7, %v1188_v60 }
  0x77   : > { %21035 = vst [vmem:[#allocation40_spill] sm:$0xff] %v16636_v50  ;;  %14979 = vmatprep.mubr.msk.bf16.mxu1 %vm20651_vm7, %v16636_v50  ;;  %vm927_vm10 = vcmp.eq.s32.totalorder %v831_v43, 0  ;;  %v724_v1 = vrot.slane %v722_v48, 7  ;;  %v1883_v8 = vshrl.u32 %v1776_v38, 16  ;;  %v730_v35 = vshrl.u32 %v15877_v9, 16 }
  0x78   : > { %vm1080_vm6 = vmpackc.low %vm927_vm10, %vm927_vm10  ;;  %v1881_v18 = vrot.slane %v1879_v0, 1  ;;  %v733_v7 = vshll.u32 %v15877_v9, 16  ;;  %v803_v16 = vadd.s32 224, %v16303_v4  ;;  %v21036_v19 = vmov 0  }
  0x79   : > { %v1110_v26 = vsel %vm1080_vm6, 65537, %v21036_v19  ;;  %v727_v27 = vor.u32 %v725_v53, %v724_v1  ;;  %v833_v49 = vand.u32 15, %v801_v3  ;;  %v738_v45 = vshrl.u32 %v15878_v42, 16  ;;  %v15879_v53 = vld [vmem:[%s16324_s22 + $0x78] sm:$0xff]  }
  0x7a   : > { %v13350_v50 = vcombine.low %v1110_v26, %v16308_v5  ;;  %v16646_v43 = vsel %vm21034_vm14, %v1877_v51, %v1881_v18  ;;  %v1885_v48 = vor.u32 %v1883_v8, %v1881_v18  ;;  %v732_v38 = vrot.slane %v730_v35, 7 }
  0x7b   : > { %21037 = vst [vmem:[#allocation41_spill] sm:$0xff] %v16646_v43  ;;  %vm21038_vm15 = vsmask.f32 256  ;;  %vm929_vm10 = vcmp.eq.s32.totalorder %v833_v49, 0  ;;  %v835_v0 = vand.u32 15, %v803_v16  ;;  %v16651_v9 = vrot.slane %v738_v45, 7 }
  0x7c   : > { %v16649_v60 = vsel %vm21038_vm15, %v716_v24, %v727_v27  ;;  %vm16653_vm7 = vcmp.ne.s16.totalorder %v13350_v50, 0  ;;  %v21039_v25 = vmov 0  ;;  %vm21042_vm6 = vcmask 23552   ;;  %vm1082_vm11 = vmpackc.low %vm929_vm10, %vm929_vm10 }
  0x7d   : > { %v21040_v25 = vsel %vm16653_vm7, 4294967295, %v21039_v25  ;;  %14980 = vmatmul.mubr.msk.bf16.gmra.mxu1 %vm21042_vm6, %v16646_v43  ;;  %vm21043_vm14 = vcmp.ne.s16.totalorder %v16388_v46, 0  ;;  %v735_v35 = vor.u32 %v733_v7, %v732_v38  ;;  %v741_v51 = vshll.u32 %v15878_v42, 16  ;;  %vm21044_vm0 = vmmov %vm21042_vm6 }
  0x7e   : > { %21041 = vst [vmem:[#allocation42_spill] sm:$0xff] %v21040_v25  ;;  %v1777_v8 = vsel %vm21043_vm14, 0, %v16649_v60  ;;  %v1189_v24 = vsel %vm16653_vm7, 0, %v16625_v36  ;;  %v1112_v45 = vsel %vm1082_vm11, 65537, %v21036_v19  ;;  %vm931_vm15 = vcmp.eq.s32.totalorder %v835_v0, 0  ;;  %vm21046_vm11 = vmmov %vm21043_vm14 }
  0x7f   : > { %v1887_v50 = vshll.u32 %v1777_v8, 16  ;;  %14949 = vmatprep.mubr.msk.bf16.mxu0 %vm21044_vm0, %v1189_v24  ;;  %v13351_v3 = vcombine.low %v1112_v45, %v16308_v5  ;;  %vm21045_vm10 = vsmask.f32 256  ;;  %vm1084_vm6 = vmpackc.low %vm931_vm15, %vm931_vm15  ;;  %v1891_v16 = vshrl.u32 %v1777_v8, 16 }
  0x80   : > { %v16670_v18 = vsel %vm21045_vm10, %v724_v1, %v735_v35  ;;  %v743_v7 = vor.u32 %v741_v51, %v16651_v9  ;;  %v1114_v26 = vsel %vm1084_vm6, 65537, %v21036_v19  ;;  %v805_v49 = vadd.s32 240, %v16303_v4  ;;  %vm21050_vm0 = vmmov %vm21045_vm10 }
  0x81   : > { %v1889_v42 = vrot.slane %v1887_v50, 1  ;;  %v1778_v27 = vsel %vm21046_vm11, 0, %v16670_v18  ;;  %vm16678_vm14 = vcmp.ne.s16.totalorder %v13351_v3, 0  ;;  %v21047_v0 = vmov 0 }
  0x82   : > { %v21048_v0 = vsel %vm16678_vm14, 4294967295, %v21047_v0  ;;  %v13352_v1 = vcombine.low %v1114_v26, %v16308_v5  ;;  %v1895_v35 = vshll.u32 %v1778_v27, 16  ;;  %v16684_v8 = vsel %vm21050_vm0, %v732_v38, %v743_v7 }
  0x83   : > { %21049 = vst [vmem:[#allocation43_spill] sm:$0xff] %v21048_v0  ;;  %v1190_v51 = vsel %vm16678_vm14, 0, %v16649_v60  ;;  %vm21051_vm15 = vsmask.f32 7424  ;;  %v1893_v45 = vor.u32 %v1891_v16, %v1889_v42  ;;  %v837_v50 = vand.u32 15, %v805_v49 }
  0x84   : > { %v16690_v24 = vsel %vm21051_vm15, %v1885_v48, %v1889_v42  ;;  %vm21053_vm10 = vcmask 23552   ;;  %vm16695_vm11 = vcmp.ne.s16.totalorder %v13352_v1, 0  ;;  %v21055_v3 = vmov 0  ;;  %v13452_v48 = vld [vmem:[%s20621_s2 + $0x6] sm:$0x3] }
  0x85   : > { %21052 = vst [vmem:[#allocation44_spill] sm:$0xff] %v16690_v24  ;;  %14950 = vmatmul.mubr.msk.bf16.gmra.mxu0 %vm21053_vm10, %v1190_v51  ;;  %vm21054_vm6 = vmmov %vm21053_vm10  ;;  %v21056_v3 = vsel %vm16695_vm11, 4294967295, %v21055_v3  ;;  %v1897_v38 = vrot.slane %v1895_v35, 1  ;;  %vm21058_vm0 = vcmp.ne.s16.totalorder %v16388_v46, 0  ;;  %v1899_v26 = vshrl.u32 %v1778_v27, 16 }
  0x86   : > { %14983 = vmatprep.mubr.msk.bf16.mxu1 %vm21054_vm6, %v16690_v24  ;;  %21057 = vst [vmem:[#allocation45_spill] sm:$0xff] %v21056_v3  ;;  %v1779_v7 = vsel %vm21058_vm0, 0, %v16684_v8  ;;  %v1191_v16 = vsel %vm16695_vm11, 0, %v16670_v18  ;;  %vm933_vm15 = vcmp.eq.s32.totalorder %v837_v50, 0  ;;  %v746_v49 = vshrl.u32 %v15879_v53, 16  ;;  %vm21059_vm10 = vmmov %vm21054_vm6 }
  0x87   : > { %v1903_v42 = vshll.u32 %v1779_v7, 16  ;;  %14953 = vmatprep.mubr.msk.bf16.mxu0 %vm21059_vm10, %v1191_v16  ;;  %vm21060_vm6 = vsmask.f32 7424  ;;  %vm1086_vm14 = vmpackc.low %vm933_vm15, %vm933_vm15  ;;  %v1901_v35 = vor.u32 %v1899_v26, %v1897_v38  ;;  %v749_v51 = vshll.u32 %v15879_v53, 16 }
  0x88   : > { %v16710_v1 = vsel %vm21060_vm6, %v1893_v45, %v1897_v38  ;;  %vm21062_vm0 = vmmov %vm21059_vm10  ;;  %v1116_v27 = vsel %vm1086_vm14, 65537, %v21036_v19  ;;  %v16715_v24 = vrot.slane %v746_v49, 7  ;;  %vm20677_vm11 = vcmp.ne.s16.totalorder %v16349_v29, 0 }
  0x89   : > { %21061 = vst [vmem:[#allocation46_spill] sm:$0xff] %v16710_v1  ;;  %14984 = vmatmul.mubr.msk.bf16.gmra.mxu1 %vm21062_vm0, %v16710_v1  ;;  %v1905_v46 = vrot.slane %v1903_v42, 1  ;;  %v13353_v50 = vcombine.low %v1116_v27, %v16308_v5  ;;  %v1907_v43 = vshrl.u32 %v1779_v7, 16  ;;  %v16720_v16 = vadd.s32 24, %v16303_v4  ;;  %vm21065_vm15 = vmmov %vm21060_vm6 }
  0x8a   : > { %v16723_v45 = vadd.s32 40, %v16303_v4  ;;  %v751_v38 = vor.u32 %v749_v51, %v16715_v24  ;;  %v2986_v26 = vand.u32 %v13452_v48, %v16310_v6  ;;  %v21067_v42 = vmov 0  ;;  %vm21070_vm10 = vmmov %vm21062_vm0 }
  0x8b   : > { %21063 = vst [vmem:[#allocation47_spill] sm:$0xff] %v16720_v16  ;;  %v16726_v53 = vsel %vm21065_vm15, %v1901_v35, %v1905_v46  ;;  %vm16730_vm14 = vcmp.ne.s16.totalorder %v13353_v50, 0  ;;  %v810_v7 = vand.u32 15, %v16720_v16  ;;  %v807_v27 = vand.u32 15, %v16303_v4 }
  0x8c   : > { %21064 = vst [vmem:[#allocation48_spill] sm:$0xff] %v16723_v45  ;;  %21066 = vst [vmem:[#allocation49_spill] sm:$0xff] %v16726_v53  ;;  %v21068_v42 = vsel %vm16730_vm14, 4294967295, %v21067_v42  ;;  %14987 = vmatprep.mubr.msk.bf16.mxu1 %vm21070_vm10, %v16726_v53  ;;  %v812_v49 = vand.u32 15, %v16723_v45  ;;  %v1192_v35 = vsel %vm16730_vm14, 0, %v16684_v8  ;;  %15025 = vmatprep.subr.bf16.mxu1 %v2986_v26  ;;  %v16748_v50 = vadd.s32 56, %v16303_v4 }
  0x8d   : > { %21069 = vst [vmem:[#allocation50_spill] sm:$0xff] %v21068_v42  ;;  %vm21071_vm6 = vsmask.f32 256  ;;  %14954 = vmatmul.mubr.msk.bf16.gmra.mxu0 %vm21062_vm0, %v1192_v35  ;;  %vm938_vm15 = vcmp.eq.s32.totalorder %v810_v7, 15  ;;  %15026 = vmatpush3.bf16.msra.mxu1 %v2986_v26  ;;  %v784_v53 = vadd.s32 72, %v16303_v4  ;;  %v2920_v26 = vsel %vm16369_vm12, 0, %v16391_v47 }
  0x8e   : > { %v16744_v48 = vsel %vm21071_vm6, %v16651_v9, %v751_v38  ;;  %21072 = vst [vmem:[#allocation51_spill] sm:$0xff] %v16748_v50  ;;  %vm16754_vm10 = vcmp.eq.s32.totalorder %v812_v49, 15  ;;  %vm16758_vm6 = vcmp.eq.s32.totalorder %v807_v27, 0  ;;  %v16762_v38 = vor.u32 %v1907_v43, %v1905_v46  ;;  %vm2258_vm14 = vmpackc.low %vm938_vm15, %vm938_vm15  ;;  %v21287_v52 = vld [vmem:[#allocation44_spill] sm:$0xff] }
  0x8f   : > { %v1780_v16 = vsel %vm20677_vm11, 0, %v16744_v48  ;;  %v814_v35 = vand.u32 15, %v16748_v50  ;;  %vm2260_vm0 = vmpackc.low %vm16754_vm10, %vm16754_vm10  ;;  %v2290_v7 = vsel %vm2258_vm14, 65537, %v21036_v19  ;;  %v786_v46 = vadd.s32 88, %v16303_v4 }
  0x90   : > { %21077 = vst [vmem:[#allocation52_spill] sm:$0xff] %v16762_v38  ;;  %v1911_v51 = vshll.u32 %v1780_v16, 16  ;;  %v788_v43 = vadd.s32 104, %v16303_v4  ;;  %v2292_v49 = vsel %vm2260_vm0, 65537, %v21036_v19  ;;  %v13404_v27 = vcombine.low %v16308_v5, %v2290_v7  ;;  %vm2791_vm15 = vmpackc.low %vm16758_vm6, %vm16758_vm6 }
  0x91   : > { %vm942_vm10 = vcmp.eq.s32.totalorder %v814_v35, 15  ;;  %v13405_v45 = vcombine.low %v16308_v5, %v2292_v49  ;;  %v2823_v50 = vsel %vm2791_vm15, 65537, %v21036_v19  ;;  %v816_v1 = vand.u32 15, %v784_v53 }
  0x92   : > { %v1913_v16 = vrot.slane %v1911_v51, 1  ;;  %vm2262_vm14 = vmpackc.low %vm942_vm10, %vm942_vm10  ;;  %v818_v29 = vand.u32 15, %v786_v46  ;;  %vm21078_vm11 = vsmask.f32 7424  ;;  %v16784_v51 = vrot.slane %v13404_v27, 7 }
  0x93   : > { %v13436_v56 = vcombine.low %v2823_v50, %v16308_v5  ;;  %v2294_v7 = vsel %vm2262_vm14, 65537, %v21036_v19  ;;  %vm21079_vm0 = vcmask 23552   ;;  %v2370_v9 = vrot.slane %v13405_v45, 7 }
  0x94   : > { %v1914_v17 = vsel %vm21078_vm11, %v16762_v38, %v1913_v16  ;;  %v13406_v35 = vcombine.low %v16308_v5, %v2294_v7  ;;  %vm16790_vm6 = vcmp.eq.s32.totalorder %v816_v1, 15  ;;  %vm16794_vm15 = vcmp.eq.s32.totalorder %v818_v29, 15 }
  0x95   : > { %14988 = vmatmul.mubr.msk.bf16.gmra.mxu1 %vm21079_vm0, %v1914_v17  ;;  %v21084_v46 = vrot.slane %v16328_v10, 7  ;;  %vm21085_vm11 = vcmask 1040384   ;;  %vm16804_vm10 = vcmp.ne.s16.totalorder %v13436_v56, 0  ;;  %v21087_v16 = vmov 0  ;;  %vm2264_vm14 = vmpackc.low %vm16790_vm6, %vm16790_vm6 }
  0x96   : > { %v21088_v16 = vsel %vm16804_vm10, 4294967295, %v21087_v16  ;;  %v2921_v29 = vsel %vm16410_vm3, 0, %v16422_v15  ;;  %v820_v17 = vand.u32 15, %v788_v43  ;;  %vm21090_vm0 = vmmov %vm21085_vm11  ;;  %v2919_v56 = vsel %vm16804_vm10, 0, %v16378_v44 }
  0x97   : > { %v16802_v50 = vsel %vm21085_vm11, %v21084_v46, %v16784_v51  ;;  %21089 = vst [vmem:[#allocation54_spill] sm:$0xff] %v21088_v16  ;;  %v16816_v1 = vsel %vm21090_vm0, %v16784_v51, %v2370_v9  ;;  %v2372_v27 = vrot.slane %v13406_v35, 7  ;;  %vm2266_vm6 = vmpackc.low %vm16794_vm15, %vm16794_vm15  ;;  %vm21092_vm3 = vcmask 23552  }
  0x98   : > { %21086 = vst [vmem:[#allocation53_spill] sm:$0xff] %v16802_v50  ;;  %21091 = vst [vmem:[#allocation55_spill] sm:$0xff] %v16816_v1  ;;  %vm20686_vm11 = vcmp.ne.s16.totalorder %v16802_v50, 0  ;;  %vm20688_vm7 = vcmp.ne.s16.totalorder %v16816_v1, 0  ;;  %15027 = vmatprep.mubr.msk.bf16.mxu1 %vm21092_vm3, %v2919_v56  ;;  %v2296_v45 = vsel %vm2264_vm14, 65537, %v21036_v19  ;;  %v2298_v7 = vsel %vm2266_vm6, 65537, %v21036_v19 }
  0x99   : > { %v2414_v43 = vsel %vm20686_vm11, 0, %v16378_v44  ;;  %v2415_v35 = vsel %vm20688_vm7, 0, %v16391_v47  ;;  %v16836_v53 = vsel %vm21090_vm0, %v2370_v9, %v2372_v27  ;;  %v13407_v46 = vcombine.low %v16308_v5, %v2296_v45 }
  0x9a   : > { %v2451_v49 = vrot.slane %v2414_v43, 1  ;;  %21093 = vst [vmem:[#allocation56_spill] sm:$0xff] %v16836_v53  ;;  %v2453_v38 = vrot.slane %v2415_v35, 1  ;;  %vm20694_vm15 = vcmp.ne.s16.totalorder %v16836_v53, 0  ;;  %v13408_v50 = vcombine.low %v16308_v5, %v2298_v7 }
  0x9b   : > { %vm948_vm3 = vcmp.eq.s32.totalorder %v820_v17, 15  ;;  %vm21094_vm14 = vcmask 1046528   ;;  %v2416_v43 = vsel %vm20694_vm15, 0, %v16422_v15  ;;  %v2374_v10 = vrot.slane %v13407_v46, 7 }
  0x9c   : > { %v2452_v56 = vsel %vm21094_vm14, %v16359_v34, %v2451_v49  ;;  %vm2268_vm6 = vmpackc.low %vm948_vm3, %vm948_vm3  ;;  %v790_v9 = vadd.s32 120, %v16303_v4  ;;  %vm21095_vm0 = vcmask 23552   ;;  %v2455_v35 = vrot.slane %v2416_v43, 1 }
  0x9d   : > { %14993 = vmatprep.mubr.msk.bf16.mxu0 %vm21095_vm0, %v2452_v56  ;;  %vm21096_vm11 = vmmov %vm21094_vm14  ;;  %v2376_v11 = vrot.slane %v13408_v50, 7  ;;  %v2300_v7 = vsel %vm2268_vm6, 65537, %v21036_v19  ;;  %vm21099_vm14 = vcmask 1040384   ;;  %v798_v13 = vadd.s32 184, %v16303_v4 }
  0x9e   : > { %v2454_v45 = vsel %vm21096_vm11, %v2451_v49, %v2453_v38  ;;  %vm21097_vm7 = vmmov %vm21095_vm0  ;;  %v16853_v17 = vsel %vm21099_vm14, %v2372_v27, %v2374_v10  ;;  %v13409_v46 = vcombine.low %v16308_v5, %v2300_v7  ;;  %v822_v34 = vand.u32 15, %v790_v9 }
  0x9f   : > { %14994 = vmatmul.mubr.msk.bf16.vlgmr.msra.gmra.mxu0 %vm21097_vm7, %v2454_v45  ;;  %vm21098_vm12 = vmmov %vm21095_vm0  ;;  %21100 = vst [vmem:[#allocation57_spill] sm:$0xff] %v16853_v17  ;;  %vm20708_vm0 = vcmp.ne.s16.totalorder %v16853_v17, 0  ;;  %v792_v49 = vadd.s32 136, %v16303_v4  ;;  %v794_v45 = vadd.s32 152, %v16303_v4  ;;  %v806_v58 = vadd.s32 248, %v16303_v4 }
  0xa0   : > { %15028 = vmatmul.mubr.msk.bf16.vlgmr.msra.gmra.mxu1 %vm21098_vm12, %v2920_v26  ;;  %vm21101_vm3 = vmmov %vm21096_vm11  ;;  %v2417_v26 = vsel %vm20708_vm0, 0, %v16443_v40  ;;  %v2378_v27 = vrot.slane %v13409_v46, 7  ;;  %vm950_vm6 = vcmp.eq.s32.totalorder %v822_v34, 15 }
  0xa1   : > { %v2456_v31 = vsel %vm21101_vm3, %v2453_v38, %v2455_v35  ;;  %vm21102_vm15 = vmmov %vm21097_vm7  ;;  %v2457_v38 = vrot.slane %v2417_v26, 1  ;;  %v824_v56 = vand.u32 15, %v792_v49  ;;  %v838_v22 = vand.u32 15, %v806_v58  ;;  %v13502_v58 = vld [vmem:[%s20621_s2 + $0xa] sm:$0x3] }
  0xa2   : > { %15031 = vmatprep.mubr.msk.bf16.mxu1 %vm21102_vm15, %v2921_v29  ;;  %vm21103_vm11 = vmmov %vm21099_vm14  ;;  %14997 = vmatprep.mubr.msk.bf16.mxu0 %vm21097_vm7, %v2456_v31  ;;  %v13469_v31 = vld [vmem:[%s20621_s2 + $0x8] sm:$0x3] }
  0xa3   : > { %v16860_v50 = vsel %vm21103_vm11, %v2374_v10, %v2376_v11  ;;  %v2922_v10 = vsel %vm16432_vm9, 0, %v16443_v40  ;;  %vm2270_vm15 = vmpackc.low %vm950_vm6, %vm950_vm6  ;;  %v2458_v7 = vsel %vm21101_vm3, %v2455_v35, %v2457_v38  ;;  %vm952_vm7 = vcmp.eq.s32.totalorder %v824_v56, 15 }
  0xa4   : > { %21104 = vst [vmem:[#allocation58_spill] sm:$0xff] %v16860_v50  ;;  %vm20701_vm12 = vcmp.ne.s16.totalorder %v16860_v50, 0  ;;  %vm21105_vm14 = vmmov %vm21103_vm11  ;;  %v2302_v34 = vsel %vm2270_vm15, 65537, %v21036_v19  ;;  %v2924_v35 = vsel %vm16477_vm8, 0, %v16493_v33  ;;  %v796_v56 = vadd.s32 168, %v16303_v4 }
  0xa5   : > { %v2418_v29 = vsel %vm20701_vm12, 0, %v16460_v55  ;;  %v16878_v9 = vsel %vm21105_vm14, %v2376_v11, %v2378_v27  ;;  %v13410_v46 = vcombine.low %v16308_v5, %v2302_v34  ;;  %vm21107_vm6 = vmmov %vm21101_vm3  ;;  %v2923_v11 = vsel %vm16455_vm5, 0, %v16460_v55 }
  0xa6   : > { %v2459_v43 = vrot.slane %v2418_v29, 1  ;;  %21106 = vst [vmem:[#allocation59_spill] sm:$0xff] %v16878_v9  ;;  %vm20700_vm11 = vcmp.ne.s16.totalorder %v16878_v9, 0  ;;  %vm2272_vm15 = vmpackc.low %vm952_vm7, %vm952_vm7  ;;  %v826_v29 = vand.u32 15, %v794_v45  ;;  %vm21108_vm14 = vcmask 23552  }
  0xa7   : > { %v2419_v26 = vsel %vm20700_vm11, 0, %v16493_v33  ;;  %v2380_v14 = vrot.slane %v13410_v46, 7  ;;  %v2304_v34 = vsel %vm2272_vm15, 65537, %v21036_v19  ;;  %14998 = vmatmul.mubr.msk.bf16.gmra.mxu0 %vm21108_vm14, %v2458_v7  ;;  %vm21109_vm3 = vmmov %vm21108_vm14  ;;  %v3364_v54 = vand.u32 %v13469_v31, %v16310_v6 }
  0xa8   : > { %v2460_v49 = vsel %vm21107_vm6, %v2457_v38, %v2459_v43  ;;  %15032 = vmatmul.mubr.msk.bf16.gmra.mxu1 %vm21109_vm3, %v2922_v10  ;;  %v2461_v38 = vrot.slane %v2419_v26, 1  ;;  %v13411_v30 = vcombine.low %v16308_v5, %v2304_v34  ;;  %vm954_vm6 = vcmp.eq.s32.totalorder %v826_v29, 15  ;;  %vm21110_vm7 = vmmov %vm21109_vm3 }
  0xa9   : > { %15001 = vmatprep.mubr.msk.bf16.mxu0 %vm21110_vm7, %v2460_v49  ;;  %vm21111_vm11 = vmmov %vm21109_vm3  ;;  %vm21112_vm12 = vcmask 1040384   ;;  %v828_v46 = vand.u32 15, %v796_v56  ;;  %v2925_v7 = vsel %vm16503_vm2, 0, %v16508_v63  ;;  %15059 = vmatprep.subr.bf16.mxu0 %v3364_v54  ;;  %v830_v26 = vand.u32 15, %v798_v13 }
  0xaa   : > { %15035 = vmatprep.mubr.msk.bf16.mxu1 %vm21111_vm11, %v2923_v11  ;;  %v16904_v45 = vsel %vm21112_vm12, %v2378_v27, %v2380_v14  ;;  %vm2274_vm15 = vmpackc.low %vm954_vm6, %vm954_vm6  ;;  %v2382_v10 = vrot.slane %v13411_v30, 7  ;;  %15060 = vmatpush3.bf16.msra.mxu0 %v3364_v54  ;;  %vm21114_vm11 = vcmask 1046528   ;;  %vm21115_vm3 = vcmask 1040384  }
  0xab   : > { %21113 = vst [vmem:[#allocation60_spill] sm:$0xff] %v16904_v45  ;;  %vm20706_vm14 = vcmp.ne.s16.totalorder %v16904_v45, 0  ;;  %v2306_v31 = vsel %vm2274_vm15, 65537, %v21036_v19  ;;  %vm956_vm12 = vcmp.eq.s32.totalorder %v828_v46, 15  ;;  %v2462_v11 = vsel %vm21114_vm11, %v2459_v43, %v2461_v38 }
  0xac   : > { %v2420_v49 = vsel %vm20706_vm14, 0, %v16508_v63  ;;  %v13412_v27 = vcombine.low %v16308_v5, %v2306_v31  ;;  %v16918_v30 = vsel %vm21115_vm3, %v2380_v14, %v2382_v10  ;;  %vm2276_vm6 = vmpackc.low %vm956_vm12, %vm956_vm12  ;;  %v800_v34 = vadd.s32 200, %v16303_v4 }
  0xad   : > { %v2463_v29 = vrot.slane %v2420_v49, 1  ;;  %21116 = vst [vmem:[#allocation61_spill] sm:$0xff] %v16918_v30  ;;  %vm20707_vm7 = vcmp.ne.s16.totalorder %v16918_v30, 0  ;;  %v2308_v61 = vsel %vm2276_vm6, 65537, %v21036_v19  ;;  %vm958_vm15 = vcmp.eq.s32.totalorder %v830_v26, 15  ;;  %vm21117_vm14 = vmmov %vm21114_vm11 }
  0xae   : > { %v2384_v56 = vrot.slane %v13412_v27, 7  ;;  %v2421_v54 = vsel %vm20707_vm7, 0, %v16529_v21  ;;  %v13413_v13 = vcombine.low %v16308_v5, %v2308_v61  ;;  %vm2278_vm11 = vmpackc.low %vm958_vm15, %vm958_vm15  ;;  %v832_v14 = vand.u32 15, %v800_v34 }
  0xaf   : > { %v2464_v31 = vsel %vm21117_vm14, %v2461_v38, %v2463_v29  ;;  %v2465_v43 = vrot.slane %v2421_v54, 1  ;;  %vm21118_vm12 = vmmov %vm21115_vm3  ;;  %v2310_v49 = vsel %vm2278_vm11, 65537, %v21036_v19  ;;  %v802_v27 = vadd.s32 216, %v16303_v4 }
  0xb0   : > { %v16929_v46 = vsel %vm21118_vm12, %v2382_v10, %v2384_v56  ;;  %vm21120_vm3 = vcmask 23552   ;;  %v2386_v38 = vrot.slane %v13413_v13, 7  ;;  %v13414_v26 = vcombine.low %v16308_v5, %v2310_v49 }
  0xb1   : > { %21119 = vst [vmem:[#allocation62_spill] sm:$0xff] %v16929_v46  ;;  %15002 = vmatmul.mubr.msk.bf16.gmra.mxu0 %vm21120_vm3, %v2462_v11  ;;  %vm21121_vm6 = vmmov %vm21120_vm3  ;;  %vm20714_vm14 = vcmp.ne.s16.totalorder %v16929_v46, 0  ;;  %vm960_vm7 = vcmp.eq.s32.totalorder %v832_v14, 15  ;;  %v834_v10 = vand.u32 15, %v802_v27  ;;  %v2926_v14 = vsel %vm16531_vm4, 0, %v16529_v21 }
  0xb2   : > { %15036 = vmatmul.mubr.msk.bf16.gmra.mxu1 %vm21121_vm6, %v2924_v35  ;;  %vm21122_vm15 = vmmov %vm21120_vm3  ;;  %v2422_v61 = vsel %vm20714_vm14, 0, %v16557_v59  ;;  %v16943_v11 = vsel %vm21118_vm12, %v2384_v56, %v2386_v38  ;;  %v2388_v35 = vrot.slane %v13414_v26, 7  ;;  %v2927_v56 = vsel %vm16552_vm1, 0, %v16557_v59 }
  0xb3   : > { %15005 = vmatprep.mubr.msk.bf16.mxu0 %vm21122_vm15, %v2464_v31  ;;  %vm21123_vm0 = vmmov %vm21120_vm3  ;;  %v2467_v34 = vrot.slane %v2422_v61, 1  ;;  %21124 = vst [vmem:[#allocation63_spill] sm:$0xff] %v16943_v11  ;;  %vm20713_vm3 = vcmp.ne.s16.totalorder %v16943_v11, 0  ;;  %vm962_vm6 = vcmp.eq.s32.totalorder %v834_v10, 15 }
  0xb4   : > { %15039 = vmatprep.mubr.msk.bf16.mxu1 %vm21123_vm0, %v2925_v7  ;;  %vm2280_vm11 = vmpackc.low %vm960_vm7, %vm960_vm7  ;;  %v804_v7 = vadd.s32 232, %v16303_v4  ;;  %vm21125_vm0 = vcmask 1046528  }
  0xb5   : > { %v2312_v54 = vsel %vm2280_vm11, 65537, %v21036_v19  ;;  %v2466_v31 = vsel %vm21125_vm0, %v2463_v29, %v2465_v43  ;;  %vm21126_vm7 = vmmov %vm21118_vm12  ;;  %v2423_v29 = vsel %vm20713_vm3, 0, %v16580_v57 }
  0xb6   : > { %v13415_v13 = vcombine.low %v16308_v5, %v2312_v54  ;;  %v16957_v49 = vsel %vm21126_vm7, %v2386_v38, %v2388_v35  ;;  %vm2282_vm15 = vmpackc.low %vm962_vm6, %vm962_vm6  ;;  %v836_v54 = vand.u32 15, %v804_v7  ;;  %vm21129_vm6 = vcmask 23552  }
  0xb7   : > { %21127 = vst [vmem:[#allocation64_spill] sm:$0xff] %v16957_v49  ;;  %vm21128_vm11 = vmmov %vm21125_vm0  ;;  %vm20720_vm12 = vcmp.ne.s16.totalorder %v16957_v49, 0  ;;  %v2314_v61 = vsel %vm2282_vm15, 65537, %v21036_v19 }
  0xb8   : > { %v2468_v27 = vsel %vm21128_vm11, %v2465_v43, %v2467_v34  ;;  %v2390_v26 = vrot.slane %v13415_v13, 7  ;;  %v13416_v10 = vcombine.low %v16308_v5, %v2314_v61  ;;  %v2424_v38 = vsel %vm20720_vm12, 0, %v16597_v23  ;;  %vm21130_vm0 = vmmov %vm21129_vm6 }
  0xb9   : > { %15006 = vmatmul.mubr.msk.bf16.gmra.mxu0 %vm21129_vm6, %v2466_v31  ;;  %vm964_vm15 = vcmp.eq.s32.totalorder %v836_v54, 15  ;;  %vm21132_vm11 = vmmov %vm21130_vm0  ;;  %v2469_v61 = vrot.slane %v2423_v29, 1  ;;  %v2471_v7 = vrot.slane %v2424_v38, 1  ;;  %vm966_vm6 = vcmp.eq.s32.totalorder %v838_v22, 15 }
  0xba   : > { %15040 = vmatmul.mubr.msk.bf16.gmra.mxu1 %vm21130_vm0, %v2926_v14  ;;  %v16973_v43 = vsel %vm21126_vm7, %v2388_v35, %v2390_v26  ;;  %v2392_v13 = vrot.slane %v13416_v10, 7  ;;  %15009 = vmatprep.mubr.msk.bf16.mxu0 %vm21132_vm11, %v2468_v27  ;;  %vm21133_vm3 = vmmov %vm21130_vm0  ;;  %v2928_v27 = vsel %vm16582_vm13, 0, %v16580_v57 }
  0xbb   : > { %21131 = vst [vmem:[#allocation65_spill] sm:$0xff] %v16973_v43  ;;  %15043 = vmatprep.mubr.msk.bf16.mxu1 %vm21133_vm3, %v2927_v56  ;;  %vm2284_vm14 = vmpackc.low %vm964_vm15, %vm964_vm15  ;;  %vm20719_vm0 = vcmp.ne.s16.totalorder %v16973_v43, 0  ;;  %vm21136_vm3 = vcmask 1046528   ;;  %vm21141_vm15 = vcmask 23552  }
  0xbc   : > { %vm21134_vm1 = vmmov %vm21126_vm7  ;;  %v2316_v31 = vsel %vm2284_vm14, 65537, %v21036_v19  ;;  %v2470_v56 = vsel %vm21136_vm3, %v2467_v34, %v2469_v61  ;;  %v2425_v10 = vsel %vm20719_vm0, 0, %v16625_v36  ;;  %vm21139_vm14 = vnez %v21027_v2 }
  0xbd   : > { %v16978_v28 = vsel %vm21134_vm1, %v2390_v26, %v2392_v13  ;;  %v13417_v35 = vcombine.low %v16308_v5, %v2316_v31  ;;  %vm2286_vm7 = vmpackc.low %vm966_vm6, %vm966_vm6  ;;  %v2929_v54 = vsel %vm21139_vm14, 0, %v16597_v23  ;;  %v3901_v34 = vand.u32 %v13502_v58, %v16310_v6 }
  0xbe   : > { %21135 = vst [vmem:[#allocation66_spill] sm:$0xff] %v16978_v28  ;;  %vm20718_vm11 = vcmp.ne.s16.totalorder %v16978_v28, 0  ;;  %v2318_v14 = vsel %vm2286_vm7, 65537, %v21036_v19  ;;  %vm21138_vm1 = vmmov %vm21136_vm3  ;;  %vm21143_vm7 = vcmask 1040384   ;;  %v2473_v58 = vrot.slane %v2425_v10, 1 }
  0xbf   : > { %v16992_v22 = vrot.slane %v13417_v35, 7  ;;  %v13418_v26 = vcombine.low %v16308_v5, %v2318_v14  ;;  %v2472_v29 = vsel %vm21138_vm1, %v2469_v61, %v2471_v7  ;;  %v2426_v38 = vsel %vm20718_vm11, 0, %v16649_v60  ;;  %vm21142_vm6 = vmmov %vm21141_vm15  ;;  %15093 = vmatprep.subr.bf16.mxu1 %v3901_v34 }
  0xc0   : > { %v17015_v35 = vadd.s32 8, %v16303_v4  ;;  %vm21146_vm3 = vmmov %vm21142_vm6  ;;  %15094 = vmatpush3.bf16.msra.mxu1 %v3901_v34 }
  0xc1   : > { %21137 = vst [vmem:[#allocation67_spill] sm:$0xff] %v16992_v22  ;;  %v17006_v31 = vrot.slane %v13418_v26, 7  ;;  %15010 = vmatmul.mubr.msk.bf16.gmra.mxu0 %vm21141_vm15, %v2470_v56  ;;  %v17012_v61 = vsel %vm21143_vm7, %v2392_v13, %v16992_v22  ;;  %vm21147_vm1 = vmmov %vm21146_vm3  ;;  %v2475_v56 = vrot.slane %v2426_v38, 1 }
  0xc2   : > { %15044 = vmatmul.mubr.msk.bf16.gmra.mxu1 %vm21142_vm6, %v2928_v27  ;;  %21144 = vst [vmem:[#allocation69_spill] sm:$0xff] %v17012_v61  ;;  %21145 = vst [vmem:[#allocation70_spill] sm:$0xff] %v17015_v35  ;;  %15013 = vmatprep.mubr.msk.bf16.mxu0 %vm21146_vm3, %v2472_v29  ;;  %vm20721_vm15 = vcmp.ne.s16.totalorder %v17012_v61, 0  ;;  %v808_v13 = vand.u32 15, %v17015_v35  ;;  %vm21151_vm3 = vnez %v21032_v20 }
  0xc3   : > { %21140 = vst [vmem:[#allocation68_spill] sm:$0xff] %v17006_v31  ;;  %15047 = vmatprep.mubr.msk.bf16.mxu1 %vm21147_vm1, %v2929_v54  ;;  %vm21148_vm11 = vmmov %vm21143_vm7  ;;  %vm21150_vm7 = vcmask 1046528   ;;  %v2930_v26 = vsel %vm21151_vm3, 0, %v16625_v36  ;;  %v2427_v10 = vsel %vm20721_vm15, 0, %v16670_v18 }
  0xc4   : > { %v17022_v14 = vsel %vm21148_vm11, %v16992_v22, %v17006_v31  ;;  %v2474_v27 = vsel %vm21150_vm7, %v2471_v7, %v2473_v58  ;;  %vm936_vm1 = vcmp.eq.s32.totalorder %v808_v13, 15  ;;  %vm21152_vm0 = vmmov %vm21150_vm7  ;;  %vm21153_vm11 = vnez %v21040_v25 }
  0xc5   : > { %21149 = vst [vmem:[#allocation71_spill] sm:$0xff] %v17022_v14  ;;  %vm20726_vm6 = vcmp.ne.s16.totalorder %v17022_v14, 0  ;;  %v2476_v29 = vsel %vm21152_vm0, %v2473_v58, %v2475_v56  ;;  %v2931_v54 = vsel %vm21153_vm11, 0, %v16649_v60  ;;  %vm3624_vm12 = vmpackc.low %vm936_vm1, %vm936_vm1  ;;  %vm21154_vm7 = vcmask 23552  }
  0xc6   : > { %v2428_v7 = vsel %vm20726_vm6, 0, %v16684_v8  ;;  %v3656_v34 = vsel %vm3624_vm12, 65537, %v21036_v19  ;;  %vm21155_vm3 = vmmov %vm21154_vm7  ;;  %v2477_v58 = vrot.slane %v2427_v10, 1  ;;  %v3186_v13 = vshll.u32 %v16378_v44, 16 }
  0xc7   : > { %v13486_v38 = vcombine.low %v16308_v5, %v3656_v34  ;;  %vm21156_vm0 = vmmov %vm21155_vm3  ;;  %v2479_v4 = vrot.slane %v2428_v7, 1  ;;  %vm21159_vm1 = vnez %v21048_v0  ;;  %vm20727_vm12 = vcmp.ne.s16.totalorder %v17006_v31, 0 }
  0xc8   : > { %vm21157_vm15 = vmmov %vm21156_vm0  ;;  %v2932_v19 = vsel %vm21159_vm1, 0, %v16670_v18  ;;  %v3188_v10 = vrot.slane %v3186_v13, 1  ;;  %v2429_v34 = vsel %vm20727_vm12, 0, %v16744_v48  ;;  %vm21164_vm1 = vnez %v21056_v3 }
  0xc9   : > { %15014 = vmatmul.mubr.msk.bf16.gmra.mxu0 %vm21154_vm7, %v2474_v27  ;;  %v17048_v35 = vrot.slane %v13486_v38, 7  ;;  %v3184_v27 = vshrl.u32 %v16378_v44, 16  ;;  %vm21162_vm7 = vcmask 1046528   ;;  %v2481_v13 = vrot.slane %v2429_v34, 1 }
  0xca   : > { %15048 = vmatmul.mubr.msk.bf16.gmra.mxu1 %vm21155_vm3, %v2930_v26  ;;  %15017 = vmatprep.mubr.msk.bf16.mxu0 %vm21156_vm0, %v2476_v29  ;;  %vm21160_vm3 = vcmask 1040384   ;;  %v2478_v29 = vsel %vm21162_vm7, %v2475_v56, %v2477_v58  ;;  %vm21163_vm6 = vmmov %vm21162_vm7  ;;  %v3195_v0 = vshrl.u32 %v16391_v47, 16 }
  0xcb   : > { %15051 = vmatprep.mubr.msk.bf16.mxu1 %vm21157_vm15, %v2931_v54  ;;  %21158 = vst [vmem:[#allocation72_spill] sm:$0xff] %v17048_v35  ;;  %v17058_v26 = vsel %vm21160_vm3, %v17048_v35, %v16784_v51  ;;  %vm20740_vm15 = vcmp.ne.s16.totalorder %v17048_v35, 0  ;;  %v3191_v54 = vshll.u32 %v16391_v47, 16  ;;  %v2480_v7 = vsel %vm21163_vm6, %v2477_v58, %v2479_v4  ;;  %v13535_v58 = vld [vmem:[%s20621_s2 + $0xc] sm:$0x3] }
  0xcc   : > { %21161 = vst [vmem:[#allocation73_spill] sm:$0xff] %v17058_v26  ;;  %vm20733_vm0 = vcmp.ne.s16.totalorder %v17058_v26, 0  ;;  %v2933_v51 = vsel %vm21164_vm1, 0, %v16684_v8  ;;  %v3783_v38 = vsel %vm20740_vm15, 0, %v16378_v44  ;;  %vm21165_vm3 = vcmask 23552  }
  0xcd   : > { %v3784_v56 = vsel %vm20733_vm0, 0, %v16391_v47  ;;  %vm21166_vm7 = vmmov %vm21165_vm3  ;;  %v3189_v5 = vor.u32 %v3188_v10, %v3184_v27  ;;  %v3193_v22 = vrot.slane %v3191_v54, 1  ;;  %v3819_v44 = vrot.slane %v3783_v38, 1 }
  0xce   : > { %vm21167_vm6 = vmmov %vm21165_vm3  ;;  %v3820_v35 = vrot.slane %v3784_v56, 1  ;;  %vm21169_vm0 = vnez %v21068_v42  ;;  %v3203_v27 = vshrl.u32 %v16422_v15, 16  ;;  %v3207_v10 = vshll.u32 %v16443_v40, 16 }
  0xcf   : > { %vm21168_vm12 = vmmov %vm21165_vm3  ;;  %v2934_v26 = vsel %vm21169_vm0, 0, %v16744_v48  ;;  %vm21174_vm15 = vcmp.ne.s16.totalorder %v16836_v53, 0  ;;  %v3215_v42 = vshll.u32 %v16460_v55, 16  ;;  %vm21185_vm1 = vcmask 23552  }
  0xd1   : > { %15018 = vmatmul.mubr.msk.bf16.gmra.mxu0 %vm21165_vm3, %v2478_v29  ;;  %v3199_v29 = vshll.u32 %v16422_v15, 16  ;;  %vm21170_vm3 = vcmask 1046528  }
  0xd2   : > { %15052 = vmatmul.mubr.msk.bf16.gmra.mxu1 %vm21166_vm7, %v2932_v19  ;;  %15021 = vmatprep.mubr.msk.bf16.mxu0 %vm21167_vm6, %v2480_v7  ;;  %v2482_v19 = vsel %vm21170_vm3, %v2479_v4, %v2481_v13  ;;  %vm21171_vm7 = vsmask.f32 7424  ;;  %v4387_v7 = vand.u32 %v13535_v58, %v16310_v6  ;;  %vm21172_vm6 = vmmov %vm21170_vm3  ;;  %v3786_v4 = vsel %vm21174_vm15, 0, %v16443_v40 }
  0xd3   : > { %15055 = vmatprep.mubr.msk.bf16.mxu1 %vm21168_vm12, %v2933_v51  ;;  %v3194_v3 = vsel %vm21171_vm7, %v3189_v5, %v3193_v22  ;;  %v3821_v34 = vsel %vm21172_vm6, %v3819_v44, %v3820_v35  ;;  %vm21173_vm12 = vcmp.ne.s16.totalorder %v16816_v1, 0  ;;  %vm21175_vm3 = vcmask 23552  }
  0xd4   : > { %v3785_v54 = vsel %vm21173_vm12, 0, %v16422_v15  ;;  %15127 = vmatprep.subr.bf16.mxu0 %v4387_v7  ;;  %vm21176_vm7 = vmmov %vm21175_vm3  ;;  %v3201_v5 = vrot.slane %v3199_v29, 1  ;;  %v3197_v51 = vor.u32 %v3195_v0, %v3193_v22  ;;  %v3209_v58 = vrot.slane %v3207_v10, 1  ;;  %v13568_v10 = vld [vmem:[%s20621_s2 + $0xe] sm:$0x3] }
  0xd5   : > { %vm21177_vm6 = vmmov %vm21175_vm3  ;;  %v3822_v38 = vrot.slane %v3785_v54, 1  ;;  %v3824_v13 = vrot.slane %v3786_v4, 1  ;;  %v3211_v44 = vshrl.u32 %v16443_v40, 16  ;;  %vm21179_vm15 = vsmask.f32 7424 }
  0xd6   : > { %vm21178_vm0 = vmmov %vm21175_vm3  ;;  %v3205_v56 = vor.u32 %v3203_v27, %v3201_v5  ;;  %v3202_v53 = vsel %vm21179_vm15, %v3197_v51, %v3201_v5  ;;  %vm21180_vm12 = vcmask 1046528   ;;  %v3223_v22 = vshll.u32 %v16493_v33, 16 }
  0xd7   : > { %v3217_v27 = vrot.slane %v3215_v42, 1  ;;  %v3231_v4 = vshll.u32 %v16508_v63, 16  ;;  %v3239_v42 = vshll.u32 %v16529_v21, 16 }
  0xd8   : > { %v3225_v51 = vrot.slane %v3223_v22, 1 }
  0xd9   : > { %15022 = vmatmul.mubr.msk.bf16.gmra.mxu0 %vm21175_vm3, %v2482_v19  ;;  %v3823_v19 = vsel %vm21180_vm12, %v3820_v35, %v3822_v38  ;;  %vm21181_vm3 = vmmov %vm21179_vm15  ;;  %v3213_v35 = vor.u32 %v3211_v44, %v3209_v58 }
  0xda   : > { %15056 = vmatmul.mubr.msk.bf16.gmra.mxu1 %vm21176_vm7, %v2934_v26  ;;  %15061 = vmatprep.mubr.msk.bf16.mxu0 %vm21177_vm6, %v3194_v3  ;;  %v3219_v26 = vshrl.u32 %v16460_v55, 16  ;;  %v3210_v0 = vsel %vm21181_vm3, %v3205_v56, %v3209_v58  ;;  %vm21182_vm7 = vmmov %vm21180_vm12  ;;  %vm21184_vm6 = vcmp.ne.s16.totalorder %v16860_v50, 0  ;;  %v3235_v56 = vshrl.u32 %v16508_v63, 16  ;;  %v13601_v58 = vld [vmem:[%s20621_s2 + $0x10] sm:$0x3] }
  0xdb   : > { %15095 = vmatprep.mubr.msk.bf16.mxu1 %vm21178_vm0, %v3821_v34  ;;  %v3825_v3 = vsel %vm21182_vm7, %v3822_v38, %v3824_v13  ;;  %vm21183_vm0 = vcmp.ne.s16.totalorder %v16853_v17, 0  ;;  %v3788_v34 = vsel %vm21184_vm6, 0, %v16493_v33  ;;  %vm21186_vm15 = vmmov %vm21185_vm1  ;;  %v3227_v38 = vshrl.u32 %v16493_v33, 16 }
  0xdc   : > { %v3787_v29 = vsel %vm21183_vm0, 0, %v16460_v55  ;;  %vm21187_vm12 = vmmov %vm21185_vm1  ;;  %v3221_v5 = vor.u32 %v3219_v26, %v3217_v27  ;;  %vm21190_vm7 = vcmp.ne.s16.totalorder %v16878_v9, 0  ;;  %vm21191_vm0 = vcmask 1046528  }
  0xdd   : > { %vm21188_vm3 = vmmov %vm21185_vm1  ;;  %v3826_v54 = vrot.slane %v3787_v29, 1  ;;  %vm21192_vm6 = vcmp.ne.s16.totalorder %v16904_v45, 0  ;;  %v17148_v45 = vand.u32 %v13601_v58, %v16310_v6 }
  0xdf   : > { %v3827_v26 = vsel %vm21191_vm0, %v3824_v13, %v3826_v54  ;;  %v3247_v13 = vshll.u32 %v16557_v59, 16 }
  0xe1   : > { %15062 = vmatmul.mubr.msk.bf16.vlgmr.msra.gmra.mxu0 %vm21185_vm1, %v3202_v53  ;;  %v3828_v53 = vrot.slane %v3788_v34, 1  ;;  %vm21189_vm1 = vsmask.f32 7424  ;;  %v3229_v34 = vor.u32 %v3227_v38, %v3225_v51 }
  0xe2   : > { %15096 = vmatmul.mubr.msk.bf16.vlgmr.msra.gmra.mxu1 %vm21186_vm15, %v3823_v19  ;;  %15065 = vmatprep.mubr.msk.bf16.mxu0 %vm21187_vm12, %v3210_v0  ;;  %v3218_v44 = vsel %vm21189_vm1, %v3213_v35, %v3217_v27  ;;  %v3789_v19 = vsel %vm21190_vm7, 0, %v16508_v63  ;;  %v3233_v0 = vrot.slane %v3231_v4, 1  ;;  %vm21193_vm15 = vmmov %vm21189_vm1  ;;  %v3241_v35 = vrot.slane %v3239_v42, 1 }
  0xe3   : > { %15099 = vmatprep.mubr.msk.bf16.mxu1 %vm21188_vm3, %v3825_v3  ;;  %15128 = vmatpush3.bf16.msra.mxu0 %v4387_v7  ;;  %v3790_v7 = vsel %vm21192_vm6, 0, %v16529_v21  ;;  %v5096_v3 = vand.u32 %v13568_v10, %v16310_v6  ;;  %v3226_v22 = vsel %vm21193_vm15, %v3221_v5, %v3225_v51  ;;  %vm21194_vm12 = vmmov %vm21191_vm0  ;;  %v3830_v27 = vrot.slane %v3789_v19, 1 }
  0xe4   : > { %v3829_v29 = vsel %vm21194_vm12, %v3826_v54, %v3828_v53  ;;  %v3237_v50 = vor.u32 %v3235_v56, %v3233_v0  ;;  %vm21195_vm1 = vmmov %vm21188_vm3  ;;  %v3832_v4 = vrot.slane %v3790_v7, 1  ;;  %v3255_v10 = vshll.u32 %v16580_v57, 16  ;;  %15195 = vmatprep.subr.bf16.mxu0 %v17148_v45 }
  0xe5   : > { %15161 = vmatprep.subr.bf16.mxu1 %v5096_v3  ;;  %vm21196_vm7 = vmmov %vm21195_vm1  ;;  %vm21198_vm6 = vcmp.ne.s16.totalorder %v16918_v30, 0  ;;  %v3263_v5 = vshll.u32 %v16597_v23, 16  ;;  %v3234_v51 = vsel %vm21193_vm15, %v3229_v34, %v3233_v0  ;;  %v3243_v56 = vshrl.u32 %v16529_v21, 16 }
  0xe6   : > { %vm21197_vm0 = vmmov %vm21195_vm1  ;;  %v3791_v54 = vsel %vm21198_vm6, 0, %v16557_v59  ;;  %15162 = vmatpush3.bf16.msra.mxu1 %v5096_v3  ;;  %v3249_v42 = vrot.slane %v3247_v13, 1  ;;  %v3271_v19 = vshll.u32 %v16625_v36, 16  ;;  %v3259_v7 = vshrl.u32 %v16580_v57, 16 }
  0xe7   : > { %vm21199_vm12 = vmmov %vm21193_vm15  ;;  %v3257_v3 = vrot.slane %v3255_v10, 1  ;;  %v3245_v34 = vor.u32 %v3243_v56, %v3241_v35  ;;  %vm21204_vm6 = vcmp.ne.s16.totalorder %v16957_v49, 0  ;;  %vm21205_vm15 = vcmask 23552  }
  0xe8   : > { %v3242_v6 = vsel %vm21199_vm12, %v3237_v50, %v3241_v35  ;;  %v3279_v50 = vshll.u32 %v16649_v60, 16  ;;  %v3794_v13 = vsel %vm21204_vm6, 0, %v16625_v36  ;;  %vm21206_vm12 = vmmov %vm21205_vm15  ;;  %v3273_v10 = vrot.slane %v3271_v19, 1 }
  0xe9   : > { %15066 = vmatmul.mubr.msk.bf16.gmra.mxu0 %vm21188_vm3, %v3218_v44  ;;  %vm21200_vm3 = vcmask 1046528   ;;  %v3251_v44 = vshrl.u32 %v16557_v59, 16  ;;  %v3283_v49 = vshrl.u32 %v16649_v60, 16  ;;  %v3291_v30 = vshrl.u32 %v16670_v18, 16 }
  0xea   : > { %15100 = vmatmul.mubr.msk.bf16.gmra.mxu1 %vm21195_vm1, %v3827_v26  ;;  %15069 = vmatprep.mubr.msk.bf16.mxu0 %vm21196_vm7, %v3226_v22  ;;  %v3831_v38 = vsel %vm21200_vm3, %v3828_v53, %v3830_v27  ;;  %vm21201_vm1 = vmmov %vm21200_vm3  ;;  %v3834_v26 = vrot.slane %v3791_v54, 1  ;;  %vm21202_vm7 = vcmp.ne.s16.totalorder %v16929_v46, 0  ;;  %v3265_v53 = vrot.slane %v3263_v5, 1 }
  0xeb   : > { %15103 = vmatprep.mubr.msk.bf16.mxu1 %vm21197_vm0, %v3829_v29  ;;  %v3833_v58 = vsel %vm21201_vm1, %v3830_v27, %v3832_v4  ;;  %v3792_v0 = vsel %vm21202_vm7, 0, %v16580_v57  ;;  %vm21203_vm0 = vcmp.ne.s16.totalorder %v16943_v11, 0  ;;  %v3287_v29 = vshll.u32 %v16670_v18, 16  ;;  %vm21208_vm1 = vmmov %vm21206_vm12 }
  0xec   : > { %v3793_v22 = vsel %vm21203_vm0, 0, %v16597_v23  ;;  %v3267_v27 = vshrl.u32 %v16597_v23, 16  ;;  %v3836_v54 = vrot.slane %v3792_v0, 1  ;;  %v3275_v5 = vshrl.u32 %v16625_v36, 16  ;;  %vm21209_vm7 = vmmov %vm21208_vm1 }
  0xed   : > { %vm21207_vm3 = vcmp.ne.s16.totalorder %v16973_v43, 0  ;;  %v3838_v35 = vrot.slane %v3793_v22, 1  ;;  %v3281_v56 = vrot.slane %v3279_v50, 1  ;;  %v3253_v46 = vor.u32 %v3251_v44, %v3249_v42  ;;  %vm21215_vm11 = vmmov %vm21209_vm7 }
  0xee   : > { %v3795_v11 = vsel %vm21207_vm3, 0, %v16649_v60  ;;  %v3289_v0 = vrot.slane %v3287_v29, 1  ;;  %vm21210_vm0 = vcmp.ne.s16.totalorder %v16978_v28, 0  ;;  %vm21211_vm6 = vsmask.f32 7424  ;;  %vm21216_vm14 = vmmov %vm21209_vm7 }
  0xef   : > { %v3842_v19 = vrot.slane %v3795_v11, 1  ;;  %v3796_v43 = vsel %vm21210_vm0, 0, %v16670_v18  ;;  %vm21213_vm3 = vmmov %vm21211_vm6  ;;  %v3261_v11 = vor.u32 %v3259_v7, %v3257_v3 }
  0xf0   : > { %v3258_v44 = vsel %vm21213_vm3, %v3253_v46, %v3257_v3  ;;  %vm21217_vm0 = vmmov %vm21209_vm7 }
  0xf1   : > { %15070 = vmatmul.mubr.msk.bf16.gmra.mxu0 %vm21205_vm15, %v3234_v51  ;;  %v3295_v51 = vshll.u32 %v16684_v8, 16  ;;  %vm21212_vm15 = vcmask 1046528  }
  0xf2   : > { %15104 = vmatmul.mubr.msk.bf16.gmra.mxu1 %vm21206_vm12, %v3831_v38  ;;  %15073 = vmatprep.mubr.msk.bf16.mxu0 %vm21208_vm1, %v3242_v6  ;;  %v3840_v38 = vrot.slane %v3794_v13, 1  ;;  %v3299_v6 = vshrl.u32 %v16684_v8, 16  ;;  %v3835_v50 = vsel %vm21212_vm15, %v3832_v4, %v3834_v26  ;;  %vm20759_vm12 = vcmp.ne.s16.totalorder %v16365_v37, 0  ;;  %vm21214_vm1 = vmmov %vm21212_vm15 }
  0xf3   : > { %15107 = vmatprep.mubr.msk.bf16.mxu1 %vm21209_vm7, %v3833_v58  ;;  %v3250_v58 = vsel %vm21211_vm6, %v3245_v34, %v3249_v42  ;;  %v3297_v22 = vrot.slane %v3295_v51, 1  ;;  %v3837_v29 = vsel %vm21214_vm1, %v3834_v26, %v3836_v54  ;;  %v3269_v13 = vor.u32 %v3267_v27, %v3265_v53 }
  0xf4   : > { %v3844_v42 = vrot.slane %v3796_v43, 1  ;;  %v3303_v4 = vshll.u32 %v16744_v48, 16  ;;  %vm21218_vm6 = vcmp.ne.s16.totalorder %v17012_v61, 0  ;;  %vm21219_vm15 = vnez %v20987_v32 }
  0xf5   : > { %v3797_v34 = vsel %vm21218_vm6, 0, %v16684_v8  ;;  %v17209_v46 = vsel %vm21219_vm15, %v16715_v24, 0  ;;  %v3266_v26 = vsel %vm21213_vm3, %v3261_v11, %v3265_v53  ;;  %v4901_v43 = vsel %vm20759_vm12, 0, %v16391_v47  ;;  %vm21224_vm6 = vmmov %vm21217_vm0 }
  0xf6   : > { %vm21225_vm15 = vmmov %vm21217_vm0  ;;  %v3277_v24 = vor.u32 %v3275_v5, %v3273_v10  ;;  %v3285_v53 = vor.u32 %v3283_v49, %v3281_v56  ;;  %v3293_v49 = vor.u32 %v3291_v30, %v3289_v0  ;;  %v3301_v5 = vor.u32 %v3299_v6, %v3297_v22 }
  0xf7   : > { %vm21234_vm12 = vmmov %vm21217_vm0 }
  0xf9   : > { %15074 = vmatmul.mubr.msk.bf16.gmra.mxu0 %vm21209_vm7, %v3250_v58  ;;  %v3846_v58 = vrot.slane %v3797_v34, 1 }
  0xfa   : > { %15108 = vmatmul.mubr.msk.bf16.gmra.mxu1 %vm21215_vm11, %v3835_v50  ;;  %15077 = vmatprep.mubr.msk.bf16.mxu0 %vm21216_vm14, %v3258_v44  ;;  %vm21220_vm11 = vmmov %vm21214_vm1  ;;  %vm21221_vm14 = vcmp.ne.s16.totalorder %v17022_v14, 0  ;;  %v3311_v50 = vshll.u32 %v17209_v46, 16 }
  0xfb   : > { %15111 = vmatprep.mubr.msk.bf16.mxu1 %vm21217_vm0, %v3837_v29  ;;  %v3839_v51 = vsel %vm21220_vm11, %v3836_v54, %v3838_v35  ;;  %v3798_v7 = vsel %vm21221_vm14, 0, %v16744_v48  ;;  %vm21222_vm1 = vmmov %vm21213_vm3  ;;  %v3305_v54 = vrot.slane %v3303_v4, 1 }
  0xfc   : > { %v3274_v3 = vsel %vm21222_vm1, %v3269_v13, %v3273_v10  ;;  %vm21223_vm7 = vmmov %vm21220_vm11  ;;  %v3848_v44 = vrot.slane %v3798_v7, 1  ;;  %v4922_v13 = vshll.u32 %v4901_v43, 16  ;;  %v4920_v7 = vshrl.u32 %v4901_v43, 16 }
  0xfd   : > { %v3841_v27 = vsel %vm21223_vm7, %v3838_v35, %v3840_v38  ;;  %vm21226_vm3 = vmmov %vm21217_vm0  ;;  %v4320_v43 = vsel %vm16804_vm10, 0, %v16391_v47 }
  0xfe   : > { %vm21227_vm11 = vmmov %vm21222_vm1  ;;  %vm21229_vm1 = vcmp.ne.s16.totalorder %v17006_v31, 0 }
  0xff   : > { %v3282_v29 = vsel %vm21227_vm11, %v3277_v24, %v3281_v56  ;;  %vm21228_vm14 = vmmov %vm21223_vm7  ;;  %v3799_v35 = vsel %vm21229_vm1, 0, %v17209_v46  ;;  %v3307_v56 = vshrl.u32 %v16744_v48, 16 }
 0x100   : > { %v3843_v11 = vsel %vm21228_vm14, %v3840_v38, %v3842_v19  ;;  %vm21230_vm7 = vmmov %vm21227_vm11  ;;  %v3313_v38 = vrot.slane %v3311_v50, 1  ;;  %v3850_v4 = vrot.slane %v3799_v35, 1 }
 0x101   : > { %15078 = vmatmul.mubr.msk.bf16.gmra.mxu0 %vm21217_vm0, %v3266_v26  ;;  %v3290_v26 = vsel %vm21230_vm7, %v3285_v53, %v3289_v0  ;;  %vm21235_vm11 = vmmov %vm21230_vm7  ;;  %v3309_v0 = vor.u32 %v3307_v56, %v3305_v54 }
 0x102   : > { %15112 = vmatmul.mubr.msk.bf16.gmra.mxu1 %vm21224_vm6, %v3839_v51  ;;  %15081 = vmatprep.mubr.msk.bf16.mxu0 %vm21225_vm15, %v3274_v3  ;;  %vm21231_vm15 = vmmov %vm21228_vm14  ;;  %v3298_v34 = vsel %vm21235_vm11, %v3293_v49, %v3297_v22  ;;  %v3847_v51 = vsel %vm21228_vm14, %v3844_v42, %v3846_v58 }
 0x103   : > { %15115 = vmatprep.mubr.msk.bf16.mxu1 %vm21226_vm3, %v3841_v27  ;;  %v3845_v10 = vsel %vm21231_vm15, %v3842_v19, %v3844_v42  ;;  %vm21232_vm6 = vmmov %vm21217_vm0  ;;  %v4924_v19 = vrot.slane %v4922_v13, 1  ;;  %v14927_v30 = vpop.f32.mrf.mxu0  ;;  %v17249_v42 = vld [vmem:[%s20622_s3] ss:$0 sm:$0xff] }
 0x104   : > { %vm21233_vm3 = vmmov %vm21217_vm0  ;;  %v1419_v50 = vadd.f32 %v14927_v30, %v17249_v42  ;;  %v21252_v30 = vld [vmem:[#allocation28_spill] sm:$0xff] }
 0x105   : > { %vm21236_vm1 = vmmov %vm21230_vm7  ;;  %v1284_v6 = vpop.f32.mrf.mxu0  ;;  %v4925_v22 = vor.u32 %v4924_v19, %v4920_v7 }
 0x106   : > { %v3306_v3 = vsel %vm21236_vm1, %v3301_v5, %v3305_v54  ;;  %vm21237_vm7 = vmmov %vm21228_vm14  ;;  %v1417_v35 = vadd.f32 %v17249_v42, %v1284_v6 }
 0x107   : > { %v3849_v27 = vsel %vm21237_vm7, %v3846_v58, %v3848_v44  ;;  %vm21238_vm15 = vmmov %vm21217_vm0  ;;  %v14928_v24 = vpop.f32.mrf.mxu0 }
 0x108   : > { %vm21242_vm11 = vmmov %vm21237_vm7 }
 0x109   : > { %15082 = vmatmul.mubr.msk.bf16.gmra.mxu0 %vm21217_vm0, %v3282_v29  ;;  %v3851_v58 = vsel %vm21242_vm11, %v3848_v44, %v3850_v4  ;;  %vm21243_vm14 = vmmov %vm21236_vm1  ;;  %v1287_v29 = vpop.f32.mrf.mxu0 }
 0x10a   : > { %15116 = vmatmul.mubr.msk.bf16.gmra.mxu1 %vm21232_vm6, %v3843_v11  ;;  %15085 = vmatprep.mubr.msk.bf16.mxu0 %vm21233_vm3, %v3290_v26  ;;  %vm21240_vm6 = vmmov %vm21217_vm0  ;;  %v4930_v54 = vsel %vm21243_vm14, %v4925_v22, %v16440_v39  ;;  %v1420_v26 = vadd.f32 %v14928_v24, %v17249_v42  ;;  %v1418_v56 = vadd.f32 %v17249_v42, %v1287_v29 }
 0x10b   : > { %15119 = vmatprep.mubr.msk.bf16.mxu1 %vm21234_vm12, %v3845_v10  ;;  %vm21239_vm12 = vmmov %vm21217_vm0  ;;  %v14961_v11 = vpop.f32.mrf.mxu1 }
 0x10c   : > { %vm21241_vm3 = vmmov %vm21236_vm1  ;;  %v17264_v13 = vadd.f32 %v14961_v11, %v1419_v50 }
 0x10d   : > { %v3314_v53 = vsel %vm21241_vm3, %v3309_v0, %v3313_v38  ;;  %vm21244_vm1 = vmmov %vm21217_vm0  ;;  %v2000_v44 = vpop.f32.mrf.mxu1 }
 0x10e   : > { %vm21245_vm7 = vmmov %vm21217_vm0  ;;  %v14931_v39 = vpop.f32.mrf.mxu0  ;;  %v17267_v10 = vadd.f32 %v2000_v44, %v1417_v35  ;;  %v4324_v44 = vsel %vm16455_vm5, 0, %v16493_v33 }
 0x10f   : > { %v14962_v49 = vpop.f32.mrf.mxu1  ;;  %vm21249_vm3 = vmmov %vm21217_vm0 }
 0x110   : > { %v1300_v38 = vpop.f32.mrf.mxu0  ;;  %v17273_v4 = vadd.f32 %v14962_v49, %v1420_v26  ;;  %vm21250_vm11 = vmmov %vm21217_vm0  ;;  %v21257_v49 = vld [vmem:[#allocation30_spill] sm:$0xff] }
 0x111   : > { %15086 = vmatmul.mubr.msk.bf16.gmra.mxu0 %vm21238_vm15, %v3298_v34  ;;  %vm21246_vm15 = vmmov %vm21217_vm0  ;;  %v1421_v6 = vadd.f32 %v17249_v42, %v1300_v38 }
 0x112   : > { %15120 = vmatmul.mubr.msk.bf16.gmra.mxu1 %vm21217_vm0, %v3847_v51  ;;  %15089 = vmatprep.mubr.msk.bf16.mxu0 %vm21239_vm12, %v3306_v3  ;;  %vm21247_vm12 = vnez %v20993_v41  ;;  %v2003_v51 = vpop.f32.mrf.mxu1  ;;  %v14932_v7 = vpop.f32.mrf.mxu0  ;;  %v1423_v3 = vadd.f32 %v14931_v39, %v17249_v42  ;;  %vm21251_vm14 = vmmov %vm21217_vm0  ;;  %v21275_v41 = vld [vmem:[#allocation15_spill] sm:$0xff] }
 0x113   : > { %15123 = vmatprep.mubr.msk.bf16.mxu1 %vm21240_vm6, %v3849_v27  ;;  %v4321_v5 = vsel %vm21247_vm12, 0, %v16422_v15  ;;  %vm21248_vm6 = vnez %v20998_v62  ;;  %v17278_v19 = vadd.f32 %v2003_v51, %v1418_v56  ;;  %vm21314_vm12 = vcmask 23552  }
 0x114   : > { %v4322_v34 = vsel %vm21248_vm6, 0, %v16443_v40  ;;  %v1303_v27 = vpop.f32.mrf.mxu0 }
 0x115   : > { %v14965_v0 = vpop.f32.mrf.mxu1  ;;  %v1422_v11 = vadd.f32 %v17249_v42, %v1303_v27 }
 0x116   : > { %v17288_v22 = vadd.f32 %v14965_v0, %v1423_v3  ;;  %v4325_v0 = vsel %vm16477_vm8, 0, %v16508_v63 }
 0x117   : > { %v2016_v24 = vpop.f32.mrf.mxu1 }
 0x119   : > { %15090 = vmatmul.mubr.msk.bf16.gmra.mxu0 %vm21244_vm1, %v3314_v53  ;;  %vm21253_vm1 = vmmov %vm21217_vm0  ;;  %v1424_v53 = vadd.f32 %v14932_v7, %v17249_v42  ;;  %v14966_v29 = vpop.f32.mrf.mxu1 }
 0x11a   : > { %15124 = vmatmul.mubr.msk.bf16.gmra.mxu1 %vm21245_vm7, %v3851_v58  ;;  %15129 = vmatprep.mubr.msk.bf16.mxu0 %vm21246_vm15, %v4320_v43  ;;  %v14935_v43 = vpop.f32.mrf.mxu0  ;;  %vm21256_vm7 = vmmov %vm21217_vm0 }
 0x11b   : > { %15163 = vmatprep.mubr.msk.bf16.mxu1 %vm21217_vm0, %v4930_v54  ;;  %v4323_v54 = vsel %vm16432_vm9, 0, %v16460_v55  ;;  %v17301_v26 = vadd.f32 %v14966_v29, %v1424_v53  ;;  %v2019_v39 = vpop.f32.mrf.mxu1  ;;  %vm21258_vm15 = vmmov %vm21217_vm0  ;;  %v1427_v56 = vadd.f32 %v14935_v43, %v17249_v42 }
 0x11c   : > { %v1316_v50 = vpop.f32.mrf.mxu0 }
 0x11d   : > { %v1425_v7 = vadd.f32 %v17249_v42, %v1316_v50 }
 0x11f   : > { %v14969_v51 = vpop.f32.mrf.mxu1 }
 0x120   : > { %v17313_v3 = vadd.f32 %v14969_v51, %v1427_v56  ;;  %v21267_v51 = vld [vmem:[#allocation35_spill] sm:$0xff] }
 0x121   : > { %15130 = vmatmul.mubr.msk.bf16.vlgmr.msra.gmra.mxu0 %vm21249_vm3, %v4321_v5  ;;  %v17306_v5 = vadd.f32 %v2019_v39, %v1422_v11  ;;  %vm21260_vm3 = vmmov %vm21217_vm0  ;;  %v2032_v27 = vpop.f32.mrf.mxu1  ;;  %v21264_v39 = vld [vmem:[#allocation34_spill] sm:$0xff] }
 0x122   : > { %15164 = vmatmul.mubr.msk.bf16.vlgmr.msra.gmra.mxu1 %vm21250_vm11, %v16475_v12  ;;  %15133 = vmatprep.mubr.msk.bf16.mxu0 %vm21251_vm14, %v4322_v34  ;;  %v17292_v12 = vadd.f32 %v2016_v24, %v1421_v6  ;;  %v21259_v34 = vld [vmem:[#allocation32_spill] sm:$0xff]  ;;  %v17319_v53 = vadd.f32 %v2032_v27, %v1425_v7  ;;  %vm21263_vm11 = vmmov %vm21217_vm0 }
 0x123   : > { %15167 = vmatprep.mubr.msk.bf16.mxu1 %vm21253_vm1, %v21252_v30  ;;  %15196 = vmatpush3.bf16.msra.mxu0 %v17148_v45  ;;  %v14936_v45 = vpop.f32.mrf.mxu0  ;;  %v14970_v29 = vpop.f32.mrf.mxu1  ;;  %vm21265_vm14 = vmmov %vm21217_vm0 }
 0x124   : > { %v1428_v6 = vadd.f32 %v14936_v45, %v17249_v42  ;;  %vm21266_vm1 = vmmov %vm21217_vm0 }
 0x125   : > { %v1319_v38 = vpop.f32.mrf.mxu0 }
 0x126   : > { %v1426_v11 = vadd.f32 %v17249_v42, %v1319_v38 }
 0x127   : > { %v14939_v24 = vpop.f32.mrf.mxu0 }
 0x128   : > { %v1431_v45 = vadd.f32 %v14939_v24, %v17249_v42 }
 0x129   : > { %15134 = vmatmul.mubr.msk.bf16.gmra.mxu0 %vm21256_vm7, %v4323_v54  ;;  %v4326_v54 = vsel %vm16503_vm2, 0, %v16529_v21  ;;  %v1332_v50 = vpop.f32.mrf.mxu0  ;;  %vm21268_vm7 = vmmov %vm21217_vm0 }
 0x12a   : > { %15168 = vmatmul.mubr.msk.bf16.gmra.mxu1 %vm21258_vm15, %v21257_v49  ;;  %15137 = vmatprep.mubr.msk.bf16.mxu0 %vm21217_vm0, %v4324_v44  ;;  %v17325_v44 = vadd.f32 %v14970_v29, %v1428_v6  ;;  %v2035_v49 = vpop.f32.mrf.mxu1  ;;  %v1429_v7 = vadd.f32 %v17249_v42, %v1332_v50  ;;  %v21269_v29 = vld [vmem:[#allocation13_spill] sm:$0xff] }
 0x12b   : > { %15171 = vmatprep.mubr.msk.bf16.mxu1 %vm21260_vm3, %v21259_v34  ;;  %v14940_v56 = vpop.f32.mrf.mxu0  ;;  %v17332_v34 = vadd.f32 %v2035_v49, %v1426_v11  ;;  %v21271_v49 = vld [vmem:[#allocation33_spill] sm:$0xff]  ;;  %vm21274_vm3 = vmmov %vm21217_vm0 }
 0x12c   : > { %v14973_v38 = vpop.f32.mrf.mxu1  ;;  %v1432_v24 = vadd.f32 %v14940_v56, %v17249_v42  ;;  %vm21272_vm15 = vnez %v21271_v49 }
 0x12d   : > { %v17337_v27 = vadd.f32 %v14973_v38, %v1431_v45  ;;  %v21273_v38 = vld [vmem:[#allocation38_spill] sm:$0xff] }
 0x12e   : > { %v2048_v6 = vpop.f32.mrf.mxu1 }
 0x12f   : > { %v17344_v11 = vadd.f32 %v2048_v6, %v1429_v7  ;;  %v21277_v6 = vld [vmem:[#allocation40_spill] sm:$0xff] }
 0x130   : > { %v14974_v16 = vpop.f32.mrf.mxu1 }
 0x131   : > { %15138 = vmatmul.mubr.msk.bf16.gmra.mxu0 %vm21263_vm11, %v4325_v0  ;;  %v1335_v0 = vpop.f32.mrf.mxu0  ;;  %v17350_v45 = vadd.f32 %v14974_v16, %v1432_v24  ;;  %vm21276_vm11 = vmmov %vm21217_vm0 }
 0x132   : > { %15172 = vmatmul.mubr.msk.bf16.gmra.mxu1 %vm21265_vm14, %v21264_v39  ;;  %15141 = vmatprep.mubr.msk.bf16.mxu0 %vm21266_vm1, %v4326_v54  ;;  %v4881_v39 = vshll.u32 %v21269_v29, 16  ;;  %v4327_v54 = vsel %vm16531_vm4, 0, %v16557_v59  ;;  %v1430_v50 = vadd.f32 %v17249_v42, %v1335_v0  ;;  %v2051_v14 = vpop.f32.mrf.mxu1  ;;  %vm21278_vm14 = vmmov %vm21217_vm0  ;;  %vm21280_vm1 = vsmask.f32 256 }
 0x133   : > { %15175 = vmatprep.mubr.msk.bf16.mxu1 %vm21268_vm7, %v21267_v51  ;;  %v4328_v51 = vsel %vm21272_vm15, 0, %v16580_v57  ;;  %v14943_v31 = vpop.f32.mrf.mxu0  ;;  %vm21283_vm7 = vnez %v21027_v2 }
 0x134   : > { %v4883_v56 = vor.u32 %v4881_v39, %v21275_v41  ;;  %v17357_v7 = vadd.f32 %v2051_v14, %v1430_v50  ;;  %v1435_v16 = vadd.f32 %v14943_v31, %v17249_v42  ;;  %v14977_v24 = vpop.f32.mrf.mxu1  ;;  %v21279_v41 = vld [vmem:[#allocation16_spill] sm:$0xff]  ;;  %v4330_v31 = vsel %vm21283_vm7, 0, %v16625_v36 }
 0x135   : > { %v1348_v49 = vpop.f32.mrf.mxu0 }
 0x136   : > { %v17366_v62 = vadd.f32 %v14977_v24, %v1435_v16  ;;  %v17370_v14 = vsel %vm21280_vm1, %v21279_v41, %v4883_v56  ;;  %vm21288_vm1 = vmmov %vm21217_vm0 }
 0x137   : > { %v14944_v0 = vpop.f32.mrf.mxu0  ;;  %21281 = vst [vmem:[#allocation28_spill] sm:$0xff] %v17370_v14 }
 0x138   : > { %v1436_v50 = vadd.f32 %v14944_v0, %v17249_v42  ;;  %v21289_v0 = vld [vmem:[#allocation23_spill] sm:$0xff] }
 0x139   : > { %15142 = vmatmul.mubr.msk.bf16.gmra.mxu0 %vm21217_vm0, %v4327_v54  ;;  %v4329_v54 = vsel %vm16582_vm13, 0, %v16597_v23  ;;  %v17372_v39 = vpop.f32.mrf.mxu0  ;;  %vm21290_vm10 = vcmp.ne.s16.totalorder %v21289_v0, 0  ;;  %vm21316_vm13 = vmmov %vm21314_vm12 }
 0x13a   : > { %15176 = vmatmul.mubr.msk.bf16.gmra.mxu1 %vm21274_vm3, %v21273_v38  ;;  %15145 = vmatprep.mubr.msk.bf16.mxu0 %vm21276_vm11, %v4328_v51  ;;  %v1433_v38 = vadd.f32 %v17249_v42, %v1348_v49  ;;  %21282 = vst [vmem:[#allocation30_spill] sm:$0xff] %v17372_v39  ;;  %v2064_v51 = vpop.f32.mrf.mxu1  ;;  %v21284_v49 = vld [vmem:[#allocation41_spill] sm:$0xff]  ;;  %vm21285_vm3 = vmmov %vm21217_vm0  ;;  %vm20785_vm11 = vcmp.ne.s16.totalorder %v17370_v14, 0 }
 0x13b   : > { %15179 = vmatprep.mubr.msk.bf16.mxu1 %vm21278_vm14, %v21277_v6  ;;  %v14947_v16 = vpop.f32.mrf.mxu0  ;;  %vm21286_vm14 = vmmov %vm21217_vm0  ;;  %v4916_v2 = vsel %vm20785_vm11, 0, %v17209_v46 }
 0x13c   : > { %v17378_v6 = vadd.f32 %v2064_v51, %v1433_v38  ;;  %v14978_v24 = vpop.f32.mrf.mxu1  ;;  %v4915_v38 = vsel %vm21290_vm10, 0, %v16744_v48  ;;  %vm21294_vm10 = vnez %v21040_v25  ;;  %v5039_v43 = vshll.u32 %v4916_v2, 16  ;;  %v21300_v25 = vld [vmem:[#allocation49_spill] sm:$0xff]  ;;  %vm21301_vm11 = vmmov %vm21288_vm1 }
 0x13d   : > { %v17385_v56 = vadd.f32 %v14978_v24, %v1436_v50  ;;  %v1364_v51 = vpop.f32.mrf.mxu0  ;;  %v5031_v50 = vshll.u32 %v4915_v38, 16  ;;  %v5035_v14 = vshrl.u32 %v4915_v38, 16 }
 0x13e   : > { %v1437_v24 = vadd.f32 %v17249_v42, %v1364_v51 }
 0x13f   : > { %v14948_v58 = vpop.f32.mrf.mxu0 }
 0x140   : > { %v1440_v41 = vadd.f32 %v14948_v58, %v17249_v42 }
 0x141   : > { %15146 = vmatmul.mubr.msk.bf16.gmra.mxu0 %vm21217_vm0, %v4329_v54  ;;  %v17392_v54 = vpop.f32.mrf.mxu1  ;;  %vm21292_vm0 = vnez %v21032_v20  ;;  %v17404_v35 = vpop.f32.mrf.mxu0  ;;  %v21297_v20 = vld [vmem:[#allocation46_spill] sm:$0xff] }
 0x142   : > { %15180 = vmatmul.mubr.msk.bf16.gmra.mxu1 %vm21285_vm3, %v21284_v49  ;;  %15149 = vmatprep.mubr.msk.bf16.mxu0 %vm21286_vm14, %v4330_v31  ;;  %21291 = vst [vmem:[#allocation32_spill] sm:$0xff] %v17392_v54  ;;  %v1439_v49 = vadd.f32 %v14947_v16, %v17249_v42  ;;  %21293 = vst [vmem:[#allocation34_spill] sm:$0xff] %v17404_v35  ;;  %v4332_v16 = vsel %vm21294_vm10, 0, %v16670_v18  ;;  %v21303_v35 = vld [vmem:[#allocation43_spill] sm:$0xff]  ;;  %v21305_v54 = vld [vmem:[#allocation52_spill] sm:$0xff] }
 0x143   : > { %15183 = vmatprep.mubr.msk.bf16.mxu1 %vm21288_vm1, %v21287_v52  ;;  %v14981_v31 = vpop.f32.mrf.mxu1  ;;  %v4331_v52 = vsel %vm21292_vm0, 0, %v16649_v60  ;;  %vm21296_vm3 = vmmov %vm21288_vm1 }
 0x144   : > { %v17402_v32 = vadd.f32 %v14981_v31, %v1439_v49  ;;  %vm21298_vm14 = vmmov %vm21288_vm1  ;;  %v5033_v49 = vrot.slane %v5031_v50, 1 }
 0x145   : > { %v2080_v30 = vpop.f32.mrf.mxu1  ;;  %v14951_v38 = vpop.f32.mrf.mxu0 }
 0x146   : > { %v17410_v37 = vadd.f32 %v2080_v30, %v1437_v24  ;;  %v5037_v58 = vor.u32 %v5035_v14, %v5033_v49  ;;  %v5041_v30 = vrot.slane %v5039_v43, 1  ;;  %v1443_v24 = vadd.f32 %v14951_v38, %v17249_v42  ;;  %v21307_v14 = vld [vmem:[#allocation45_spill] sm:$0xff] }
 0x147   : > { %v14982_v51 = vpop.f32.mrf.mxu1 }
 0x148   : > { %21295 = vst [vmem:[#allocation35_spill] sm:$0xff] %v17410_v37  ;;  %v17416_v31 = vadd.f32 %v14982_v51, %v1440_v41  ;;  %v21312_v37 = vld [vmem:[#allocation73_spill] sm:$0xff] }
 0x149   : > { %15150 = vmatmul.mubr.msk.bf16.gmra.mxu0 %vm21296_vm3, %v4331_v52  ;;  %v17420_v0 = vpop.f32.mrf.mxu1  ;;  %v1380_v52 = vpop.f32.mrf.mxu0  ;;  %vm21304_vm3 = vnez %v21303_v35  ;;  %v21310_v35 = vld [vmem:[#allocation72_spill] sm:$0xff] }
 0x14a   : > { %15184 = vmatmul.mubr.msk.bf16.gmra.mxu1 %vm21298_vm14, %v21297_v20  ;;  %15153 = vmatprep.mubr.msk.bf16.mxu0 %vm21288_vm1, %v4332_v16  ;;  %21299 = vst [vmem:[#allocation38_spill] sm:$0xff] %v17416_v31  ;;  %21302 = vst [vmem:[#allocation15_spill] sm:$0xff] %v17420_v0  ;;  %v4333_v20 = vsel %vm21304_vm3, 0, %v16684_v8  ;;  %vm21306_vm14 = vsmask.f32 7424  ;;  %v5043_v16 = vshrl.u32 %v4916_v2, 16  ;;  %v1441_v51 = vadd.f32 %v17249_v42, %v1380_v52 }
 0x14b   : > { %15187 = vmatprep.mubr.msk.bf16.mxu1 %vm21301_vm11, %v21300_v25  ;;  %v14985_v50 = vpop.f32.mrf.mxu1  ;;  %v5034_v41 = vsel %vm21306_vm14, %v21305_v54, %v5033_v49  ;;  %v14952_v25 = vpop.f32.mrf.mxu0  ;;  %vm21308_vm11 = vnez %v21307_v14  ;;  %vm21309_vm1 = vmmov %vm21306_vm14  ;;  %vm21311_vm15 = vcmp.ne.s16.totalorder %v21310_v35, 0  ;;  %vm21313_vm14 = vcmp.ne.s16.totalorder %v21312_v37, 0 }
 0x14c   : > { %v17429_v39 = vadd.f32 %v14985_v50, %v1443_v24  ;;  %v4334_v43 = vsel %vm21308_vm11, 0, %v16744_v48  ;;  %v5042_v38 = vsel %vm21309_vm1, %v5037_v58, %v5041_v30  ;;  %v5546_v31 = vsel %vm21311_vm15, 0, %v16391_v47  ;;  %vm21317_vm1 = vmmov %vm21314_vm12 }
 0x14d   : > { %v2096_v0 = vpop.f32.mrf.mxu1  ;;  %v5547_v2 = vsel %vm21313_vm14, 0, %v16422_v15  ;;  %v1444_v54 = vadd.f32 %v14952_v25, %v17249_v42  ;;  %v17443_v49 = vpop.f32.mrf.mxu0  ;;  %v5045_v52 = vor.u32 %v5043_v16, %v5041_v30  ;;  %vm21318_vm6 = vmmov %vm21317_vm1  ;;  %vm20788_vm15 = vcmp.ne.s16.totalorder %v21269_v29, 0 }
 0x14e   : > { %21315 = vst [vmem:[#allocation40_spill] sm:$0xff] %v17443_v49  ;;  %v17446_v24 = vadd.f32 %v2096_v0, %v1441_v51  ;;  %v5581_v50 = vrot.slane %v5547_v2, 1  ;;  %v4335_v0 = vsel %vm20788_vm15, 0, %v17209_v46  ;;  %vm21326_vm15 = vmmov %vm21317_vm1 }
 0x14f   : > { %v14986_v58 = vpop.f32.mrf.mxu1  ;;  %v14955_v47 = vpop.f32.mrf.mxu0 }
 0x150   : > { %v17451_v15 = vadd.f32 %v14986_v58, %v1444_v54 }
 0x151   : > { %15154 = vmatmul.mubr.msk.bf16.gmra.mxu0 %vm21314_vm12, %v4333_v20  ;;  %v5580_v20 = vrot.slane %v5546_v31, 1  ;;  %v1396_v25 = vpop.f32.mrf.mxu0  ;;  %v17453_v35 = vpop.f32.mrf.mxu1  ;;  %vm21322_vm12 = vcmask 1046528   ;;  %v21324_v31 = vld [vmem:[#allocation56_spill] sm:$0xff] }
 0x152   : > { %15188 = vmatmul.mubr.msk.bf16.gmra.mxu1 %vm21316_vm13, %v5034_v41  ;;  %15157 = vmatprep.mubr.msk.bf16.mxu0 %vm21317_vm1, %v4334_v43  ;;  %21319 = vst [vmem:[#allocation41_spill] sm:$0xff] %v17453_v35  ;;  %v21320_v41 = vld [vmem:[#allocation18_spill] sm:$0xff]  ;;  %vm21321_vm13 = vsmask.f32 7424  ;;  %v1447_v43 = vadd.f32 %v14955_v47, %v17249_v42  ;;  %vm21325_vm14 = vcmp.ne.s16.totalorder %v21324_v31, 0  ;;  %v1445_v58 = vadd.f32 %v17249_v42, %v1396_v25 }
 0x153   : > { %15191 = vmatprep.mubr.msk.bf16.mxu1 %vm21318_vm6, %v5042_v38  ;;  %v5046_v51 = vsel %vm21321_vm13, %v5045_v52, %v21320_v41  ;;  %v5582_v30 = vsel %vm21322_vm12, %v5580_v20, %v5581_v50  ;;  %vm21323_vm6 = vcmp.ne.s16.totalorder %v16816_v1, 0  ;;  %v5549_v38 = vsel %vm21325_vm14, 0, %v16460_v55  ;;  %v14956_v2 = vpop.f32.mrf.mxu0  ;;  %vm21327_vm13 = vmmov %vm21317_vm1 }
 0x154   : > { %v5548_v16 = vsel %vm21323_vm6, 0, %v16443_v40  ;;  %v5585_v37 = vrot.slane %v5549_v38, 1  ;;  %v1448_v47 = vadd.f32 %v14956_v2, %v17249_v42  ;;  %vm21331_vm6 = vcmp.ne.s16.totalorder %v16853_v17, 0 }
 0x155   : > { %v14989_v54 = vpop.f32.mrf.mxu1  ;;  %v5583_v20 = vrot.slane %v5548_v16, 1  ;;  %v17477_v55 = vpop.f32.mrf.mxu0  ;;  %v21332_v16 = vld [vmem:[#allocation58_spill] sm:$0xff] }
 0x156   : > { %v17471_v52 = vadd.f32 %v14989_v54, %v1447_v43  ;;  %21328 = vst [vmem:[#allocation44_spill] sm:$0xff] %v17477_v55  ;;  %vm21333_vm14 = vcmp.ne.s16.totalorder %v21332_v16, 0 }
 0x157   : > { %v2112_v40 = vpop.f32.mrf.mxu1  ;;  %v5584_v31 = vsel %vm21322_vm12, %v5581_v50, %v5583_v20  ;;  %v5551_v42 = vsel %vm21333_vm14, 0, %v16508_v63 }
 0x158   : > { %v17475_v1 = vadd.f32 %v2112_v40, %v1445_v58 }
 0x159   : > { %15158 = vmatmul.mubr.msk.bf16.gmra.mxu0 %vm21317_vm1, %v4335_v0  ;;  %v14990_v0 = vpop.f32.mrf.mxu1 }
 0x15a   : > { %15192 = vmatmul.mubr.msk.bf16.gmra.mxu1 %vm21326_vm15, %v5046_v51  ;;  %15197 = vmatprep.mubr.msk.bf16.mxu0 %vm21327_vm13, %v5582_v30  ;;  %v17480_v14 = vadd.f32 %v14990_v0, %v1448_v47  ;;  %vm21330_vm15 = vmmov %vm21322_vm12  ;;  %v5550_v30 = vsel %vm21331_vm6, 0, %v16493_v33  ;;  %vm21336_vm6 = vcmp.ne.s16.totalorder %v16878_v9, 0 }
 0x15b   : > { %v17482_v51 = vpop.f32.mrf.mxu1  ;;  %v5586_v25 = vsel %vm21330_vm15, %v5583_v20, %v5585_v37  ;;  %vm21334_vm13 = vmmov %vm21317_vm1  ;;  %v5587_v2 = vrot.slane %v5550_v30, 1  ;;  %v5589_v20 = vrot.slane %v5551_v42, 1  ;;  %v5552_v30 = vsel %vm21336_vm6, 0, %v16529_v21 }
 0x15c   : > { %21329 = vst [vmem:[#allocation46_spill] sm:$0xff] %v17482_v51  ;;  %vm21335_vm15 = vmmov %vm21322_vm12 }
 0x15d   : > { %v5588_v17 = vsel %vm21322_vm12, %v5585_v37, %v5587_v2 }
 0x15f   : > { %v14995_v43 = vpop.f32.mrf.mxu0 }
 0x160   : > { %v15029_v38 = vpop.f32.mrf.mxu1  ;;  %v2697_v50 = vadd.f32 %v14995_v43, %v17264_v13 }
 0x161   : > { %15198 = vmatmul.mubr.msk.bf16.vlgmr.msra.gmra.mxu0 %vm21317_vm1, %v5584_v31  ;;  %v2568_v54 = vpop.f32.mrf.mxu0 }
 0x162   : > { %15201 = vmatprep.mubr.msk.bf16.mxu0 %vm21334_vm13, %v5586_v25  ;;  %v3022_v58 = vpop.f32.mrf.mxu1  ;;  %v2695_v40 = vadd.f32 %v2568_v54, %v17267_v10  ;;  %v17495_v47 = vadd.f32 %v15029_v38, %v2697_v50  ;;  %v5590_v25 = vsel %vm21335_vm15, %v5587_v2, %v5589_v20  ;;  %vm21339_vm13 = vmmov %vm21317_vm1  ;;  %v5591_v2 = vrot.slane %v5552_v30, 1  ;;  %v21341_v30 = vld [vmem:[#allocation61_spill] sm:$0xff] }
 0x163   : > { %v14996_v33 = vpop.f32.mrf.mxu0  ;;  %vm21340_vm15 = vmmov %vm21322_vm12  ;;  %vm21342_vm6 = vcmp.ne.s16.totalorder %v21341_v30, 0 }
 0x164   : > { %v15030_v0 = vpop.f32.mrf.mxu1  ;;  %v2698_v63 = vadd.f32 %v14996_v33, %v17273_v4  ;;  %v17499_v31 = vadd.f32 %v3022_v58, %v2695_v40  ;;  %v21337_v4 = vld [vmem:[#allocation60_spill] sm:$0xff] }
 0x165   : > { %v2571_v16 = vpop.f32.mrf.mxu0  ;;  %vm21338_vm14 = vcmp.ne.s16.totalorder %v21337_v4, 0 }
 0x166   : > { %v17501_v13 = vpop.f32.mrf.mxu1  ;;  %v17508_v10 = vadd.f32 %v2571_v16, %v17278_v19  ;;  %v17510_v42 = vadd.f32 %v15030_v0, %v2698_v63  ;;  %v5553_v37 = vsel %vm21338_vm14, 0, %v16557_v59  ;;  %v5592_v0 = vsel %vm21322_vm12, %v5589_v20, %v5591_v2 }
 0x167   : > { %v14999_v43 = vpop.f32.mrf.mxu0  ;;  %v5593_v58 = vrot.slane %v5553_v37, 1  ;;  %v5554_v37 = vsel %vm21342_vm6, 0, %v16580_v57 }
 0x168   : > { %v15033_v38 = vpop.f32.mrf.mxu1  ;;  %v2701_v50 = vadd.f32 %v14999_v43, %v17288_v22 }
 0x169   : > { %15202 = vmatmul.mubr.msk.bf16.gmra.mxu0 %vm21317_vm1, %v5588_v17  ;;  %v2584_v54 = vpop.f32.mrf.mxu0 }
 0x16a   : > { %15205 = vmatprep.mubr.msk.bf16.mxu0 %vm21339_vm13, %v5590_v25  ;;  %v3038_v21 = vpop.f32.mrf.mxu1  ;;  %v2699_v19 = vadd.f32 %v2584_v54, %v17292_v12  ;;  %v17519_v16 = vadd.f32 %v15033_v38, %v2701_v50  ;;  %v5594_v25 = vsel %vm21340_vm15, %v5591_v2, %v5593_v58  ;;  %vm21345_vm13 = vmmov %vm21317_vm1  ;;  %v5595_v2 = vrot.slane %v5554_v37, 1  ;;  %v21347_v37 = vld [vmem:[#allocation63_spill] sm:$0xff] }
 0x16b   : > { %v15000_v40 = vpop.f32.mrf.mxu0  ;;  %vm21346_vm15 = vmmov %vm21322_vm12  ;;  %vm21348_vm6 = vcmp.ne.s16.totalorder %v21347_v37, 0 }
 0x16c   : > { %v15034_v33 = vpop.f32.mrf.mxu1  ;;  %v2702_v59 = vadd.f32 %v15000_v40, %v17301_v26  ;;  %v17523_v17 = vadd.f32 %v3038_v21, %v2699_v19  ;;  %v21343_v26 = vld [vmem:[#allocation62_spill] sm:$0xff] }
 0x16d   : > { %v2587_v63 = vpop.f32.mrf.mxu0  ;;  %vm21344_vm14 = vcmp.ne.s16.totalorder %v21343_v26, 0 }
 0x16e   : > { %v17525_v22 = vpop.f32.mrf.mxu1  ;;  %v17532_v12 = vadd.f32 %v2587_v63, %v17306_v5  ;;  %v17534_v43 = vadd.f32 %v15034_v33, %v2702_v59  ;;  %v5555_v20 = vsel %vm21344_vm14, 0, %v16597_v23  ;;  %v5596_v63 = vsel %vm21322_vm12, %v5593_v58, %v5595_v2 }
 0x16f   : > { %v5597_v19 = vrot.slane %v5555_v20, 1  ;;  %v5556_v20 = vsel %vm21348_vm6, 0, %v16625_v36 }
 0x171   : > { %v15003_v38 = vpop.f32.mrf.mxu0  ;;  %15206 = vmatmul.mubr.msk.bf16.gmra.mxu0 %vm21317_vm1, %v5592_v0 }
 0x172   : > { %v15037_v50 = vpop.f32.mrf.mxu1  ;;  %v2705_v54 = vadd.f32 %v15003_v38, %v17313_v3  ;;  %15209 = vmatprep.mubr.msk.bf16.mxu0 %vm21345_vm13, %v5594_v25  ;;  %v5598_v25 = vsel %vm21346_vm15, %v5595_v2, %v5597_v19  ;;  %vm21351_vm13 = vmmov %vm21317_vm1  ;;  %v5599_v2 = vrot.slane %v5556_v20, 1  ;;  %v21353_v20 = vld [vmem:[#allocation65_spill] sm:$0xff] }
 0x173   : > { %v2600_v21 = vpop.f32.mrf.mxu0  ;;  %vm21352_vm15 = vmmov %vm21322_vm12  ;;  %vm21354_vm6 = vcmp.ne.s16.totalorder %v21353_v20, 0 }
 0x174   : > { %v3054_v57 = vpop.f32.mrf.mxu1  ;;  %v2703_v5 = vadd.f32 %v2600_v21, %v17319_v53  ;;  %v17543_v40 = vadd.f32 %v15037_v50, %v2705_v54 }
 0x175   : > { %v15004_v33 = vpop.f32.mrf.mxu0 }
 0x176   : > { %v15038_v59 = vpop.f32.mrf.mxu1  ;;  %v2706_v23 = vadd.f32 %v15004_v33, %v17325_v44  ;;  %v17547_v0 = vadd.f32 %v3054_v57, %v2703_v5  ;;  %v21349_v44 = vld [vmem:[#allocation64_spill] sm:$0xff] }
 0x177   : > { %v2603_v26 = vpop.f32.mrf.mxu0  ;;  %vm21350_vm14 = vcmp.ne.s16.totalorder %v21349_v44, 0 }
 0x178   : > { %v17549_v3 = vpop.f32.mrf.mxu1  ;;  %v17556_v53 = vadd.f32 %v2603_v26, %v17332_v34  ;;  %v17558_v38 = vadd.f32 %v15038_v59, %v2706_v23  ;;  %v5557_v58 = vsel %vm21350_vm14, 0, %v16649_v60  ;;  %v5600_v23 = vsel %vm21322_vm12, %v5597_v19, %v5599_v2 }
 0x179   : > { %v15007_v50 = vpop.f32.mrf.mxu0  ;;  %15210 = vmatmul.mubr.msk.bf16.gmra.mxu0 %vm21317_vm1, %v5596_v63  ;;  %v5601_v5 = vrot.slane %v5557_v58, 1  ;;  %v5558_v58 = vsel %vm21354_vm6, 0, %v16670_v18  ;;  %vm21355_vm14 = vcmp.ne.s16.totalorder %v16978_v28, 0  ;;  %v21357_v18 = vrot.slane %v21269_v29, 7 }
 0x17a   : > { %v15041_v54 = vpop.f32.mrf.mxu1  ;;  %v2709_v21 = vadd.f32 %v15007_v50, %v17337_v27  ;;  %15213 = vmatprep.mubr.msk.bf16.mxu0 %vm21351_vm13, %v5598_v25  ;;  %vm21356_vm13 = vmmov %vm21317_vm1  ;;  %vm21359_vm12 = vcmask 1040384   ;;  %vm21361_vm6 = vcmask 1046528  }
 0x17b   : > { %v2616_v57 = vpop.f32.mrf.mxu0  ;;  %v5602_v25 = vsel %vm21352_vm15, %v5599_v2, %v5601_v5  ;;  %v5603_v2 = vrot.slane %v5558_v58, 1 }
 0x17c   : > { %v3070_v36 = vpop.f32.mrf.mxu1  ;;  %v2707_v34 = vadd.f32 %v2616_v57, %v17344_v11  ;;  %v17567_v26 = vadd.f32 %v15041_v54, %v2709_v21  ;;  %v21358_v57 = vld [vmem:[#allocation67_spill] sm:$0xff] }
 0x17d   : > { %v15008_v33 = vpop.f32.mrf.mxu0 }
 0x17e   : > { %v15042_v59 = vpop.f32.mrf.mxu1  ;;  %v2710_v60 = vadd.f32 %v15008_v33, %v17350_v45  ;;  %v17571_v63 = vadd.f32 %v3070_v36, %v2707_v34  ;;  %v5559_v45 = vsel %vm21355_vm14, 0, %v16684_v8  ;;  %vm21362_vm14 = vmmov %vm21361_vm6 }
 0x17f   : > { %v2619_v37 = vpop.f32.mrf.mxu0  ;;  %v5605_v34 = vrot.slane %v5559_v45, 1 }
 0x180   : > { %v17573_v27 = vpop.f32.mrf.mxu1  ;;  %v17580_v11 = vadd.f32 %v2619_v37, %v17357_v7  ;;  %v17582_v50 = vadd.f32 %v15042_v59, %v2710_v60  ;;  %v17594_v7 = vsel %vm21359_vm12, %v21358_v57, %v21357_v18  ;;  %vm21364_vm12 = vmmov %vm21356_vm13 }
 0x181   : > { %v15011_v19 = vpop.f32.mrf.mxu0  ;;  %15214 = vmatmul.mubr.msk.bf16.gmra.mxu0 %vm21317_vm1, %v5600_v23  ;;  %21360 = vst [vmem:[#allocation49_spill] sm:$0xff] %v17594_v7  ;;  %vm20802_vm15 = vcmp.ne.s16.totalorder %v17594_v7, 0  ;;  %v5604_v23 = vsel %vm21361_vm6, %v5601_v5, %v5603_v2  ;;  %v5606_v45 = vsel %vm21362_vm14, %v5603_v2, %v5605_v34  ;;  %vm21363_vm1 = vcmp.ne.s16.totalorder %v17012_v61, 0  ;;  %v21366_v7 = vld [vmem:[#allocation38_spill] sm:$0xff]  ;;  %vm21369_vm14 = vmmov %vm21361_vm6 }
 0x182   : > { %v15045_v54 = vpop.f32.mrf.mxu1  ;;  %v2713_v21 = vadd.f32 %v15011_v19, %v17366_v62  ;;  %15217 = vmatprep.mubr.msk.bf16.mxu0 %vm21356_vm13, %v5602_v25 }
 0x183   : > { %v2632_v37 = vpop.f32.mrf.mxu0 }
 0x184   : > { %v3086_v36 = vpop.f32.mrf.mxu1  ;;  %v2711_v8 = vadd.f32 %v2632_v37, %v17378_v6  ;;  %v17597_v33 = vadd.f32 %v15045_v54, %v2713_v21  ;;  %v5560_v6 = vsel %vm21363_vm1, 0, %v16744_v48  ;;  %vm21370_vm1 = vmmov %vm21364_vm12 }
 0x185   : > { %v15012_v59 = vpop.f32.mrf.mxu0  ;;  %v5607_v57 = vrot.slane %v5560_v6, 1 }
 0x186   : > { %v15046_v60 = vpop.f32.mrf.mxu1  ;;  %v2714_v62 = vadd.f32 %v15012_v59, %v17385_v56  ;;  %v17602_v25 = vadd.f32 %v3086_v36, %v2711_v8  ;;  %v5561_v56 = vsel %vm20802_vm15, 0, %v17209_v46  ;;  %v21365_v8 = vld [vmem:[#allocation35_spill] sm:$0xff] }
 0x187   : > { %v17604_v58 = vpop.f32.mrf.mxu0  ;;  %v5609_v36 = vrot.slane %v5561_v56, 1  ;;  %v5608_v29 = vsel %vm21361_vm6, %v5605_v34, %v5607_v57 }
 0x188   : > { %v17606_v19 = vpop.f32.mrf.mxu1  ;;  %v17612_v54 = vadd.f32 %v15046_v60, %v2714_v62 }
 0x189   : > { %v15015_v21 = vpop.f32.mrf.mxu0  ;;  %15218 = vmatmul.mubr.msk.bf16.gmra.mxu0 %vm21356_vm13, %v5604_v23  ;;  %vm21371_vm13 = vmmov %vm21370_vm1 }
 0x18a   : > { %v15049_v5 = vpop.f32.mrf.mxu1  ;;  %v2717_v18 = vadd.f32 %v15015_v21, %v17402_v32  ;;  %15221 = vmatprep.mubr.msk.bf16.mxu0 %vm21364_vm12, %v5606_v45  ;;  %v5610_v45 = vsel %vm21369_vm14, %v5607_v57, %v5609_v36  ;;  %vm21372_vm12 = vmmov %vm21361_vm6  ;;  %vm21396_vm14 = vsmask.f32 256 }
 0x18b   : > { %v2648_v2 = vpop.f32.mrf.mxu0  ;;  %vm21375_vm6 = vmmov %vm21370_vm1 }
 0x18c   : > { %v3102_v37 = vpop.f32.mrf.mxu1  ;;  %v2715_v48 = vadd.f32 %v2648_v2, %v21365_v8  ;;  %v17621_v59 = vadd.f32 %v15049_v5, %v2717_v18 }
 0x18d   : > { %v15016_v60 = vpop.f32.mrf.mxu0 }
 0x18e   : > { %v15050_v62 = vpop.f32.mrf.mxu1  ;;  %v2718_v46 = vadd.f32 %v15016_v60, %v21366_v7  ;;  %v17625_v23 = vadd.f32 %v3102_v37, %v2715_v48  ;;  %v5611_v48 = vsel %vm21372_vm12, %v5609_v36, %v21320_v41 }
 0x18f   : > { %v17627_v44 = vpop.f32.mrf.mxu0 }
 0x190   : > { %21367 = vst [vmem:[#allocation52_spill] sm:$0xff] %v17627_v44  ;;  %v17629_v32 = vpop.f32.mrf.mxu1  ;;  %v17632_v6 = vadd.f32 %v15050_v62, %v2718_v46 }
 0x191   : > { %21368 = vst [vmem:[#allocation67_spill] sm:$0xff] %v17629_v32  ;;  %v15019_v56 = vpop.f32.mrf.mxu0  ;;  %15222 = vmatmul.mubr.msk.bf16.gmra.mxu0 %vm21370_vm1, %v5608_v29  ;;  %vm21399_vm1 = vmmov %vm21396_vm14 }
 0x192   : > { %v15053_v21 = vpop.f32.mrf.mxu1  ;;  %v2721_v5 = vadd.f32 %v15019_v56, %v17429_v39  ;;  %15225 = vmatprep.mubr.msk.bf16.mxu0 %vm21371_vm13, %v5610_v45  ;;  %vm21400_vm13 = vmmov %vm21399_vm1 }
 0x193   : > { %v2664_v7 = vpop.f32.mrf.mxu0  ;;  %vm21403_vm12 = vmmov %vm21399_vm1 }
 0x194   : > { %v3118_v34 = vpop.f32.mrf.mxu1  ;;  %v2719_v18 = vadd.f32 %v2664_v7, %v17446_v24  ;;  %v17638_v2 = vadd.f32 %v15053_v21, %v2721_v5 }
 0x195   : > { %v15020_v37 = vpop.f32.mrf.mxu0 }
 0x196   : > { %v15054_v8 = vpop.f32.mrf.mxu1  ;;  %v2722_v57 = vadd.f32 %v15020_v37, %v17451_v15  ;;  %v17643_v60 = vadd.f32 %v3118_v34, %v2719_v18 }
 0x197   : > { %v17645_v29 = vpop.f32.mrf.mxu0 }
 0x198   : > { %21373 = vst [vmem:[#allocation35_spill] sm:$0xff] %v17645_v29  ;;  %v17647_v39 = vpop.f32.mrf.mxu1  ;;  %v17649_v62 = vadd.f32 %v15054_v8, %v2722_v57 }
 0x199   : > { %21374 = vst [vmem:[#allocation38_spill] sm:$0xff] %v17647_v39  ;;  %v15023_v46 = vpop.f32.mrf.mxu0  ;;  %15226 = vmatmul.mubr.msk.bf16.gmra.mxu0 %vm21375_vm6, %v5611_v48  ;;  %vm21407_vm6 = vmmov %vm21399_vm1 }
 0x19a   : > { %v15057_v24 = vpop.f32.mrf.mxu1  ;;  %v2725_v45 = vadd.f32 %v15023_v46, %v17471_v52 }
 0x19b   : > { %v2680_v56 = vpop.f32.mrf.mxu0 }
 0x19c   : > { %v3134_v21 = vpop.f32.mrf.mxu1  ;;  %v2723_v15 = vadd.f32 %v2680_v56, %v17475_v1  ;;  %v17654_v5 = vadd.f32 %v15057_v24, %v2725_v45 }
 0x19d   : > { %v15024_v36 = vpop.f32.mrf.mxu0 }
 0x19e   : > { %v15058_v7 = vpop.f32.mrf.mxu1  ;;  %v2726_v34 = vadd.f32 %v15024_v36, %v17480_v14  ;;  %v17657_v18 = vadd.f32 %v3134_v21, %v2723_v15 }
 0x19f   : > { %v17659_v37 = vpop.f32.mrf.mxu0 }
 0x1a0   : > { %21376 = vst [vmem:[#allocation74_spill] sm:$0xff] %v17659_v37  ;;  %v17661_v8 = vpop.f32.mrf.mxu1  ;;  %v17663_v57 = vadd.f32 %v15058_v7, %v2726_v34 }
 0x1a1   : > { %21377 = vst [vmem:[#allocation75_spill] sm:$0xff] %v17661_v8  ;;  %v15063_v48 = vpop.f32.mrf.mxu0 }
 0x1a2   : > { %v15097_v52 = vpop.f32.mrf.mxu1  ;;  %v3529_v46 = vadd.f32 %v15063_v48, %v17495_v47 }
 0x1a3   : > { %v3400_v20 = vpop.f32.mrf.mxu0 }
 0x1a4   : > { %v3937_v1 = vpop.f32.mrf.mxu1  ;;  %v3527_v24 = vadd.f32 %v3400_v20, %v17499_v31  ;;  %v17667_v45 = vadd.f32 %v15097_v52, %v3529_v46 }
 0x1a5   : > { %v15064_v56 = vpop.f32.mrf.mxu0 }
 0x1a6   : > { %v15098_v14 = vpop.f32.mrf.mxu1  ;;  %v3530_v21 = vadd.f32 %v15064_v56, %v17510_v42  ;;  %v17670_v15 = vadd.f32 %v3937_v1, %v3527_v24 }
 0x1a7   : > { %v17672_v36 = vpop.f32.mrf.mxu0 }
 0x1a8   : > { %v17674_v7 = vpop.f32.mrf.mxu1  ;;  %v17676_v34 = vadd.f32 %v15098_v14, %v3530_v21 }
 0x1a9   : > { %v15067_v9 = vpop.f32.mrf.mxu0 }
 0x1aa   : > { %v15101_v47 = vpop.f32.mrf.mxu1  ;;  %v3533_v48 = vadd.f32 %v15067_v9, %v17519_v16 }
 0x1ab   : > { %v3416_v28 = vpop.f32.mrf.mxu0 }
 0x1ac   : > { %v3953_v31 = vpop.f32.mrf.mxu1  ;;  %v3531_v20 = vadd.f32 %v3416_v28, %v17523_v17  ;;  %v17680_v52 = vadd.f32 %v15101_v47, %v3533_v48 }
 0x1ad   : > { %v15068_v46 = vpop.f32.mrf.mxu0 }
 0x1ae   : > { %v15102_v42 = vpop.f32.mrf.mxu1  ;;  %v3534_v1 = vadd.f32 %v15068_v46, %v17534_v43  ;;  %v17683_v24 = vadd.f32 %v3953_v31, %v3531_v20 }
 0x1af   : > { %v17685_v56 = vpop.f32.mrf.mxu0 }
 0x1b0   : > { %v17687_v14 = vpop.f32.mrf.mxu1  ;;  %v17689_v21 = vadd.f32 %v15102_v42, %v3534_v1 }
 0x1b1   : > { %v15071_v61 = vpop.f32.mrf.mxu0 }
 0x1b2   : > { %v15105_v9 = vpop.f32.mrf.mxu1  ;;  %v3537_v16 = vadd.f32 %v15071_v61, %v17543_v40 }
 0x1b3   : > { %v3432_v30 = vpop.f32.mrf.mxu0 }
 0x1b4   : > { %v3969_v28 = vpop.f32.mrf.mxu1  ;;  %v3535_v17 = vadd.f32 %v3432_v30, %v17547_v0  ;;  %v17693_v47 = vadd.f32 %v15105_v9, %v3537_v16 }
 0x1b5   : > { %v15072_v48 = vpop.f32.mrf.mxu0 }
 0x1b6   : > { %v15106_v43 = vpop.f32.mrf.mxu1  ;;  %v3538_v31 = vadd.f32 %v15072_v48, %v17558_v38  ;;  %v17696_v20 = vadd.f32 %v3969_v28, %v3535_v17 }
 0x1b7   : > { %v17698_v46 = vpop.f32.mrf.mxu0 }
 0x1b8   : > { %v17700_v42 = vpop.f32.mrf.mxu1  ;;  %v17702_v1 = vadd.f32 %v15106_v43, %v3538_v31 }
 0x1b9   : > { %v15075_v4 = vpop.f32.mrf.mxu0 }
 0x1ba   : > { %v15109_v61 = vpop.f32.mrf.mxu1  ;;  %v3541_v40 = vadd.f32 %v15075_v4, %v17567_v26 }
 0x1bb   : > { %v3448_v41 = vpop.f32.mrf.mxu0 }
 0x1bc   : > { %v3985_v30 = vpop.f32.mrf.mxu1  ;;  %v3539_v0 = vadd.f32 %v3448_v41, %v17571_v63  ;;  %v17706_v9 = vadd.f32 %v15109_v61, %v3541_v40 }
 0x1bd   : > { %v15076_v16 = vpop.f32.mrf.mxu0 }
 0x1be   : > { %v15110_v38 = vpop.f32.mrf.mxu1  ;;  %v3542_v28 = vadd.f32 %v15076_v16, %v17582_v50  ;;  %v17709_v17 = vadd.f32 %v3985_v30, %v3539_v0 }
 0x1bf   : > { %v17711_v48 = vpop.f32.mrf.mxu0 }
 0x1c0   : > { %v17713_v43 = vpop.f32.mrf.mxu1  ;;  %v17715_v31 = vadd.f32 %v15110_v38, %v3542_v28 }
 0x1c1   : > { %v15079_v8 = vpop.f32.mrf.mxu0 }
 0x1c2   : > { %v15113_v4 = vpop.f32.mrf.mxu1  ;;  %v3545_v26 = vadd.f32 %v15079_v8, %v17597_v33 }
 0x1c3   : > { %v3464_v37 = vpop.f32.mrf.mxu0 }
 0x1c4   : > { %v4001_v41 = vpop.f32.mrf.mxu1  ;;  %v3543_v63 = vadd.f32 %v3464_v37, %v17602_v25  ;;  %v17719_v61 = vadd.f32 %v15113_v4, %v3545_v26 }
 0x1c5   : > { %v15080_v40 = vpop.f32.mrf.mxu0 }
 0x1c6   : > { %v15114_v50 = vpop.f32.mrf.mxu1  ;;  %v3546_v30 = vadd.f32 %v15080_v40, %v17612_v54  ;;  %v17722_v0 = vadd.f32 %v4001_v41, %v3543_v63 }
 0x1c7   : > { %v17724_v16 = vpop.f32.mrf.mxu0 }
 0x1c8   : > { %v17726_v38 = vpop.f32.mrf.mxu1  ;;  %v17728_v28 = vadd.f32 %v15114_v50, %v3546_v30 }
 0x1c9   : > { %v15083_v51 = vpop.f32.mrf.mxu0 }
 0x1ca   : > { %v15117_v33 = vpop.f32.mrf.mxu1  ;;  %v3549_v8 = vadd.f32 %v15083_v51, %v17621_v59 }
 0x1cb   : > { %v3480_v55 = vpop.f32.mrf.mxu0 }
 0x1cc   : > { %v4017_v25 = vpop.f32.mrf.mxu1  ;;  %v3547_v37 = vadd.f32 %v3480_v55, %v17625_v23  ;;  %v17732_v4 = vadd.f32 %v15117_v33, %v3549_v8 }
 0x1cd   : > { %v15084_v26 = vpop.f32.mrf.mxu0 }
 0x1ce   : > { %v15118_v54 = vpop.f32.mrf.mxu1  ;;  %v3550_v41 = vadd.f32 %v15084_v26, %v17632_v6  ;;  %v17735_v63 = vadd.f32 %v4017_v25, %v3547_v37 }
 0x1cf   : > { %v17737_v40 = vpop.f32.mrf.mxu0 }
 0x1d0   : > { %21378 = vst [vmem:[#allocation76_spill] sm:$0xff] %v17737_v40  ;;  %v17739_v50 = vpop.f32.mrf.mxu1  ;;  %v17741_v30 = vadd.f32 %v15118_v54, %v3550_v41 }
 0x1d1   : > { %21379 = vst [vmem:[#allocation77_spill] sm:$0xff] %v17739_v50  ;;  %v15087_v39 = vpop.f32.mrf.mxu0 }
 0x1d2   : > { %v15121_v51 = vpop.f32.mrf.mxu1  ;;  %v3553_v59 = vadd.f32 %v15087_v39, %v17638_v2 }
 0x1d3   : > { %v3496_v29 = vpop.f32.mrf.mxu0 }
 0x1d4   : > { %v4033_v55 = vpop.f32.mrf.mxu1  ;;  %v3551_v23 = vadd.f32 %v3496_v29, %v17643_v60  ;;  %v17745_v33 = vadd.f32 %v15121_v51, %v3553_v59 }
 0x1d5   : > { %v15088_v8 = vpop.f32.mrf.mxu0 }
 0x1d6   : > { %v15122_v6 = vpop.f32.mrf.mxu1  ;;  %v3554_v25 = vadd.f32 %v15088_v8, %v17649_v62  ;;  %v17748_v37 = vadd.f32 %v4033_v55, %v3551_v23 }
 0x1d7   : > { %v17750_v26 = vpop.f32.mrf.mxu0 }
 0x1d8   : > { %21380 = vst [vmem:[#allocation78_spill] sm:$0xff] %v17750_v26  ;;  %v17752_v54 = vpop.f32.mrf.mxu1  ;;  %v17754_v41 = vadd.f32 %v15122_v6, %v3554_v25 }
 0x1d9   : > { %21381 = vst [vmem:[#allocation79_spill] sm:$0xff] %v17752_v54  ;;  %v15091_v50 = vpop.f32.mrf.mxu0 }
 0x1da   : > { %v15125_v2 = vpop.f32.mrf.mxu1  ;;  %v3557_v39 = vadd.f32 %v15091_v50, %v17654_v5 }
 0x1db   : > { %v3512_v35 = vpop.f32.mrf.mxu0 }
 0x1dc   : > { %v4049_v60 = vpop.f32.mrf.mxu1  ;;  %v3555_v29 = vadd.f32 %v3512_v35, %v17657_v18  ;;  %v17758_v51 = vadd.f32 %v15125_v2, %v3557_v39 }
 0x1dd   : > { %v15092_v59 = vpop.f32.mrf.mxu0 }
 0x1de   : > { %v15126_v62 = vpop.f32.mrf.mxu1  ;;  %v3558_v55 = vadd.f32 %v15092_v59, %v17663_v57  ;;  %v17761_v23 = vadd.f32 %v4049_v60, %v3555_v29 }
 0x1df   : > { %v17763_v8 = vpop.f32.mrf.mxu0 }
 0x1e0   : > { %21382 = vst [vmem:[#allocation80_spill] sm:$0xff] %v17763_v8  ;;  %v17765_v6 = vpop.f32.mrf.mxu1  ;;  %v17767_v25 = vadd.f32 %v15126_v62, %v3558_v55 }
 0x1e1   : > { %21383 = vst [vmem:[#allocation81_spill] sm:$0xff] %v17765_v6  ;;  %v15131_v54 = vpop.f32.mrf.mxu0 }
 0x1e2   : > { %v15165_v5 = vpop.f32.mrf.mxu1  ;;  %v4552_v50 = vadd.f32 %v15131_v54, %v17667_v45 }
 0x1e3   : > { %v4423_v26 = vpop.f32.mrf.mxu0 }
 0x1e4   : > { %v5132_v35 = vpop.f32.mrf.mxu1  ;;  %v4550_v18 = vadd.f32 %v4423_v26, %v17670_v15  ;;  %v17771_v2 = vadd.f32 %v15165_v5, %v4552_v50 }
 0x1e5   : > { %v15132_v39 = vpop.f32.mrf.mxu0 }
 0x1e6   : > { %v15166_v57 = vpop.f32.mrf.mxu1  ;;  %v4553_v60 = vadd.f32 %v15132_v39, %v17676_v34  ;;  %v17774_v29 = vadd.f32 %v5132_v35, %v4550_v18 }
 0x1e7   : > { %v17776_v59 = vpop.f32.mrf.mxu0 }
 0x1e8   : > { %v17778_v62 = vpop.f32.mrf.mxu1  ;;  %v17780_v55 = vadd.f32 %v15166_v57, %v4553_v60 }
 0x1e9   : > { %v15135_v6 = vpop.f32.mrf.mxu0 }
 0x1ea   : > { %v15169_v45 = vpop.f32.mrf.mxu1  ;;  %v4556_v54 = vadd.f32 %v15135_v6, %v17680_v52 }
 0x1eb   : > { %v4439_v8 = vpop.f32.mrf.mxu0 }
 0x1ec   : > { %v5148_v15 = vpop.f32.mrf.mxu1  ;;  %v4554_v26 = vadd.f32 %v4439_v8, %v17683_v24  ;;  %v17784_v5 = vadd.f32 %v15169_v45, %v4556_v54 }
 0x1ed   : > { %v15136_v50 = vpop.f32.mrf.mxu0 }
 0x1ee   : > { %v17787_v34 = vadd.f32 %v15136_v50, %v17689_v21  ;;  %v17789_v35 = vadd.f32 %v5148_v15, %v4554_v26  ;;  %v17799_v24 = vpop.f32.mrf.mxu1 }
 0x1ef   : > { %v17791_v18 = vpop.f32.mrf.mxu0 }
 0x1f0   : > { %v17806_v54 = vpop.f32.mrf.mxu1 }
 0x1f1   : > { %v15139_v39 = vpop.f32.mrf.mxu0 }
 0x1f2   : > { %v17794_v57 = vadd.f32 %v15139_v39, %v17693_v47  ;;  %v17814_v50 = vpop.f32.mrf.mxu1 }
 0x1f3   : > { %v4455_v60 = vpop.f32.mrf.mxu0 }
 0x1f4   : > { %v17797_v52 = vadd.f32 %v4455_v60, %v17696_v20 }
 0x1f5   : > { %v15140_v6 = vpop.f32.mrf.mxu0 }
 0x1f6   : > { %v17802_v8 = vadd.f32 %v15140_v6, %v17702_v1  ;;  %v17821_v6 = vpop.f32.mrf.mxu1 }
 0x1f7   : > { %v17804_v21 = vpop.f32.mrf.mxu0 }
 0x1f9   : > { %v15143_v45 = vpop.f32.mrf.mxu0 }
 0x1fa   : > { %v17809_v15 = vadd.f32 %v15143_v45, %v17706_v9 }
 0x1fb   : > { %v4471_v47 = vpop.f32.mrf.mxu0 }
 0x1fc   : > { %v17812_v26 = vadd.f32 %v4471_v47, %v17709_v17  ;;  %v17829_v47 = vpop.f32.mrf.mxu1 }
 0x1fd   : > { %v15144_v20 = vpop.f32.mrf.mxu0 }
 0x1fe   : > { %v17817_v39 = vadd.f32 %v15144_v20, %v17715_v31  ;;  %v17836_v32 = vpop.f32.mrf.mxu1 }
 0x1ff   : > { %v17819_v1 = vpop.f32.mrf.mxu0 }
 0x201   : > { %v15147_v60 = vpop.f32.mrf.mxu0 }
 0x202   : > { %v17824_v40 = vadd.f32 %v15147_v60, %v17719_v61 }
 0x203   : > { %v4487_v9 = vpop.f32.mrf.mxu0 }
 0x204   : > { %v17827_v45 = vadd.f32 %v4487_v9, %v17722_v0  ;;  %v15880_v0 = vld [vmem:[%s20620_s1 + $0x4] ss:$8 sps:$4 sm:$0xff]  }
 0x205   : > { %v15148_v17 = vpop.f32.mrf.mxu0  ;;  %6146 = vmatprep.mubr.bf16.mxu1 %v15880_v0  ;;  %6496 = vmatprep.mubr.bf16.mxu0 %v15880_v0 }
 0x206   : > { %21384 = vst [vmem:[#allocation82_spill] sm:$0xff] %v17827_v45  ;;  %v17832_v49 = vadd.f32 %v15148_v17, %v17728_v28  ;;  %v17847_v28 = vpop.f32.mrf.mxu1 }
 0x207   : > { %v17834_v31 = vpop.f32.mrf.mxu0 }
 0x208   : > { %21385 = vst [vmem:[#allocation83_spill] sm:$0xff] %v17832_v49 }
 0x209   : > { %v15151_v20 = vpop.f32.mrf.mxu0 }
 0x20a   : > { %v17839_v44 = vadd.f32 %v15151_v20, %v17732_v4  ;;  %v17854_v20 = vpop.f32.mrf.mxu1 }
 0x20b   : > { %v4503_v61 = vpop.f32.mrf.mxu0 }
 0x20c   : > { %21386 = vst [vmem:[#allocation84_spill] sm:$0xff] %v17839_v44  ;;  %v17845_v60 = vadd.f32 %v4503_v61, %v17735_v63 }
 0x20d   : > { %v15152_v9 = vpop.f32.mrf.mxu0 }
 0x20e   : > { %21387 = vst [vmem:[#allocation85_spill] sm:$0xff] %v17845_v60  ;;  %v17850_v17 = vadd.f32 %v15152_v9, %v17741_v30  ;;  %v17862_v60 = vpop.f32.mrf.mxu1 }
 0x20f   : > { %v17852_v49 = vpop.f32.mrf.mxu0 }
 0x210   : > { %21388 = vst [vmem:[#allocation86_spill] sm:$0xff] %v17850_v17  ;;  %21389 = vst [vmem:[#allocation87_spill] sm:$0xff] %v17852_v49  ;;  %v17869_v17 = vpop.f32.mrf.mxu1 }
 0x211   : > { %v15155_v4 = vpop.f32.mrf.mxu0 }
 0x212   : > { %v17857_v44 = vadd.f32 %v15155_v4, %v17745_v33 }
 0x213   : > { %v4519_v45 = vpop.f32.mrf.mxu0 }
 0x214   : > { %v17860_v63 = vadd.f32 %v4519_v45, %v17748_v37  ;;  %v3150_v45 = vadd.f32 %v17501_v13, %v17508_v10  ;;  %v3154_v10 = vadd.f32 %v17525_v22, %v17532_v12 }
 0x215   : > { %v15156_v61 = vpop.f32.mrf.mxu0 }
 0x216   : > { %21390 = vst [vmem:[#allocation88_spill] sm:$0xff] %v17860_v63  ;;  %v17865_v0 = vadd.f32 %v15156_v61, %v17754_v41  ;;  %v17879_v63 = vpop.f32.mrf.mxu1 }
 0x217   : > { %v17867_v30 = vpop.f32.mrf.mxu0 }
 0x218   : > { %21391 = vst [vmem:[#allocation89_spill] sm:$0xff] %v17865_v0  ;;  %21392 = vst [vmem:[#allocation90_spill] sm:$0xff] %v17867_v30  ;;  %v3528_v0 = vadd.f32 %v17672_v36, %v3150_v45 }
 0x219   : > { %v15159_v9 = vpop.f32.mrf.mxu0 }
 0x21a   : > { %v17872_v49 = vadd.f32 %v15159_v9, %v17758_v51  ;;  %v4065_v51 = vadd.f32 %v17674_v7, %v3528_v0  ;;  %v17888_v9 = vpop.f32.mrf.mxu1  ;;  %v3532_v7 = vadd.f32 %v17685_v56, %v3154_v10  ;;  %v5266_v56 = vadd.f32 %v17799_v24, %v17787_v34 }
 0x21b   : > { %v4535_v33 = vpop.f32.mrf.mxu0 }
 0x21c   : > { %v17875_v4 = vadd.f32 %v4535_v33, %v17761_v23 }
 0x21d   : > { %v15160_v37 = vpop.f32.mrf.mxu0 }
 0x21e   : > { %21393 = vst [vmem:[#allocation91_spill] sm:$0xff] %v17875_v4  ;;  %v17882_v41 = vadd.f32 %v15160_v37, %v17767_v25  ;;  %v4551_v4 = vadd.f32 %v17776_v59, %v4065_v51  ;;  %v4069_v59 = vadd.f32 %v17687_v14, %v3532_v7  ;;  %v3158_v14 = vadd.f32 %v17549_v3, %v17556_v53 }
 0x21f   : > { %v17884_v61 = vpop.f32.mrf.mxu0 }
 0x220   : > { %21394 = vst [vmem:[#allocation92_spill] sm:$0xff] %v17882_v41  ;;  %21395 = vst [vmem:[#allocation93_spill] sm:$0xff] %v17884_v61  ;;  %v5260_v37 = vadd.f32 %v17778_v62, %v4551_v4  ;;  %v17896_v41 = vpop.f32.mrf.mxu1  ;;  %v4555_v4 = vadd.f32 %v17791_v18, %v4069_v59  ;;  %v3536_v34 = vadd.f32 %v17698_v46, %v3158_v14 }
 0x221   : > { %v15199_v30 = vpop.f32.mrf.mxu0 }
 0x222   : > { %v5826_v23 = vadd.f32 %v15199_v30, %v17771_v2  ;;  %v5264_v10 = vadd.f32 %v17806_v54, %v4555_v4  ;;  %v4073_v54 = vadd.f32 %v17700_v42, %v3536_v34 }
 0x223   : > { %v5697_v33 = vpop.f32.mrf.mxu0 }
 0x224   : > { %v5824_v13 = vadd.f32 %v5697_v33, %v17774_v29  ;;  %v5858_v45 = vmax.f32 %v5826_v23, 0.0  ;;  %v17901_v29 = vpop.f32.mrf.mxu1 }
 0x225   : > { %v15200_v25 = vpop.f32.mrf.mxu0 }
 0x226   : > { %v5827_v36 = vadd.f32 %v15200_v25, %v17780_v55  ;;  %v5856_v33 = vmax.f32 %v5824_v13, 0.0 }
 0x227   : > { %v5700_v0 = vpop.f32.mrf.mxu0 }
 0x228   : > { %v5859_v2 = vmax.f32 %v5827_v36, 0.0  ;;  %v5825_v30 = vadd.f32 %v5700_v0, %v5260_v37  ;;  %v17913_v37 = vpop.f32.mrf.mxu1 }
 0x229   : > { %v15203_v51 = vpop.f32.mrf.mxu0 }
 0x22a   : > { %v5889_v22 = vpack.c.bf16 %v5859_v2, %v5858_v45  ;;  %v5857_v12 = vmax.f32 %v5825_v30, 0.0  ;;  %v5830_v62 = vadd.f32 %v15203_v51, %v17784_v5  ;;  %v17922_v30 = vpop.f32.mrf.mxu1 }
 0x22b   : > { %v5713_v61 = vpop.f32.mrf.mxu0 }
 0x22c   : > { %v5920_v55 = vshrl.u32 %v5889_v22, 16  ;;  %v17907_v23 = vpack.c.bf16 %v5857_v12, %v5856_v33  ;;  %v5828_v13 = vadd.f32 %v5713_v61, %v17789_v35  ;;  %v5923_v36 = vshll.u32 %v5889_v22, 16 }
 0x22d   : > { %v15204_v25 = vpop.f32.mrf.mxu0  ;;  %v5862_v24 = vmax.f32 %v5830_v62, 0.0  ;;  %v5269_v35 = vadd.f32 %v17814_v50, %v17794_v57  ;;  %v4559_v22 = vadd.f32 %v17804_v21, %v4073_v54  ;;  %v5267_v12 = vadd.f32 %v17821_v6, %v17797_v52 }
 0x22e   : > { %v5922_v5 = vrot.slane %v5920_v55, 7  ;;  %v5913_v18 = vshrl.u32 %v17907_v23, 16  ;;  %v5831_v7 = vadd.f32 %v15204_v25, %v5266_v56  ;;  %v5860_v46 = vmax.f32 %v5828_v13, 0.0  ;;  %v17936_v13 = vpop.f32.mrf.mxu1 }
 0x22f   : > { %v5716_v0 = vpop.f32.mrf.mxu0  ;;  %v5270_v57 = vadd.f32 %v17829_v47, %v17802_v8  ;;  %v3162_v56 = vadd.f32 %v17573_v27, %v17580_v11  ;;  %v5268_v55 = vadd.f32 %v17836_v32, %v4559_v22  ;;  %v17943_v8 = vld [vmem:[%s20622_s3] ss:$0 sm:$0xff]  ;;  %v21397_v47 = vld [vmem:[#allocation30_spill] sm:$0xff]  ;;  %v5273_v54 = vadd.f32 %v17847_v28, %v17809_v15 }
 0x230   : > { %v5925_v45 = vor.u32 %v5923_v36, %v5922_v5  ;;  %v17917_v2 = vrot.slane %v5913_v18, 7  ;;  %v5863_v3 = vmax.f32 %v5831_v7, 0.0  ;;  %v5829_v53 = vadd.f32 %v5716_v0, %v5264_v10 }
 0x231   : > { %v15207_v61 = vpop.f32.mrf.mxu0  ;;  %v1434_v36 = vadd.f32 %v17943_v8, %v21397_v47  ;;  %v3540_v27 = vadd.f32 %v17711_v48, %v3162_v56  ;;  %v5274_v15 = vadd.f32 %v17862_v60, %v17817_v39 }
 0x232   : > { %v17926_v59 = vsel %vm21396_vm14, %v17917_v2, %v5925_v45  ;;  %v5891_v51 = vpack.c.bf16 %v5863_v3, %v5862_v24  ;;  %v5861_v33 = vmax.f32 %v5829_v53, 0.0  ;;  %v5834_v62 = vadd.f32 %v15207_v61, %v5269_v35  ;;  %v21398_v45 = vld [vmem:[#allocation32_spill] sm:$0xff]  ;;  %vm21414_vm14 = vmmov %vm21399_vm1 }
 0x233   : > { %v5729_v42 = vpop.f32.mrf.mxu0  ;;  %v2144_v3 = vadd.f32 %v21398_v45, %v1434_v36  ;;  %v4077_v53 = vadd.f32 %v17713_v43, %v3540_v27  ;;  %v5271_v43 = vadd.f32 %v17854_v20, %v17812_v26 }
 0x234   : > { %v5936_v50 = vshrl.u32 %v5891_v51, 16  ;;  %v5890_v4 = vpack.c.bf16 %v5861_v33, %v5860_v46  ;;  %v5832_v14 = vadd.f32 %v5729_v42, %v5267_v12  ;;  %v5939_v25 = vshll.u32 %v5891_v51, 16  ;;  %v17953_v46 = vpop.f32.mrf.mxu1 }
 0x235   : > { %v15208_v10 = vpop.f32.mrf.mxu0  ;;  %v5866_v32 = vmax.f32 %v5834_v62, 0.0  ;;  %v2712_v12 = vadd.f32 %v17604_v58, %v2144_v3  ;;  %v4563_v62 = vadd.f32 %v17819_v1, %v4077_v53 }
 0x236   : > { %v17938_v21 = vrot.slane %v5936_v50, 7  ;;  %v5928_v52 = vshrl.u32 %v5890_v4, 16  ;;  %v5835_v6 = vadd.f32 %v15208_v10, %v5270_v57  ;;  %v5931_v11 = vshll.u32 %v5890_v4, 16  ;;  %v17969_v1 = vpop.f32.mrf.mxu1 }
 0x237   : > { %v5732_v18 = vpop.f32.mrf.mxu0  ;;  %v5864_v35 = vmax.f32 %v5832_v14, 0.0  ;;  %v3166_v56 = vadd.f32 %v17606_v19, %v2712_v12 }
 0x238   : > { %v5941_v7 = vor.u32 %v5939_v25, %v17938_v21  ;;  %v5930_v34 = vrot.slane %v5928_v52, 7  ;;  %v5867_v24 = vmax.f32 %v5835_v6, 0.0  ;;  %v5833_v0 = vadd.f32 %v5732_v18, %v5268_v55  ;;  %v21401_v52 = vld [vmem:[#allocation34_spill] sm:$0xff] }
 0x239   : > { %v15211_v61 = vpop.f32.mrf.mxu0  ;;  %v5272_v55 = vadd.f32 %v17869_v17, %v4563_v62  ;;  %v1438_v39 = vadd.f32 %v17943_v8, %v21401_v52  ;;  %v3544_v60 = vadd.f32 %v17724_v16, %v3166_v56 }
 0x23a   : > { %v5933_v48 = vor.u32 %v5931_v11, %v5930_v34  ;;  %v17956_v51 = vsel %vm21399_vm1, %v5930_v34, %v5941_v7  ;;  %v5893_v33 = vpack.c.bf16 %v5867_v24, %v5866_v32  ;;  %v5865_v22 = vmax.f32 %v5833_v0, 0.0  ;;  %v21402_v11 = vld [vmem:[#allocation15_spill] sm:$0xff]  ;;  %v17981_v0 = vpop.f32.mrf.mxu1 }
 0x23b   : > { %v5838_v42 = vadd.f32 %v15211_v61, %v5273_v54  ;;  %v5745_v57 = vpop.f32.mrf.mxu0  ;;  %v2148_v32 = vadd.f32 %v21402_v11, %v1438_v39  ;;  %v4081_v18 = vadd.f32 %v17726_v38, %v3544_v60  ;;  %v5277_v7 = vadd.f32 %v17879_v63, %v17824_v40  ;;  %v21404_v54 = vld [vmem:[#allocation52_spill] sm:$0xff]  ;;  %v21406_v40 = vld [vmem:[#allocation83_spill] sm:$0xff] }
 0x23c   : > { %v17965_v28 = vsel %vm21400_vm13, %v5922_v5, %v5933_v48  ;;  %v5952_v50 = vshrl.u32 %v5893_v33, 16  ;;  %v5892_v4 = vpack.c.bf16 %v5865_v22, %v5864_v35  ;;  %v5836_v58 = vadd.f32 %v5745_v57, %v5271_v43  ;;  %v21405_v48 = vld [vmem:[#allocation82_spill] sm:$0xff]  ;;  %vm21424_vm13 = vmmov %vm21399_vm1 }
 0x23d   : > { %v15212_v14 = vpop.f32.mrf.mxu0  ;;  %v5955_v26 = vshll.u32 %v5893_v33, 16  ;;  %v5870_v6 = vmax.f32 %v5838_v42, 0.0  ;;  %v2716_v35 = vadd.f32 %v21404_v54, %v2148_v32  ;;  %v4567_v61 = vadd.f32 %v17834_v31, %v4081_v18  ;;  %v21408_v42 = vld [vmem:[#allocation67_spill] sm:$0xff] }
 0x23e   : > { %v17971_v10 = vrot.slane %v5952_v50, 7  ;;  %v5944_v20 = vshrl.u32 %v5892_v4, 16  ;;  %v5839_v25 = vadd.f32 %v15212_v14, %v5274_v15  ;;  %v5947_v5 = vshll.u32 %v5892_v4, 16  ;;  %v17998_v4 = vpop.f32.mrf.mxu1  ;;  %v21416_v54 = vld [vmem:[#allocation87_spill] sm:$0xff] }
 0x23f   : > { %v5748_v47 = vpop.f32.mrf.mxu0  ;;  %v5868_v34 = vmax.f32 %v5836_v58, 0.0  ;;  %v5275_v38 = vadd.f32 %v17888_v9, %v21405_v48  ;;  %v5278_v63 = vadd.f32 %v17896_v41, %v21406_v40  ;;  %v3170_v57 = vadd.f32 %v21408_v42, %v2716_v35  ;;  %v21409_v41 = vld [vmem:[#allocation40_spill] sm:$0xff] }
 0x240   : > { %v5957_v19 = vor.u32 %v5955_v26, %v17971_v10  ;;  %v5946_v17 = vrot.slane %v5944_v20, 7  ;;  %v5871_v36 = vmax.f32 %v5839_v25, 0.0  ;;  %v5837_v27 = vadd.f32 %v5748_v47, %v5272_v55  ;;  %v5231_v18 = vpop.f32.mrf.mxu1 }
 0x241   : > { %v15215_v24 = vpop.f32.mrf.mxu0  ;;  %v5276_v15 = vadd.f32 %v17901_v29, %v4567_v61  ;;  %v1442_v14 = vadd.f32 %v17943_v8, %v21409_v41  ;;  %v21417_v61 = vld [vmem:[#allocation85_spill] sm:$0xff]  ;;  %v21420_v41 = vld [vmem:[#allocation44_spill] sm:$0xff] }
 0x242   : > { %v5949_v16 = vor.u32 %v5947_v5, %v5946_v17  ;;  %v17984_v45 = vsel %vm21403_vm12, %v5946_v17, %v5957_v19  ;;  %v5895_v3 = vpack.c.bf16 %v5871_v36, %v5870_v6  ;;  %v5869_v53 = vmax.f32 %v5837_v27, 0.0  ;;  %v21411_v6 = vld [vmem:[#allocation41_spill] sm:$0xff]  ;;  %v21413_v36 = vld [vmem:[#allocation84_spill] sm:$0xff]  ;;  %vm21429_vm12 = vmmov %vm21399_vm1 }
 0x243   : > { %v5842_v33 = vadd.f32 %v15215_v24, %v5277_v7  ;;  %v5761_v22 = vpop.f32.mrf.mxu0  ;;  %v2152_v47 = vadd.f32 %v21411_v6, %v1442_v14  ;;  %v21412_v19 = vld [vmem:[#allocation77_spill] sm:$0xff]  ;;  %v5281_v27 = vadd.f32 %v17913_v37, %v21413_v36  ;;  %v5279_v48 = vadd.f32 %v17922_v30, %v21417_v61  ;;  %v21421_v14 = vld [vmem:[#allocation78_spill] sm:$0xff] }
 0x244   : > { %v17994_v12 = vsel %vm21407_vm6, %v17938_v21, %v5949_v16  ;;  %v5968_v62 = vshrl.u32 %v5895_v3, 16  ;;  %v5894_v43 = vpack.c.bf16 %v5869_v53, %v5868_v34  ;;  %v5840_v50 = vadd.f32 %v5761_v22, %v5275_v38  ;;  %v21410_v21 = vld [vmem:[#allocation76_spill] sm:$0xff]  ;;  %v21418_v22 = vld [vmem:[#allocation86_spill] sm:$0xff]  ;;  %vm21433_vm6 = vmmov %vm21399_vm1 }
 0x245   : > { %v15216_v31 = vpop.f32.mrf.mxu0  ;;  %v5971_v56 = vshll.u32 %v5895_v3, 16  ;;  %v3548_v26 = vadd.f32 %v21410_v21, %v3170_v57  ;;  %v5874_v25 = vmax.f32 %v5842_v33, 0.0  ;;  %v21415_v3 = vld [vmem:[#allocation35_spill] sm:$0xff]  ;;  %v5282_v37 = vadd.f32 %v17936_v13, %v21418_v22 }
 0x246   : > { %v18000_v9 = vrot.slane %v5968_v62, 7  ;;  %v5960_v55 = vshrl.u32 %v5894_v43, 16  ;;  %v5843_v58 = vadd.f32 %v15216_v31, %v5278_v63  ;;  %v5963_v20 = vshll.u32 %v5894_v43, 16  ;;  %v21419_v43 = vld [vmem:[#allocation38_spill] sm:$0xff]  ;;  %v15193_v31 = vpop.f32.mrf.mxu1  ;;  %v21430_v22 = vld [vmem:[#allocation75_spill] sm:$0xff] }
 0x247   : > { %v5764_v52 = vpop.f32.mrf.mxu0  ;;  %v4085_v17 = vadd.f32 %v21412_v19, %v3548_v26  ;;  %v5872_v11 = vmax.f32 %v5840_v50, 0.0  ;;  %v2720_v53 = vadd.f32 %v21415_v3, %v2152_v47  ;;  %v1446_v13 = vadd.f32 %v17943_v8, %v21420_v41 }
 0x248   : > { %v5973_v39 = vor.u32 %v5971_v56, %v18000_v9  ;;  %v5962_v29 = vrot.slane %v5960_v55, 7  ;;  %v5875_v60 = vmax.f32 %v5843_v58, 0.0  ;;  %v5841_v5 = vadd.f32 %v5764_v52, %v5276_v15  ;;  %v5244_v8 = vpop.f32.mrf.mxu1 }
 0x249   : > { %v15219_v32 = vpop.f32.mrf.mxu0  ;;  %v4571_v35 = vadd.f32 %v21416_v54, %v4085_v17  ;;  %v3174_v42 = vadd.f32 %v21419_v43, %v2720_v53  ;;  %v5285_v47 = vadd.f32 %v17969_v1, %v17857_v44  ;;  %v21427_v53 = vld [vmem:[#allocation88_spill] sm:$0xff] }
 0x24a   : > { %v5965_v7 = vor.u32 %v5963_v20, %v5962_v29  ;;  %v18011_v34 = vsel %vm21414_vm14, %v5962_v29, %v5973_v39  ;;  %v5897_v24 = vpack.c.bf16 %v5875_v60, %v5874_v25  ;;  %v5873_v16 = vmax.f32 %v5841_v5, 0.0  ;;  %v21422_v29 = vld [vmem:[#allocation46_spill] sm:$0xff]  ;;  %v21423_v5 = vld [vmem:[#allocation79_spill] sm:$0xff]  ;;  %vm21437_vm14 = vmmov %vm21399_vm1 }
 0x24b   : > { %v5846_v38 = vadd.f32 %v15219_v32, %v5281_v27  ;;  %v5777_v33 = vpop.f32.mrf.mxu0  ;;  %v5280_v57 = vadd.f32 %v17953_v46, %v4571_v35  ;;  %v2156_v60 = vadd.f32 %v21422_v29, %v1446_v13  ;;  %v5283_v54 = vadd.f32 %v17981_v0, %v21427_v53 }
 0x24c   : > { %v18021_v40 = vsel %vm21399_vm1, %v17971_v10, %v5965_v7  ;;  %v5984_v63 = vshrl.u32 %v5897_v24, 16  ;;  %v5896_v62 = vpack.c.bf16 %v5873_v16, %v5872_v11  ;;  %v5844_v15 = vadd.f32 %v5777_v33, %v5279_v48  ;;  %v21425_v7 = vld [vmem:[#allocation74_spill] sm:$0xff]  ;;  %v21428_v48 = vld [vmem:[#allocation89_spill] sm:$0xff] }
 0x24d   : > { %v15220_v50 = vpop.f32.mrf.mxu0  ;;  %v5987_v30 = vshll.u32 %v5897_v24, 16  ;;  %v3552_v10 = vadd.f32 %v21421_v14, %v3174_v42  ;;  %v5878_v26 = vmax.f32 %v5846_v38, 0.0  ;;  %v2724_v24 = vadd.f32 %v21425_v7, %v2156_v60  ;;  %v21426_v16 = vld [vmem:[#allocation90_spill] sm:$0xff]  ;;  %v15194_v42 = vpop.f32.mrf.mxu1 }
 0x24e   : > { %v18025_v56 = vrot.slane %v5984_v63, 7  ;;  %v5976_v55 = vshrl.u32 %v5896_v62, 16  ;;  %v5847_v58 = vadd.f32 %v15220_v50, %v5282_v37  ;;  %v5979_v21 = vshll.u32 %v5896_v62, 16 }
 0x24f   : > { %v5780_v20 = vpop.f32.mrf.mxu0  ;;  %v4089_v6 = vadd.f32 %v21423_v5, %v3552_v10  ;;  %v5876_v19 = vmax.f32 %v5844_v15, 0.0  ;;  %v5286_v44 = vadd.f32 %v17998_v4, %v21428_v48  ;;  %v3178_v37 = vadd.f32 %v21430_v22, %v2724_v24  ;;  %v21434_v5 = vld [vmem:[#allocation93_spill] sm:$0xff] }
 0x250   : > { %v5989_v25 = vor.u32 %v5987_v30, %v18025_v56  ;;  %v5978_v52 = vrot.slane %v5976_v55, 7  ;;  %v5879_v46 = vmax.f32 %v5847_v58, 0.0  ;;  %v5845_v39 = vadd.f32 %v5780_v20, %v5280_v57  ;;  %v21431_v30 = vld [vmem:[#allocation80_spill] sm:$0xff] }
 0x251   : > { %v15223_v17 = vpop.f32.mrf.mxu0  ;;  %v4575_v3 = vadd.f32 %v21426_v16, %v4089_v6  ;;  %v3556_v55 = vadd.f32 %v21431_v30, %v3178_v37 }
 0x252   : > { %v5981_v36 = vor.u32 %v5979_v21, %v5978_v52  ;;  %v18036_v27 = vsel %vm21424_vm13, %v5978_v52, %v5989_v25  ;;  %v5899_v11 = vpack.c.bf16 %v5879_v46, %v5878_v26  ;;  %v5877_v32 = vmax.f32 %v5845_v39, 0.0  ;;  %v21432_v21 = vld [vmem:[#allocation81_spill] sm:$0xff]  ;;  %v5247_v52 = vpop.f32.mrf.mxu1  ;;  %vm21438_vm13 = vmmov %vm21399_vm1 }
 0x253   : > { %v5850_v35 = vadd.f32 %v15223_v17, %v5285_v47  ;;  %v5793_v61 = vpop.f32.mrf.mxu0  ;;  %v5284_v63 = vadd.f32 %v5231_v18, %v4575_v3  ;;  %v4093_v26 = vadd.f32 %v21432_v21, %v3556_v55  ;;  %v5289_v18 = vadd.f32 %v15193_v31, %v17872_v49  ;;  %v21435_v47 = vld [vmem:[#allocation91_spill] sm:$0xff] }
 0x254   : > { %v18046_v1 = vsel %vm21429_vm12, %v18000_v9, %v5981_v36  ;;  %v6000_v38 = vshrl.u32 %v5899_v11, 16  ;;  %v5898_v33 = vpack.c.bf16 %v5877_v32, %v5876_v19  ;;  %v5848_v62 = vadd.f32 %v5793_v61, %v5283_v54 }
 0x255   : > { %v15224_v43 = vpop.f32.mrf.mxu0  ;;  %v6003_v15 = vshll.u32 %v5899_v11, 16  ;;  %v5882_v4 = vmax.f32 %v5850_v35, 0.0  ;;  %v4579_v6 = vadd.f32 %v21434_v5, %v4093_v26  ;;  %v5287_v19 = vadd.f32 %v5244_v8, %v21435_v47  ;;  %v21436_v11 = vld [vmem:[#allocation92_spill] sm:$0xff] }
 0x256   : > { %v6002_v57 = vrot.slane %v6000_v38, 7  ;;  %v5992_v0 = vshrl.u32 %v5898_v33, 16  ;;  %v5851_v50 = vadd.f32 %v15224_v43, %v5286_v44  ;;  %v5995_v58 = vshll.u32 %v5898_v33, 16 }
 0x257   : > { %v5796_v41 = vpop.f32.mrf.mxu0  ;;  %v5880_v20 = vmax.f32 %v5848_v62, 0.0  ;;  %v5290_v32 = vadd.f32 %v15194_v42, %v21436_v11  ;;  %v5288_v24 = vadd.f32 %v5247_v52, %v4579_v6 }
 0x258   : > { %v6005_v13 = vor.u32 %v6003_v15, %v6002_v57  ;;  %v5994_v9 = vrot.slane %v5992_v0, 7  ;;  %v5883_v14 = vmax.f32 %v5851_v50, 0.0  ;;  %v5849_v10 = vadd.f32 %v5796_v41, %v5284_v63 }
 0x259   : > { %v15227_v25 = vpop.f32.mrf.mxu0 }
 0x25a   : > { %v5997_v46 = vor.u32 %v5995_v58, %v5994_v9  ;;  %v18053_v39 = vsel %vm21433_vm6, %v5994_v9, %v6005_v13  ;;  %v5901_v29 = vpack.c.bf16 %v5883_v14, %v5882_v4  ;;  %v5881_v60 = vmax.f32 %v5849_v10, 0.0  ;;  %v21440_v4 = vld [vmem:[#allocation23_spill] sm:$0xff] }
 0x25b   : > { %v5854_v17 = vadd.f32 %v15227_v25, %v5289_v18  ;;  %v5809_v36 = vpop.f32.mrf.mxu0  ;;  %vm21441_vm12 = vcmp.ne.s16.totalorder %v21440_v4, 0  ;;  %v21444_v18 = vld [vmem:[#allocation50_spill] sm:$0xff]  ;;  %v21447_v25 = vld [vmem:[#allocation16_spill] sm:$0xff] }
 0x25c   : > { %v18060_v49 = vsel %vm21437_vm14, %v18025_v56, %v5997_v46  ;;  %v6016_v31 = vshrl.u32 %v5901_v29, 16  ;;  %v5900_v7 = vpack.c.bf16 %v5881_v60, %v5880_v20  ;;  %v5852_v16 = vadd.f32 %v5809_v36, %v5287_v19  ;;  %vm21442_vm6 = vmmov %vm21441_vm12 }
 0x25d   : > { %v15228_v3 = vpop.f32.mrf.mxu0  ;;  %v6019_v54 = vshll.u32 %v5901_v29, 16  ;;  %v5886_v44 = vmax.f32 %v5854_v17, 0.0  ;;  %v6313_v41 = vsel %vm21441_vm12, 0, %v18021_v40  ;;  %vm21443_vm14 = vmmov %vm21399_vm1  ;;  %vm21448_vm12 = vcmp.ne.s16.totalorder %v21447_v25, 0 }
 0x25e   : > { %v6018_v53 = vrot.slane %v6016_v31, 7  ;;  %v6008_v35 = vshrl.u32 %v5900_v7, 16  ;;  %v5855_v61 = vadd.f32 %v15228_v3, %v5290_v32  ;;  %v6011_v48 = vshll.u32 %v5900_v7, 16  ;;  %vm21449_vm7 = vmmov %vm21442_vm6 }
 0x25f   : > { %v5812_v8 = vpop.f32.mrf.mxu0  ;;  %v5884_v63 = vmax.f32 %v5852_v16, 0.0  ;;  %v6372_v10 = vshll.u32 %v6313_v41, 16  ;;  %vm21450_vm9 = vmmov %vm21443_vm14 }
 0x260   : > { %v6021_v38 = vor.u32 %v6019_v54, %v6018_v53  ;;  %v6010_v33 = vrot.slane %v6008_v35, 7  ;;  %v5887_v22 = vmax.f32 %v5855_v61, 0.0  ;;  %v5853_v37 = vadd.f32 %v5812_v8, %v5288_v24  ;;  %vm21453_vm15 = vmmov %vm21449_vm7 }
 0x261   : > { %v6312_v47 = vsel %vm21453_vm15, 0, %v17984_v45  ;;  %v6374_v17 = vrot.slane %v6372_v10, 1  ;;  %v6376_v24 = vshrl.u32 %v6313_v41, 16 }
 0x262   : > { %v6013_v62 = vor.u32 %v6011_v48, %v6010_v33  ;;  %v18063_v56 = vsel %vm21399_vm1, %v6010_v33, %v6021_v38  ;;  %v5903_v43 = vpack.c.bf16 %v5887_v22, %v5886_v44  ;;  %v5885_v42 = vmax.f32 %v5853_v37, 0.0 }
 0x263   : > { %vm21445_vm1 = vnez %v21444_v18  ;;  %v6364_v3 = vshll.u32 %v6312_v47, 16  ;;  %v6378_v48 = vor.u32 %v6376_v24, %v6374_v17  ;;  %v6368_v10 = vshrl.u32 %v6312_v47, 16 }
 0x264   : > { %v18066_v15 = vsel %vm21438_vm13, %v6002_v57, %v6013_v62  ;;  %v6032_v0 = vshrl.u32 %v5903_v43, 16  ;;  %v5902_v50 = vpack.c.bf16 %v5885_v42, %v5884_v63  ;;  %v6035_v55 = vshll.u32 %v5903_v43, 16  ;;  %vm20811_vm13 = vmneg %vm21445_vm1 }
 0x265   : > { %v6320_v57 = vsel %vm21442_vm6, 0, %v18063_v56  ;;  %v6319_v46 = vsel %vm21449_vm7, 0, %v18066_v15  ;;  %vm20807_vm6 = vmneg %vm21308_vm11  ;;  %v6366_v43 = vrot.slane %v6364_v3, 1 }
 0x266   : > { %v18068_v30 = vrot.slane %v6032_v0, 7  ;;  %v6024_v58 = vshrl.u32 %v5902_v50, 16  ;;  %v6027_v14 = vshll.u32 %v5902_v50, 16  ;;  %v6428_v6 = vshll.u32 %v6320_v57, 16 }
 0x267   : > { %v6420_v32 = vshll.u32 %v6319_v46, 16  ;;  %v6432_v22 = vshrl.u32 %v6320_v57, 16  ;;  %v6424_v41 = vshrl.u32 %v6319_v46, 16 }
 0x268   : > { %21439 = vst [vmem:[#allocation30_spill] sm:$0xff] %v18068_v30  ;;  %v6037_v13 = vor.u32 %v6035_v55, %v18068_v30  ;;  %v6026_v9 = vrot.slane %v6024_v58, 7  ;;  %v6430_v61 = vrot.slane %v6428_v6, 1  ;;  %v21514_v30 = vld [vmem:[#allocation68_spill] sm:$0xff] }
 0x269   : > { %v6422_v37 = vrot.slane %v6420_v32, 1  ;;  %v21470_v32 = vld [vmem:[#allocation39_spill] sm:$0xff] }
 0x26a   : > { %v6029_v21 = vor.u32 %v6027_v14, %v6026_v9  ;;  %v18078_v26 = vsel %vm21443_vm14, %v6026_v9, %v6037_v13  ;;  %vm21452_vm14 = vmmov %vm21449_vm7  ;;  %v6434_v58 = vor.u32 %v6432_v22, %v6430_v61  ;;  %v5916_v9 = vshll.u32 %v17907_v23, 16 }
 0x26b   : > { %v6322_v52 = vsel %vm21448_vm12, 0, %v18078_v26  ;;  %v18098_v5 = vsel %vm21452_vm14, 0, %v18011_v34  ;;  %vm20805_vm12 = vmneg %vm16503_vm2 }
 0x26c   : > { %v18091_v29 = vsel %vm21450_vm9, %v6018_v53, %v6029_v21  ;;  %vm21454_vm9 = vmmov %vm21449_vm7  ;;  %v6444_v11 = vshll.u32 %v6322_v52, 16  ;;  %v6380_v16 = vshll.u32 %v18098_v5, 16  ;;  %v6426_v52 = vor.u32 %v6424_v41, %v6422_v37 }
 0x26d   : > { %14270 = vmatprep.subr.msk.bf16.mxu1 %vm20811_vm13, %v18091_v29  ;;  %v6321_v19 = vsel %vm21454_vm9, 0, %v18091_v29  ;;  %vm21455_vm7 = vmneg %vm16531_vm4  ;;  %v6318_v8 = vsel %vm21454_vm9, 0, %v18053_v39  ;;  %v6317_v0 = vsel %vm21454_vm9, 0, %v18060_v49  ;;  %v5918_v6 = vor.u32 %v5916_v9, %v17917_v2 }
 0x26e   : > { %14271 = vmatpush3.bf16.msk.msra.mxu1 %vm21455_vm7, %v18021_v40  ;;  %v6436_v36 = vshll.u32 %v6321_v19, 16  ;;  %vm21456_vm15 = vmmov %vm21454_vm9  ;;  %v6440_v35 = vshrl.u32 %v6321_v19, 16  ;;  %v6446_v33 = vrot.slane %v6444_v11, 1  ;;  %v18141_v62 = vrot.slane %v6380_v16, 1 }
 0x26f   : > { %v6311_v31 = vsel %vm21456_vm15, 0, %v17994_v12  ;;  %14272 = vmatprep.subr.msk.bf16.mxu1 %vm20807_vm6, %v18063_v56  ;;  %vm20806_vm14 = vmneg %vm21304_vm3  ;;  %v6412_v13 = vshll.u32 %v6318_v8, 16  ;;  %v6404_v46 = vshll.u32 %v6317_v0, 16  ;;  %v6370_v19 = vor.u32 %v6368_v10, %v6366_v43 }
 0x270   : > { %v6438_v54 = vrot.slane %v6436_v36, 1  ;;  %v6356_v44 = vshll.u32 %v6311_v31, 16  ;;  %vm20810_vm7 = vmneg %vm16477_vm8  ;;  %v6360_v36 = vshrl.u32 %v6311_v31, 16 }
 0x271   : > { %vm21461_vm15 = vmmov %vm21454_vm9  ;;  %v6414_v24 = vrot.slane %v6412_v13, 1 }
 0x272   : > { %14273 = vmatpush3.bf16.msk.msra.mxu1 %vm20805_vm12, %v17984_v45  ;;  %v18133_v38 = vor.u32 %v6440_v35, %v6438_v54  ;;  %v6310_v42 = vsel %vm21461_vm15, 0, %v17956_v51  ;;  %vm21462_vm12 = vsmask.f32 7424  ;;  %v6358_v57 = vrot.slane %v6356_v44, 1  ;;  %vm21468_vm15 = vmmov %vm21454_vm9 }
 0x273   : > { %14274 = vmatprep.subr.msk.bf16.mxu1 %vm20806_vm14, %v18066_v15  ;;  %vm20808_vm14 = vmneg %vm21294_vm10  ;;  %v6309_v23 = vsel %vm21468_vm15, 0, %v17965_v28  ;;  %v6348_v11 = vshll.u32 %v6310_v42, 16  ;;  %v6416_v35 = vshrl.u32 %v6318_v8, 16  ;;  %v21479_v8 = vld [vmem:[#allocation37_spill] sm:$0xff]  ;;  %v6352_v10 = vshrl.u32 %v6310_v42, 16  ;;  %v21489_v42 = vld [vmem:[#allocation24_spill] sm:$0xff] }
 0x274   : > { %21459 = vst [vmem:[#allocation32_spill] sm:$0xff] %v18133_v38  ;;  %v6447_v50 = vsel %vm21462_vm12, %v18133_v38, %v6446_v33  ;;  %vm21464_vm6 = vmmov %vm21462_vm12  ;;  %v6362_v2 = vor.u32 %v6360_v36, %v6358_v57  ;;  %v6340_v3 = vshll.u32 %v6309_v23, 16  ;;  %v21476_v33 = vld [vmem:[#allocation25_spill] sm:$0xff] }
 0x275   : > { %14318 = vmatprep.subr.bf16.mxu0 %v6447_v50  ;;  %v18156_v14 = vsel %vm21464_vm6, %v6378_v48, %v18141_v62  ;;  %vm21466_vm12 = vmmov %vm21464_vm6  ;;  %v6406_v48 = vrot.slane %v6404_v46, 1  ;;  %v6350_v22 = vrot.slane %v6348_v11, 1  ;;  %v6418_v50 = vor.u32 %v6416_v35, %v6414_v24 }
 0x276   : > { %21465 = vst [vmem:[#allocation34_spill] sm:$0xff] %v18156_v14  ;;  %14275 = vmatpush3.bf16.msk.msra.mxu1 %vm20810_vm7, %v17994_v12  ;;  %14319 = vmatpush3.bf16.msra.mxu0 %v18156_v14  ;;  %v18164_v21 = vsel %vm21466_vm12, %v6434_v58, %v6438_v54  ;;  %vm20809_vm6 = vmneg %vm16455_vm5  ;;  %v18180_v16 = vsel %vm21466_vm12, %v6370_v19, %v6374_v17  ;;  %v6316_v54 = vsel %vm21468_vm15, 0, %v18036_v27  ;;  %v21474_v17 = vld [vmem:[#allocation17_spill] sm:$0xff]  ;;  %vm21477_vm15 = vnez %v21476_v33  ;;  %v21487_v19 = vld [vmem:[#allocation22_spill] sm:$0xff] }
 0x277   : > { %21467 = vst [vmem:[#allocation15_spill] sm:$0xff] %v18164_v21  ;;  %14276 = vmatprep.subr.msk.bf16.mxu1 %vm20808_vm14, %v18053_v39  ;;  %14320 = vmatprep.subr.bf16.mxu0 %v18164_v21  ;;  %vm20812_vm9 = vmneg %vm21292_vm0  ;;  %vm21480_vm7 = vnez %v21479_v8  ;;  %v6408_v58 = vshrl.u32 %v6317_v0, 16  ;;  %v6396_v41 = vshll.u32 %v6316_v54, 16  ;;  %v6354_v36 = vor.u32 %v6352_v10, %v6350_v22 }
 0x278   : > { %21471 = vst [vmem:[#allocation52_spill] sm:$0xff] %v18180_v16  ;;  %vm21472_vm14 = vmmov %vm21466_vm12  ;;  %vm21475_vm12 = vnez %v21474_v17  ;;  %v6344_v11 = vshrl.u32 %v6309_v23, 16  ;;  %vm21493_vm0 = vsmask.f32 7424  ;;  %v6400_v10 = vshrl.u32 %v6316_v54, 16 }
 0x279   : > { %v18191_v31 = vsel %vm21472_vm14, %v6426_v52, %v6430_v61  ;;  %v18195_v44 = vsel %vm21475_vm12, 0, %v5918_v6  ;;  %vm21478_vm14 = vcmp.ne.s16.totalorder %v21440_v4, 0  ;;  %vm20816_vm13 = vmneg %vm21480_vm7  ;;  %v18215_v52 = vrot.slane %v6340_v3, 1 }
 0x27a   : > { %14277 = vmatpush3.bf16.msk.msra.mxu1 %vm20809_vm6, %v17956_v51  ;;  %14321 = vmatpush3.bf16.msra.mxu0 %v18180_v16  ;;  %21473 = vst [vmem:[#allocation82_spill] sm:$0xff] %v18191_v31  ;;  %vm20813_vm6 = vmneg %vm21477_vm15  ;;  %v6315_v61 = vsel %vm21478_vm14, 0, %v18046_v1  ;;  %v6410_v46 = vor.u32 %v6408_v58, %v6406_v48  ;;  %v6398_v3 = vrot.slane %v6396_v41, 1  ;;  %v18238_v35 = vsel %vm21493_vm0, %v6354_v36, %v6358_v57  ;;  %v21497_v57 = vld [vmem:[#allocation21_spill] sm:$0xff] }
 0x27b   : > { %14278 = vmatprep.subr.msk.bf16.mxu1 %vm20812_vm9, %v18060_v49  ;;  %14322 = vmatprep.subr.bf16.mxu0 %v18191_v31  ;;  %vm21481_vm12 = vmmov %vm21478_vm14  ;;  %vm21482_vm9 = vsmask.f32 7424  ;;  %21484 = vst [vmem:[#allocation67_spill] sm:$0xff] %v18215_v52  ;;  %v6388_v6 = vshll.u32 %v6315_v61, 16  ;;  %v21499_v36 = vld [vmem:[#allocation33_spill] sm:$0xff]  ;;  %v6392_v25 = vshrl.u32 %v6315_v61, 16 }
 0x27c   : > { %v6308_v13 = vsel %vm21481_vm12, 0, %v17926_v59  ;;  %v18213_v9 = vsel %vm21482_vm9, %v6362_v2, %v6366_v43  ;;  %vm21485_vm14 = vmmov %vm21482_vm9  ;;  %vm21488_vm12 = vcmp.ne.s16.totalorder %v21487_v19, 0  ;;  %vm21490_vm9 = vnez %v21489_v42  ;;  %v21491_v2 = vld [vmem:[#allocation36_spill] sm:$0xff]  ;;  %21494 = vst [vmem:[#allocation76_spill] sm:$0xff] %v18238_v35 }
 0x27d   : > { %21483 = vst [vmem:[#allocation83_spill] sm:$0xff] %v18213_v9  ;;  %v18223_v0 = vsel %vm21485_vm14, %v6418_v50, %v6422_v37  ;;  %v6307_v43 = vsel %vm21488_vm12, 0, %v18195_v44  ;;  %v6332_v37 = vshll.u32 %v6308_v13, 16  ;;  %vm21492_vm14 = vnez %v21491_v2  ;;  %vm21495_vm12 = vmmov %vm21493_vm0 }
 0x27e   : > { %14279 = vmatpush3.bf16.msk.msra.mxu1 %vm20813_vm6, %v17965_v28  ;;  %14323 = vmatpush3.bf16.msra.mxu0 %v18213_v9  ;;  %21486 = vst [vmem:[#allocation40_spill] sm:$0xff] %v18223_v0  ;;  %vm20817_vm6 = vmneg %vm21490_vm9  ;;  %v6346_v50 = vor.u32 %v6344_v11, %v18215_v52  ;;  %v6324_v58 = vshll.u32 %v6307_v43, 16  ;;  %v18247_v23 = vsel %vm21495_vm12, %v6410_v46, %v6414_v24  ;;  %v6390_v19 = vrot.slane %v6388_v6, 1 }
 0x27f   : > { %14280 = vmatprep.subr.msk.bf16.mxu1 %vm20816_vm13, %v18036_v27  ;;  %14324 = vmatprep.subr.bf16.mxu0 %v18223_v0  ;;  %vm20819_vm15 = vmneg %vm21492_vm14  ;;  %21496 = vst [vmem:[#allocation41_spill] sm:$0xff] %v18247_v23  ;;  %vm21498_vm0 = vnez %v21497_v57  ;;  %v6334_v41 = vrot.slane %v6332_v37, 1  ;;  %v6402_v11 = vor.u32 %v6400_v10, %v6398_v3  ;;  %v6336_v54 = vshrl.u32 %v6308_v13, 16 }
 0x280   : > { %vm20844_vm13 = vmneg %vm21498_vm0  ;;  %v18259_v24 = vsel %vm21495_vm12, %v6346_v50, %v6350_v22  ;;  %v6326_v46 = vrot.slane %v6324_v58, 1  ;;  %v6394_v37 = vor.u32 %v6392_v25, %v6390_v19  ;;  %v6328_v61 = vshrl.u32 %v6307_v43, 16  ;;  %v18279_v50 = vld [vmem:[%s20620_s1] ss:$8 sps:$4 sm:$0xff]   ;;  %v18289_v43 = vld [vmem:[%s20620_s1 + $0x14] ss:$8 sps:$4 sm:$0xff]  }
 0x281   : > { %21501 = vst [vmem:[#allocation77_spill] sm:$0xff] %v18259_v24  ;;  %v6338_v22 = vor.u32 %v6336_v54, %v6334_v41  ;;  %v21504_v58 = vmov 0   ;;  %v6384_v10 = vshrl.u32 %v18098_v5, 16  ;;  %v21509_v5 = vld [vmem:[#allocation18_spill] sm:$0xff] }
 0x282   : > { %14281 = vmatpush3.bf16.msk.msra.mxu1 %vm20817_vm6, %v17926_v59  ;;  %14325 = vmatpush3.bf16.msra.mxu0 %v18238_v35  ;;  %vm21500_vm6 = vnez %v21499_v36 }
 0x283   : > { %14282 = vmatprep.subr.msk.bf16.mxu1 %vm20819_vm15, %v18046_v1  ;;  %14326 = vmatprep.subr.bf16.mxu0 %v18247_v23  ;;  %vm20820_vm9 = vmneg %vm21500_vm6  ;;  %v6343_v13 = vsel %vm21495_vm12, %v6338_v22, %v18215_v52  ;;  %vm21528_vm6 = vcmask 1046528  }
 0x284   : > { %vm21502_vm15 = vmmov %vm21495_vm12 }
 0x285   : > { %v18267_v6 = vsel %vm21502_vm15, %v6402_v11, %v6406_v48  ;;  %v6330_v48 = vor.u32 %v6328_v61, %v6326_v46  ;;  %vm21505_vm15 = vmmov %vm21495_vm12  ;;  %v6386_v11 = vor.u32 %v6384_v10, %v18141_v62  ;;  %v18310_v62 = vld [vmem:[%s20620_s1 + $0x24] ss:$8 sps:$4 sm:$0xff]   ;;  %v15892_v61 = vld [vmem:[%s20623_s4 + $0x18] sm:$0xff]  }
 0x286   : > { %14283 = vmatpush3.bf16.msk.msra.mxu1 %vm20844_vm13, %v18195_v44  ;;  %14327 = vmatpush3.bf16.msra.mxu0 %v18259_v24  ;;  %21503 = vst [vmem:[#allocation84_spill] sm:$0xff] %v18267_v6  ;;  %v18283_v25 = vsel %vm21505_vm15, %v6394_v37, %v6398_v3  ;;  %v18305_v37 = vld [vmem:[%s20620_s1 + $0x10] ss:$8 sps:$4 sm:$0xff]   ;;  %v15895_v10 = vld [vmem:[%s20623_s4] sm:$0xff]   ;;  %vm21533_vm14 = vmmov %vm21528_vm6 }
 0x287   : > { %14284 = vmatprep.subr.msk.bf16.mxu1 %vm20820_vm9, %v18011_v34  ;;  %14328 = vmatprep.subr.bf16.mxu0 %v18267_v6  ;;  %21506 = vst [vmem:[#allocation35_spill] sm:$0xff] %v18283_v25  ;;  %v6335_v54 = vsel %vm21495_vm12, %v6330_v48, %v6334_v41  ;;  %vm21507_vm9 = vmmov %vm21495_vm12  ;;  %v18324_v41 = vld [vmem:[%s20620_s1 + $0x34] ss:$8 sps:$4 sm:$0xff]   ;;  %v15894_v48 = vld [vmem:[%s20623_s4 + $0x8] sm:$0xff]  }
 0x288   : > { %v18296_v22 = vsel %vm21507_vm9, %v6386_v11, %v6390_v19  ;;  %vm21510_vm15 = vmmov %vm21507_vm9  ;;  %v18319_v19 = vld [vmem:[%s20620_s1 + $0x20] ss:$8 sps:$4 sm:$0xff]   ;;  %v15896_v11 = vld [vmem:[%s20623_s4 + $0x38] sm:$0xff]   ;;  %vm20845_vm9 = vcmask 523264  }
 0x289   : > { %21508 = vst [vmem:[#allocation87_spill] sm:$0xff] %v18296_v22  ;;  %v6327_v3 = vsel %vm21510_vm15, %v21509_v5, %v6326_v46  ;;  %v18333_v46 = vld [vmem:[%s20620_s1 + $0x30] ss:$8 sps:$4 sm:$0xff]   ;;  %vm21515_vm15 = vcmp.ne.s16.totalorder %v21514_v30, 0 }
 0x28a   : > { %14285 = vmatpush3.bf16.msra.mxu1 %v21504_v58  ;;  %14329 = vmatpush3.bf16.msra.mxu0 %v6343_v13  ;;  %21511 = vst [vmem:[#allocation85_spill] sm:$0xff] %v18333_v46  ;;  %v15893_v13 = vld [vmem:[%s20623_s4 + $0x10] sm:$0xff]  }
 0x28b   : > { %14330 = vmatprep.subr.bf16.mxu0 %v18283_v25  ;;  %15229 = vmatprep.subr.bf16.mxu1 %v15892_v61 }
 0x28d   : > { %6147 = vmatmul.mubr.bf16.vlgmr.msra.gmra.mxu1 %v18279_v50 }
 0x28e   : > { %14331 = vmatpush3.bf16.msra.mxu0 %v6335_v54  ;;  %6154 = vmatprep.mubr.bf16.mxu1 %v18289_v43 }
 0x28f   : > { %14332 = vmatprep.subr.bf16.mxu0 %v18296_v22  ;;  %15230 = vmatpush3.bf16.msra.mxu1 %v15892_v61 }
 0x290   : > { %15231 = vmatprep.subr.bf16.mxu1 %v15893_v13 }
 0x292   : > { %14333 = vmatpush3.bf16.msra.mxu0 %v6327_v3 }
 0x293   : > { %15232 = vmatpush3.bf16.msra.mxu1 %v15893_v13 }
 0x294   : > { %15233 = vmatprep.subr.bf16.mxu1 %v15894_v48 }
 0x295   : > { %6155 = vmatmul.mubr.bf16.gmra.mxu1 %v18305_v37  ;;  %6497 = vmatmul.mubr.bf16.vlgmr.msra.gmra.mxu0 %v18279_v50 }
 0x296   : > { %6162 = vmatprep.mubr.bf16.mxu1 %v18310_v62  ;;  %6504 = vmatprep.mubr.bf16.mxu0 %v18289_v43 }
 0x297   : > { %15234 = vmatpush3.bf16.msra.mxu1 %v15894_v48 }
 0x298   : > { %15235 = vmatprep.subr.bf16.mxu1 %v15895_v10 }
 0x29b   : > { %15236 = vmatpush3.bf16.msra.mxu1 %v15895_v10 }
 0x29c   : > { %15245 = vmatprep.subr.bf16.mxu1 %v15896_v11 }
 0x29d   : > { %6163 = vmatmul.mubr.bf16.gmra.mxu1 %v18319_v19  ;;  %6505 = vmatmul.mubr.bf16.gmra.mxu0 %v18305_v37 }
 0x29e   : > { %6170 = vmatprep.mubr.bf16.mxu1 %v18324_v41  ;;  %6512 = vmatprep.mubr.bf16.mxu0 %v18310_v62 }
 0x2a5   : > { %6171 = vmatmul.mubr.bf16.gmra.mxu1 %v18333_v46  ;;  %6513 = vmatmul.mubr.bf16.gmra.mxu0 %v18319_v19 }
 0x2a6   : > { %6520 = vmatprep.mubr.bf16.mxu0 %v18324_v41 }
 0x2ad   : > { %6521 = vmatmul.mubr.bf16.gmra.mxu0 %v18333_v46 }
 0x34d   : > { %v14286_v54 = vpop.f32.mrf.mxu1 }
 0x34f   : > { %v14287_v3 = vpop.f32.mrf.mxu1 }
 0x350   : > { %v14288_v52 = vadd.f32 %v14287_v3, %v14286_v54 }
 0x351   : > { %v14289_v61 = vpop.f32.mrf.mxu1 }
 0x353   : > { %v14290_v58 = vpop.f32.mrf.mxu1 }
 0x354   : > { %v14291_v6 = vadd.f32 %v14290_v58, %v14289_v61  ;;  %v15897_v58 = vld [vmem:[%s20623_s4 + $0x30] sm:$0xff]  }
 0x355   : > { %v14292_v13 = vpop.f32.mrf.mxu1  ;;  %v14334_v48 = vpop.f32.mrf.mxu0 }
 0x356   : > { %v6179_v24 = vpack.c.bf16 %v14291_v6, %v14288_v52 }
 0x357   : > { %v14293_v23 = vpop.f32.mrf.mxu1  ;;  %v14335_v35 = vpop.f32.mrf.mxu0 }
 0x358   : > { %15237 = vmatprep.mubr.msk.bf16.mxu1 %vm20845_vm9, %v6179_v24  ;;  %v14294_v10 = vadd.f32 %v14293_v23, %v14292_v13  ;;  %v15898_v23 = vld [vmem:[%s20623_s4 + $0x28] sm:$0xff]  }
 0x359   : > { %v14295_v0 = vpop.f32.mrf.mxu1  ;;  %v14337_v9 = vpop.f32.mrf.mxu0 }
 0x35b   : > { %v14296_v31 = vpop.f32.mrf.mxu1  ;;  %v14338_v16 = vpop.f32.mrf.mxu0 }
 0x35c   : > { %v14297_v21 = vadd.f32 %v14296_v31, %v14295_v0 }
 0x35d   : > { %v14298_v14 = vpop.f32.mrf.mxu1  ;;  %v14340_v38 = vpop.f32.mrf.mxu0 }
 0x35e   : > { %v6180_v22 = vpack.c.bf16 %v14297_v21, %v14294_v10 }
 0x35f   : > { %v14299_v54 = vpop.f32.mrf.mxu1  ;;  %v14341_v3 = vpop.f32.mrf.mxu0 }
 0x360   : > { %15238 = vmatmul.mubr.msk.bf16.vlgmr.msra.gmra.mxu1 %vm20845_vm9, %v6180_v22  ;;  %v14300_v6 = vadd.f32 %v14299_v54, %v14298_v14  ;;  %v15899_v22 = vld [vmem:[%s20623_s4 + $0x20] sm:$0xff]   ;;  %v6666_v14 = vsel %vm21515_vm15, 0, %v18078_v26 }
 0x361   : > { %15246 = vmatpush3.bf16.msra.mxu1 %v15896_v11  ;;  %v14301_v52 = vpop.f32.mrf.mxu1  ;;  %v14343_v24 = vpop.f32.mrf.mxu0  ;;  %v21512_v11 = vld [vmem:[#allocation71_spill] sm:$0xff]  ;;  %v6713_v36 = vrot.slane %v6666_v14, 1 }
 0x362   : > { %15247 = vmatprep.subr.bf16.mxu1 %v15897_v58  ;;  %vm21513_vm12 = vcmp.ne.s16.totalorder %v21512_v11, 0 }
 0x363   : > { %v14302_v31 = vpop.f32.mrf.mxu1  ;;  %v14344_v0 = vpop.f32.mrf.mxu0  ;;  %v6665_v25 = vsel %vm21513_vm12, 0, %v18091_v29  ;;  %vm21516_vm12 = vcmask 1046528  }
 0x364   : > { %v14303_v21 = vadd.f32 %v14302_v31, %v14301_v52  ;;  %v6711_v54 = vrot.slane %v6665_v25, 1  ;;  %v14336_v31 = vadd.f32 %v14335_v35, %v14334_v48  ;;  %v14342_v48 = vadd.f32 %v14341_v3, %v14340_v38 }
 0x365   : > { %15248 = vmatpush3.bf16.msra.mxu1 %v15897_v58  ;;  %v14304_v61 = vpop.f32.mrf.mxu1  ;;  %v14346_v13 = vpop.f32.mrf.mxu0 }
 0x366   : > { %v6181_v10 = vpack.c.bf16 %v14303_v21, %v14300_v6  ;;  %15249 = vmatprep.subr.bf16.mxu1 %v15898_v23  ;;  %v14339_v6 = vadd.f32 %v14338_v16, %v14337_v9  ;;  %v6714_v2 = vsel %vm21516_vm12, %v6711_v54, %v6713_v36  ;;  %v21517_v16 = vld [vmem:[#allocation60_spill] sm:$0xff]  ;;  %v21519_v36 = vld [vmem:[#allocation61_spill] sm:$0xff] }
 0x367   : > { %v14305_v4 = vpop.f32.mrf.mxu1  ;;  %v14347_v17 = vpop.f32.mrf.mxu0  ;;  %vm21518_vm15 = vcmp.ne.s16.totalorder %v21517_v16, 0  ;;  %vm21520_vm12 = vcmp.ne.s16.totalorder %v21519_v36, 0 }
 0x368   : > { %15241 = vmatprep.mubr.msk.bf16.mxu1 %vm20845_vm9, %v6181_v10  ;;  %v14306_v11 = vadd.f32 %v14305_v4, %v14304_v61  ;;  %v6529_v8 = vpack.c.bf16 %v14339_v6, %v14336_v31  ;;  %v14348_v25 = vadd.f32 %v14347_v17, %v14346_v13  ;;  %v6657_v9 = vsel %vm21518_vm15, 0, %v18021_v40  ;;  %v21521_v61 = vld [vmem:[#allocation69_spill] sm:$0xff]  ;;  %v21530_v6 = vld [vmem:[#allocation58_spill] sm:$0xff] }
 0x369   : > { %15250 = vmatpush3.bf16.msra.mxu1 %v15898_v23  ;;  %v14307_v58 = vpop.f32.mrf.mxu1  ;;  %v14349_v52 = vpop.f32.mrf.mxu0  ;;  %v14345_v23 = vadd.f32 %v14344_v0, %v14343_v24  ;;  %vm21522_vm13 = vcmp.ne.s16.totalorder %v21521_v61, 0  ;;  %v21525_v24 = vld [vmem:[#allocation59_spill] sm:$0xff]  ;;  %vm21531_vm0 = vcmp.ne.s16.totalorder %v21530_v6, 0 }
 0x36a   : > { %15251 = vmatprep.subr.bf16.mxu1 %v15899_v22 }
 0x36b   : > { %v14308_v21 = vpop.f32.mrf.mxu1  ;;  %v14350_v57 = vpop.f32.mrf.mxu0  ;;  %v6530_v13 = vpack.c.bf16 %v14345_v23, %v14342_v48  ;;  %v21534_v23 = vld [vmem:[#allocation65_spill] sm:$0xff] }
 0x36c   : > { %v14309_v46 = vadd.f32 %v14308_v21, %v14307_v58  ;;  %v14351_v35 = vadd.f32 %v14350_v57, %v14349_v52  ;;  %v21523_v57 = vld [vmem:[#allocation66_spill] sm:$0xff]  ;;  %v6655_v21 = vsel %vm21531_vm0, 0, %v17994_v12 }
 0x36d   : > { %15252 = vmatpush3.bf16.msra.mxu1 %v15899_v22  ;;  %v14352_v42 = vpop.f32.mrf.mxu0  ;;  %vm21524_vm15 = vcmp.ne.s16.totalorder %v21523_v57, 0 }
 0x36e   : > { %v6182_v30 = vpack.c.bf16 %v14309_v46, %v14306_v11  ;;  %14366 = vmatprep.subr.bf16.mxu1 %v6714_v2  ;;  %v18381_v46 = vsel %vm21520_vm12, 0, %v18011_v34  ;;  %v6695_v2 = vrot.slane %v6657_v9, 1  ;;  %v6531_v17 = vpack.c.bf16 %v14351_v35, %v14348_v25 }
 0x36f   : > { %v14353_v10 = vpop.f32.mrf.mxu0  ;;  %v6697_v22 = vrot.slane %v18381_v46, 1  ;;  %v6663_v38 = vsel %vm21524_vm15, 0, %v18066_v15  ;;  %vm21527_vm12 = vcmask 523264   ;;  %v6691_v35 = vrot.slane %v6655_v21, 1 }
 0x370   : > { %15242 = vmatmul.mubr.msk.bf16.gmra.mxu1 %vm20845_vm9, %v6182_v30  ;;  %v6664_v30 = vsel %vm21522_vm13, 0, %v18063_v56  ;;  %v14354_v14 = vadd.f32 %v14353_v10, %v14352_v42  ;;  %vm21529_vm13 = vmmov %vm21528_vm6  ;;  %v6707_v31 = vrot.slane %v6663_v38, 1  ;;  %v21537_v10 = vld [vmem:[#allocation64_spill] sm:$0xff] }
 0x371   : > { %15253 = vmatprep.mubr.msk.bf16.mxu1 %vm20845_vm9, %v6529_v8  ;;  %v14355_v4 = vpop.f32.mrf.mxu0  ;;  %v6709_v3 = vrot.slane %v6664_v30, 1  ;;  %vm21526_vm9 = vcmp.ne.s16.totalorder %v21525_v24, 0  ;;  %v6698_v11 = vsel %vm21528_vm6, %v6695_v2, %v6697_v22  ;;  %vm21532_vm15 = vmmov %vm21527_vm12  ;;  %vm21535_vm6 = vcmp.ne.s16.totalorder %v21534_v23, 0  ;;  %v21539_v30 = vld [vmem:[#allocation57_spill] sm:$0xff]  ;;  %v21544_v38 = vld [vmem:[#allocation56_spill] sm:$0xff] }
 0x372   : > { %v6656_v0 = vsel %vm21526_vm9, 0, %v17984_v45  ;;  %v6662_v42 = vsel %vm21535_vm6, 0, %v18053_v39  ;;  %vm21536_vm9 = vmmov %vm21529_vm13  ;;  %vm21540_vm0 = vcmp.ne.s16.totalorder %v21539_v30, 0  ;;  %vm21545_vm6 = vcmp.ne.s16.totalorder %v21544_v38, 0 }
 0x373   : > { %v14356_v8 = vpop.f32.mrf.mxu0  ;;  %v6712_v52 = vsel %vm21529_vm13, %v6709_v3, %v6711_v54  ;;  %v6693_v25 = vrot.slane %v6656_v0, 1  ;;  %v6710_v54 = vsel %vm21536_vm9, %v6707_v31, %v6709_v3  ;;  %v6705_v46 = vrot.slane %v6662_v42, 1  ;;  %vm21542_vm13 = vmmov %vm21532_vm15  ;;  %v18420_v0 = vld [vmem:[%s20620_s1 + $0x4] ss:$8 sps:$4 sm:$0xff]   ;;  %v21551_v42 = vld [vmem:[#allocation55_spill] sm:$0xff] }
 0x374   : > { %v14357_v58 = vadd.f32 %v14356_v8, %v14355_v4  ;;  %v6653_v3 = vsel %vm21545_vm6, 0, %v17965_v28 }
 0x375   : > { %v6696_v9 = vsel %vm21533_vm14, %v6693_v25, %v6695_v2  ;;  %vm21541_vm14 = vmmov %vm21536_vm9 }
 0x376   : > { %v6532_v48 = vpack.c.bf16 %v14357_v58, %v14354_v14  ;;  %v6694_v2 = vsel %vm21541_vm14, %v6691_v35, %v6693_v25  ;;  %v6687_v58 = vrot.slane %v6653_v3, 1  ;;  %v21549_v25 = vld [vmem:[#allocation62_spill] sm:$0xff] }
 0x377   : > { %vm21550_vm14 = vcmp.ne.s16.totalorder %v21549_v25, 0 }
 0x378   : > { %15254 = vmatmul.mubr.msk.bf16.vlgmr.msra.gmra.mxu1 %vm21527_vm12, %v6530_v13  ;;  %vm21538_vm12 = vcmp.ne.s16.totalorder %v21537_v10, 0 }
 0x379   : > { %14367 = vmatpush3.bf16.msra.mxu1 %v6698_v11  ;;  %15257 = vmatprep.mubr.msk.bf16.mxu1 %vm21532_vm15, %v6531_v17  ;;  %v6661_v4 = vsel %vm21538_vm12, 0, %v18060_v49  ;;  %v6654_v17 = vsel %vm21540_vm0, 0, %v17956_v51  ;;  %vm21543_vm15 = vmmov %vm21536_vm9 }
 0x37a   : > { %14368 = vmatprep.subr.bf16.mxu1 %v6712_v52  ;;  %v6708_v8 = vsel %vm21543_vm15, %v6705_v46, %v6707_v31  ;;  %v6703_v13 = vrot.slane %v6661_v4, 1  ;;  %v6689_v11 = vrot.slane %v6654_v17, 1  ;;  %v21546_v52 = vld [vmem:[#allocation63_spill] sm:$0xff]  ;;  %vm21548_vm0 = vmmov %vm21536_vm9 }
 0x37b   : > { %vm21547_vm12 = vcmp.ne.s16.totalorder %v21546_v52, 0  ;;  %vm21553_vm15 = vmmov %vm21548_vm0 }
 0x37c   : > { %v6692_v14 = vsel %vm21536_vm9, %v6689_v11, %v6691_v35  ;;  %v6660_v31 = vsel %vm21547_vm12, 0, %v18036_v27  ;;  %v6706_v21 = vsel %vm21548_vm0, %v6703_v13, %v6705_v46  ;;  %v6690_v35 = vsel %vm21553_vm15, %v6687_v58, %v6689_v11  ;;  %vm21554_vm6 = vmmov %vm21548_vm0 }
 0x37d   : > { %14369 = vmatpush3.bf16.msra.mxu1 %v6696_v9  ;;  %v6659_v9 = vsel %vm21550_vm14, 0, %v18046_v1  ;;  %vm21557_vm12 = vmmov %vm21548_vm0 }
 0x37e   : > { %14370 = vmatprep.subr.bf16.mxu1 %v6710_v54  ;;  %v6699_v17 = vrot.slane %v6659_v9, 1  ;;  %vm21558_vm14 = vmmov %vm21548_vm0  ;;  %v21581_v9 = vld [vmem:[#allocation85_spill] sm:$0xff] }
 0x37f   : > { %vm21560_vm15 = vmmov %vm21548_vm0 }
 0x380   : > { %15258 = vmatmul.mubr.msk.bf16.gmra.mxu1 %vm21542_vm13, %v6532_v48  ;;  %v6701_v48 = vrot.slane %v6660_v31, 1  ;;  %vm21552_vm13 = vcmp.ne.s16.totalorder %v21551_v42, 0 }
 0x381   : > { %14371 = vmatpush3.bf16.msra.mxu1 %v6694_v2  ;;  %6763 = vmatprep.mubr.bf16.mxu1 %v18420_v0  ;;  %v6652_v54 = vsel %vm21552_vm13, 0, %v17926_v59  ;;  %v21555_v2 = vld [vmem:[#allocation53_spill] sm:$0xff]  ;;  %vm21559_vm13 = vmmov %vm21548_vm0 }
 0x382   : > { %14372 = vmatprep.subr.bf16.mxu1 %v6708_v8  ;;  %v6704_v4 = vsel %vm21554_vm6, %v6701_v48, %v6703_v13  ;;  %vm21556_vm9 = vcmp.ne.s16.totalorder %v21555_v2, 0  ;;  %v6685_v8 = vrot.slane %v6652_v54, 1  ;;  %v6702_v31 = vsel %vm21548_vm0, %v6699_v17, %v6701_v48  ;;  %vm21561_vm6 = vmneg %vm21445_vm1  ;;  %v21582_v48 = vld [vmem:[#allocation21_spill] sm:$0xff]  ;;  %v15902_v2 = vld [vmem:[%s20623_s4 + $0x48] sm:$0xff]  }
 0x383   : > { %v6651_v46 = vsel %vm21556_vm9, 0, %v18195_v44  ;;  %v6700_v11 = vsel %vm21559_vm13, %v6697_v22, %v6699_v17  ;;  %vm21562_vm9 = vmneg %vm16531_vm4  ;;  %v21575_v22 = vld [vmem:[#allocation24_spill] sm:$0xff]  ;;  %v21585_v54 = vld [vmem:[#allocation33_spill] sm:$0xff] }
 0x384   : > { %v6688_v3 = vsel %vm21557_vm12, %v6685_v8, %v6687_v58  ;;  %vm21563_vm12 = vmneg %vm21308_vm11  ;;  %v21578_v58 = vld [vmem:[#allocation36_spill] sm:$0xff]  ;;  %v15901_v17 = vld [vmem:[%s20623_s4 + $0x50] sm:$0xff]  }
 0x385   : > { %14373 = vmatpush3.bf16.msra.mxu1 %v6692_v14  ;;  %v6683_v14 = vrot.slane %v6651_v46, 1  ;;  %vm21564_vm0 = vmneg %vm16503_vm2  ;;  %v15903_v46 = vld [vmem:[%s20623_s4 + $0x40] sm:$0xff]  }
 0x386   : > { %14374 = vmatprep.subr.bf16.mxu1 %v6706_v21  ;;  %vm21565_vm1 = vmneg %vm21304_vm3 }
 0x387   : > { %v6686_v21 = vsel %vm21558_vm14, %v6683_v14, %v6685_v8  ;;  %v6684_v13 = vsel %vm21560_vm15, %v21509_v5, %v6683_v14  ;;  %vm21566_vm14 = vmneg %vm16477_vm8  ;;  %v15904_v8 = vld [vmem:[%s20623_s4 + $0x78] sm:$0xff]  }
 0x388   : > { %vm21567_vm13 = vmneg %vm21294_vm10 }
 0x389   : > { %14375 = vmatpush3.bf16.msra.mxu1 %v6690_v35  ;;  %vm21568_vm15 = vmneg %vm16455_vm5  ;;  %v21588_v35 = vld [vmem:[#allocation54_spill] sm:$0xff] }
 0x38a   : > { %14376 = vmatprep.subr.bf16.mxu1 %v6704_v4  ;;  %v15900_v4 = vld [vmem:[%s20623_s4 + $0x58] sm:$0xff]  }
 0x38b   : > { %15261 = vmatprep.subr.bf16.mxu0 %v15900_v4 }
 0x38c   : > { %15262 = vmatpush3.bf16.msra.mxu0 %v15900_v4  ;;  %v13664_v4 = vld [vmem:[%s20624_s5] ss:$0 sm:$0xff] }
 0x38d   : > { %14377 = vmatpush3.bf16.msra.mxu1 %v6688_v3  ;;  %15263 = vmatprep.subr.bf16.mxu0 %v15901_v17 }
 0x38e   : > { %14378 = vmatprep.subr.bf16.mxu1 %v6702_v31 }
 0x390   : > { %15264 = vmatpush3.bf16.msra.mxu0 %v15901_v17 }
 0x391   : > { %14379 = vmatpush3.bf16.msra.mxu1 %v6686_v21  ;;  %15265 = vmatprep.subr.bf16.mxu0 %v15902_v2 }
 0x392   : > { %14380 = vmatprep.subr.bf16.mxu1 %v6700_v11 }
 0x394   : > { %15266 = vmatpush3.bf16.msra.mxu0 %v15902_v2 }
 0x395   : > { %14381 = vmatpush3.bf16.msra.mxu1 %v6684_v13  ;;  %15267 = vmatprep.subr.bf16.mxu0 %v15903_v46 }
 0x396   : > { %14414 = vmatprep.subr.msk.bf16.mxu1 %vm21561_vm6, %v18078_v26  ;;  %vm21569_vm6 = vnez %v21470_v32 }
 0x398   : > { %6764 = vmatmul.mubr.bf16.vlgmr.msra.gmra.mxu1 %v18279_v50  ;;  %15268 = vmatpush3.bf16.msra.mxu0 %v15903_v46 }
 0x399   : > { %14415 = vmatpush3.bf16.msk.msra.mxu1 %vm21562_vm9, %v18011_v34  ;;  %6771 = vmatprep.mubr.bf16.mxu1 %v18289_v43  ;;  %vm21570_vm9 = vmneg %vm21569_vm6 }
 0x39a   : > { %14416 = vmatprep.subr.msk.bf16.mxu1 %vm21563_vm12, %v18091_v29  ;;  %vm21571_vm12 = vnez %v21476_v33  ;;  %15277 = vmatprep.subr.bf16.mxu0 %v15904_v8 }
 0x39d   : > { %14417 = vmatpush3.bf16.msk.msra.mxu1 %vm21564_vm0, %v18021_v40  ;;  %vm21572_vm0 = vmneg %vm21571_vm12 }
 0x39e   : > { %14418 = vmatprep.subr.msk.bf16.mxu1 %vm21565_vm1, %v18063_v56  ;;  %vm21574_vm1 = vmneg %vm21480_vm7 }
 0x3a0   : > { %6772 = vmatmul.mubr.bf16.gmra.mxu1 %v18305_v37 }
 0x3a1   : > { %14419 = vmatpush3.bf16.msk.msra.mxu1 %vm21566_vm14, %v17984_v45  ;;  %6779 = vmatprep.mubr.bf16.mxu1 %v18310_v62  ;;  %vm21576_vm14 = vnez %v21575_v22 }
 0x3a2   : > { %14420 = vmatprep.subr.msk.bf16.mxu1 %vm21567_vm13, %v18066_v15  ;;  %vm21577_vm13 = vmneg %vm21576_vm14 }
 0x3a5   : > { %14421 = vmatpush3.bf16.msk.msra.mxu1 %vm21568_vm15, %v17994_v12  ;;  %vm21579_vm15 = vnez %v21578_v58 }
 0x3a6   : > { %14422 = vmatprep.subr.msk.bf16.mxu1 %vm21570_vm9, %v18053_v39  ;;  %vm21580_vm9 = vmneg %vm21579_vm15 }
 0x3a8   : > { %6780 = vmatmul.mubr.bf16.gmra.mxu1 %v18319_v19 }
 0x3a9   : > { %14423 = vmatpush3.bf16.msk.msra.mxu1 %vm21572_vm0, %v17956_v51  ;;  %6787 = vmatprep.mubr.bf16.mxu1 %v18324_v41  ;;  %vm21583_vm0 = vnez %v21582_v48 }
 0x3aa   : > { %14424 = vmatprep.subr.msk.bf16.mxu1 %vm21574_vm1, %v18060_v49  ;;  %vm21584_vm12 = vmneg %vm21583_vm0  ;;  %vm21586_vm1 = vnez %v21585_v54 }
 0x3ab   : > { %vm21587_vm7 = vmneg %vm21586_vm1 }
 0x3ad   : > { %14425 = vmatpush3.bf16.msk.msra.mxu1 %vm21577_vm13, %v17965_v28  ;;  %vm21589_vm13 = vnez %v21588_v35 }
 0x3ae   : > { %14426 = vmatprep.subr.msk.bf16.mxu1 %vm21580_vm9, %v18036_v27  ;;  %vm20862_vm14 = vmneg %vm21589_vm13 }
 0x3b0   : > { %6788 = vmatmul.mubr.bf16.gmra.mxu1 %v21581_v9 }
 0x3b1   : > { %14427 = vmatpush3.bf16.msk.msra.mxu1 %vm21584_vm12, %v17926_v59  ;;  %6966 = vmatprep.mubr.bf16.mxu1 %v18420_v0 }
 0x3b2   : > { %14428 = vmatprep.subr.msk.bf16.mxu1 %vm21587_vm7, %v18046_v1  ;;  %vm21600_vm7 = vcmask 523264  }
 0x3b3   : > { %vm21601_vm12 = vmmov %vm21600_vm7 }
 0x3b5   : > { %14429 = vmatpush3.bf16.msk.msra.mxu1 %vm20862_vm14, %v18195_v44 }
 0x3b8   : > { %6967 = vmatmul.mubr.bf16.vlgmr.msra.gmra.mxu1 %v18279_v50 }
 0x3b9   : > { %6974 = vmatprep.mubr.bf16.mxu1 %v18289_v43 }
 0x3c0   : > { %6975 = vmatmul.mubr.bf16.gmra.mxu1 %v18305_v37 }
 0x3c1   : > { %6982 = vmatprep.mubr.bf16.mxu1 %v18310_v62 }
 0x3c8   : > { %6983 = vmatmul.mubr.bf16.gmra.mxu1 %v18319_v19 }
 0x3c9   : > { %6990 = vmatprep.mubr.bf16.mxu1 %v18324_v41 }
 0x3d0   : > { %6991 = vmatmul.mubr.bf16.gmra.mxu1 %v21581_v9 }
 0x420   : > { %v15239_v3 = vpop.f32.mrf.mxu1 }
 0x421   : > { %v6301_v5 = vadd.f32 %v15239_v3, %v13664_v4 }
 0x422   : > { %v6262_v14 = vpop.f32.mrf.mxu1 }
 0x423   : > { %v6299_v54 = vadd.f32 %v13664_v4, %v6262_v14 }
 0x424   : > { %v15240_v31 = vpop.f32.mrf.mxu1 }
 0x425   : > { %v6302_v58 = vadd.f32 %v15240_v31, %v13664_v4 }
 0x426   : > { %v18541_v21 = vpop.f32.mrf.mxu1 }
 0x427   : > { %21590 = vst [vmem:[#allocation86_spill] sm:$0xff] %v18541_v21 }
 0x430   : > { %v15243_v11 = vpop.f32.mrf.mxu1 }
 0x431   : > { %v6305_v32 = vadd.f32 %v15243_v11, %v13664_v4 }
 0x432   : > { %v6278_v13 = vpop.f32.mrf.mxu1 }
 0x433   : > { %v6303_v55 = vadd.f32 %v13664_v4, %v6278_v13 }
 0x434   : > { %v15244_v17 = vpop.f32.mrf.mxu1 }
 0x435   : > { %v6306_v3 = vadd.f32 %v15244_v17, %v13664_v4 }
 0x436   : > { %v18546_v2 = vpop.f32.mrf.mxu1 }
 0x437   : > { %21591 = vst [vmem:[#allocation38_spill] sm:$0xff] %v18546_v2 }
 0x438   : > { %v15255_v35 = vpop.f32.mrf.mxu1 }
 0x439   : > { %v18548_v48 = vadd.f32 %v15255_v35, %v6301_v5 }
 0x43a   : > { %v6612_v46 = vpop.f32.mrf.mxu1 }
 0x43b   : > { %21592 = vst [vmem:[#allocation44_spill] sm:$0xff] %v18548_v48  ;;  %v18550_v22 = vadd.f32 %v6612_v46, %v6299_v54  ;;  %v7209_v48 = vshll.u32 %v18053_v39, 16 }
 0x43c   : > { %v15256_v18 = vpop.f32.mrf.mxu1 }
 0x43d   : > { %21593 = vst [vmem:[#allocation78_spill] sm:$0xff] %v18550_v22  ;;  %v18552_v21 = vadd.f32 %v15256_v18, %v6302_v58 }
 0x43e   : > { %v18554_v33 = vpop.f32.mrf.mxu1 }
 0x43f   : > { %21594 = vst [vmem:[#allocation46_spill] sm:$0xff] %v18552_v21  ;;  %21595 = vst [vmem:[#allocation79_spill] sm:$0xff] %v18554_v33 }
 0x440   : > { %v15259_v47 = vpop.f32.mrf.mxu1 }
 0x441   : > { %v18556_v63 = vadd.f32 %v15259_v47, %v6305_v32 }
 0x442   : > { %v6628_v2 = vpop.f32.mrf.mxu1 }
 0x443   : > { %21596 = vst [vmem:[#allocation74_spill] sm:$0xff] %v18556_v63  ;;  %v18558_v53 = vadd.f32 %v6628_v2, %v6303_v55 }
 0x444   : > { %v15260_v5 = vpop.f32.mrf.mxu1 }
 0x445   : > { %21597 = vst [vmem:[#allocation90_spill] sm:$0xff] %v18558_v53  ;;  %v18560_v35 = vadd.f32 %v15260_v5, %v6306_v3  ;;  %v15905_v3 = vld [vmem:[%s20623_s4 + $0x70] sm:$0xff]  }
 0x446   : > { %v18562_v14 = vpop.f32.mrf.mxu1 }
 0x447   : > { %21598 = vst [vmem:[#allocation88_spill] sm:$0xff] %v18560_v35  ;;  %21599 = vst [vmem:[#allocation89_spill] sm:$0xff] %v18562_v14 }
 0x458   : > { %v14382_v54 = vpop.f32.mrf.mxu1 }
 0x45a   : > { %v14383_v31 = vpop.f32.mrf.mxu1 }
 0x45b   : > { %v14384_v46 = vadd.f32 %v14383_v31, %v14382_v54 }
 0x45c   : > { %v14385_v18 = vpop.f32.mrf.mxu1 }
 0x45e   : > { %v14386_v58 = vpop.f32.mrf.mxu1 }
 0x45f   : > { %v14387_v33 = vadd.f32 %v14386_v58, %v14385_v18  ;;  %v21602_v18 = vld [vmem:[#allocation30_spill] sm:$0xff]  ;;  %v21603_v58 = vld [vmem:[#allocation17_spill] sm:$0xff] }
 0x460   : > { %v14388_v11 = vpop.f32.mrf.mxu1  ;;  %vm21604_vm9 = vnez %v21603_v58 }
 0x461   : > { %v6796_v7 = vpack.c.bf16 %v14387_v33, %v14384_v46  ;;  %v7241_v33 = vshll.u32 %v18078_v26, 16  ;;  %v18576_v46 = vsel %vm21604_vm9, %v21602_v18, 0  ;;  %vm21606_vm9 = vmmov %vm21600_vm7 }
 0x462   : > { %v14389_v13 = vpop.f32.mrf.mxu1  ;;  %v7249_v14 = vshll.u32 %v18576_v46, 16 }
 0x463   : > { %15269 = vmatprep.mubr.msk.bf16.mxu0 %vm21600_vm7, %v6796_v7  ;;  %v14390_v55 = vadd.f32 %v14389_v13, %v14388_v11  ;;  %v15906_v7 = vld [vmem:[%s20623_s4 + $0x68] sm:$0xff]  }
 0x464   : > { %v14391_v47 = vpop.f32.mrf.mxu1 }
 0x466   : > { %v14392_v32 = vpop.f32.mrf.mxu1 }
 0x467   : > { %v14393_v4 = vadd.f32 %v14392_v32, %v14391_v47  ;;  %v7243_v32 = vrot.slane %v7241_v33, 1 }
 0x468   : > { %v14394_v17 = vpop.f32.mrf.mxu1 }
 0x469   : > { %v6797_v2 = vpack.c.bf16 %v14393_v4, %v14390_v55  ;;  %v15907_v55 = vld [vmem:[%s20623_s4 + $0x60] sm:$0xff]  }
 0x46a   : > { %v14395_v5 = vpop.f32.mrf.mxu1 }
 0x46b   : > { %15270 = vmatmul.mubr.msk.bf16.vlgmr.msra.gmra.mxu0 %vm21601_vm12, %v6797_v2  ;;  %v14396_v11 = vadd.f32 %v14395_v5, %v14394_v17  ;;  %v7245_v2 = vshrl.u32 %v18078_v26, 16  ;;  %v7251_v5 = vrot.slane %v7249_v14, 1  ;;  %vm21605_vm12 = vsmask.f32 7424 }
 0x46c   : > { %15278 = vmatpush3.bf16.msra.mxu0 %v15904_v8  ;;  %v14397_v54 = vpop.f32.mrf.mxu1  ;;  %v7177_v14 = vshll.u32 %v18011_v34, 16 }
 0x46d   : > { %15279 = vmatprep.subr.bf16.mxu0 %v15905_v3  ;;  %v7247_v17 = vor.u32 %v7245_v2, %v7243_v32  ;;  %v7233_v2 = vshll.u32 %v18091_v29, 16 }
 0x46e   : > { %v14398_v31 = vpop.f32.mrf.mxu1 }
 0x46f   : > { %v14399_v13 = vadd.f32 %v14398_v31, %v14397_v54  ;;  %v7252_v58 = vsel %vm21605_vm12, %v7247_v17, %v7251_v5  ;;  %v7235_v17 = vrot.slane %v7233_v2, 1  ;;  %v7173_v2 = vshrl.u32 %v18021_v40, 16  ;;  %vm21607_vm12 = vmmov %vm21600_vm7 }
 0x470   : > { %15280 = vmatpush3.bf16.msra.mxu0 %v15905_v3  ;;  %v14400_v47 = vpop.f32.mrf.mxu1 }
 0x471   : > { %v6798_v8 = vpack.c.bf16 %v14399_v13, %v14396_v11  ;;  %15281 = vmatprep.subr.bf16.mxu0 %v15906_v7 }
 0x472   : > { %v14401_v4 = vpop.f32.mrf.mxu1 }
 0x473   : > { %15273 = vmatprep.mubr.msk.bf16.mxu0 %vm21600_vm7, %v6798_v8  ;;  %v14402_v54 = vadd.f32 %v14401_v4, %v14400_v47  ;;  %v7169_v4 = vshll.u32 %v18021_v40, 16 }
 0x474   : > { %15282 = vmatpush3.bf16.msra.mxu0 %v15906_v7  ;;  %v14403_v18 = vpop.f32.mrf.mxu1 }
 0x475   : > { %15283 = vmatprep.subr.bf16.mxu0 %v15907_v55 }
 0x476   : > { %v14404_v3 = vpop.f32.mrf.mxu1 }
 0x477   : > { %v14405_v33 = vadd.f32 %v14404_v3, %v14403_v18  ;;  %v7179_v3 = vrot.slane %v7177_v14, 1  ;;  %v7161_v14 = vshll.u32 %v17984_v45, 16 }
 0x478   : > { %15284 = vmatpush3.bf16.msra.mxu0 %v15907_v55  ;;  %v14430_v31 = vpop.f32.mrf.mxu1  ;;  %v7185_v55 = vshll.u32 %v18046_v1, 16 }
 0x479   : > { %v6799_v11 = vpack.c.bf16 %v14405_v33, %v14402_v54  ;;  %14462 = vmatprep.subr.bf16.mxu0 %v7252_v58  ;;  %v7181_v54 = vshrl.u32 %v18011_v34, 16 }
 0x47a   : > { %v14431_v13 = vpop.f32.mrf.mxu1  ;;  %v18594_v58 = vrot.slane %v7185_v55, 1  ;;  %v7153_v55 = vshll.u32 %v17994_v12, 16 }
 0x47b   : > { %15274 = vmatmul.mubr.msk.bf16.gmra.mxu0 %vm21606_vm9, %v6799_v11  ;;  %v14432_v8 = vadd.f32 %v14431_v13, %v14430_v31  ;;  %v7171_v11 = vrot.slane %v7169_v4, 1  ;;  %v7183_v63 = vor.u32 %v7181_v54, %v7179_v3  ;;  %vm21608_vm9 = vsmask.f32 7424 }
 0x47c   : > { %v14433_v60 = vpop.f32.mrf.mxu1  ;;  %v7155_v9 = vrot.slane %v7153_v55, 1  ;;  %v7137_v55 = vshll.u32 %v17965_v28, 16 }
 0x47e   : > { %v14434_v20 = vpop.f32.mrf.mxu1 }
 0x47f   : > { %v14435_v7 = vadd.f32 %v14434_v20, %v14433_v60  ;;  %v7237_v20 = vshrl.u32 %v18091_v29, 16  ;;  %v7225_v60 = vshll.u32 %v18063_v56, 16 }
 0x480   : > { %v14436_v35 = vpop.f32.mrf.mxu1 }
 0x481   : > { %v6999_v53 = vpack.c.bf16 %v14435_v7, %v14432_v8  ;;  %v7239_v13 = vor.u32 %v7237_v20, %v7235_v17  ;;  %v7217_v8 = vshll.u32 %v18066_v15, 16  ;;  %v7227_v22 = vrot.slane %v7225_v60, 1 }
 0x482   : > { %v14437_v47 = vpop.f32.mrf.mxu1 }
 0x483   : > { %15285 = vmatprep.mubr.msk.bf16.mxu0 %vm21600_vm7, %v6999_v53  ;;  %v14438_v33 = vadd.f32 %v14437_v47, %v14436_v35  ;;  %v7188_v35 = vsel %vm21608_vm9, %v7183_v63, %v18594_v58  ;;  %v7175_v47 = vor.u32 %v7173_v2, %v7171_v11  ;;  %vm21609_vm7 = vmmov %vm21608_vm9  ;;  %v7219_v54 = vrot.slane %v7217_v8, 1 }
 0x484   : > { %v14439_v18 = vpop.f32.mrf.mxu1  ;;  %vm21611_vm9 = vmmov %vm21609_vm7 }
 0x485   : > { %vm21616_vm14 = vmmov %vm21609_vm7 }
 0x486   : > { %v14440_v5 = vpop.f32.mrf.mxu1  ;;  %vm21623_vm13 = vmmov %vm21609_vm7 }
 0x487   : > { %v14441_v31 = vadd.f32 %v14440_v5, %v14439_v18  ;;  %v7244_v18 = vsel %vm21609_vm7, %v7239_v13, %v7243_v32  ;;  %v7229_v5 = vshrl.u32 %v18063_v56, 16 }
 0x488   : > { %v14442_v53 = vpop.f32.mrf.mxu1 }
 0x489   : > { %v7000_v7 = vpack.c.bf16 %v14441_v31, %v14438_v33  ;;  %v7163_v33 = vrot.slane %v7161_v14, 1  ;;  %v7231_v60 = vor.u32 %v7229_v5, %v7227_v22  ;;  %v7145_v5 = vshll.u32 %v17956_v51, 16 }
 0x48a   : > { %v14443_v21 = vpop.f32.mrf.mxu1 }
 0x48b   : > { %15286 = vmatmul.mubr.msk.bf16.vlgmr.msra.gmra.mxu0 %vm21607_vm12, %v7000_v7  ;;  %v14444_v20 = vadd.f32 %v14443_v21, %v14442_v53  ;;  %v7221_v7 = vshrl.u32 %v18066_v15, 16  ;;  %vm21610_vm12 = vmmov %vm21609_vm7  ;;  %v7236_v13 = vsel %vm21611_vm9, %v7231_v60, %v7235_v17  ;;  %v7201_v21 = vshll.u32 %v18060_v49, 16 }
 0x48c   : > { %14463 = vmatpush3.bf16.msra.mxu0 %v7188_v35  ;;  %v14445_v4 = vpop.f32.mrf.mxu1  ;;  %v7180_v2 = vsel %vm21610_vm12, %v7175_v47, %v7179_v3  ;;  %v7165_v35 = vshrl.u32 %v17984_v45, 16  ;;  %vm21612_vm12 = vcmask 523264   ;;  %vm21613_vm9 = vmmov %vm21609_vm7 }
 0x48d   : > { %14464 = vmatprep.subr.bf16.mxu0 %v7244_v18  ;;  %v7223_v8 = vor.u32 %v7221_v7, %v7219_v54  ;;  %v7157_v18 = vshrl.u32 %v17994_v12, 16  ;;  %v7203_v7 = vrot.slane %v7201_v21, 1 }
 0x48e   : > { %v14446_v31 = vpop.f32.mrf.mxu1  ;;  %v7167_v14 = vor.u32 %v7165_v35, %v7163_v33 }
 0x48f   : > { %v14447_v63 = vadd.f32 %v14446_v31, %v14445_v4  ;;  %v7211_v31 = vrot.slane %v7209_v48, 1  ;;  %v7159_v47 = vor.u32 %v7157_v18, %v7155_v9  ;;  %v7228_v60 = vsel %vm21613_vm9, %v7223_v8, %v7227_v22 }
 0x490   : > { %14465 = vmatpush3.bf16.msra.mxu0 %v7180_v2  ;;  %v14448_v32 = vpop.f32.mrf.mxu1  ;;  %v7172_v3 = vsel %vm21609_vm7, %v7167_v14, %v7171_v11  ;;  %v7147_v2 = vrot.slane %v7145_v5, 1  ;;  %v7205_v48 = vshrl.u32 %v18060_v49, 16  ;;  %v7193_v11 = vshll.u32 %v18036_v27, 16 }
 0x491   : > { %v7001_v53 = vpack.c.bf16 %v14447_v63, %v14444_v20  ;;  %14466 = vmatprep.subr.bf16.mxu0 %v7236_v13  ;;  %v7213_v20 = vshrl.u32 %v18053_v39, 16  ;;  %v7149_v18 = vshrl.u32 %v17956_v51, 16  ;;  %v7141_v5 = vshrl.u32 %v17965_v28, 16 }
 0x492   : > { %v14449_v4 = vpop.f32.mrf.mxu1  ;;  %v7207_v8 = vor.u32 %v7205_v48, %v7203_v7  ;;  %vm21615_vm9 = vcmask 523264   ;;  %v7133_v48 = vshrl.u32 %v17926_v59, 16 }
 0x493   : > { %15289 = vmatprep.mubr.msk.bf16.mxu0 %vm21612_vm12, %v7001_v53  ;;  %v14450_v63 = vadd.f32 %v14449_v4, %v14448_v32  ;;  %v7215_v13 = vor.u32 %v7213_v20, %v7211_v31  ;;  %v7164_v53 = vsel %vm21609_vm7, %v7159_v47, %v7163_v33  ;;  %vm21614_vm12 = vmmov %vm21609_vm7  ;;  %v7151_v32 = vor.u32 %v7149_v18, %v7147_v2  ;;  %v21619_v18 = vld [vmem:[#allocation71_spill] sm:$0xff] }
 0x494   : > { %14467 = vmatpush3.bf16.msra.mxu0 %v7172_v3  ;;  %v14451_v17 = vpop.f32.mrf.mxu1  ;;  %v7139_v3 = vrot.slane %v7137_v55, 1  ;;  %v7129_v4 = vshll.u32 %v17926_v59, 16  ;;  %v7124_v47 = vshll.u32 %v18195_v44, 16  ;;  %v7212_v55 = vsel %vm21609_vm7, %v7207_v8, %v7211_v31 }
 0x495   : > { %14468 = vmatprep.subr.bf16.mxu0 %v7228_v60  ;;  %v7220_v22 = vsel %vm21614_vm12, %v7215_v13, %v7219_v54  ;;  %v7195_v60 = vrot.slane %v7193_v11, 1  ;;  %v7197_v54 = vshrl.u32 %v18036_v27, 16  ;;  %vm21617_vm12 = vmmov %vm21609_vm7 }
 0x496   : > { %v14452_v35 = vpop.f32.mrf.mxu1  ;;  %v7143_v33 = vor.u32 %v7141_v5, %v7139_v3  ;;  %v7131_v20 = vrot.slane %v7129_v4, 1 }
 0x497   : > { %v14453_v14 = vadd.f32 %v14452_v35, %v14451_v17  ;;  %v7156_v17 = vsel %vm21616_vm14, %v7151_v32, %v7155_v9  ;;  %v7189_v35 = vshrl.u32 %v18046_v1, 16  ;;  %v7126_v9 = vrot.slane %v7124_v47, 1  ;;  %vm21618_vm14 = vmmov %vm21609_vm7 }
 0x498   : > { %14469 = vmatpush3.bf16.msra.mxu0 %v7164_v53  ;;  %v7148_v13 = vsel %vm21617_vm12, %v7143_v33, %v7147_v2  ;;  %v7135_v31 = vor.u32 %v7133_v48, %v7131_v20  ;;  %v7122_v53 = vshrl.u32 %v18195_v44, 16  ;;  %v21621_v2 = vld [vmem:[#allocation68_spill] sm:$0xff] }
 0x499   : > { %v7002_v21 = vpack.c.bf16 %v14453_v14, %v14450_v63  ;;  %14470 = vmatprep.subr.bf16.mxu0 %v7220_v22  ;;  %v7199_v63 = vor.u32 %v7197_v54, %v7195_v60  ;;  %v7191_v14 = vor.u32 %v7189_v35, %v18594_v58  ;;  %vm21622_vm12 = vcmp.ne.s16.totalorder %v21621_v2, 0 }
 0x49a   : > { %v7140_v8 = vsel %vm21609_vm7, %v7135_v31, %v7139_v3  ;;  %v7472_v32 = vsel %vm21622_vm12, 0, %v18576_v46  ;;  %vm21626_vm7 = vcmp.ne.s16.totalorder %v21517_v16, 0  ;;  %vm21627_vm12 = vmmov %vm21623_vm13 }
 0x49b   : > { %15290 = vmatmul.mubr.msk.bf16.gmra.mxu0 %vm21615_vm9, %v7002_v21  ;;  %v7204_v11 = vsel %vm21618_vm14, %v7199_v63, %v7203_v7  ;;  %vm21620_vm9 = vcmp.ne.s16.totalorder %v21619_v18, 0  ;;  %v7127_v21 = vor.u32 %v7126_v9, %v7122_v53  ;;  %v7196_v7 = vsel %vm21623_vm13, %v7191_v14, %v7195_v60 }
 0x49c   : > { %14471 = vmatpush3.bf16.msra.mxu0 %v7156_v17  ;;  %7301 = vmatprep.mubr.bf16.mxu0 %v18420_v0  ;;  %v7471_v22 = vsel %vm21620_vm9, 0, %v18078_v26  ;;  %vm21624_vm14 = vcmp.ne.s16.totalorder %v21519_v36, 0  ;;  %vm21625_vm9 = vcmp.ne.s16.totalorder %v21521_v61, 0  ;;  %v7521_v3 = vrot.slane %v7472_v32, 1 }
 0x49d   : > { %14472 = vmatprep.subr.bf16.mxu0 %v7212_v55  ;;  %v7519_v5 = vrot.slane %v7471_v22, 1  ;;  %v18648_v58 = vsel %vm21624_vm14, 0, %v18046_v1  ;;  %v7470_v4 = vsel %vm21625_vm9, 0, %v18091_v29  ;;  %v7463_v17 = vsel %vm21626_vm7, 0, %v18011_v34 }
 0x49e   : > { %v7132_v33 = vsel %vm21627_vm12, %v7127_v21, %v7131_v20  ;;  %v7505_v60 = vrot.slane %v18648_v58, 1  ;;  %vm21628_vm13 = vcmask 1046528   ;;  %v7517_v55 = vrot.slane %v7470_v4, 1 }
 0x49f   : > { %v7522_v47 = vsel %vm21628_vm13, %v7519_v5, %v7521_v3  ;;  %vm21629_vm14 = vcmp.ne.s16.totalorder %v21525_v24, 0  ;;  %v7503_v63 = vrot.slane %v7463_v17, 1  ;;  %vm21630_vm9 = vmmov %vm21628_vm13  ;;  %vm21631_vm7 = vcmp.ne.s16.totalorder %v21523_v57, 0 }
 0x4a0   : > { %14473 = vmatpush3.bf16.msra.mxu0 %v7148_v13  ;;  %v7462_v54 = vsel %vm21629_vm14, 0, %v18021_v40  ;;  %v7469_v20 = vsel %vm21631_vm7, 0, %v18063_v56  ;;  %vm21632_vm12 = vmmov %vm21630_vm9  ;;  %vm21633_vm13 = vcmp.ne.s16.totalorder %v21534_v23, 0  ;;  %vm21634_vm14 = vcmp.ne.s16.totalorder %v21530_v6, 0 }
 0x4a1   : > { %14474 = vmatprep.subr.bf16.mxu0 %v7204_v11  ;;  %v7506_v35 = vsel %vm21630_vm9, %v7503_v63, %v7505_v60  ;;  %v7501_v13 = vrot.slane %v7462_v54, 1  ;;  %v7520_v48 = vsel %vm21632_vm12, %v7517_v55, %v7519_v5  ;;  %v7468_v9 = vsel %vm21633_vm13, 0, %v18066_v15  ;;  %vm21635_vm1 = vmmov %vm21630_vm9 }
 0x4a2   : > { %v7515_v11 = vrot.slane %v7469_v20, 1  ;;  %v7461_v14 = vsel %vm21634_vm14, 0, %v17984_v45  ;;  %v7513_v18 = vrot.slane %v7468_v9, 1  ;;  %vm21636_vm7 = vcmp.ne.s16.totalorder %v21539_v30, 0  ;;  %vm21637_vm12 = vmmov %vm21635_vm1  ;;  %v21648_v9 = vld [vmem:[#allocation73_spill] sm:$0xff] }
 0x4a3   : > { %v7504_v31 = vsel %vm21630_vm9, %v7501_v13, %v7503_v63  ;;  %v7460_v22 = vsel %vm21636_vm7, 0, %v17994_v12  ;;  %vm21638_vm13 = vcmp.ne.s16.totalorder %v21537_v10, 0  ;;  %vm21639_vm14 = vmmov %vm21635_vm1  ;;  %vm21641_vm9 = vcmp.ne.s16.totalorder %v21544_v38, 0 }
 0x4a4   : > { %14475 = vmatpush3.bf16.msra.mxu0 %v7140_v8  ;;  %v7518_v53 = vsel %vm21635_vm1, %v7515_v11, %v7517_v55  ;;  %v7499_v8 = vrot.slane %v7461_v14, 1  ;;  %v7497_v2 = vrot.slane %v7460_v22, 1  ;;  %v7467_v32 = vsel %vm21638_vm13, 0, %v18053_v39  ;;  %vm21642_vm7 = vmmov %vm21637_vm12 }
 0x4a5   : > { %14476 = vmatprep.subr.bf16.mxu0 %v7196_v7  ;;  %v7516_v7 = vsel %vm21639_vm14, %v7513_v18, %v7515_v11  ;;  %vm21640_vm1 = vcmp.ne.s16.totalorder %v21546_v52, 0  ;;  %v7511_v4 = vrot.slane %v7467_v32, 1  ;;  %v7459_v3 = vsel %vm21641_vm9, 0, %v17956_v51  ;;  %vm21645_vm14 = vmmov %vm21642_vm7 }
 0x4a6   : > { %v7502_v21 = vsel %vm21637_vm12, %v7499_v8, %v7501_v13  ;;  %v7466_v5 = vsel %vm21640_vm1, 0, %v18060_v49  ;;  %v7500_v17 = vsel %vm21642_vm7, %v7497_v2, %v7499_v8  ;;  %vm21643_vm12 = vmmov %vm21642_vm7  ;;  %vm21644_vm13 = vcmp.ne.s16.totalorder %v21551_v42, 0  ;;  %v21654_v8 = vld [vmem:[#allocation85_spill] sm:$0xff] }
 0x4a7   : > { %v7458_v55 = vsel %vm21644_vm13, 0, %v17965_v28  ;;  %v7495_v54 = vrot.slane %v7459_v3, 1  ;;  %vm21646_vm1 = vcmp.ne.s16.totalorder %v21549_v25, 0  ;;  %vm21647_vm9 = vmmov %vm21642_vm7  ;;  %vm21649_vm7 = vcmp.ne.s16.totalorder %v21648_v9, 0 }
 0x4a8   : > { %14477 = vmatpush3.bf16.msra.mxu0 %v7132_v33  ;;  %v7514_v33 = vsel %vm21643_vm12, %v7511_v4, %v7513_v18  ;;  %v7465_v13 = vsel %vm21646_vm1, 0, %v18036_v27  ;;  %v7457_v11 = vsel %vm21649_vm7, 0, %v17926_v59  ;;  %vm21650_vm12 = vmmov %vm21647_vm9 }
 0x4a9   : > { %14510 = vmatprep.subr.bf16.mxu0 %v7522_v47  ;;  %v7509_v47 = vrot.slane %v7466_v5, 1  ;;  %v7498_v63 = vsel %vm21645_vm14, %v7495_v54, %v7497_v2  ;;  %vm21651_vm13 = vmmov %vm21647_vm9  ;;  %v7491_v22 = vrot.slane %v7457_v11, 1  ;;  %v21659_v5 = vld [vmem:[#allocation78_spill] sm:$0xff]  ;;  %v21664_v11 = vld [vmem:[#allocation88_spill] sm:$0xff] }
 0x4aa   : > { %vm21655_vm1 = vmmov %vm21647_vm9 }
 0x4ab   : > { %7302 = vmatmul.mubr.bf16.vlgmr.msra.gmra.mxu0 %v18279_v50  ;;  %v7512_v20 = vsel %vm21647_vm9, %v7509_v47, %v7511_v4  ;;  %vm21656_vm9 = vmmov %vm21655_vm1 }
 0x4ac   : > { %14511 = vmatpush3.bf16.msra.mxu0 %v7506_v35  ;;  %7309 = vmatprep.mubr.bf16.mxu0 %v18289_v43  ;;  %v7493_v35 = vrot.slane %v7458_v55, 1  ;;  %vm21657_vm7 = vmmov %vm21655_vm1 }
 0x4ad   : > { %14512 = vmatprep.subr.bf16.mxu0 %v7520_v48  ;;  %v7507_v48 = vrot.slane %v7465_v13, 1  ;;  %v21663_v13 = vld [vmem:[#allocation90_spill] sm:$0xff] }
 0x4ae   : > { %v7496_v14 = vsel %vm21650_vm12, %v7493_v35, %v7495_v54  ;;  %v21662_v54 = vld [vmem:[#allocation74_spill] sm:$0xff]  ;;  %vm21668_vm12 = vcmask 523264  }
 0x4af   : > { %v7508_v32 = vsel %vm21656_vm9, %v7505_v60, %v7507_v48 }
 0x4b0   : > { %14513 = vmatpush3.bf16.msra.mxu0 %v7504_v31  ;;  %v7510_v31 = vsel %vm21651_vm13, %v7507_v48, %v7509_v47  ;;  %vm21669_vm13 = vmmov %vm21668_vm12 }
 0x4b1   : > { %14514 = vmatprep.subr.bf16.mxu0 %v7518_v53  ;;  %v21652_v53 = vld [vmem:[#allocation72_spill] sm:$0xff] }
 0x4b2   : > { %vm21653_vm14 = vcmp.ne.s16.totalorder %v21652_v53, 0 }
 0x4b3   : > { %7310 = vmatmul.mubr.bf16.gmra.mxu0 %v18305_v37  ;;  %v7456_v18 = vsel %vm21653_vm14, 0, %v18195_v44  ;;  %v15908_v44 = vld [vmem:[%s20623_s4 + $0x98] sm:$0xff]   ;;  %vm21670_vm14 = vmmov %vm21668_vm12 }
 0x4b4   : > { %14515 = vmatpush3.bf16.msra.mxu0 %v7502_v21  ;;  %7317 = vmatprep.mubr.bf16.mxu0 %v18310_v62  ;;  %v7494_v21 = vsel %vm21655_vm1, %v7491_v22, %v7493_v35  ;;  %v7490_v2 = vrot.slane %v7456_v18, 1 }
 0x4b5   : > { %14516 = vmatprep.subr.bf16.mxu0 %v7516_v7  ;;  %15293 = vmatprep.subr.bf16.mxu1 %v15908_v44 }
 0x4b6   : > { %v7492_v7 = vsel %vm21657_vm7, %v7490_v2, %v7491_v22  ;;  %15294 = vmatpush3.bf16.msra.mxu1 %v15908_v44  ;;  %vm21673_vm7 = vmmov %vm21668_vm12 }
 0x4b8   : > { %14517 = vmatpush3.bf16.msra.mxu0 %v7500_v17  ;;  %v21660_v17 = vld [vmem:[#allocation46_spill] sm:$0xff] }
 0x4b9   : > { %14518 = vmatprep.subr.bf16.mxu0 %v7514_v33 }
 0x4bb   : > { %7318 = vmatmul.mubr.bf16.gmra.mxu0 %v18319_v19 }
 0x4bc   : > { %14519 = vmatpush3.bf16.msra.mxu0 %v7498_v63  ;;  %7325 = vmatprep.mubr.bf16.mxu0 %v18324_v41 }
 0x4bd   : > { %14520 = vmatprep.subr.bf16.mxu0 %v7512_v20 }
 0x4c0   : > { %14521 = vmatpush3.bf16.msra.mxu0 %v7496_v14 }
 0x4c1   : > { %14522 = vmatprep.subr.bf16.mxu0 %v7510_v31 }
 0x4c3   : > { %7326 = vmatmul.mubr.bf16.gmra.mxu0 %v21654_v8 }
 0x4c4   : > { %14523 = vmatpush3.bf16.msra.mxu0 %v7494_v21  ;;  %7571 = vmatprep.mubr.bf16.mxu0 %v18420_v0 }
 0x4c5   : > { %14524 = vmatprep.subr.bf16.mxu0 %v7508_v32 }
 0x4c8   : > { %14525 = vmatpush3.bf16.msra.mxu0 %v7492_v7 }
 0x4cb   : > { %7572 = vmatmul.mubr.bf16.vlgmr.msra.gmra.mxu0 %v18279_v50  ;;  %v15909_v50 = vld [vmem:[%s20623_s4 + $0x90] sm:$0xff]  }
 0x4cc   : > { %7579 = vmatprep.mubr.bf16.mxu0 %v18289_v43  ;;  %15295 = vmatprep.subr.bf16.mxu1 %v15909_v50  ;;  %v15910_v43 = vld [vmem:[%s20623_s4 + $0x88] sm:$0xff]  }
 0x4cd   : > { %15296 = vmatpush3.bf16.msra.mxu1 %v15909_v50 }
 0x4ce   : > { %15297 = vmatprep.subr.bf16.mxu1 %v15910_v43 }
 0x4d1   : > { %15298 = vmatpush3.bf16.msra.mxu1 %v15910_v43 }
 0x4d3   : > { %7580 = vmatmul.mubr.bf16.gmra.mxu0 %v18305_v37  ;;  %v15911_v37 = vld [vmem:[%s20623_s4 + $0x80] sm:$0xff]  }
 0x4d4   : > { %7587 = vmatprep.mubr.bf16.mxu0 %v18310_v62  ;;  %15299 = vmatprep.subr.bf16.mxu1 %v15911_v37  ;;  %v15912_v62 = vld [vmem:[%s20623_s4 + $0xb8] sm:$0xff]  }
 0x4d5   : > { %15300 = vmatpush3.bf16.msra.mxu1 %v15911_v37 }
 0x4d6   : > { %15309 = vmatprep.subr.bf16.mxu1 %v15912_v62 }
 0x4db   : > { %7588 = vmatmul.mubr.bf16.gmra.mxu0 %v18319_v19 }
 0x4dc   : > { %7595 = vmatprep.mubr.bf16.mxu0 %v18324_v41  ;;  %v21658_v41 = vld [vmem:[#allocation44_spill] sm:$0xff] }
 0x4e3   : > { %7596 = vmatmul.mubr.bf16.gmra.mxu0 %v21654_v8 }
 0x52b   : > { %v15271_v19 = vpop.f32.mrf.mxu0 }
 0x52c   : > { %v6912_v58 = vadd.f32 %v15271_v19, %v21658_v41 }
 0x52d   : > { %v6879_v60 = vpop.f32.mrf.mxu0 }
 0x52e   : > { %v6910_v4 = vadd.f32 %v6879_v60, %v21659_v5 }
 0x52f   : > { %v15272_v3 = vpop.f32.mrf.mxu0 }
 0x530   : > { %v6913_v33 = vadd.f32 %v15272_v3, %v21660_v17 }
 0x531   : > { %v18747_v47 = vpop.f32.mrf.mxu0 }
 0x532   : > { %21661 = vst [vmem:[#allocation75_spill] sm:$0xff] %v18747_v47 }
 0x53b   : > { %v15275_v55 = vpop.f32.mrf.mxu0 }
 0x53c   : > { %v6916_v63 = vadd.f32 %v15275_v55, %v21662_v54 }
 0x53d   : > { %v6895_v35 = vpop.f32.mrf.mxu0 }
 0x53e   : > { %v6914_v20 = vadd.f32 %v6895_v35, %v21663_v13 }
 0x53f   : > { %v15276_v48 = vpop.f32.mrf.mxu0 }
 0x540   : > { %v6917_v14 = vadd.f32 %v15276_v48, %v21664_v11 }
 0x541   : > { %v18752_v31 = vpop.f32.mrf.mxu0 }
 0x542   : > { %21665 = vst [vmem:[#allocation80_spill] sm:$0xff] %v18752_v31 }
 0x54b   : > { %v15287_v18 = vpop.f32.mrf.mxu0 }
 0x54c   : > { %v18754_v22 = vadd.f32 %v15287_v18, %v6912_v58  ;;  %v15913_v18 = vld [vmem:[%s20623_s4 + $0xb0] sm:$0xff]  }
 0x54d   : > { %v7082_v8 = vpop.f32.mrf.mxu0 }
 0x54e   : > { %v18756_v21 = vadd.f32 %v7082_v8, %v6910_v4 }
 0x54f   : > { %v15288_v2 = vpop.f32.mrf.mxu0 }
 0x550   : > { %v18758_v32 = vadd.f32 %v15288_v2, %v6913_v33 }
 0x551   : > { %v18760_v7 = vpop.f32.mrf.mxu0 }
 0x552   : > { %21666 = vst [vmem:[#allocation81_spill] sm:$0xff] %v18760_v7 }
 0x55b   : > { %v15291_v44 = vpop.f32.mrf.mxu0 }
 0x55c   : > { %v18762_v50 = vadd.f32 %v15291_v44, %v6916_v63  ;;  %v15914_v44 = vld [vmem:[%s20623_s4 + $0xa8] sm:$0xff]  }
 0x55d   : > { %v7098_v43 = vpop.f32.mrf.mxu0 }
 0x55e   : > { %v18764_v37 = vadd.f32 %v7098_v43, %v6914_v20 }
 0x55f   : > { %v15292_v19 = vpop.f32.mrf.mxu0 }
 0x560   : > { %v18766_v41 = vadd.f32 %v15292_v19, %v6917_v14 }
 0x561   : > { %v18768_v60 = vpop.f32.mrf.mxu0 }
 0x562   : > { %21667 = vst [vmem:[#allocation93_spill] sm:$0xff] %v18768_v60 }
 0x56b   : > { %v14478_v58 = vpop.f32.mrf.mxu0 }
 0x56d   : > { %v14479_v5 = vpop.f32.mrf.mxu0 }
 0x56e   : > { %v14480_v17 = vadd.f32 %v14479_v5, %v14478_v58 }
 0x56f   : > { %v14481_v4 = vpop.f32.mrf.mxu0 }
 0x571   : > { %v14482_v3 = vpop.f32.mrf.mxu0 }
 0x572   : > { %v14483_v33 = vadd.f32 %v14482_v3, %v14481_v4  ;;  %v15915_v3 = vld [vmem:[%s20623_s4 + $0xa0] sm:$0xff]  }
 0x573   : > { %v14484_v55 = vpop.f32.mrf.mxu0 }
 0x574   : > { %v7334_v54 = vpack.c.bf16 %v14483_v33, %v14480_v17 }
 0x575   : > { %v14485_v35 = vpop.f32.mrf.mxu0 }
 0x576   : > { %15301 = vmatprep.mubr.msk.bf16.mxu1 %vm21668_vm12, %v7334_v54  ;;  %v14486_v20 = vadd.f32 %v14485_v35, %v14484_v55  ;;  %v21671_v55 = vld [vmem:[#allocation13_spill] sm:$0xff]  ;;  %vm21674_vm12 = vmmov %vm21673_vm7 }
 0x577   : > { %v14487_v63 = vpop.f32.mrf.mxu0  ;;  %vm21672_vm1 = vcmp.ne.s16.totalorder %v21671_v55, 0 }
 0x578   : > { %vm13793_vm9 = vmneg %vm21672_vm1 }
 0x579   : > { %v14488_v13 = vpop.f32.mrf.mxu0  ;;  %vm21679_vm1 = vmneg %vm21308_vm11 }
 0x57a   : > { %v14489_v48 = vadd.f32 %v14488_v13, %v14487_v63  ;;  %vm21685_vm11 = vmneg %vm16477_vm8 }
 0x57b   : > { %v14490_v11 = vpop.f32.mrf.mxu0  ;;  %vm21691_vm8 = vmneg %vm21569_vm6 }
 0x57c   : > { %v7335_v14 = vpack.c.bf16 %v14489_v48, %v14486_v20 }
 0x57d   : > { %v14491_v8 = vpop.f32.mrf.mxu0 }
 0x57e   : > { %15302 = vmatmul.mubr.msk.bf16.vlgmr.msra.gmra.mxu1 %vm21669_vm13, %v7335_v14  ;;  %v14492_v19 = vadd.f32 %v14491_v8, %v14490_v11  ;;  %vm21675_vm13 = vmmov %vm21673_vm7 }
 0x57f   : > { %15310 = vmatpush3.bf16.msra.mxu1 %v15912_v62  ;;  %v14493_v2 = vpop.f32.mrf.mxu0 }
 0x580   : > { %15311 = vmatprep.subr.bf16.mxu1 %v15913_v18 }
 0x581   : > { %v14494_v43 = vpop.f32.mrf.mxu0 }
 0x582   : > { %v14495_v58 = vadd.f32 %v14494_v43, %v14493_v2 }
 0x583   : > { %15312 = vmatpush3.bf16.msra.mxu1 %v15913_v18  ;;  %v14496_v5 = vpop.f32.mrf.mxu0 }
 0x584   : > { %v7336_v4 = vpack.c.bf16 %v14495_v58, %v14492_v19  ;;  %15313 = vmatprep.subr.bf16.mxu1 %v15914_v44 }
 0x585   : > { %v14497_v17 = vpop.f32.mrf.mxu0 }
 0x586   : > { %15305 = vmatprep.mubr.msk.bf16.mxu1 %vm21670_vm14, %v7336_v4  ;;  %v14498_v54 = vadd.f32 %v14497_v17, %v14496_v5  ;;  %vm21677_vm14 = vmneg %vm16531_vm4 }
 0x587   : > { %15314 = vmatpush3.bf16.msra.mxu1 %v15914_v44  ;;  %v14499_v62 = vpop.f32.mrf.mxu0  ;;  %vm21683_vm4 = vmneg %vm21304_vm3 }
 0x588   : > { %15315 = vmatprep.subr.bf16.mxu1 %v15915_v3  ;;  %vm21689_vm3 = vmneg %vm16455_vm5 }
 0x589   : > { %v14500_v33 = vpop.f32.mrf.mxu0 }
 0x58a   : > { %v14501_v35 = vadd.f32 %v14500_v33, %v14499_v62  ;;  %v21695_v62 = vld [vmem:[#allocation25_spill] sm:$0xff] }
 0x58b   : > { %15316 = vmatpush3.bf16.msra.mxu1 %v15915_v3  ;;  %v14526_v63 = vpop.f32.mrf.mxu0 }
 0x58c   : > { %v7337_v13 = vpack.c.bf16 %v14501_v35, %v14498_v54  ;;  %14558 = vmatprep.subr.msk.bf16.mxu1 %vm13793_vm9, %v18576_v46  ;;  %vm21681_vm9 = vmneg %vm16503_vm2  ;;  %v21701_v54 = vld [vmem:[#allocation23_spill] sm:$0xff] }
 0x58d   : > { %v14527_v20 = vpop.f32.mrf.mxu0  ;;  %vm21687_vm2 = vmneg %vm21294_vm10  ;;  %vm21696_vm10 = vnez %v21695_v62  ;;  %vm21702_vm6 = vcmp.ne.s16.totalorder %v21701_v54, 0  ;;  %v21720_v62 = vld [vmem:[#allocation87_spill] sm:$0xff] }
 0x58e   : > { %15306 = vmatmul.mubr.msk.bf16.gmra.mxu1 %vm21673_vm7, %v7337_v13  ;;  %v14528_v14 = vadd.f32 %v14527_v20, %v14526_v63 }
 0x58f   : > { %v14529_v48 = vpop.f32.mrf.mxu0 }
 0x591   : > { %v14530_v11 = vpop.f32.mrf.mxu0 }
 0x592   : > { %v14531_v18 = vadd.f32 %v14530_v11, %v14529_v48  ;;  %v21727_v11 = vld [vmem:[#allocation20_spill] sm:$0xff] }
 0x593   : > { %v14532_v8 = vpop.f32.mrf.mxu0 }
 0x594   : > { %v7604_v2 = vpack.c.bf16 %v14531_v18, %v14528_v14 }
 0x595   : > { %v14533_v44 = vpop.f32.mrf.mxu0 }
 0x596   : > { %15317 = vmatprep.mubr.msk.bf16.mxu1 %vm21674_vm12, %v7604_v2  ;;  %v14534_v58 = vadd.f32 %v14533_v44, %v14532_v8  ;;  %v21713_v44 = vld [vmem:[#allocation54_spill] sm:$0xff] }
 0x597   : > { %v14535_v43 = vpop.f32.mrf.mxu0 }
 0x599   : > { %v14536_v19 = vpop.f32.mrf.mxu0 }
 0x59a   : > { %v14537_v5 = vadd.f32 %v14536_v19, %v14535_v43 }
 0x59b   : > { %v14538_v4 = vpop.f32.mrf.mxu0 }
 0x59c   : > { %v7605_v3 = vpack.c.bf16 %v14537_v5, %v14534_v58 }
 0x59d   : > { %v14539_v17 = vpop.f32.mrf.mxu0 }
 0x59e   : > { %15318 = vmatmul.mubr.msk.bf16.vlgmr.msra.gmra.mxu1 %vm21675_vm13, %v7605_v3  ;;  %v14540_v55 = vadd.f32 %v14539_v17, %v14538_v4  ;;  %v21692_v3 = vld [vmem:[#allocation28_spill] sm:$0xff]  ;;  %vm21694_vm13 = vmmov %vm21673_vm7  ;;  %v21718_v4 = vld [vmem:[#allocation35_spill] sm:$0xff] }
 0x59f   : > { %14559 = vmatpush3.bf16.msk.msra.mxu1 %vm21677_vm14, %v18046_v1  ;;  %v14541_v33 = vpop.f32.mrf.mxu0  ;;  %vm21693_vm12 = vcmp.ne.s16.totalorder %v21692_v3, 0  ;;  %vm21697_vm14 = vmneg %vm21696_vm10  ;;  %vm21728_vm10 = vcmp.ne.s16.totalorder %v21727_v11, 0 }
 0x5a0   : > { %14560 = vmatprep.subr.msk.bf16.mxu1 %vm21679_vm1, %v18078_v26  ;;  %v7944_v17 = vsel %vm21693_vm12, 0, %v18576_v46 }
 0x5a1   : > { %v14542_v35 = vpop.f32.mrf.mxu0 }
 0x5a2   : > { %v14543_v63 = vadd.f32 %v14542_v35, %v14541_v33  ;;  %v8065_v33 = vshll.u32 %v7944_v17, 16  ;;  %v7943_v35 = vsel %vm21702_vm6, 0, %v18078_v26 }
 0x5a3   : > { %14561 = vmatpush3.bf16.msk.msra.mxu1 %vm21681_vm9, %v18011_v34  ;;  %v14544_v20 = vpop.f32.mrf.mxu0 }
 0x5a4   : > { %v7606_v48 = vpack.c.bf16 %v14543_v63, %v14540_v55  ;;  %14562 = vmatprep.subr.msk.bf16.mxu1 %vm21683_vm4, %v18091_v29  ;;  %v21698_v55 = vld [vmem:[#allocation37_spill] sm:$0xff]  ;;  %v21703_v63 = vld [vmem:[#allocation24_spill] sm:$0xff]  ;;  %v8067_v13 = vrot.slane %v8065_v33, 1 }
 0x5a5   : > { %v14545_v14 = vpop.f32.mrf.mxu0  ;;  %vm21699_vm5 = vnez %v21698_v55  ;;  %vm21704_vm9 = vnez %v21703_v63  ;;  %v21721_v33 = vld [vmem:[#allocation32_spill] sm:$0xff]  ;;  %v21723_v63 = vld [vmem:[#allocation34_spill] sm:$0xff] }
 0x5a6   : > { %15321 = vmatprep.mubr.msk.bf16.mxu1 %vm21673_vm7, %v7606_v48  ;;  %v14546_v2 = vadd.f32 %v14545_v14, %v14544_v20  ;;  %vm21700_vm1 = vmneg %vm21699_vm5  ;;  %v8057_v20 = vshll.u32 %v7943_v35, 16  ;;  %v21725_v48 = vld [vmem:[#allocation52_spill] sm:$0xff]  ;;  %vm21741_vm5 = vcmask 523264  }
 0x5a7   : > { %14563 = vmatpush3.bf16.msk.msra.mxu1 %vm21685_vm11, %v18021_v40  ;;  %v14547_v8 = vpop.f32.mrf.mxu0  ;;  %vm21705_vm4 = vmneg %vm21704_vm9 }
 0x5a8   : > { %14564 = vmatprep.subr.msk.bf16.mxu1 %vm21687_vm2, %v18063_v56  ;;  %vm21707_vm7 = vmneg %vm21579_vm15  ;;  %v8059_v18 = vrot.slane %v8057_v20, 1  ;;  %vm21717_vm15 = vsmask.f32 7424  ;;  %v21724_v20 = vld [vmem:[#allocation15_spill] sm:$0xff] }
 0x5a9   : > { %v14548_v43 = vpop.f32.mrf.mxu0  ;;  %vm21709_vm11 = vmneg %vm21583_vm0 }
 0x5aa   : > { %v14549_v19 = vadd.f32 %v14548_v43, %v14547_v8  ;;  %v21710_v8 = vld [vmem:[#allocation33_spill] sm:$0xff]  ;;  %v21716_v43 = vld [vmem:[#allocation18_spill] sm:$0xff]  ;;  %vm21719_vm0 = vmmov %vm21717_vm15 }
 0x5ab   : > { %14565 = vmatpush3.bf16.msk.msra.mxu1 %vm21689_vm3, %v17984_v45  ;;  %vm21711_vm2 = vnez %v21710_v8  ;;  %v21729_v8 = vld [vmem:[#allocation83_spill] sm:$0xff] }
 0x5ac   : > { %v7607_v5 = vpack.c.bf16 %v14549_v19, %v14546_v2  ;;  %14566 = vmatprep.subr.msk.bf16.mxu1 %vm21691_vm8, %v18066_v15  ;;  %vm21712_vm3 = vmneg %vm21711_vm2  ;;  %v8061_v2 = vshrl.u32 %v7943_v35, 16  ;;  %vm21714_vm8 = vnez %v21713_v44  ;;  %v18879_v35 = vld [vmem:[%s20620_s1 + $0x10] ss:$8 sps:$4 sm:$0xff]   ;;  %vm21749_vm2 = vcmp.ne.s16.totalorder %v21517_v16, 0 }
 0x5ad   : > { %vm21715_vm12 = vmneg %vm21714_vm8  ;;  %v21730_v44 = vld [vmem:[#allocation40_spill] sm:$0xff]  ;;  %vm21751_vm8 = vcmp.ne.s16.totalorder %v21519_v36, 0 }
 0x5ae   : > { %15322 = vmatmul.mubr.msk.bf16.gmra.mxu1 %vm21694_vm13, %v7607_v5  ;;  %v8063_v58 = vor.u32 %v8061_v2, %v8059_v18  ;;  %v18862_v5 = vld [vmem:[%s20620_s1] ss:$8 sps:$4 sm:$0xff]   ;;  %vm21722_vm13 = vmmov %vm21719_vm0  ;;  %v18905_v2 = vld [vmem:[%s20620_s1 + $0x34] ss:$8 sps:$4 sm:$0xff]  }
 0x5af   : > { %14567 = vmatpush3.bf16.msk.msra.mxu1 %vm21697_vm14, %v17994_v12  ;;  %7774 = vmatprep.mubr.bf16.mxu1 %v18420_v0  ;;  %v8069_v0 = vshrl.u32 %v7944_v17, 16  ;;  %v18870_v17 = vld [vmem:[%s20620_s1 + $0x14] ss:$8 sps:$4 sm:$0xff]   ;;  %v8060_v55 = vsel %vm21722_vm13, %v21721_v33, %v8059_v18  ;;  %v18898_v18 = vld [vmem:[%s20620_s1 + $0x20] ss:$8 sps:$4 sm:$0xff]   ;;  %vm21736_vm14 = vmmov %vm21719_vm0 }
 0x5b0   : > { %14568 = vmatprep.subr.msk.bf16.mxu1 %vm21700_vm1, %v18053_v39  ;;  %v8068_v3 = vsel %vm21719_vm0, %v8063_v58, %v8067_v13  ;;  %v21731_v58 = vld [vmem:[#allocation76_spill] sm:$0xff]  ;;  %vm21742_vm1 = vmmov %vm21741_vm5 }
 0x5b1   : > { %v8071_v14 = vor.u32 %v8069_v0, %v8067_v13  ;;  %v18886_v13 = vld [vmem:[%s20620_s1 + $0x24] ss:$8 sps:$4 sm:$0xff]   ;;  %vm21745_vm9 = vmmov %vm21742_vm1 }
 0x5b2   : > { %v21726_v0 = vld [vmem:[#allocation82_spill] sm:$0xff]  ;;  %vm21754_vm0 = vmmov %vm21742_vm1 }
 0x5b3   : > { %14569 = vmatpush3.bf16.msk.msra.mxu1 %vm21705_vm4, %v17956_v51  ;;  %v8072_v19 = vsel %vm21717_vm15, %v8071_v14, %v21716_v43  ;;  %v7929_v14 = vsel %vm21728_vm10, 0, %v17926_v59  ;;  %vm21746_vm4 = vcmask 1046528   ;;  %vm21753_vm15 = vcmp.ne.s16.totalorder %v21525_v24, 0 }
 0x5b4   : > { %14570 = vmatprep.subr.msk.bf16.mxu1 %vm21707_vm7, %v18060_v49  ;;  %v7946_v33 = vshrl.u32 %v7929_v14, 16  ;;  %vm21747_vm7 = vmmov %vm21742_vm1 }
 0x5b5   : > { %vm21755_vm13 = vmmov %vm21746_vm4 }
 0x5b6   : > { %vm21756_vm10 = vmmov %vm21746_vm4 }
 0x5b7   : > { %14571 = vmatpush3.bf16.msk.msra.mxu1 %vm21709_vm11, %v17965_v28  ;;  %vm21748_vm11 = vmmov %vm21742_vm1 }
 0x5b8   : > { %14572 = vmatprep.subr.msk.bf16.mxu1 %vm21712_vm3, %v18036_v27  ;;  %vm21750_vm3 = vcmp.ne.s16.totalorder %v21521_v61, 0 }
 0x5bb   : > { %14573 = vmatpush3.bf16.msk.msra.mxu1 %vm21715_vm12, %v17926_v59  ;;  %vm21752_vm12 = vcmp.ne.s16.totalorder %v21523_v57, 0 }
 0x5bc   : > { %14606 = vmatprep.subr.bf16.mxu1 %v8072_v19  ;;  %v7948_v19 = vshll.u32 %v7929_v14, 16  ;;  %v15916_v14 = vld [vmem:[%s20623_s4 + $0xd8] sm:$0xff]  }
 0x5bd   : > { %15325 = vmatprep.subr.bf16.mxu0 %v15916_v14 }
 0x5be   : > { %7775 = vmatmul.mubr.bf16.vlgmr.msra.gmra.mxu1 %v18862_v5  ;;  %15326 = vmatpush3.bf16.msra.mxu0 %v15916_v14 }
 0x5bf   : > { %14607 = vmatpush3.bf16.msra.mxu1 %v21718_v4  ;;  %7782 = vmatprep.mubr.bf16.mxu1 %v18870_v17  ;;  %v21732_v4 = vld [vmem:[#allocation41_spill] sm:$0xff] }
 0x5c0   : > { %14608 = vmatprep.subr.bf16.mxu1 %v8068_v3  ;;  %v7950_v3 = vrot.slane %v7948_v19, 1  ;;  %v15918_v19 = vld [vmem:[%s20623_s4 + $0xc8] sm:$0xff]  }
 0x5c3   : > { %14609 = vmatpush3.bf16.msra.mxu1 %v21720_v62  ;;  %v18914_v62 = vld [vmem:[%s20620_s1 + $0x30] ss:$8 sps:$4 sm:$0xff]  }
 0x5c4   : > { %14610 = vmatprep.subr.bf16.mxu1 %v8060_v55  ;;  %v21733_v55 = vld [vmem:[#allocation77_spill] sm:$0xff] }
 0x5c6   : > { %7783 = vmatmul.mubr.bf16.gmra.mxu1 %v18879_v35 }
 0x5c7   : > { %14611 = vmatpush3.bf16.msra.mxu1 %v21723_v63  ;;  %7790 = vmatprep.mubr.bf16.mxu1 %v18886_v13  ;;  %v18921_v63 = vld [vmem:[%s20620_s1 + $0x4] ss:$8 sps:$4 sm:$0xff]  }
 0x5c8   : > { %14612 = vmatprep.subr.bf16.mxu1 %v21724_v20  ;;  %v21734_v20 = vld [vmem:[#allocation84_spill] sm:$0xff] }
 0x5cb   : > { %14613 = vmatpush3.bf16.msra.mxu1 %v21725_v48  ;;  %v7951_v48 = vor.u32 %v7950_v3, %v7946_v33 }
 0x5cc   : > { %14614 = vmatprep.subr.bf16.mxu1 %v21726_v0  ;;  %v21735_v0 = vld [vmem:[#allocation67_spill] sm:$0xff] }
 0x5ce   : > { %7791 = vmatmul.mubr.bf16.gmra.mxu1 %v18898_v18 }
 0x5cf   : > { %14615 = vmatpush3.bf16.msra.mxu1 %v21729_v8  ;;  %7798 = vmatprep.mubr.bf16.mxu1 %v18905_v2  ;;  %v7956_v8 = vsel %vm21736_vm14, %v7951_v48, %v21735_v0  ;;  %vm21757_vm14 = vcmp.ne.s16.totalorder %v21530_v6, 0 }
 0x5d0   : > { %14616 = vmatprep.subr.bf16.mxu1 %v21730_v44  ;;  %v15917_v44 = vld [vmem:[%s20623_s4 + $0xd0] sm:$0xff]  }
 0x5d1   : > { %15327 = vmatprep.subr.bf16.mxu0 %v15917_v44 }
 0x5d2   : > { %15328 = vmatpush3.bf16.msra.mxu0 %v15917_v44 }
 0x5d3   : > { %14617 = vmatpush3.bf16.msra.mxu1 %v21731_v58  ;;  %15329 = vmatprep.subr.bf16.mxu0 %v15918_v19  ;;  %v15919_v58 = vld [vmem:[%s20623_s4 + $0xc0] sm:$0xff]  }
 0x5d4   : > { %14618 = vmatprep.subr.bf16.mxu1 %v21732_v4  ;;  %v15920_v4 = vld [vmem:[%s20623_s4 + $0xf8] sm:$0xff]  }
 0x5d6   : > { %7799 = vmatmul.mubr.bf16.gmra.mxu1 %v18914_v62  ;;  %15330 = vmatpush3.bf16.msra.mxu0 %v15918_v19 }
 0x5d7   : > { %14619 = vmatpush3.bf16.msra.mxu1 %v21733_v55  ;;  %8121 = vmatprep.mubr.bf16.mxu1 %v18921_v63 }
 0x5d8   : > { %14620 = vmatprep.subr.bf16.mxu1 %v21734_v20  ;;  %15331 = vmatprep.subr.bf16.mxu0 %v15919_v58 }
 0x5da   : > { %15332 = vmatpush3.bf16.msra.mxu0 %v15919_v58 }
 0x5db   : > { %14621 = vmatpush3.bf16.msra.mxu1 %v7956_v8  ;;  %15341 = vmatprep.subr.bf16.mxu0 %v15920_v4 }
 0x5de   : > { %8122 = vmatmul.mubr.bf16.vlgmr.msra.gmra.mxu1 %v18862_v5 }
 0x5df   : > { %8129 = vmatprep.mubr.bf16.mxu1 %v18870_v17 }
 0x5e6   : > { %8130 = vmatmul.mubr.bf16.gmra.mxu1 %v18879_v35 }
 0x5e7   : > { %8137 = vmatprep.mubr.bf16.mxu1 %v18886_v13 }
 0x5ee   : > { %8138 = vmatmul.mubr.bf16.gmra.mxu1 %v18898_v18 }
 0x5ef   : > { %8145 = vmatprep.mubr.bf16.mxu1 %v18905_v2 }
 0x5f6   : > { %8146 = vmatmul.mubr.bf16.gmra.mxu1 %v18914_v62 }
 0x63e   : > { %v15303_v3 = vpop.f32.mrf.mxu1 }
 0x63f   : > { %v7450_v33 = vadd.f32 %v15303_v3, %v18754_v22 }
 0x640   : > { %v7417_v55 = vpop.f32.mrf.mxu1 }
 0x641   : > { %v7448_v20 = vadd.f32 %v7417_v55, %v18756_v21 }
 0x642   : > { %v15304_v48 = vpop.f32.mrf.mxu1 }
 0x643   : > { %v7451_v0 = vadd.f32 %v15304_v48, %v18758_v32 }
 0x644   : > { %v18952_v8 = vpop.f32.mrf.mxu1 }
 0x645   : > { %21737 = vst [vmem:[#allocation91_spill] sm:$0xff] %v18952_v8 }
 0x64e   : > { %v15307_v14 = vpop.f32.mrf.mxu1 }
 0x64f   : > { %v7454_v44 = vadd.f32 %v15307_v14, %v18762_v50 }
 0x650   : > { %v7433_v19 = vpop.f32.mrf.mxu1 }
 0x651   : > { %v7452_v54 = vadd.f32 %v7433_v19, %v18764_v37 }
 0x652   : > { %v15308_v11 = vpop.f32.mrf.mxu1 }
 0x653   : > { %v7455_v58 = vadd.f32 %v15308_v11, %v18766_v41 }
 0x654   : > { %v18957_v60 = vpop.f32.mrf.mxu1 }
 0x655   : > { %21738 = vst [vmem:[#allocation92_spill] sm:$0xff] %v18957_v60 }
 0x65e   : > { %v15319_v22 = vpop.f32.mrf.mxu1 }
 0x65f   : > { %v18959_v3 = vadd.f32 %v15319_v22, %v7450_v33 }
 0x660   : > { %v7687_v21 = vpop.f32.mrf.mxu1 }
 0x661   : > { %v18961_v55 = vadd.f32 %v7687_v21, %v7448_v20 }
 0x662   : > { %v15320_v32 = vpop.f32.mrf.mxu1 }
 0x663   : > { %v18963_v48 = vadd.f32 %v15320_v32, %v7451_v0 }
 0x664   : > { %v18965_v8 = vpop.f32.mrf.mxu1 }
 0x665   : > { %21739 = vst [vmem:[#allocation50_spill] sm:$0xff] %v18965_v8 }
 0x66e   : > { %v15323_v50 = vpop.f32.mrf.mxu1 }
 0x66f   : > { %v18967_v14 = vadd.f32 %v15323_v50, %v7454_v44 }
 0x670   : > { %v7703_v37 = vpop.f32.mrf.mxu1 }
 0x671   : > { %v18969_v19 = vadd.f32 %v7703_v37, %v7452_v54 }
 0x672   : > { %v15324_v41 = vpop.f32.mrf.mxu1 }
 0x673   : > { %v18971_v11 = vadd.f32 %v15324_v41, %v7455_v58  ;;  %v15921_v41 = vld [vmem:[%s20623_s4 + $0xf0] sm:$0xff]  }
 0x674   : > { %v18973_v60 = vpop.f32.mrf.mxu1 }
 0x675   : > { %21740 = vst [vmem:[#allocation22_spill] sm:$0xff] %v18973_v60 }
 0x67e   : > { %v14574_v33 = vpop.f32.mrf.mxu1 }
 0x680   : > { %v14575_v22 = vpop.f32.mrf.mxu1 }
 0x681   : > { %v14576_v7 = vadd.f32 %v14575_v22, %v14574_v33 }
 0x682   : > { %v14577_v20 = vpop.f32.mrf.mxu1 }
 0x684   : > { %v14578_v21 = vpop.f32.mrf.mxu1 }
 0x685   : > { %v14579_v0 = vadd.f32 %v14578_v21, %v14577_v20 }
 0x686   : > { %v14580_v32 = vpop.f32.mrf.mxu1 }
 0x687   : > { %v7807_v31 = vpack.c.bf16 %v14579_v0, %v14576_v7  ;;  %v15923_v0 = vld [vmem:[%s20623_s4 + $0xe0] sm:$0xff]  }
 0x688   : > { %v14581_v8 = vpop.f32.mrf.mxu1 }
 0x689   : > { %15333 = vmatprep.mubr.msk.bf16.mxu0 %vm21741_vm5, %v7807_v31  ;;  %v14582_v54 = vadd.f32 %v14581_v8, %v14580_v32  ;;  %v15922_v31 = vld [vmem:[%s20623_s4 + $0xe8] sm:$0xff]   ;;  %v21743_v32 = vld [vmem:[#allocation49_spill] sm:$0xff]  ;;  %vm21758_vm5 = vmmov %vm21746_vm4 }
 0x68a   : > { %v14583_v44 = vpop.f32.mrf.mxu1  ;;  %vm21744_vm6 = vcmp.ne.s16.totalorder %v21743_v32, 0 }
 0x68c   : > { %v14584_v50 = vpop.f32.mrf.mxu1 }
 0x68d   : > { %v14585_v37 = vadd.f32 %v14584_v50, %v14583_v44 }
 0x68e   : > { %v14586_v47 = vpop.f32.mrf.mxu1 }
 0x68f   : > { %v7808_v58 = vpack.c.bf16 %v14585_v37, %v14582_v54 }
 0x690   : > { %v14587_v60 = vpop.f32.mrf.mxu1 }
 0x691   : > { %15334 = vmatmul.mubr.msk.bf16.vlgmr.msra.gmra.mxu0 %vm21742_vm1, %v7808_v58  ;;  %v14588_v22 = vadd.f32 %v14587_v60, %v14586_v47  ;;  %vm21759_vm1 = vcmp.ne.s16.totalorder %v21534_v23, 0 }
 0x692   : > { %15342 = vmatpush3.bf16.msra.mxu0 %v15920_v4  ;;  %v14589_v33 = vpop.f32.mrf.mxu1  ;;  %v8291_v4 = vsel %vm21744_vm6, 0, %v18576_v46  ;;  %vm21760_vm6 = vmmov %vm21746_vm4 }
 0x693   : > { %15343 = vmatprep.subr.bf16.mxu0 %v15921_v41  ;;  %v8337_v54 = vrot.slane %v8291_v4, 1 }
 0x694   : > { %v14590_v7 = vpop.f32.mrf.mxu1 }
 0x695   : > { %v14591_v8 = vadd.f32 %v14590_v7, %v14589_v33 }
 0x696   : > { %15344 = vmatpush3.bf16.msra.mxu0 %v15921_v41  ;;  %v14592_v20 = vpop.f32.mrf.mxu1  ;;  %v8339_v41 = vsel %vm21746_vm4, %v8337_v54, %v21716_v43  ;;  %vm21762_vm4 = vcmp.ne.s16.totalorder %v21539_v30, 0 }
 0x697   : > { %v7809_v21 = vpack.c.bf16 %v14591_v8, %v14588_v22  ;;  %15345 = vmatprep.subr.bf16.mxu0 %v15922_v31 }
 0x698   : > { %v14593_v44 = vpop.f32.mrf.mxu1 }
 0x699   : > { %15337 = vmatprep.mubr.msk.bf16.mxu0 %vm21745_vm9, %v7809_v21  ;;  %v14594_v60 = vadd.f32 %v14593_v44, %v14592_v20  ;;  %v8290_v44 = vsel %vm21750_vm3, 0, %v18078_v26  ;;  %v8282_v26 = vsel %vm21753_vm15, 0, %v18011_v34  ;;  %vm21761_vm9 = vcmp.ne.s16.totalorder %v21537_v10, 0 }
 0x69a   : > { %15346 = vmatpush3.bf16.msra.mxu0 %v15922_v31  ;;  %v14595_v50 = vpop.f32.mrf.mxu1  ;;  %vm21766_vm3 = vcmp.ne.s16.totalorder %v21544_v38, 0 }
 0x69b   : > { %15347 = vmatprep.subr.bf16.mxu0 %v15923_v0  ;;  %v8279_v10 = vsel %vm21766_vm3, 0, %v17994_v12 }
 0x69c   : > { %v14596_v47 = vpop.f32.mrf.mxu1  ;;  %v8313_v30 = vrot.slane %v8279_v10, 1 }
 0x69d   : > { %v14597_v37 = vadd.f32 %v14596_v47, %v14595_v50  ;;  %v19003_v47 = vsel %vm21751_vm8, 0, %v18036_v27 }
 0x69e   : > { %15348 = vmatpush3.bf16.msra.mxu0 %v15923_v0  ;;  %v14622_v58 = vpop.f32.mrf.mxu1  ;;  %v8283_v0 = vsel %vm21749_vm2, 0, %v18046_v1  ;;  %v8289_v1 = vsel %vm21752_vm12, 0, %v18091_v29  ;;  %v8281_v29 = vsel %vm21757_vm14, 0, %v18021_v40  ;;  %v8287_v40 = vsel %vm21761_vm9, 0, %v18066_v15  ;;  %vm21765_vm2 = vmmov %vm21758_vm5 }
 0x69f   : > { %v7810_v33 = vpack.c.bf16 %v14597_v37, %v14594_v60  ;;  %14654 = vmatprep.subr.bf16.mxu0 %v8339_v41  ;;  %vm21767_vm8 = vmmov %vm21765_vm2  ;;  %vm21768_vm12 = vcmp.ne.s16.totalorder %v21546_v52, 0 }
 0x6a0   : > { %v14623_v7 = vpop.f32.mrf.mxu1  ;;  %vm21769_vm15 = vmmov %vm21765_vm2 }
 0x6a1   : > { %15338 = vmatmul.mubr.msk.bf16.gmra.mxu0 %vm21747_vm7, %v7810_v33  ;;  %v14624_v8 = vadd.f32 %v14623_v7, %v14622_v58  ;;  %v8321_v58 = vrot.slane %v8283_v0, 1  ;;  %v8335_v33 = vrot.slane %v8290_v44, 1  ;;  %v8280_v44 = vsel %vm21762_vm4, 0, %v17984_v45  ;;  %vm21763_vm7 = vmmov %vm21758_vm5 }
 0x6a2   : > { %v14625_v46 = vpop.f32.mrf.mxu1  ;;  %vm21773_vm14 = vmmov %vm21765_vm2  ;;  %vm21778_vm4 = vcmp.ne.s16.totalorder %v21652_v53, 0  ;;  %v15925_v53 = vld [vmem:[%s20623_s4 + $0x110] sm:$0xff]  }
 0x6a3   : > { %v8338_v61 = vsel %vm21756_vm10, %v8335_v33, %v8337_v54  ;;  %vm21777_vm9 = vmmov %vm21765_vm2 }
 0x6a4   : > { %v14626_v22 = vpop.f32.mrf.mxu1 }
 0x6a5   : > { %v14627_v31 = vadd.f32 %v14626_v22, %v14625_v46  ;;  %v8323_v46 = vrot.slane %v19003_v47, 1  ;;  %v8333_v22 = vrot.slane %v8289_v1, 1 }
 0x6a6   : > { %v14628_v21 = vpop.f32.mrf.mxu1 }
 0x6a7   : > { %v8154_v32 = vpack.c.bf16 %v14627_v31, %v14624_v8  ;;  %v8324_v27 = vsel %vm21755_vm13, %v8321_v58, %v8323_v46  ;;  %v8319_v8 = vrot.slane %v8282_v26, 1  ;;  %v8336_v54 = vsel %vm21760_vm6, %v8333_v22, %v8335_v33  ;;  %vm21776_vm6 = vmmov %vm21765_vm2 }
 0x6a8   : > { %v14629_v4 = vpop.f32.mrf.mxu1  ;;  %v8286_v33 = vsel %vm21768_vm12, 0, %v18053_v39  ;;  %vm21771_vm13 = vcmp.ne.s16.totalorder %v21551_v42, 0 }
 0x6a9   : > { %15349 = vmatprep.mubr.msk.bf16.mxu0 %vm21748_vm11, %v8154_v32  ;;  %v14630_v60 = vadd.f32 %v14629_v4, %v14628_v21  ;;  %v8322_v31 = vsel %vm21758_vm5, %v8319_v8, %v8321_v58  ;;  %v8317_v21 = vrot.slane %v8281_v29, 1  ;;  %v8288_v32 = vsel %vm21759_vm1, 0, %v18063_v56  ;;  %vm21764_vm11 = vmmov %vm21754_vm0 }
 0x6aa   : > { %v14631_v20 = vpop.f32.mrf.mxu1  ;;  %v8331_v0 = vrot.slane %v8288_v32, 1  ;;  %v8327_v38 = vrot.slane %v8286_v33, 1  ;;  %vm21772_vm10 = vmmov %vm21764_vm11  ;;  %vm21775_vm1 = vcmp.ne.s16.totalorder %v21648_v9, 0 }
 0x6ab   : > { %vm21774_vm5 = vmmov %vm21765_vm2 }
 0x6ac   : > { %v14632_v50 = vpop.f32.mrf.mxu1  ;;  %v8334_v23 = vsel %vm21765_vm2, %v8331_v0, %v8333_v22  ;;  %vm21781_vm3 = vmmov %vm21772_vm10 }
 0x6ad   : > { %v14633_v37 = vadd.f32 %v14632_v50, %v14631_v20  ;;  %v8320_v50 = vsel %vm21763_vm7, %v8317_v21, %v8319_v8  ;;  %vm21779_vm7 = vmmov %vm21765_vm2 }
 0x6ae   : > { %v14634_v41 = vpop.f32.mrf.mxu1  ;;  %vm21783_vm12 = vmmov %vm21781_vm3 }
 0x6af   : > { %v8155_v7 = vpack.c.bf16 %v14633_v37, %v14630_v60  ;;  %v8329_v60 = vrot.slane %v8287_v40, 1  ;;  %v8315_v37 = vrot.slane %v8280_v44, 1 }
 0x6b0   : > { %v14635_v16 = vpop.f32.mrf.mxu1 }
 0x6b1   : > { %15350 = vmatmul.mubr.msk.bf16.vlgmr.msra.gmra.mxu0 %vm21754_vm0, %v8155_v7  ;;  %v14636_v57 = vadd.f32 %v14635_v16, %v14634_v41  ;;  %v8318_v45 = vsel %vm21767_vm8, %v8315_v37, %v8317_v21  ;;  %v8332_v7 = vsel %vm21769_vm15, %v8329_v60, %v8331_v0  ;;  %vm21770_vm0 = vcmp.ne.s16.totalorder %v21549_v25, 0  ;;  %vm21782_vm8 = vmmov %vm21781_vm3 }
 0x6b2   : > { %14655 = vmatpush3.bf16.msra.mxu0 %v8324_v27  ;;  %v14637_v36 = vpop.f32.mrf.mxu1  ;;  %v8285_v12 = vsel %vm21770_vm0, 0, %v18060_v49  ;;  %v8278_v16 = vsel %vm21771_vm13, 0, %v17956_v51  ;;  %v8316_v26 = vsel %vm21773_vm14, %v8313_v30, %v8315_v37  ;;  %v8330_v39 = vsel %vm21774_vm5, %v8327_v38, %v8329_v60  ;;  %vm21784_vm15 = vmmov %vm21781_vm3 }
 0x6b3   : > { %14656 = vmatprep.subr.bf16.mxu0 %v8338_v61  ;;  %v8325_v52 = vrot.slane %v8285_v12, 1  ;;  %v8277_v27 = vsel %vm21775_vm1, 0, %v17965_v28  ;;  %v8311_v49 = vrot.slane %v8278_v16, 1 }
 0x6b4   : > { %v14638_v24 = vpop.f32.mrf.mxu1  ;;  %v8309_v42 = vrot.slane %v8277_v27, 1 }
 0x6b5   : > { %v14639_v34 = vadd.f32 %v14638_v24, %v14637_v36  ;;  %v8314_v25 = vsel %vm21776_vm6, %v8311_v49, %v8313_v30  ;;  %v8328_v51 = vsel %vm21777_vm9, %v8325_v52, %v8327_v38  ;;  %v8276_v36 = vsel %vm21778_vm4, 0, %v17926_v59  ;;  %v15924_v59 = vld [vmem:[%s20623_s4 + $0x118] sm:$0xff]  }
 0x6b6   : > { %14657 = vmatpush3.bf16.msra.mxu0 %v8322_v31  ;;  %v14640_v4 = vpop.f32.mrf.mxu1  ;;  %v8312_v61 = vsel %vm21779_vm7, %v8309_v42, %v8311_v49  ;;  %v8308_v9 = vrot.slane %v8276_v36, 1  ;;  %15357 = vmatprep.subr.bf16.mxu1 %v15924_v59  ;;  %vm21790_vm4 = vcmask 1040384   ;;  %vm8596_vm7 = vcmask 1044480  }
 0x6b7   : > { %v8156_v20 = vpack.c.bf16 %v14639_v34, %v14636_v57  ;;  %14658 = vmatprep.subr.bf16.mxu0 %v8336_v54  ;;  %15358 = vmatpush3.bf16.msra.mxu1 %v15924_v59  ;;  %v15931_v59 = vld [vmem:[#allocation2] sm:$0xff]  }
 0x6b8   : > { %v14641_v6 = vpop.f32.mrf.mxu1  ;;  %15359 = vmatprep.subr.bf16.mxu1 %v15925_v53 }
 0x6b9   : > { %15353 = vmatprep.mubr.msk.bf16.mxu0 %vm21764_vm11, %v8156_v20  ;;  %v14642_v15 = vadd.f32 %v14641_v6, %v14640_v4  ;;  %vm21780_vm11 = vmmov %vm21765_vm2 }
 0x6ba   : > { %14659 = vmatpush3.bf16.msra.mxu0 %v8320_v50  ;;  %v14643_v56 = vpop.f32.mrf.mxu1  ;;  %v8326_v28 = vsel %vm21780_vm11, %v8323_v46, %v8325_v52 }
 0x6bb   : > { %14660 = vmatprep.subr.bf16.mxu0 %v8334_v23  ;;  %15360 = vmatpush3.bf16.msra.mxu1 %v15925_v53  ;;  %v21785_v53 = vld [vmem:[#allocation14_spill] sm:$0xff] }
 0x6bc   : > { %v14644_v58 = vpop.f32.mrf.mxu1 }
 0x6bd   : > { %v14645_v41 = vadd.f32 %v14644_v58, %v14643_v56 }
 0x6be   : > { %14661 = vmatpush3.bf16.msra.mxu0 %v8318_v45 }
 0x6bf   : > { %v8157_v1 = vpack.c.bf16 %v14645_v41, %v14642_v15  ;;  %14662 = vmatprep.subr.bf16.mxu0 %v8332_v7 }
 0x6c1   : > { %15354 = vmatmul.mubr.msk.bf16.gmra.mxu0 %vm21772_vm10, %v8157_v1 }
 0x6c2   : > { %14663 = vmatpush3.bf16.msra.mxu0 %v8316_v26  ;;  %8388 = vmatprep.mubr.bf16.mxu0 %v18921_v63  ;;  %v8310_v63 = vsel %vm21765_vm2, %v8308_v9, %v8309_v42  ;;  %v15929_v9 = vld [vmem:[#allocation2 + $0x10] sm:$0xff]  }
 0x6c3   : > { %14664 = vmatprep.subr.bf16.mxu0 %v8330_v39 }
 0x6c6   : > { %14665 = vmatpush3.bf16.msra.mxu0 %v8314_v25 }
 0x6c7   : > { %14666 = vmatprep.subr.bf16.mxu0 %v8328_v51 }
 0x6ca   : > { %14667 = vmatpush3.bf16.msra.mxu0 %v8312_v61 }
 0x6cb   : > { %14668 = vmatprep.subr.bf16.mxu0 %v8326_v28  ;;  %v15928_v28 = vld [vmem:[#allocation2 + $0x18] sm:$0xff]  }
 0x6ce   : > { %14669 = vmatpush3.bf16.msra.mxu0 %v8310_v63  ;;  %v15930_v63 = vld [vmem:[#allocation2 + $0x8] sm:$0xff]  }
 0x6d1   : > { %8389 = vmatmul.mubr.bf16.vlgmr.msra.gmra.mxu0 %v18862_v5  ;;  %v15926_v5 = vld [vmem:[%s20623_s4 + $0x108] sm:$0xff]  }
 0x6d2   : > { %8396 = vmatprep.mubr.bf16.mxu0 %v18870_v17  ;;  %15361 = vmatprep.subr.bf16.mxu1 %v15926_v5  ;;  %v15927_v17 = vld [vmem:[%s20623_s4 + $0x100] sm:$0xff]  }
 0x6d3   : > { %15362 = vmatpush3.bf16.msra.mxu1 %v15926_v5  ;;  %v8604_v5 = vand.u32 7, %v21785_v53 }
 0x6d4   : > { %15363 = vmatprep.subr.bf16.mxu1 %v15927_v17 }
 0x6d5   : > { %vm8636_vm0 = vcmp.eq.s32.totalorder %v8604_v5, 7 }
 0x6d6   : > { %vm9091_vm14 = vmpackc.low %vm8636_vm0, %vm8636_vm0  ;;  %vm19193_vm0 = vcmp.eq.s32.totalorder %v8604_v5, 0 }
 0x6d7   : > { %15364 = vmatpush3.bf16.msra.mxu1 %v15927_v17  ;;  %v21786_v17 = vld [vmem:[#allocation11_spill] sm:$0xff] }
 0x6d8   : > { %15373 = vmatprep.subr.bf16.mxu1 %v15928_v28 }
 0x6d9   : > { %8397 = vmatmul.mubr.bf16.gmra.mxu0 %v18879_v35 }
 0x6da   : > { %8404 = vmatprep.mubr.bf16.mxu0 %v18886_v13 }
 0x6e1   : > { %8405 = vmatmul.mubr.bf16.gmra.mxu0 %v18898_v18 }
 0x6e2   : > { %8412 = vmatprep.mubr.bf16.mxu0 %v18905_v2 }
 0x6e9   : > { %8413 = vmatmul.mubr.bf16.gmra.mxu0 %v18914_v62 }
 0x751   : > { %v15335_v35 = vpop.f32.mrf.mxu0 }
 0x752   : > { %v7923_v13 = vadd.f32 %v15335_v35, %v18959_v3  ;;  %v8602_v35 = vand.u32 7, %v21786_v17  ;;  %v21811_v17 = vld [vmem:[#allocation93_spill] sm:$0xff] }
 0x753   : > { %v7890_v18 = vpop.f32.mrf.mxu0 }
 0x754   : > { %v7921_v2 = vadd.f32 %v7890_v18, %v18961_v55  ;;  %v15933_v18 = vld [vmem:[#allocation2 + $0x30] sm:$0xff]   ;;  %vm8634_vm13 = vcmp.eq.s32.totalorder %v8602_v35, 7  ;;  %vm19163_vm11 = vcmp.eq.s32.totalorder %v8602_v35, 0 }
 0x755   : > { %v15336_v62 = vpop.f32.mrf.mxu0  ;;  %vm9089_vm1 = vmpackc.low %vm8634_vm13, %vm8634_vm13 }
 0x756   : > { %v7924_v47 = vadd.f32 %v15336_v62, %v18963_v48  ;;  %v21787_v62 = vld [vmem:[#allocation48_spill] sm:$0xff] }
 0x757   : > { %v19087_v46 = vpop.f32.mrf.mxu0 }
 0x761   : > { %v15339_v22 = vpop.f32.mrf.mxu0 }
 0x762   : > { %v7927_v29 = vadd.f32 %v15339_v22, %v18967_v14  ;;  %v21788_v22 = vld [vmem:[#allocation47_spill] sm:$0xff] }
 0x763   : > { %v7906_v57 = vpop.f32.mrf.mxu0 }
 0x764   : > { %v7925_v8 = vadd.f32 %v7906_v57, %v18969_v19  ;;  %v15935_v57 = vld [vmem:[#allocation2 + $0x28] sm:$0xff]  }
 0x765   : > { %v15340_v24 = vpop.f32.mrf.mxu0 }
 0x766   : > { %v7928_v34 = vadd.f32 %v15340_v24, %v18971_v11 }
 0x767   : > { %v19092_v31 = vpop.f32.mrf.mxu0 }
 0x771   : > { %v15351_v3 = vpop.f32.mrf.mxu0 }
 0x772   : > { %v19094_v21 = vadd.f32 %v15351_v3, %v7923_v13  ;;  %v15932_v13 = vld [vmem:[#allocation2 + $0x38] sm:$0xff]   ;;  %v15937_v3 = vld [vmem:[#allocation2 + $0x20] sm:$0xff]  }
 0x773   : > { %v8237_v55 = vpop.f32.mrf.mxu0  ;;  %15389 = vmatprep.subr.bf16.mxu0 %v15932_v13 }
 0x774   : > { %v19096_v32 = vadd.f32 %v8237_v55, %v7921_v2  ;;  %v19116_v2 = vld [vmem:[#allocation2 + $0x58] sm:$0xff]   ;;  %15390 = vmatpush3.bf16.msra.mxu0 %v15932_v13  ;;  %v21812_v13 = vld [vmem:[#allocation91_spill] sm:$0xff] }
 0x775   : > { %v15352_v48 = vpop.f32.mrf.mxu0  ;;  %15391 = vmatprep.subr.bf16.mxu0 %v15933_v18 }
 0x776   : > { %v19098_v4 = vadd.f32 %v15352_v48, %v7924_v47  ;;  %v8605_v47 = vand.u32 7, %v21787_v62 }
 0x777   : > { %v19100_v54 = vpop.f32.mrf.mxu0 }
 0x778   : > { %vm8637_vm10 = vcmp.eq.s32.totalorder %v8605_v47, 7  ;;  %15392 = vmatpush3.bf16.msra.mxu0 %v15933_v18 }
 0x779   : > { %vm9092_vm5 = vmpackc.low %vm8637_vm10, %vm8637_vm10  ;;  %15393 = vmatprep.subr.bf16.mxu0 %v15935_v57 }
 0x77c   : > { %15394 = vmatpush3.bf16.msra.mxu0 %v15935_v57  ;;  %v21817_v57 = vld [vmem:[#allocation9_spill] sm:$0xff] }
 0x77d   : > { %15395 = vmatprep.subr.bf16.mxu0 %v15937_v3 }
 0x780   : > { %15396 = vmatpush3.bf16.msra.mxu0 %v15937_v3 }
 0x781   : > { %v15355_v14 = vpop.f32.mrf.mxu0 }
 0x782   : > { %v19102_v20 = vadd.f32 %v15355_v14, %v7927_v29  ;;  %v8603_v29 = vand.u32 7, %v21788_v22 }
 0x783   : > { %v8253_v19 = vpop.f32.mrf.mxu0 }
 0x784   : > { %v19104_v40 = vadd.f32 %v8253_v19, %v7925_v8  ;;  %v21789_v8 = vmov 0   ;;  %vm8635_vm6 = vcmp.eq.s32.totalorder %v8603_v29, 7  ;;  %v19129_v19 = vld [vmem:[#allocation2 + $0x78] sm:$0xff]  }
 0x785   : > { %v15356_v11 = vpop.f32.mrf.mxu0  ;;  %v9099_v24 = vsel %vm9091_vm14, 65537, %v21789_v8  ;;  %v9097_v55 = vsel %vm9089_vm1, 65537, %v21789_v8  ;;  %vm9090_vm9 = vmpackc.low %vm8635_vm6, %vm8635_vm6  ;;  %15421 = vmatprep.subr.bf16.mxu0 %v19129_v19  ;;  %vm19218_vm1 = vcmp.eq.s32.totalorder %v8605_v47, 0 }
 0x786   : > { %v19106_v6 = vadd.f32 %v15356_v11, %v7928_v34  ;;  %v9100_v34 = vsel %vm9092_vm5, 65537, %v21789_v8  ;;  %v9098_v14 = vsel %vm9090_vm9, 65537, %v21789_v8  ;;  %vm8669_vm6 = vmpackc.low %vm19193_vm0, %vm19193_vm0 }
 0x787   : > { %v19108_v0 = vpop.f32.mrf.mxu0  ;;  %v19126_v48 = vcombine.low %v9099_v24, %v9100_v34  ;;  %v19131_v11 = vcombine.low %v9097_v55, %v9098_v14  ;;  %v8600_v24 = vand.u32 7, %v21817_v57  ;;  %v21818_v34 = vld [vmem:[#allocation92_spill] sm:$0xff]  ;;  %v21819_v55 = vld [vmem:[#allocation50_spill] sm:$0xff] }
 0x791   : > { %v14670_v44 = vpop.f32.mrf.mxu0 }
 0x793   : > { %v14671_v50 = vpop.f32.mrf.mxu0 }
 0x794   : > { %v14672_v60 = vadd.f32 %v14671_v50, %v14670_v44  ;;  %v19134_v44 = vrot.slane %v19126_v48, 7  ;;  %v19137_v50 = vrot.slane %v19131_v11, 7 }
 0x795   : > { %v14673_v56 = vpop.f32.mrf.mxu0 }
 0x797   : > { %v14674_v23 = vpop.f32.mrf.mxu0 }
 0x798   : > { %v14675_v10 = vadd.f32 %v14674_v23, %v14673_v56  ;;  %v19143_v56 = vsel %vm21790_vm4, %v19137_v50, %v19134_v44  ;;  %v9660_v23 = vrot.slane %v19131_v11, 3  ;;  %vm19231_vm4 = vcmp.eq.s32.totalorder %v8600_v24, 7 }
 0x799   : > { %v14676_v15 = vpop.f32.mrf.mxu0  ;;  %21791 = vst [vmem:[#allocation60_spill] sm:$0xff] %v19143_v56 }
 0x79a   : > { %v8421_v37 = vpack.c.bf16 %v14675_v10, %v14672_v60  ;;  %v9662_v60 = vrot.slane %v19126_v48, 3 }
 0x79b   : > { %v14677_v58 = vpop.f32.mrf.mxu0 }
 0x79c   : > { %15365 = vmatprep.mubr.msk.bf16.mxu1 %vm21781_vm3, %v8421_v37  ;;  %v14678_v30 = vadd.f32 %v14677_v58, %v14676_v15  ;;  %v19152_v10 = vsel %vm8596_vm7, %v9660_v23, %v9662_v60  ;;  %v16050_v15 = vld [vmem:[%s20624_s5] ss:$0 sm:$0xff]  ;;  %v21793_v37 = vld [vmem:[#allocation86_spill] sm:$0xff]  ;;  %vm19174_vm3 = vcmp.eq.s32.totalorder %v8603_v29, 0 }
 0x79d   : > { %v14679_v41 = vpop.f32.mrf.mxu0  ;;  %21792 = vst [vmem:[#allocation61_spill] sm:$0xff] %v19152_v10  ;;  %v6300_v58 = vadd.f32 %v16050_v15, %v21793_v37  ;;  %vm8668_vm13 = vmpackc.low %vm19174_vm3, %vm19174_vm3 }
 0x79f   : > { %v14680_v45 = vpop.f32.mrf.mxu0 }
 0x7a0   : > { %v14681_v33 = vadd.f32 %v14680_v45, %v14679_v41  ;;  %v21794_v41 = vld [vmem:[#allocation38_spill] sm:$0xff] }
 0x7a1   : > { %v14682_v7 = vpop.f32.mrf.mxu0  ;;  %v6304_v45 = vadd.f32 %v16050_v15, %v21794_v41 }
 0x7a2   : > { %v8422_v1 = vpack.c.bf16 %v14681_v33, %v14678_v30  ;;  %v21795_v30 = vld [vmem:[#allocation79_spill] sm:$0xff] }
 0x7a3   : > { %v14683_v12 = vpop.f32.mrf.mxu0  ;;  %v6644_v33 = vadd.f32 %v21795_v30, %v6300_v58  ;;  %v21824_v58 = vld [vmem:[#allocation22_spill] sm:$0xff]  ;;  %v21843_v30 = vmov 0 }
 0x7a4   : > { %15366 = vmatmul.mubr.msk.bf16.vlgmr.msra.gmra.mxu1 %vm21782_vm8, %v8422_v1  ;;  %v14684_v26 = vadd.f32 %v14683_v12, %v14682_v7  ;;  %v21796_v7 = vld [vmem:[#allocation89_spill] sm:$0xff]  ;;  %v21797_v12 = vld [vmem:[#allocation75_spill] sm:$0xff] }
 0x7a5   : > { %v14685_v38 = vpop.f32.mrf.mxu0  ;;  %15374 = vmatpush3.bf16.msra.mxu1 %v15928_v28  ;;  %v6648_v1 = vadd.f32 %v21796_v7, %v6304_v45  ;;  %v21808_v28 = vld [vmem:[#allocation10_spill] sm:$0xff] }
 0x7a6   : > { %15375 = vmatprep.subr.bf16.mxu1 %v15929_v9 }
 0x7a7   : > { %v14686_v16 = vpop.f32.mrf.mxu0 }
 0x7a8   : > { %v14687_v39 = vadd.f32 %v14686_v16, %v14685_v38  ;;  %v6911_v38 = vadd.f32 %v21797_v12, %v6644_v33  ;;  %v21798_v16 = vld [vmem:[#allocation70_spill] sm:$0xff]  ;;  %v19251_v12 = vsel %vm8668_vm13, 65537, %v21789_v8  ;;  %vm20870_vm13 = vsmask.f32 4352 }
 0x7a9   : > { %v14688_v52 = vpop.f32.mrf.mxu0  ;;  %15376 = vmatpush3.bf16.msra.mxu1 %v15929_v9  ;;  %v21809_v9 = vld [vmem:[#allocation12_spill] sm:$0xff] }
 0x7aa   : > { %v8423_v27 = vpack.c.bf16 %v14687_v39, %v14684_v26  ;;  %15377 = vmatprep.subr.bf16.mxu1 %v15930_v63  ;;  %v8601_v26 = vand.u32 7, %v21798_v16 }
 0x7ab   : > { %v14689_v49 = vpop.f32.mrf.mxu0 }
 0x7ac   : > { %15369 = vmatprep.mubr.msk.bf16.mxu1 %vm21783_vm12, %v8423_v27  ;;  %v14690_v51 = vadd.f32 %v14689_v49, %v14688_v52  ;;  %v21801_v52 = vld [vmem:[#allocation80_spill] sm:$0xff]  ;;  %v21802_v49 = vld [vmem:[#allocation81_spill] sm:$0xff]  ;;  %vm19169_vm2 = vcmp.eq.s32.totalorder %v8601_v26, 0  ;;  %vm19183_vm8 = vcmp.eq.s32.totalorder %v8601_v26, 7  ;;  %vm8667_vm12 = vmpackc.low %vm19163_vm11, %vm19163_vm11 }
 0x7ad   : > { %v14691_v25 = vpop.f32.mrf.mxu0  ;;  %15378 = vmatpush3.bf16.msra.mxu1 %v15930_v63  ;;  %v6915_v27 = vadd.f32 %v21801_v52, %v6648_v1  ;;  %v13870_v63 = vcombine.low %v21809_v9, %v21808_v28  ;;  %vm9088_vm14 = vmpackc.low %vm19183_vm8, %vm19183_vm8  ;;  %v19243_v1 = vsel %vm8667_vm12, 65537, %v21789_v8  ;;  %vm19289_vm12 = vcmp.eq.s32.totalorder %v8600_v24, 0 }
 0x7ae   : > { %15379 = vmatprep.subr.bf16.mxu1 %v15931_v59  ;;  %vm8670_vm11 = vmpackc.low %vm19218_vm1, %vm19218_vm1  ;;  %v9096_v16 = vsel %vm9088_vm14, 65537, %v21789_v8 }
 0x7af   : > { %v14692_v42 = vpop.f32.mrf.mxu0  ;;  %v7118_v35 = vadd.f32 %v21811_v17, %v6915_v27  ;;  %v8869_v5 = vshrl.u32 %v13870_v63, 16  ;;  %vm9631_vm8 = vmpackc.low %vm19231_vm4, %vm19231_vm4  ;;  %v19320_v17 = vsel %vm8670_vm11, 65537, %v21789_v8 }
 0x7b0   : > { %v14693_v36 = vadd.f32 %v14692_v42, %v14691_v25  ;;  %v7114_v25 = vadd.f32 %v21802_v49, %v6911_v38  ;;  %v8872_v38 = vshll.u32 %v13870_v63, 16  ;;  %v13942_v42 = vcombine.low %v21808_v28, %v21809_v9  ;;  %vm9280_vm14 = vmpackc.low %vm19289_vm12, %vm19289_vm12 }
 0x7b1   : > { %15380 = vmatpush3.bf16.msra.mxu1 %v15931_v59  ;;  %v21810_v59 = vld [vmem:[#allocation51_spill] sm:$0xff]  ;;  %v7453_v3 = vadd.f32 %v21818_v34, %v7118_v35  ;;  %v13882_v63 = vcombine.low %v21809_v9, %v9096_v16  ;;  %v19372_v7 = vsel %vm9280_vm14, 65537, %v21789_v8 }
 0x7b2   : > { %v8424_v61 = vpack.c.bf16 %v14693_v36, %v14690_v51  ;;  %15405 = vmatprep.subr.bf16.mxu1 %v19116_v2  ;;  %v21805_v51 = vld [vmem:[#allocation19_spill] sm:$0xff]  ;;  %v8607_v53 = vand.u32 7, %v21810_v59  ;;  %v7449_v18 = vadd.f32 %v21812_v13, %v7114_v25  ;;  %v21836_v13 = vld [vmem:[#allocation20_spill] sm:$0xff]  ;;  %v13894_v52 = vcombine.low %v19372_v7, %v19372_v7 }
 0x7b3   : > { %v8606_v36 = vand.u32 7, %v21805_v51  ;;  %v7723_v41 = vadd.f32 %v21824_v58, %v7453_v3  ;;  %v10055_v3 = vshrl.u32 %v13942_v42, 16  ;;  %v19351_v15 = vrot.slane %v13882_v63, 7 }
 0x7b4   : > { %15370 = vmatmul.mubr.msk.bf16.gmra.mxu1 %vm21784_vm15, %v8424_v61  ;;  %vm8666_vm15 = vmpackc.low %vm19169_vm2, %vm19169_vm2  ;;  %v7719_v14 = vadd.f32 %v21819_v55, %v7449_v18  ;;  %vm19210_vm5 = vcmp.eq.s32.totalorder %v8607_v53, 7 }
 0x7b5   : > { %vm19203_vm10 = vcmp.eq.s32.totalorder %v8606_v36, 7  ;;  %v19226_v33 = vsel %vm8666_vm15, 65537, %v21789_v8  ;;  %vm9094_vm2 = vmpackc.low %vm19210_vm5, %vm19210_vm5  ;;  %vm19271_vm3 = vcmp.eq.s32.totalorder %v8606_v36, 0  ;;  %v13858_v36 = vcombine.low %v19243_v1, %v19251_v12  ;;  %21839 = vst [vmem:[#allocation59_spill] sm:$0xff] %v19351_v15 }
 0x7b6   : > { %v7922_v45 = vadd.f32 %v19087_v46, %v7719_v14  ;;  %vm9093_vm9 = vmpackc.low %vm19203_vm10, %vm19203_vm10  ;;  %v7926_v46 = vadd.f32 %v19092_v31, %v7723_v41  ;;  %v9102_v49 = vsel %vm9094_vm2, 65537, %v21789_v8  ;;  %vm19305_vm15 = vcmp.eq.s32.totalorder %v8607_v53, 0 }
 0x7b7   : > { %v19281_v27 = vsel %vm9093_vm9, 65537, %v21789_v8  ;;  %vm8671_vm0 = vmpackc.low %vm19271_vm3, %vm19271_vm3  ;;  %v13895_v35 = vcombine.low %v19226_v33, %v19243_v1  ;;  %vm21837_vm10 = vsmask.f32 256  ;;  %v10058_v1 = vshll.u32 %v13942_v42, 16 }
 0x7b8   : > { %v8269_v62 = vadd.f32 %v19100_v54, %v7922_v45  ;;  %v8871_v54 = vrot.slane %v8869_v5, 7  ;;  %v19267_v26 = vadd.f32 %v19108_v0, %v7926_v46  ;;  %v19338_v22 = vcombine.low %v19281_v27, %v9102_v49  ;;  %vm8672_vm5 = vmpackc.low %vm19305_vm15, %vm19305_vm15 }
 0x7b9   : > { %v21840_v45 = vmov 0  ;;  %v19380_v46 = vsel %vm8671_vm0, 65537, %v21789_v8  ;;  %vm21846_vm2 = vcmask 1040384   ;;  %vm20867_vm11 = vcmp.ne.s16.totalorder %v19351_v15, 0 }
 0x7ba   : > { %v19312_v59 = vor.u32 %v8872_v38, %v8871_v54  ;;  %v19335_v18 = vsel %vm21837_vm10, %v8871_v54, %v21836_v13  ;;  %v13954_v61 = vcombine.low %v19281_v27, %v21809_v9  ;;  %vm21848_vm3 = vmmov %vm21846_vm2  ;;  %vm19420_vm15 = vcmp.ne.s16.totalorder %v13894_v52, 0 }
 0x7bb   : > { %21838 = vst [vmem:[#allocation66_spill] sm:$0xff] %v19335_v18  ;;  %vm20868_vm4 = vcmp.ne.s16.totalorder %v19335_v18, 0  ;;  %v21853_v27 = vmov 0  ;;  %vm19424_vm0 = vcmp.ne.s16.totalorder %v13895_v35, 0  ;;  %vm21861_vm14 = vmmov %vm21846_vm2  ;;  %v15938_v35 = vld [vmem:[#allocation2 + $0x48] sm:$0xff]  }
 0x7bc   : > { %21835 = vst [vmem:[#allocation69_spill] sm:$0xff] %v19312_v59  ;;  %vm20869_vm9 = vcmp.ne.s16.totalorder %v19312_v59, 0  ;;  %v21854_v27 = vsel %vm19420_vm15, 4294967295, %v21853_v27  ;;  %v19452_v11 = vrot.slane %v13954_v61, 7 }
 0x7bd   : > { %21855 = vst [vmem:[#allocation63_spill] sm:$0xff] %v21854_v27 }
 0x7be   : > { %v19582_v57 = vsel %vm21846_vm2, %v19134_v44, %v19452_v11 }
 0x7bf   : > { %21896 = vst [vmem:[#allocation46_spill] sm:$0xff] %v19582_v57 }
 0x864   : > { %v15367_v47 = vpop.f32.mrf.mxu1 }
 0x865   : > { %v8537_v31 = vadd.f32 %v15367_v47, %v19094_v21  ;;  %v13857_v21 = vcombine.low %v21809_v9, %v19226_v33  ;;  %v9120_v47 = vrot.slane %v19338_v22, 7 }
 0x866   : > { %v8504_v39 = vpop.f32.mrf.mxu1 }
 0x867   : > { %v8535_v0 = vadd.f32 %v8504_v39, %v19096_v32  ;;  %10429 = vrot.lane.b32.xlu1 %v8537_v31, %s16154_s18  ;;  %v19303_v32 = vsel %vm8669_vm6, 65537, %v21789_v8  ;;  %v8545_v29 = vmax.f32 %v8537_v31, 0.0  ;;  %vm19356_vm1 = vcmp.ne.s16.totalorder %v13857_v21, 0 }
 0x868   : > { %v15368_v51 = vpop.f32.mrf.mxu1  ;;  %v13859_v55 = vcombine.low %v19303_v32, %v19320_v17  ;;  %v21841_v45 = vsel %vm19356_vm1, 4294967295, %v21840_v45  ;;  %vm19360_vm6 = vcmp.ne.s16.totalorder %v13858_v36, 0  ;;  %v19396_v21 = vsel %vm21846_vm2, %v19351_v15, %v19137_v50 }
 0x869   : > { %v8538_v28 = vadd.f32 %v15368_v51, %v19098_v4  ;;  %10425 = vrot.lane.b32.xlu0 %v8535_v0, %s16154_s18  ;;  %v9639_v4 = vsel %vm9631_vm8, 65537, %v21789_v8  ;;  %v8543_v37 = vmax.f32 %v8535_v0, 0.0  ;;  %21842 = vst [vmem:[#allocation58_spill] sm:$0xff] %v21841_v45  ;;  %v21844_v30 = vsel %vm19360_vm6, 4294967295, %v21843_v30  ;;  %21847 = vst [vmem:[#allocation64_spill] sm:$0xff] %v19396_v21 }
 0x86a   : > { %v8507_v53 = vpop.f32.mrf.mxu1  ;;  %v19353_v5 = vcombine.low %v9639_v4, %v9096_v16  ;;  %21845 = vst [vmem:[#allocation65_spill] sm:$0xff] %v21844_v30  ;;  %v10057_v16 = vrot.slane %v10055_v3, 7  ;;  %v20865_v36 = vrot.slane %v19338_v22, 3  ;;  %v19411_v4 = vsel %vm21848_vm3, %v19134_v44, %v9120_v47  ;;  %vm19415_vm8 = vmand %vm8596_vm7, %vm20870_vm13 }
 0x86b   : > { %v8546_v24 = vmax.f32 %v8538_v28, 0.0  ;;  %v8536_v34 = vadd.f32 %v8507_v53, %v8269_v62  ;;  %10431 = vrot.lane.b32.xlu1 %v8538_v28, %s16154_s18  ;;  %v19388_v62 = vsel %vm8672_vm5, 65537, %v21789_v8  ;;  %21849 = vst [vmem:[#allocation57_spill] sm:$0xff] %v19411_v4  ;;  %vm20866_vm12 = vcmp.ne.s16.totalorder %v19396_v21, 0  ;;  %vm21867_vm5 = vmmov %vm21837_vm10 }
 0x86c   : > { %v13860_v39 = vcombine.low %v19380_v46, %v19388_v62  ;;  %v9659_v8 = vrot.slane %v19353_v5, 3  ;;  %v13898_v51 = vcombine.low %v19388_v62, %v19388_v62  ;;  %v10060_v53 = vor.u32 %v10058_v1, %v10057_v16  ;;  %v21866_v16 = vld [vmem:[#allocation16_spill] sm:$0xff] }
 0x86d   : > { %v8552_v58 = vpack.c.bf16 %v8546_v24, %v8545_v29  ;;  %v8544_v41 = vmax.f32 %v8536_v34, 0.0  ;;  %10427 = vrot.lane.b32.xlu0 %v8536_v34, %s16154_s18  ;;  %v21850_v29 = vmov 0  ;;  %v21856_v34 = vmov 0 }
 0x86e   : > { %v21851_v29 = vsel %vm19415_vm8, 4294967295, %v21850_v29  ;;  %v21857_v34 = vsel %vm19424_vm0, 4294967295, %v21856_v34  ;;  %v20864_v3 = vrot.slane %v19353_v5, 7  ;;  %v19435_v1 = vsel %vm8596_vm7, %v9659_v8, %v9660_v23 }
 0x86f   : > { %v8565_v31 = vshrl.u32 %v8552_v58, 16  ;;  %v8568_v54 = vshll.u32 %v8552_v58, 16  ;;  %v8551_v38 = vpack.c.bf16 %v8544_v41, %v8543_v37  ;;  %21852 = vst [vmem:[#allocation56_spill] sm:$0xff] %v21851_v29  ;;  %21858 = vst [vmem:[#allocation62_spill] sm:$0xff] %v21857_v34  ;;  %vm21869_vm3 = vcmask 523264  }
 0x870   : > { %21859 = vst [vmem:[#allocation55_spill] sm:$0xff] %v19435_v1  ;;  %vm21885_vm10 = vcmask 523264   ;;  %vm21903_vm2 = vcmask 523264  }
 0x871   : > { %v8567_v0 = vrot.slane %v8565_v31, 3  ;;  %v8570_v49 = vrot.slane %v8568_v54, 4  ;;  %v8557_v25 = vshrl.u32 %v8551_v38, 16  ;;  %v8560_v42 = vshll.u32 %v8551_v38, 16 }
 0x872   : > { %v19444_v54 = vsel %vm8596_vm7, %v9662_v60, %v20865_v36  ;;  %vm19463_vm7 = vcmp.ne.s16.totalorder %v9659_v8, 0  ;;  %v21863_v60 = vmov 0 }
 0x873   : > { %v8559_v63 = vrot.slane %v8557_v25, 3  ;;  %v8562_v28 = vrot.slane %v8560_v42, 4  ;;  %v19429_v37 = vor.u32 %v8570_v49, %v8567_v0  ;;  %21860 = vst [vmem:[#allocation53_spill] sm:$0xff] %v19444_v54  ;;  %v21864_v60 = vsel %vm19463_vm7, 4294967295, %v21863_v60  ;;  %v15936_v25 = vld [vmem:[#allocation2 + $0x50] sm:$0xff]  }
 0x874   : > { %v15371_v24 = vpop.f32.mrf.mxu1  ;;  %21865 = vst [vmem:[#allocation17_spill] sm:$0xff] %v21864_v60  ;;  %v15941_v60 = vld [vmem:[#allocation2 + $0x70] sm:$0xff]  }
 0x875   : > { %v8563_v58 = vor.u32 %v8562_v28, %v8559_v63  ;;  %v8541_v41 = vadd.f32 %v15371_v24, %v19102_v20  ;;  %v19450_v20 = vsel %vm21861_vm14, %v20864_v3, %v19137_v50  ;;  %v19469_v50 = vsel %vm21867_vm5, %v21866_v16, %v10060_v53  ;;  %vm21870_vm14 = vmmov %vm21869_vm3 }
 0x876   : > { %v8520_v31 = vpop.f32.mrf.mxu1  ;;  %21862 = vst [vmem:[#allocation30_spill] sm:$0xff] %v19450_v20  ;;  %21868 = vst [vmem:[#allocation71_spill] sm:$0xff] %v19469_v50  ;;  %vm19501_vm5 = vcmp.ne.s16.totalorder %v13898_v51, 0 }
 0x877   : > { %v19456_v23 = vsel %vm20870_vm13, %v8563_v58, %v19429_v37  ;;  %v19460_v38 = vsel %vm19415_vm8, 0, %v8563_v58  ;;  %v8539_v48 = vadd.f32 %v8520_v31, %v19104_v40  ;;  %v8549_v42 = vmax.f32 %v8541_v41, 0.0 }
 0x878   : > { %v15372_v52 = vpop.f32.mrf.mxu1  ;;  %v8697_v0 = vsel %vm19356_vm1, 0, %v19460_v38  ;;  %v8698_v49 = vsel %vm19360_vm6, 0, %v19456_v23  ;;  %v8904_v40 = vsel %vm20869_vm9, 0, %v19460_v38  ;;  %v19483_v8 = vsel %vm20868_vm4, 0, %v19456_v23 }
 0x879   : > { %v8547_v61 = vmax.f32 %v8539_v48, 0.0  ;;  %v8542_v63 = vadd.f32 %v15372_v52, %v19106_v6  ;;  %15381 = vmatprep.mubr.msk.bf16.mxu1 %vm21869_vm3, %v8697_v0  ;;  %10433 = vrot.lane.b32.xlu0 %v8539_v48, %s16154_s18  ;;  %v8921_v28 = vshll.u32 %v8904_v40, 16  ;;  %v8919_v24 = vshrl.u32 %v8904_v40, 16 }
 0x87a   : > { %v8523_v53 = vpop.f32.mrf.mxu1  ;;  %15382 = vmatmul.mubr.msk.bf16.vlgmr.msra.gmra.mxu1 %vm21870_vm14, %v8698_v49  ;;  %v8926_v58 = vshll.u32 %v19483_v8, 16  ;;  %v9127_v31 = vsel %vm20867_vm11, 0, %v19460_v38  ;;  %v19497_v3 = vsel %vm20866_vm12, 0, %v19456_v23  ;;  %v21871_v0 = vmov 0 }
 0x87b   : > { %v8550_v6 = vmax.f32 %v8542_v63, 0.0  ;;  %v8540_v52 = vadd.f32 %v8523_v53, %v19267_v26  ;;  %v8923_v48 = vrot.slane %v8921_v28, 1  ;;  %15406 = vmatpush3.bf16.msra.mxu1 %v19116_v2  ;;  %v21872_v0 = vsel %vm19501_vm5, 4294967295, %v21871_v0 }
 0x87c   : > { %21873 = vst [vmem:[#allocation68_spill] sm:$0xff] %v21872_v0  ;;  %v9146_v49 = vrot.slane %v9127_v31, 1  ;;  %vm19507_vm3 = vcmp.ne.s16.totalorder %v9120_v47, 0  ;;  %v21874_v40 = vmov 0  ;;  %v8928_v36 = vrot.slane %v8926_v58, 1  ;;  %15407 = vmatprep.subr.bf16.mxu1 %v15936_v25 }
 0x87d   : > { %v21875_v40 = vsel %vm19507_vm3, 4294967295, %v21874_v40  ;;  %v20871_v14 = vrot.slane %v19497_v3, 1  ;;  %v9314_v2 = vsel %vm19420_vm15, 0, %v19460_v38  ;;  %v9315_v26 = vsel %vm19424_vm0, 0, %v19456_v23  ;;  %10437 = vrot.lane.b32.xlu0 %v8541_v41, %s16154_s18  ;;  %10435 = vrot.lane.b32.xlu1 %v8540_v52, %s16154_s18 }
 0x87e   : > { %21876 = vst [vmem:[#allocation73_spill] sm:$0xff] %v21875_v40  ;;  %v8554_v51 = vpack.c.bf16 %v8550_v6, %v8549_v42  ;;  %v8548_v28 = vmax.f32 %v8540_v52, 0.0  ;;  %v8924_v47 = vor.u32 %v8923_v48, %v8919_v24  ;;  %vm19523_vm14 = vcmp.ne.s16.totalorder %v13859_v55, 0 }
 0x87f   : > { %v21877_v53 = vmov 0  ;;  %vm19530_vm12 = vcmp.ne.s16.totalorder %v13860_v39, 0  ;;  %v21880_v58 = vmov 0  ;;  %v9334_v42 = vrot.slane %v9314_v2, 4  ;;  %15408 = vmatpush3.bf16.msra.mxu1 %v15936_v25  ;;  %v15939_v39 = vld [vmem:[#allocation2 + $0x40] sm:$0xff]  }
 0x880   : > { %v21878_v53 = vsel %vm19523_vm14, 4294967295, %v21877_v53  ;;  %v21881_v58 = vsel %vm19530_vm12, 4294967295, %v21880_v58  ;;  %v8930_v41 = vshrl.u32 %v19483_v8, 16  ;;  %vm21883_vm11 = vcmask 1046528   ;;  %15409 = vmatprep.subr.bf16.mxu1 %v15938_v35 }
 0x881   : > { %21879 = vst [vmem:[#allocation72_spill] sm:$0xff] %v21878_v53  ;;  %21882 = vst [vmem:[#allocation85_spill] sm:$0xff] %v21881_v58  ;;  %v19538_v24 = vsel %vm21883_vm11, %v9146_v49, %v20871_v14  ;;  %v19540_v31 = vrot.slane %v9315_v26, 4  ;;  %v9463_v55 = vshrl.u32 %v19460_v38, 16  ;;  %v8583_v6 = vshrl.u32 %v8554_v51, 16  ;;  %10439 = vrot.lane.b32.xlu1 %v8542_v63, %s16154_s18  ;;  %v19577_v14 = vld [vmem:[#allocation2 + $0x98] sm:$0xff]  }
 0x882   : > { %v8586_v52 = vshll.u32 %v8554_v51, 16  ;;  %v8553_v48 = vpack.c.bf16 %v8548_v28, %v8547_v61  ;;  %vm21884_vm4 = vsmask.f32 7424  ;;  %vm21886_vm11 = vcmask 1043456  }
 0x883   : > { %v8929_v62 = vsel %vm21884_vm4, %v8924_v47, %v8928_v36  ;;  %v19549_v8 = vsel %vm21886_vm11, %v9334_v42, %v19540_v31  ;;  %v9465_v49 = vrot.slane %v9463_v55, 4  ;;  %v9466_v2 = vshll.u32 %v19460_v38, 16  ;;  %15410 = vmatpush3.bf16.msra.mxu1 %v15938_v35 }
 0x884   : > { %15397 = vmatprep.mubr.msk.bf16.mxu0 %vm21885_vm10, %v8929_v62  ;;  %v9471_v61 = vshrl.u32 %v19456_v23, 16  ;;  %v8585_v26 = vrot.slane %v8583_v6, 3  ;;  %v8588_v25 = vrot.slane %v8586_v52, 4  ;;  %v8574_v51 = vshrl.u32 %v8553_v48, 16  ;;  %15411 = vmatprep.subr.bf16.mxu1 %v15939_v39 }
 0x885   : > { %v8577_v28 = vshll.u32 %v8553_v48, 16  ;;  %v21887_v47 = vcombine.low %v19251_v12, %v19303_v32  ;;  %v21888_v62 = vmov 0  ;;  %v21891_v42 = vcombine.low %v19320_v17, %v19380_v46 }
 0x886   : > { %v21892_v55 = vmov 0  ;;  %v9468_v6 = vrot.slane %v9466_v2, 5  ;;  %v9473_v52 = vrot.slane %v9471_v61, 4  ;;  %v9474_v48 = vshll.u32 %v19456_v23, 16 }
 0x887   : > { %vm19557_vm4 = vcmp.ne.s16.totalorder %v21887_v47, 0  ;;  %vm19564_vm10 = vcmp.ne.s16.totalorder %v21891_v42, 0  ;;  %v9671_v63 = vsel %vm19463_vm7, 0, %v19460_v38  ;;  %v8589_v12 = vor.u32 %v8588_v25, %v8585_v26  ;;  %15412 = vmatpush3.bf16.msra.mxu1 %v15939_v39 }
 0x888   : > { %v21889_v62 = vsel %vm19557_vm4, 4294967295, %v21888_v62  ;;  %v21893_v55 = vsel %vm19564_vm10, 4294967295, %v21892_v55  ;;  %v8576_v32 = vrot.slane %v8574_v51, 3  ;;  %v8579_v47 = vrot.slane %v8577_v28, 4  ;;  %15437 = vmatprep.subr.bf16.mxu1 %v19577_v14 }
 0x889   : > { %21890 = vst [vmem:[#allocation44_spill] sm:$0xff] %v21889_v62  ;;  %21894 = vst [vmem:[#allocation78_spill] sm:$0xff] %v21893_v55  ;;  %vm21895_vm11 = vcmp.ne.s16.totalorder %v19435_v1, 0  ;;  %v8932_v42 = vor.u32 %v8930_v41, %v8928_v36  ;;  %v9469_v2 = vor.u32 %v9468_v6, %v9465_v49  ;;  %v9476_v61 = vrot.slane %v9474_v48, 5 }
 0x88a   : > { %v19575_v17 = vsel %vm21895_vm11, 0, %v19456_v23  ;;  %v19586_v38 = vsel %vm19415_vm8, %v8589_v12, 0  ;;  %v8580_v35 = vor.u32 %v8579_v47, %v8576_v32  ;;  %v19588_v26 = vrot.slane %v9671_v63, 5  ;;  %v21900_v63 = vld [vmem:[#allocation23_spill] sm:$0xff] }
 0x88b   : > { %vm21897_vm11 = vcmp.ne.s16.totalorder %v21866_v16, 0  ;;  %v9131_v41 = vsel %vm19507_vm3, 0, %v19586_v38  ;;  %v19597_v49 = vor.u32 %v9476_v61, %v9473_v52  ;;  %v9318_v44 = vsel %vm19501_vm5, 0, %v19586_v38  ;;  %vm21904_vm5 = vmmov %vm21903_vm2 }
 0x88c   : > { %v8908_v36 = vsel %vm21897_vm11, 0, %v19586_v38  ;;  %vm21898_vm13 = vsmask.f32 4352  ;;  %v9153_v6 = vrot.slane %v9131_v41, 1  ;;  %vm21905_vm7 = vcmp.ne.s16.totalorder %v19143_v56, 0 }
 0x88d   : > { %v19604_v11 = vsel %vm21898_vm13, %v19429_v37, %v8580_v35  ;;  %vm21899_vm9 = vmmov %vm21898_vm13  ;;  %v8950_v28 = vshll.u32 %v8908_v36, 16  ;;  %vm21901_vm13 = vcmp.ne.s16.totalorder %v21900_v63, 0  ;;  %v21917_v55 = vrot.slane %v19497_v3, 1 }
 0x88e   : > { %v19607_v51 = vsel %vm21899_vm9, %v8580_v35, %v8589_v12  ;;  %v8699_v52 = vsel %vm19523_vm14, 0, %v19604_v11  ;;  %v8906_v37 = vsel %vm21901_vm13, 0, %v19604_v11  ;;  %vm21902_vm9 = vmmov %vm21901_vm13  ;;  %v9129_v35 = vsel %vm21905_vm7, 0, %v19604_v11 }
 0x88f   : > { %v8700_v48 = vsel %vm19530_vm12, 0, %v19607_v51  ;;  %v8907_v39 = vsel %vm21902_vm9, 0, %v19607_v51  ;;  %15385 = vmatprep.mubr.msk.bf16.mxu1 %vm21903_vm2, %v8699_v52  ;;  %v8934_v12 = vshll.u32 %v8906_v37, 16  ;;  %v8938_v32 = vshrl.u32 %v8906_v37, 16 }
 0x890   : > { %v8942_v47 = vshll.u32 %v8907_v39, 16  ;;  %v8946_v61 = vshrl.u32 %v8907_v39, 16  ;;  %15386 = vmatmul.mubr.msk.bf16.gmra.mxu1 %vm21904_vm5, %v8700_v48  ;;  %vm21906_vm13 = vcmp.ne.s16.totalorder %v19411_v4, 0  ;;  %v8952_v41 = vrot.slane %v8950_v28, 1 }
 0x891   : > { %v9130_v36 = vsel %vm21906_vm13, 0, %v19607_v51  ;;  %vm21907_vm9 = vsmask.f32 3328  ;;  %v21908_v37 = vrot.slane %v19338_v22, 3  ;;  %v21909_v39 = vmov 0  ;;  %15413 = vmatprep.mubr.msk.bf16.mxu1 %vm21904_vm5, %v19538_v24 }
 0x892   : > { %v19634_v52 = vsel %vm21907_vm9, %v9469_v2, %v19597_v49  ;;  %v19644_v48 = vrot.slane %v8934_v12, 1  ;;  %v8944_v25 = vrot.slane %v8942_v47, 1  ;;  %v9149_v0 = vrot.slane %v9129_v35, 1 }
 0x893   : > { %vm19638_vm2 = vcmp.ne.s16.totalorder %v21908_v37, 0  ;;  %v9151_v1 = vrot.slane %v9130_v36, 1  ;;  %v9316_v2 = vsel %vm19557_vm4, 0, %v19604_v11  ;;  %v9317_v22 = vsel %vm19564_vm10, 0, %v19607_v51 }
 0x894   : > { %v21910_v39 = vsel %vm19638_vm2, 4294967295, %v21909_v39  ;;  %v9480_v28 = vshrl.u32 %v19604_v11, 16  ;;  %v9483_v37 = vshll.u32 %v19604_v11, 16  ;;  %v21912_v24 = vrot.slane %v19353_v5, 7 }
 0x895   : > { %21911 = vst [vmem:[#allocation74_spill] sm:$0xff] %v21910_v39  ;;  %v21913_v12 = vmov 0  ;;  %vm21916_vm13 = vsmask.f32 7424  ;;  %v8940_v35 = vor.u32 %v8938_v32, %v19644_v48  ;;  %v19663_v36 = vor.u32 %v8946_v61, %v8944_v25  ;;  %v15944_v61 = vld [vmem:[#allocation2 + $0x90] sm:$0xff]  }
 0x896   : > { %vm19656_vm7 = vcmp.ne.s16.totalorder %v21912_v24, 0  ;;  %v8937_v47 = vsel %vm21916_vm13, %v8932_v42, %v19644_v48  ;;  %vm21918_vm9 = vcmask 1046528   ;;  %vm20898_vm5 = vcmp.ne.s16.totalorder %v19450_v20, 0  ;;  %vm21922_vm3 = vmmov %vm21916_vm13 }
 0x897   : > { %v21914_v12 = vsel %vm19656_vm7, 4294967295, %v21913_v12  ;;  %v9150_v62 = vsel %vm21918_vm9, %v21917_v55, %v9149_v0  ;;  %vm21919_vm11 = vcmask 523264   ;;  %vm21920_vm10 = vmmov %vm21918_vm9  ;;  %v9337_v40 = vrot.slane %v9316_v2, 4 }
 0x898   : > { %21915 = vst [vmem:[#allocation90_spill] sm:$0xff] %v21914_v12  ;;  %15398 = vmatmul.mubr.msk.bf16.vlgmr.msra.gmra.mxu0 %vm21919_vm11, %v8937_v47  ;;  %v9152_v5 = vsel %vm21920_vm10, %v9149_v0, %v9151_v1  ;;  %vm21921_vm4 = vmmov %vm21918_vm9  ;;  %v9339_v34 = vrot.slane %v9317_v22, 4  ;;  %v19676_v42 = vsel %vm21916_vm13, %v8940_v35, %v8944_v25  ;;  %v8953_v3 = vsel %vm21922_vm3, %v19663_v36, %v8952_v41  ;;  %v15943_v0 = vld [vmem:[#allocation2 + $0x68] sm:$0xff]  }
 0x899   : > { %v19672_v24 = vsel %vm21921_vm4, %v9151_v1, %v9153_v6  ;;  %15422 = vmatpush3.bf16.msra.mxu0 %v19129_v19  ;;  %v9482_v55 = vrot.slane %v9480_v28, 4  ;;  %v9485_v32 = vrot.slane %v9483_v37, 5  ;;  %vm21923_vm9 = vmmov %vm21919_vm11  ;;  %vm21924_vm4 = vcmask 1043456  }
 0x89a   : > { %15401 = vmatprep.mubr.msk.bf16.mxu0 %vm21923_vm9, %v19676_v42  ;;  %15423 = vmatprep.subr.bf16.mxu0 %v15941_v60  ;;  %v19684_v1 = vsel %vm21924_vm4, %v19540_v31, %v9337_v40  ;;  %vm21925_vm10 = vmmov %vm21924_vm4  ;;  %v9489_v19 = vshrl.u32 %v19607_v51, 16  ;;  %v9492_v25 = vshll.u32 %v19607_v51, 16  ;;  %v9341_v2 = vrot.slane %v9318_v44, 4 }
 0x89b   : > { %v19687_v6 = vsel %vm21925_vm10, %v9337_v40, %v9339_v34  ;;  %v9486_v41 = vor.u32 %v9485_v32, %v9482_v55  ;;  %v21926_v22 = vrot.slane %v19575_v17, 5  ;;  %vm21927_vm3 = vcmask 1042432   ;;  %vm21928_vm11 = vmmov %vm21923_vm9  ;;  %v15945_v32 = vld [vmem:[#allocation2 + $0x60] sm:$0xff]  }
 0x89c   : > { %v9498_v37 = vshrl.u32 %v19586_v38, 16  ;;  %15414 = vmatmul.mubr.msk.bf16.vlgmr.msra.gmra.mxu1 %vm21928_vm11, %v9150_v62  ;;  %v9491_v31 = vrot.slane %v9489_v19, 4  ;;  %v9494_v40 = vrot.slane %v9492_v25, 5  ;;  %v9501_v47 = vshll.u32 %v19586_v38, 16 }
 0x89d   : > { %v19695_v28 = vsel %vm21927_vm3, %v19588_v26, %v21926_v22  ;;  %vm21929_vm13 = vcmp.ne.s16.totalorder %v19152_v10, 0  ;;  %15417 = vmatprep.mubr.msk.bf16.mxu1 %vm21923_vm9, %v9152_v5  ;;  %15424 = vmatpush3.bf16.msra.mxu0 %v15941_v60  ;;  %vm21930_vm4 = vsmask.f32 3328  ;;  %v19709_v26 = vsel %vm21925_vm10, %v9339_v34, %v9341_v2 }
 0x89e   : > { %v9673_v35 = vsel %vm21929_vm13, 0, %v19604_v11  ;;  %v19706_v44 = vsel %vm21930_vm4, %v19597_v49, %v9486_v41  ;;  %v9500_v55 = vrot.slane %v9498_v37, 4  ;;  %15438 = vmatpush3.bf16.msra.mxu1 %v19577_v14  ;;  %15425 = vmatprep.subr.bf16.mxu0 %v15943_v0  ;;  %v9495_v19 = vor.u32 %v9494_v40, %v9491_v31  ;;  %v15946_v49 = vld [vmem:[#allocation2 + $0x88] sm:$0xff]  }
 0x89f   : > { %v9694_v62 = vrot.slane %v9673_v35, 5  ;;  %v9503_v25 = vrot.slane %v9501_v47, 5  ;;  %vm21931_vm3 = vcmp.ne.s16.totalorder %v19444_v54, 0  ;;  %vm21932_vm11 = vcmp.ne.s16.totalorder %v21836_v13, 0  ;;  %15439 = vmatprep.subr.bf16.mxu1 %v15944_v61 }
 0x8a0   : > { %v9674_v5 = vsel %vm21931_vm3, 0, %v19607_v51  ;;  %v10066_v60 = vsel %vm21932_vm11, 0, %v19456_v23  ;;  %v21933_v34 = vmov %v21926_v22  ;;  %vm21934_vm13 = vcmask 1042432  }
 0x8a1   : > { %v19721_v2 = vsel %vm21934_vm13, %v21933_v34, %v9694_v62  ;;  %v9696_v14 = vrot.slane %v9674_v5, 5  ;;  %v9675_v22 = vsel %vm19638_vm2, 0, %v19586_v38  ;;  %vm20897_vm9 = vcmp.ne.s16.totalorder %v19469_v50, 0  ;;  %15426 = vmatpush3.bf16.msra.mxu0 %v15943_v0  ;;  %v13869_v50 = vld [vmem:[%s20626_s7] ss:$0 sm:$0xff] }
 0x8a2   : > { %vm21935_vm4 = vcmask 523264   ;;  %vm21936_vm10 = vsmask.f32 3328  ;;  %v9504_v31 = vor.u32 %v9503_v25, %v9500_v55  ;;  %v9698_v40 = vrot.slane %v9675_v22, 5  ;;  %15440 = vmatpush3.bf16.msra.mxu1 %v15944_v61  ;;  %15427 = vmatprep.subr.bf16.mxu0 %v15945_v32 }
 0x8a3   : > { %15402 = vmatmul.mubr.msk.bf16.gmra.mxu0 %vm21935_vm4, %v8953_v3  ;;  %v9496_v37 = vsel %vm21936_vm10, %v9486_v41, %v9495_v19  ;;  %vm20896_vm3 = vcmp.ne.s16.totalorder %v19582_v57, 0  ;;  %vm21937_vm11 = vmmov %vm21935_vm4  ;;  %v19733_v17 = vsel %vm21934_vm13, %v9694_v62, %v9696_v14  ;;  %v10080_v47 = vshrl.u32 %v10066_v60, 16  ;;  %v15948_v3 = vld [vmem:[#allocation2 + $0xb8] sm:$0xff]   ;;  %15441 = vmatprep.subr.bf16.mxu1 %v15946_v49  ;;  %v15947_v62 = vld [vmem:[#allocation2 + $0x80] sm:$0xff]  }
 0x8a4   : > { %15429 = vmatprep.mubr.msk.bf16.mxu0 %vm21937_vm11, %v19549_v8  ;;  %v10082_v35 = vshll.u32 %v10066_v60, 16  ;;  %v10283_v5 = vsel %vm19656_vm7, 0, %v19456_v23  ;;  %vm21938_vm4 = vmmov %vm21936_vm10  ;;  %v10284_v8 = vsel %vm20898_vm5, 0, %v19604_v11  ;;  %v19748_v61 = vsel %vm20897_vm9, 0, %v19586_v38 }
 0x8a5   : > { %v9505_v41 = vsel %vm21938_vm4, %v9495_v19, %v9504_v31  ;;  %vm21939_vm10 = vmmov %vm21934_vm13  ;;  %v10300_v0 = vrot.slane %v10283_v5, 1  ;;  %v10301_v60 = vrot.slane %v10284_v8, 1  ;;  %vm21940_vm11 = vcmp.ne.s16.totalorder %v19143_v56, 0  ;;  %15428 = vmatpush3.bf16.msra.mxu0 %v15945_v32 }
 0x8a6   : > { %v19740_v55 = vsel %vm21939_vm10, %v9696_v14, %v9698_v40  ;;  %v10084_v25 = vrot.slane %v10082_v35, 1  ;;  %v10285_v19 = vsel %vm21940_vm11, 0, %v19607_v51  ;;  %vm21941_vm13 = vcmask 523264   ;;  %15442 = vmatpush3.bf16.msra.mxu1 %v15946_v49  ;;  %15453 = vmatprep.subr.bf16.mxu0 %v15948_v3 }
 0x8a7   : > { %15418 = vmatmul.mubr.msk.bf16.gmra.mxu1 %vm21941_vm13, %v19672_v24  ;;  %v10103_v34 = vshll.u32 %v19748_v61, 16  ;;  %v10303_v14 = vrot.slane %v10285_v19, 1  ;;  %v19759_v22 = vsel %vm20896_vm3, 0, %v19586_v38  ;;  %vm21942_vm4 = vmmov %vm21941_vm13  ;;  %vm21943_vm10 = vcmask 1046528   ;;  %v15949_v24 = vld [vmem:[#allocation2 + $0xb0] sm:$0xff]   ;;  %15443 = vmatprep.subr.bf16.mxu1 %v15947_v62  ;;  %v15950_v19 = vld [vmem:[#allocation2 + $0xd8] sm:$0xff]  }
 0x8a8   : > { %15445 = vmatprep.mubr.msk.bf16.mxu1 %vm21942_vm4, %v19634_v52  ;;  %v10085_v31 = vor.u32 %v10084_v25, %v10080_v47  ;;  %v19764_v40 = vsel %vm21943_vm10, %v10300_v0, %v10301_v60  ;;  %v10305_v35 = vrot.slane %v19759_v22, 1  ;;  %vm21944_vm11 = vmmov %vm21943_vm10  ;;  %vm21945_vm13 = vsmask.f32 7424  ;;  %v15952_v47 = vld [vmem:[#allocation2 + $0xd0] sm:$0xff]   ;;  %v15964_v25 = vld [vmem:[#allocation4 + $0x18] sm:$0xff]  }
 0x8a9   : > { %v19767_v5 = vrot.slane %v10103_v34, 1  ;;  %v19770_v8 = vsel %vm21944_vm11, %v10301_v60, %v10303_v14  ;;  %vm21946_vm4 = vmmov %vm21943_vm10  ;;  %vm21947_vm10 = vcmask 523264   ;;  %v9867_v0 = vsel %vm19523_vm14, 0, %v19607_v51  ;;  %v15965_v60 = vld [vmem:[#allocation4 + $0x10] sm:$0xff]   ;;  %v15968_v34 = vld [vmem:[#allocation4 + $0x38] sm:$0xff]  }
 0x8aa   : > { %v10090_v32 = vsel %vm21945_vm13, %v10085_v31, %v19644_v48  ;;  %v19777_v52 = vsel %vm21946_vm4, %v10303_v14, %v10305_v35  ;;  %vm21948_vm3 = vmmov %vm21945_vm13  ;;  %15444 = vmatpush3.bf16.msra.mxu1 %v15947_v62  ;;  %v15951_v48 = vld [vmem:[#allocation2 + $0xa8] sm:$0xff]   ;;  %v10107_v51 = vshrl.u32 %v19748_v61, 16  ;;  %v15969_v14 = vld [vmem:[#allocation4 + $0x30] sm:$0xff]  }
 0x8ab   : > { %15430 = vmatmul.mubr.msk.bf16.vlgmr.msra.gmra.mxu0 %vm21947_vm10, %v19684_v1  ;;  %v19784_v49 = vsel %vm21948_vm3, %v19663_v36, %v19767_v5  ;;  %vm21949_vm11 = vmmov %vm21947_vm10  ;;  %15469 = vmatprep.subr.bf16.mxu1 %v15950_v19  ;;  %v15953_v1 = vld [vmem:[#allocation2 + $0xa0] sm:$0xff]   ;;  %v13927_v36 = vcombine.low %v19372_v7, %v19226_v33  ;;  %v15957_v7 = vld [vmem:[#allocation2 + $0xf0] sm:$0xff]  }
 0x8ac   : > { %15433 = vmatprep.mubr.msk.bf16.mxu0 %vm21949_vm11, %v19687_v6  ;;  %15454 = vmatpush3.bf16.msra.mxu0 %v15948_v3  ;;  %vm21950_vm13 = vmmov %vm21947_vm10  ;;  %v15954_v6 = vld [vmem:[#allocation2 + $0xc8] sm:$0xff]   ;;  %v15956_v3 = vld [vmem:[#allocation2 + $0xf8] sm:$0xff]  }
 0x8ad   : > { %15455 = vmatprep.subr.bf16.mxu0 %v15949_v24  ;;  %vm21951_vm4 = vmmov %vm21947_vm10  ;;  %vm19797_vm11 = vcmp.ne.s16.totalorder %v13927_v36, 0  ;;  %v15962_v62 = vld [vmem:[#allocation2 + $0x108] sm:$0xff]   ;;  %v15967_v31 = vld [vmem:[#allocation4] sm:$0xff]  }
 0x8ae   : > { %vm21952_vm3 = vmmov %vm21951_vm4  ;;  %v9865_v33 = vsel %vm19797_vm11, 0, %v19456_v23  ;;  %v9866_v23 = vsel %vm19360_vm6, 0, %v19604_v11  ;;  %v21963_v11 = vmov 0  ;;  %v15966_v61 = vld [vmem:[#allocation4 + $0x8] sm:$0xff]   ;;  %v19851_v22 = vld [vmem:[#allocation4 + $0x58] sm:$0xff]  }
 0x8af   : > { %15446 = vmatmul.mubr.msk.bf16.vlgmr.msra.gmra.mxu1 %vm21950_vm13, %v19706_v44  ;;  %vm21953_vm10 = vmmov %vm21952_vm3  ;;  %v21954_v44 = vmov 0  ;;  %21975 = vst [vmem:[#allocation31_spill] sm:$0xff] %v19851_v22 }
 0x8b0   : > { %15456 = vmatpush3.bf16.msra.mxu0 %v15949_v24  ;;  %15449 = vmatprep.mubr.msk.bf16.mxu1 %vm21951_vm4, %v9496_v37  ;;  %v21955_v44 = vsel %vm19797_vm11, 4294967295, %v21954_v44  ;;  %v15955_v37 = vld [vmem:[#allocation2 + $0xc0] sm:$0xff]   ;;  %vm21957_vm13 = vmmov %vm21952_vm3  ;;  %v19854_v24 = vld [vmem:[#allocation4 + $0x78] sm:$0xff]  }
 0x8b1   : > { %15470 = vmatpush3.bf16.msra.mxu1 %v15950_v19  ;;  %15457 = vmatprep.subr.bf16.mxu0 %v15951_v48  ;;  %21956 = vst [vmem:[#allocation88_spill] sm:$0xff] %v21955_v44  ;;  %vm21958_vm4 = vmmov %vm21952_vm3 }
 0x8b2   : > { %15471 = vmatprep.subr.bf16.mxu1 %v15952_v47  ;;  %vm21968_vm9 = vmmov %vm21952_vm3  ;;  %21976 = vst [vmem:[#allocation45_spill] sm:$0xff] %v19854_v24 }
 0x8b3   : > { %15434 = vmatmul.mubr.msk.bf16.gmra.mxu0 %vm21952_vm3, %v19709_v26  ;;  %v15959_v26 = vld [vmem:[#allocation2 + $0xe8] sm:$0xff]   ;;  %vm21969_vm5 = vmmov %vm21952_vm3 }
 0x8b4   : > { %15458 = vmatpush3.bf16.msra.mxu0 %v15951_v48  ;;  %15461 = vmatprep.mubr.msk.bf16.mxu0 %vm21953_vm10, %v19695_v28  ;;  %v15958_v28 = vld [vmem:[#allocation2 + $0x118] sm:$0xff]   ;;  %vm21959_vm10 = vmmov %vm21952_vm3 }
 0x8b5   : > { %15472 = vmatpush3.bf16.msra.mxu1 %v15952_v47  ;;  %15459 = vmatprep.subr.bf16.mxu0 %v15953_v1 }
 0x8b6   : > { %15473 = vmatprep.subr.bf16.mxu1 %v15954_v6 }
 0x8b7   : > { %15450 = vmatmul.mubr.msk.bf16.gmra.mxu1 %vm21957_vm13, %v9505_v41  ;;  %v15960_v41 = vld [vmem:[#allocation2 + $0x110] sm:$0xff]   ;;  %vm21960_vm13 = vmmov %vm21952_vm3 }
 0x8b8   : > { %15460 = vmatpush3.bf16.msra.mxu0 %v15953_v1  ;;  %15477 = vmatprep.mubr.msk.bf16.mxu1 %vm21958_vm4, %v9865_v33  ;;  %vm21961_vm4 = vmmov %vm21952_vm3 }
 0x8b9   : > { %15474 = vmatpush3.bf16.msra.mxu1 %v15954_v6  ;;  %15485 = vmatprep.subr.bf16.mxu0 %v15956_v3 }
 0x8ba   : > { %15475 = vmatprep.subr.bf16.mxu1 %v15955_v37 }
 0x8bb   : > { %15462 = vmatmul.mubr.msk.bf16.vlgmr.msra.gmra.mxu0 %vm21952_vm3, %v19721_v2  ;;  %v13930_v2 = vcombine.low %v19380_v46, %v21809_v9  ;;  %v15963_v9 = vld [vmem:[#allocation2 + $0x100] sm:$0xff]  }
 0x8bc   : > { %15465 = vmatprep.mubr.msk.bf16.mxu0 %vm21959_vm10, %v19733_v17  ;;  %15486 = vmatpush3.bf16.msra.mxu0 %v15956_v3  ;;  %v15961_v17 = vld [vmem:[#allocation2 + $0xe0] sm:$0xff]   ;;  %vm21962_vm10 = vmmov %vm21952_vm3 }
 0x8bd   : > { %15476 = vmatpush3.bf16.msra.mxu1 %v15955_v37  ;;  %15487 = vmatprep.subr.bf16.mxu0 %v15957_v7 }
 0x8be   : > { %15501 = vmatprep.subr.bf16.mxu1 %v15958_v28 }
 0x8c0   : > { %15478 = vmatmul.mubr.msk.bf16.vlgmr.msra.gmra.mxu1 %vm21960_vm13, %v9866_v23  ;;  %15488 = vmatpush3.bf16.msra.mxu0 %v15957_v7  ;;  %vm19823_vm13 = vcmp.ne.s16.totalorder %v13930_v2, 0 }
 0x8c1   : > { %15481 = vmatprep.mubr.msk.bf16.mxu1 %vm21961_vm4, %v9867_v0  ;;  %15502 = vmatpush3.bf16.msra.mxu1 %v15958_v28  ;;  %v21964_v11 = vsel %vm19823_vm13, 4294967295, %v21963_v11  ;;  %v9868_v46 = vsel %vm19823_vm13, 0, %v19586_v38  ;;  %vm21966_vm4 = vmmov %vm21952_vm3 }
 0x8c2   : > { %15489 = vmatprep.subr.bf16.mxu0 %v15959_v26  ;;  %15503 = vmatprep.subr.bf16.mxu1 %v15960_v41  ;;  %21965 = vst [vmem:[#allocation13_spill] sm:$0xff] %v21964_v11 }
 0x8c3   : > { %15466 = vmatmul.mubr.msk.bf16.gmra.mxu0 %vm21952_vm3, %v19740_v55  ;;  %v10109_v55 = vor.u32 %v10107_v51, %v19767_v5 }
 0x8c4   : > { %15490 = vmatpush3.bf16.msra.mxu0 %v15959_v26  ;;  %15493 = vmatprep.mubr.msk.bf16.mxu0 %vm21962_vm10, %v10090_v32  ;;  %vm21967_vm10 = vmmov %vm21952_vm3 }
 0x8c5   : > { %15504 = vmatpush3.bf16.msra.mxu1 %v15960_v41  ;;  %15491 = vmatprep.subr.bf16.mxu0 %v15961_v17 }
 0x8c6   : > { %15505 = vmatprep.subr.bf16.mxu1 %v15962_v62 }
 0x8c8   : > { %15482 = vmatmul.mubr.msk.bf16.gmra.mxu1 %vm21966_vm4, %v9868_v46  ;;  %15492 = vmatpush3.bf16.msra.mxu0 %v15961_v17  ;;  %vm21970_vm4 = vmmov %vm21952_vm3 }
 0x8c9   : > { %15506 = vmatpush3.bf16.msra.mxu1 %v15962_v62  ;;  %15509 = vmatprep.mubr.msk.bf16.mxu1 %vm21952_vm3, %v19764_v40  ;;  %vm21971_vm3 = vsmask.f32 7424  ;;  %vm21972_vm13 = vmmov %vm21970_vm4  ;;  %v15971_v40 = vld [vmem:[#allocation4 + $0x28] sm:$0xff]  }
 0x8ca   : > { %15507 = vmatprep.subr.bf16.mxu1 %v15963_v9  ;;  %v10110_v38 = vsel %vm21971_vm3, %v10109_v55, %v21716_v43  ;;  %15517 = vmatprep.subr.bf16.mxu0 %v15964_v25 }
 0x8cb   : > { %15494 = vmatmul.mubr.msk.bf16.vlgmr.msra.gmra.mxu0 %vm21967_vm10, %v19676_v42  ;;  %vm21973_vm10 = vcmask 1046528  }
 0x8cc   : > { %15497 = vmatprep.mubr.msk.bf16.mxu0 %vm21968_vm9, %v19784_v49  ;;  %v10307_v42 = vsel %vm21973_vm10, %v10305_v35, %v21716_v43  ;;  %vm21974_vm9 = vmmov %vm21970_vm4  ;;  %15518 = vmatpush3.bf16.msra.mxu0 %v15964_v25  ;;  %v15973_v35 = vld [vmem:[#allocation4 + $0x20] sm:$0xff]  }
 0x8cd   : > { %15508 = vmatpush3.bf16.msra.mxu1 %v15963_v9  ;;  %15519 = vmatprep.subr.bf16.mxu0 %v15965_v60  ;;  %vm21994_vm10 = vmmov %vm21974_vm9 }
 0x8ce   : > { %15533 = vmatprep.subr.bf16.mxu1 %v15968_v34 }
 0x8d0   : > { %15510 = vmatmul.mubr.msk.bf16.vlgmr.msra.gmra.mxu1 %vm21969_vm5, %v19770_v8  ;;  %15520 = vmatpush3.bf16.msra.mxu0 %v15965_v60  ;;  %vm21985_vm5 = vsmask.f32 4352 }
 0x8d1   : > { %15513 = vmatprep.mubr.msk.bf16.mxu1 %vm21970_vm4, %v19777_v52  ;;  %15521 = vmatprep.subr.bf16.mxu0 %v15966_v61 }
 0x8d2   : > { %15534 = vmatpush3.bf16.msra.mxu1 %v15968_v34 }
 0x8d3   : > { %15498 = vmatmul.mubr.msk.bf16.gmra.mxu0 %vm21972_vm13, %v10110_v38  ;;  %15535 = vmatprep.subr.bf16.mxu1 %v15969_v14  ;;  %vm21988_vm13 = vmmov %vm21970_vm4 }
 0x8d4   : > { %15522 = vmatpush3.bf16.msra.mxu0 %v15966_v61 }
 0x8d5   : > { %15523 = vmatprep.subr.bf16.mxu0 %v15967_v31 }
 0x8d6   : > { %15536 = vmatpush3.bf16.msra.mxu1 %v15969_v14 }
 0x8d7   : > { %15537 = vmatprep.subr.bf16.mxu1 %v15971_v40 }
 0x8d8   : > { %15514 = vmatmul.mubr.msk.bf16.gmra.mxu1 %vm21974_vm9, %v10307_v42  ;;  %15524 = vmatpush3.bf16.msra.mxu0 %v15967_v31 }
 0x8d9   : > { %15549 = vmatprep.subr.bf16.mxu0 %v19851_v22 }
 0x8da   : > { %15538 = vmatpush3.bf16.msra.mxu1 %v15971_v40 }
 0x8db   : > { %15539 = vmatprep.subr.bf16.mxu1 %v15973_v35 }
 0x8de   : > { %15540 = vmatpush3.bf16.msra.mxu1 %v15973_v35 }
 0x8df   : > { %15565 = vmatprep.subr.bf16.mxu1 %v19854_v24 }
 0x93a   : > { %v15383_v5 = vpop.f32.mrf.mxu1 }
 0x93b   : > { %v8818_v13 = vadd.f32 %v15383_v5, %v13869_v50 }
 0x93c   : > { %v8779_v8 = vpop.f32.mrf.mxu1 }
 0x93d   : > { %v8816_v24 = vadd.f32 %v13869_v50, %v8779_v8 }
 0x93e   : > { %v15384_v19 = vpop.f32.mrf.mxu1 }
 0x93f   : > { %v8819_v56 = vadd.f32 %v15384_v19, %v13869_v50 }
 0x940   : > { %v8782_v32 = vpop.f32.mrf.mxu1 }
 0x941   : > { %v8817_v15 = vadd.f32 %v13869_v50, %v8782_v32 }
 0x950   : > { %v19857_v52 = vpop.f32.mrf.mxu1 }
 0x952   : > { %v19859_v49 = vpop.f32.mrf.mxu1 }
 0x954   : > { %v19861_v48 = vpop.f32.mrf.mxu1 }
 0x956   : > { %v19863_v1 = vpop.f32.mrf.mxu1 }
 0x958   : > { %v15399_v47 = vpop.f32.mrf.mxu0 }
 0x959   : > { %v9057_v27 = vadd.f32 %v15399_v47, %v8818_v13 }
 0x95a   : > { %v9024_v36 = vpop.f32.mrf.mxu0 }
 0x95b   : > { %v9055_v63 = vadd.f32 %v9024_v36, %v8816_v24  ;;  %v8822_v24 = vadd.f32 %v19857_v52, %v13869_v50  ;;  %v8823_v52 = vadd.f32 %v19861_v48, %v13869_v50 }
 0x95c   : > { %v15400_v6 = vpop.f32.mrf.mxu0  ;;  %v15415_v37 = vpop.f32.mrf.mxu1 }
 0x95d   : > { %v9258_v58 = vadd.f32 %v15415_v37, %v9057_v27  ;;  %v9058_v22 = vadd.f32 %v15400_v6, %v8819_v56 }
 0x95e   : > { %v9027_v3 = vpop.f32.mrf.mxu0  ;;  %v9225_v33 = vpop.f32.mrf.mxu1 }
 0x95f   : > { %v9256_v18 = vadd.f32 %v9225_v33, %v9055_v63  ;;  %v9056_v45 = vadd.f32 %v9027_v3, %v8817_v15  ;;  %v10426_v15 = vpop.permute.xlu0 %10425 }
 0x960   : > { %v15416_v28 = vpop.f32.mrf.mxu1 }
 0x961   : > { %v9259_v8 = vadd.f32 %v15416_v28, %v9058_v22 }
 0x962   : > { %v9228_v41 = vpop.f32.mrf.mxu1 }
 0x963   : > { %v15403_v7 = vpop.f32.mrf.mxu0  ;;  %v9257_v19 = vadd.f32 %v9228_v41, %v9056_v45 }
 0x964   : > { %v9061_v6 = vadd.f32 %v15403_v7, %v8822_v24 }
 0x965   : > { %v19865_v26 = vpop.f32.mrf.mxu0 }
 0x967   : > { %v19867_v23 = vpop.f32.mrf.mxu0  ;;  %v19869_v0 = vpop.f32.mrf.mxu1 }
 0x968   : > { %v9262_v45 = vadd.f32 %v19869_v0, %v9061_v6 }
 0x969   : > { %v19871_v2 = vpop.f32.mrf.mxu0  ;;  %v19873_v17 = vpop.f32.mrf.mxu1 }
 0x96b   : > { %v19875_v62 = vpop.f32.mrf.mxu1  ;;  %v15431_v9 = vpop.f32.mrf.mxu0 }
 0x96c   : > { %v9446_v59 = vadd.f32 %v15431_v9, %v9258_v58  ;;  %v8820_v58 = vadd.f32 %v13869_v50, %v19859_v49 }
 0x96d   : > { %v19877_v46 = vpop.f32.mrf.mxu1  ;;  %v9413_v51 = vpop.f32.mrf.mxu0 }
 0x96e   : > { %v9444_v13 = vadd.f32 %v9413_v51, %v9256_v18  ;;  %v9059_v28 = vadd.f32 %v19865_v26, %v8820_v58 }
 0x96f   : > { %v15432_v55 = vpop.f32.mrf.mxu0  ;;  %v15447_v38 = vpop.f32.mrf.mxu1 }
 0x970   : > { %v9609_v47 = vadd.f32 %v15447_v38, %v9446_v59  ;;  %v9447_v36 = vadd.f32 %v15432_v55, %v9259_v8  ;;  %v8821_v38 = vadd.f32 %v13869_v50, %v19863_v1 }
 0x971   : > { %v9416_v42 = vpop.f32.mrf.mxu0  ;;  %v9576_v25 = vpop.f32.mrf.mxu1 }
 0x972   : > { %v9607_v32 = vadd.f32 %v9576_v25, %v9444_v13  ;;  %v9445_v22 = vadd.f32 %v9416_v42, %v9257_v19 }
 0x973   : > { %v19879_v60 = vpop.f32.mrf.mxu0  ;;  %v15448_v61 = vpop.f32.mrf.mxu1 }
 0x974   : > { %v9610_v18 = vadd.f32 %v15448_v61, %v9447_v36  ;;  %v9450_v48 = vadd.f32 %v19879_v60, %v9262_v45 }
 0x975   : > { %v19881_v34 = vpop.f32.mrf.mxu0  ;;  %v9579_v14 = vpop.f32.mrf.mxu1 }
 0x976   : > { %v9608_v9 = vadd.f32 %v9579_v14, %v9445_v22  ;;  %v9060_v14 = vadd.f32 %v19871_v2, %v8821_v38 }
 0x977   : > { %v19883_v31 = vpop.f32.mrf.mxu0  ;;  %v19885_v40 = vpop.f32.mrf.mxu1 }
 0x978   : > { %v9613_v50 = vadd.f32 %v19885_v40, %v9450_v48 }
 0x979   : > { %v19887_v35 = vpop.f32.mrf.mxu0  ;;  %v19889_v43 = vpop.f32.mrf.mxu1 }
 0x97b   : > { %v15463_v57 = vpop.f32.mrf.mxu0  ;;  %v19891_v11 = vpop.f32.mrf.mxu1 }
 0x97c   : > { %v9803_v56 = vadd.f32 %v15463_v57, %v9609_v47  ;;  %v10430_v57 = vpop.permute.xlu1 %10429 }
 0x97d   : > { %v9770_v12 = vpop.f32.mrf.mxu0  ;;  %v19896_v20 = vpop.f32.mrf.mxu1 }
 0x97e   : > { %v9801_v59 = vadd.f32 %v9770_v12, %v9607_v32  ;;  %v9062_v12 = vadd.f32 %v19867_v23, %v8823_v52  ;;  %v10428_v23 = vpop.permute.xlu0 %10427 }
 0x97f   : > { %v15464_v39 = vpop.f32.mrf.mxu0 }
 0x980   : > { %v15479_v44 = vpop.f32.mrf.mxu1  ;;  %v9804_v49 = vadd.f32 %v15464_v39, %v9610_v18 }
 0x981   : > { %v9773_v54 = vpop.f32.mrf.mxu0  ;;  %v9981_v3 = vadd.f32 %v15479_v44, %v9803_v56  ;;  %v9260_v44 = vadd.f32 %v19873_v17, %v9059_v28 }
 0x982   : > { %v9948_v10 = vpop.f32.mrf.mxu1  ;;  %v9802_v26 = vadd.f32 %v9773_v54, %v9608_v9  ;;  %v9261_v54 = vadd.f32 %v19877_v46, %v9060_v14  ;;  %v10434_v58 = vpop.permute.xlu0 %10433 }
 0x983   : > { %v19898_v16 = vpop.f32.mrf.mxu0  ;;  %v9979_v7 = vadd.f32 %v9948_v10, %v9801_v59  ;;  %v9263_v10 = vadd.f32 %v19875_v62, %v9062_v12  ;;  %v9448_v39 = vadd.f32 %v19881_v34, %v9260_v44  ;;  %v10432_v62 = vpop.permute.xlu1 %10431 }
 0x984   : > { %v15480_v4 = vpop.f32.mrf.mxu1  ;;  %v9807_v2 = vadd.f32 %v19898_v16, %v9613_v50 }
 0x985   : > { %v19900_v53 = vpop.f32.mrf.mxu0  ;;  %v9982_v25 = vadd.f32 %v15480_v4, %v9804_v49  ;;  %v9451_v4 = vadd.f32 %v19883_v31, %v9263_v10  ;;  %v9611_v24 = vadd.f32 %v19889_v43, %v9448_v39 }
 0x986   : > { %v9951_v21 = vpop.f32.mrf.mxu1  ;;  %v10438_v38 = vpop.permute.xlu0 %10437 }
 0x987   : > { %v19902_v30 = vpop.f32.mrf.mxu0  ;;  %v9980_v13 = vadd.f32 %v9951_v21, %v9802_v26  ;;  %v9449_v21 = vadd.f32 %v19887_v35, %v9261_v54  ;;  %v9614_v56 = vadd.f32 %v19891_v11, %v9451_v4 }
 0x988   : > { %v19904_v5 = vpop.f32.mrf.mxu1 }
 0x989   : > { %v19906_v29 = vpop.f32.mrf.mxu0  ;;  %v9985_v46 = vadd.f32 %v19904_v5, %v9807_v2  ;;  %v9612_v18 = vadd.f32 %v19896_v20, %v9449_v21  ;;  %v9808_v59 = vadd.f32 %v19902_v30, %v9614_v56 }
 0x98a   : > { %v19909_v27 = vpop.f32.mrf.mxu1 }
 0x98b   : > { %v15495_v63 = vpop.f32.mrf.mxu0 }
 0x98c   : > { %v19912_v37 = vpop.f32.mrf.mxu1  ;;  %v10214_v51 = vadd.f32 %v15495_v63, %v9981_v3  ;;  %v9805_v63 = vadd.f32 %v19900_v53, %v9611_v24 }
 0x98d   : > { %v10181_v33 = vpop.f32.mrf.mxu0  ;;  %v9986_v28 = vadd.f32 %v19912_v37, %v9808_v59 }
 0x98e   : > { %v19917_v41 = vpop.f32.mrf.mxu1  ;;  %v10212_v0 = vadd.f32 %v10181_v33, %v9979_v7  ;;  %v9983_v35 = vadd.f32 %v19909_v27, %v9805_v63  ;;  %v10436_v33 = vpop.permute.xlu1 %10435 }
 0x98f   : > { %v15496_v55 = vpop.f32.mrf.mxu0 }
 0x990   : > { %v15511_v42 = vpop.f32.mrf.mxu1  ;;  %v10215_v17 = vadd.f32 %v15496_v55, %v9982_v25 }
 0x991   : > { %v10411_v61 = vadd.f32 %v15511_v42, %v10214_v51  ;;  %v10184_v8 = vpop.f32.mrf.mxu0 }
 0x992   : > { %v10378_v1 = vpop.f32.mrf.mxu1  ;;  %v10213_v34 = vadd.f32 %v10184_v8, %v9980_v13 }
 0x993   : > { %v10409_v47 = vadd.f32 %v10378_v1, %v10212_v0  ;;  %v15499_v60 = vpop.f32.mrf.mxu0  ;;  %v19931_v36 = vadd.f32 %v10430_v57, %v10411_v61  ;;  %v10440_v0 = vpop.permute.xlu1 %10439 }
 0x994   : > { %v15512_v19 = vpop.f32.mrf.mxu1  ;;  %v10218_v3 = vadd.f32 %v15499_v60, %v9985_v46  ;;  %v15972_v46 = vld [vmem:[#allocation4 + $0x50] sm:$0xff]  }
 0x995   : > { %21977 = vst [vmem:[#allocation29_spill] sm:$0xff] %v19931_v36  ;;  %v10412_v40 = vadd.f32 %v15512_v19, %v10215_v17  ;;  %v10197_v32 = vpop.f32.mrf.mxu0  ;;  %v19937_v43 = vadd.f32 %v10426_v15, %v10409_v47  ;;  %v20958_v53 = vmax.f32 %v19931_v36, 0.0  ;;  %v9806_v15 = vadd.f32 %v19906_v29, %v9612_v18  ;;  %v21992_v18 = vld [vmem:[#allocation66_spill] sm:$0xff] }
 0x996   : > { %v10381_v31 = vpop.f32.mrf.mxu1  ;;  %v10216_v45 = vadd.f32 %v10197_v32, %v9983_v35  ;;  %vm21993_vm3 = vcmp.ne.s16.totalorder %v21992_v18, 0 }
 0x997   : > { %21978 = vst [vmem:[#allocation43_spill] sm:$0xff] %v19937_v43  ;;  %v19939_v16 = vadd.f32 %v10432_v62, %v10412_v40  ;;  %v10410_v6 = vadd.f32 %v10381_v31, %v10213_v34  ;;  %v15500_v22 = vpop.f32.mrf.mxu0  ;;  %v20959_v30 = vmax.f32 %v19937_v43, 0.0  ;;  %v9984_v7 = vadd.f32 %v19917_v41, %v9806_v15  ;;  %v21995_v15 = vld [vmem:[#allocation31_spill] sm:$0xff] }
 0x998   : > { %v15515_v11 = vpop.f32.mrf.mxu1  ;;  %v10219_v51 = vadd.f32 %v15500_v22, %v9986_v28 }
 0x999   : > { %21979 = vst [vmem:[#allocation27_spill] sm:$0xff] %v19939_v16  ;;  %v20957_v5 = vmax.f32 %v19939_v16, 0.0  ;;  %v19946_v52 = vadd.f32 %v10428_v23, %v10410_v6  ;;  %v10415_v57 = vadd.f32 %v15515_v11, %v10218_v3  ;;  %v10200_v49 = vpop.f32.mrf.mxu0  ;;  %v21990_v6 = vld [vmem:[#allocation69_spill] sm:$0xff] }
 0x99a   : > { %v10394_v20 = vpop.f32.mrf.mxu1  ;;  %v10217_v42 = vadd.f32 %v10200_v49, %v9984_v7  ;;  %vm21991_vm4 = vcmp.ne.s16.totalorder %v21990_v6, 0 }
 0x99b   : > { %21980 = vst [vmem:[#allocation42_spill] sm:$0xff] %v19946_v52  ;;  %v10466_v27 = vpack.c.bf16 %v20957_v5, %v20958_v53  ;;  %v20956_v9 = vmax.f32 %v19946_v52, 0.0  ;;  %v10413_v55 = vadd.f32 %v10394_v20, %v10216_v45  ;;  %v19961_v48 = vadd.f32 %v10438_v38, %v10415_v57  ;;  %v21996_v57 = vld [vmem:[#allocation59_spill] sm:$0xff] }
 0x99c   : > { %v15516_v29 = vpop.f32.mrf.mxu1  ;;  %vm21997_vm9 = vcmp.ne.s16.totalorder %v21996_v57, 0 }
 0x99d   : > { %v10478_v37 = vshrl.u32 %v10466_v27, 16  ;;  %v10481_v12 = vshll.u32 %v10466_v27, 16  ;;  %v10465_v44 = vpack.c.bf16 %v20956_v9, %v20959_v30  ;;  %21981 = vst [vmem:[#allocation26_spill] sm:$0xff] %v19961_v48  ;;  %v10416_v26 = vadd.f32 %v15516_v29, %v10219_v51  ;;  %v15974_v51 = vld [vmem:[#allocation4 + $0x48] sm:$0xff]  }
 0x99e   : > { %v10397_v25 = vpop.f32.mrf.mxu1  ;;  %v19963_v10 = vadd.f32 %v10434_v58, %v10413_v55  ;;  %v20952_v13 = vmax.f32 %v19961_v48, 0.0  ;;  %v21998_v55 = vld [vmem:[#allocation64_spill] sm:$0xff] }
 0x99f   : > { %v10480_v61 = vrot.slane %v10478_v37, 3  ;;  %v10483_v8 = vrot.slane %v10481_v12, 4  ;;  %v10470_v41 = vshrl.u32 %v10465_v44, 16  ;;  %v10473_v14 = vshll.u32 %v10465_v44, 16 }
 0x9a0   : > { %21982 = vst [vmem:[#allocation39_spill] sm:$0xff] %v19963_v10  ;;  %v19965_v39 = vadd.f32 %v10440_v0, %v10416_v26  ;;  %v10414_v50 = vadd.f32 %v10397_v25, %v10217_v42  ;;  %v20955_v4 = vmax.f32 %v19963_v10, 0.0 }
 0x9a1   : > { %v10472_v1 = vrot.slane %v10470_v41, 3  ;;  %v10475_v23 = vrot.slane %v10473_v14, 4  ;;  %v10484_v60 = vor.u32 %v10483_v8, %v10480_v61 }
 0x9a2   : > { %21983 = vst [vmem:[#allocation28_spill] sm:$0xff] %v19965_v39  ;;  %v20951_v17 = vmax.f32 %v19965_v39, 0.0  ;;  %v19969_v47 = vadd.f32 %v10436_v33, %v10414_v50 }
 0x9a3   : > { %v10476_v54 = vor.u32 %v10475_v23, %v10472_v1 }
 0x9a4   : > { %21984 = vst [vmem:[#allocation25_spill] sm:$0xff] %v19969_v47  ;;  %v10468_v24 = vpack.c.bf16 %v20951_v17, %v20952_v13  ;;  %v20950_v2 = vmax.f32 %v19969_v47, 0.0  ;;  %v15990_v13 = vld [vmem:[#allocation4 + $0xc8] sm:$0xff]  }
 0x9a5   : > { %v19978_v19 = vsel %vm21985_vm5, %v10476_v54, %v10484_v60  ;;  %v19982_v34 = vsel %vm19415_vm8, 0, %v10476_v54  ;;  %vm21999_vm5 = vcmp.ne.s16.totalorder %v21998_v55, 0  ;;  %v22005_v54 = vld [vmem:[#allocation23_spill] sm:$0xff] }
 0x9a6   : > { %v10496_v40 = vshrl.u32 %v10468_v24, 16  ;;  %v10499_v32 = vshll.u32 %v10468_v24, 16  ;;  %v10467_v21 = vpack.c.bf16 %v20950_v2, %v20955_v4  ;;  %v10512_v63 = vsel %vm19356_vm1, 0, %v19982_v34 }
 0x9a7   : > { %15525 = vmatprep.mubr.msk.bf16.mxu0 %vm21988_vm13, %v10512_v63  ;;  %v10513_v58 = vsel %vm19360_vm6, 0, %v19978_v19  ;;  %v10639_v22 = vsel %vm21991_vm4, 0, %v19982_v34  ;;  %v10640_v59 = vsel %vm21993_vm3, 0, %v19978_v19  ;;  %v10798_v20 = vsel %vm21997_vm9, 0, %v19982_v34  ;;  %v22010_v63 = vld [vmem:[#allocation60_spill] sm:$0xff] }
 0x9a8   : > { %v10498_v35 = vrot.slane %v10496_v40, 3  ;;  %v10501_v3 = vrot.slane %v10499_v32, 4  ;;  %v10487_v11 = vshrl.u32 %v10467_v21, 16  ;;  %v10490_v33 = vshll.u32 %v10467_v21, 16  ;;  %15526 = vmatmul.mubr.msk.bf16.vlgmr.msra.gmra.mxu0 %vm21994_vm10, %v10513_v58 }
 0x9a9   : > { %15550 = vmatpush3.bf16.msra.mxu0 %v21995_v15  ;;  %v10656_v28 = vshll.u32 %v10639_v22, 16  ;;  %v10661_v45 = vshll.u32 %v10640_v59, 16  ;;  %v10799_v29 = vsel %vm21999_vm5, 0, %v19978_v19  ;;  %v10654_v38 = vshrl.u32 %v10639_v22, 16  ;;  %v22017_v15 = vld [vmem:[#allocation16_spill] sm:$0xff] }
 0x9aa   : > { %v10502_v27 = vor.u32 %v10501_v3, %v10498_v35  ;;  %v10489_v49 = vrot.slane %v10487_v11, 3  ;;  %v10492_v7 = vrot.slane %v10490_v33, 4  ;;  %15551 = vmatprep.subr.bf16.mxu0 %v15972_v46  ;;  %v10817_v26 = vrot.slane %v10798_v20, 1  ;;  %v15977_v20 = vld [vmem:[#allocation4 + $0x70] sm:$0xff]  }
 0x9ab   : > { %v10658_v37 = vrot.slane %v10656_v28, 1  ;;  %v10663_v42 = vrot.slane %v10661_v45, 1  ;;  %v10818_v25 = vrot.slane %v10799_v29, 1  ;;  %vm22000_vm13 = vsmask.f32 4352 }
 0x9ac   : > { %v10493_v12 = vor.u32 %v10492_v7, %v10489_v49  ;;  %v20011_v0 = vsel %vm19415_vm8, %v10502_v27, 0  ;;  %vm22001_vm4 = vmmov %vm22000_vm13  ;;  %vm22002_vm3 = vsmask.f32 7424  ;;  %vm22006_vm10 = vcmp.ne.s16.totalorder %v22005_v54, 0 }
 0x9ad   : > { %15552 = vmatpush3.bf16.msra.mxu0 %v15972_v46  ;;  %v10659_v44 = vor.u32 %v10658_v37, %v10654_v38  ;;  %v10665_v40 = vshrl.u32 %v10640_v59, 16  ;;  %vm22007_vm9 = vcmask 523264   ;;  %v22014_v59 = vld [vmem:[#allocation57_spill] sm:$0xff]  ;;  %v10935_v49 = vsel %vm19420_vm15, 0, %v19982_v34  ;;  %v15978_v38 = vld [vmem:[#allocation4 + $0x98] sm:$0xff]  }
 0x9ae   : > { %v20014_v61 = vsel %vm22000_vm13, %v10484_v60, %v10493_v12  ;;  %v20017_v8 = vsel %vm22001_vm4, %v10493_v12, %v10502_v27  ;;  %15553 = vmatprep.subr.bf16.mxu0 %v15974_v51  ;;  %v15975_v60 = vld [vmem:[#allocation4 + $0x40] sm:$0xff]   ;;  %vm22008_vm5 = vmmov %vm22007_vm9  ;;  %vm22011_vm4 = vcmp.ne.s16.totalorder %v22010_v63, 0 }
 0x9af   : > { %v10664_v41 = vsel %vm22002_vm3, %v10659_v44, %v10663_v42  ;;  %v10514_v50 = vsel %vm19523_vm14, 0, %v20014_v61  ;;  %v10515_v23 = vsel %vm19530_vm12, 0, %v20017_v8  ;;  %v10641_v24 = vsel %vm22006_vm10, 0, %v20014_v61  ;;  %vm22009_vm13 = vmmov %vm22006_vm10 }
 0x9b0   : > { %15541 = vmatprep.mubr.msk.bf16.mxu1 %vm22007_vm9, %v10664_v41  ;;  %15529 = vmatprep.mubr.msk.bf16.mxu0 %vm22008_vm5, %v10514_v50  ;;  %v10669_v32 = vshll.u32 %v10641_v24, 16  ;;  %v10642_v21 = vsel %vm22009_vm13, 0, %v20017_v8  ;;  %v10800_v46 = vsel %vm22011_vm4, 0, %v20014_v61  ;;  %vm22012_vm3 = vmmov %vm22008_vm5  ;;  %vm22013_vm12 = vcmask 1046528   ;;  %v22023_v50 = vld [vmem:[#allocation45_spill] sm:$0xff] }
 0x9b1   : > { %15530 = vmatmul.mubr.msk.bf16.gmra.mxu0 %vm22012_vm3, %v10515_v23  ;;  %v10819_v58 = vsel %vm22013_vm12, %v10817_v26, %v10818_v25  ;;  %v10677_v22 = vshll.u32 %v10642_v21, 16  ;;  %vm22015_vm10 = vcmp.ne.s16.totalorder %v22014_v59, 0  ;;  %v10667_v3 = vor.u32 %v10665_v40, %v10663_v42  ;;  %vm22016_vm9 = vmmov %vm22012_vm3 }
 0x9b2   : > { %v20042_v35 = vsel %vm22015_vm10, 0, %v20017_v8  ;;  %15554 = vmatpush3.bf16.msra.mxu0 %v15974_v51  ;;  %15557 = vmatprep.mubr.msk.bf16.mxu0 %vm22016_vm9, %v10819_v58  ;;  %v20045_v11 = vrot.slane %v10669_v32, 1  ;;  %v10673_v33 = vshrl.u32 %v10641_v24, 16  ;;  %vm22018_vm5 = vcmp.ne.s16.totalorder %v22017_v15, 0  ;;  %vm22021_vm13 = vmmov %vm22012_vm3 }
 0x9b3   : > { %v10643_v28 = vsel %vm22018_vm5, 0, %v20011_v0  ;;  %15555 = vmatprep.subr.bf16.mxu0 %v15975_v60  ;;  %v10820_v45 = vrot.slane %v10800_v46, 1  ;;  %vm22020_vm12 = vsmask.f32 7424  ;;  %v10679_v29 = vrot.slane %v10677_v22, 1  ;;  %v15979_v46 = vld [vmem:[#allocation4 + $0x68] sm:$0xff]   ;;  %vm22027_vm5 = vmmov %vm22012_vm3 }
 0x9b4   : > { %v10672_v7 = vsel %vm22020_vm12, %v10667_v3, %v20045_v11  ;;  %v10675_v51 = vor.u32 %v10673_v33, %v20045_v11  ;;  %v10822_v37 = vrot.slane %v20042_v35, 1  ;;  %v10685_v12 = vshll.u32 %v10643_v28, 16  ;;  %vm22024_vm4 = vmmov %vm22020_vm12  ;;  %v15980_v3 = vld [vmem:[#allocation4 + $0x90] sm:$0xff]  }
 0x9b5   : > { %15542 = vmatmul.mubr.msk.bf16.vlgmr.msra.gmra.mxu1 %vm22021_vm13, %v10672_v7  ;;  %v10936_v42 = vsel %vm19424_vm0, 0, %v19978_v19  ;;  %v11082_v26 = vshrl.u32 %v19982_v34, 16  ;;  %v11085_v41 = vshll.u32 %v19982_v34, 16  ;;  %v10681_v24 = vshrl.u32 %v10642_v21, 16  ;;  %vm22028_vm12 = vmmov %vm22012_vm3 }
 0x9b6   : > { %15556 = vmatpush3.bf16.msra.mxu0 %v15975_v60  ;;  %15566 = vmatpush3.bf16.msra.mxu1 %v22023_v50  ;;  %v20065_v23 = vsel %vm22024_vm4, %v10675_v51, %v10679_v29  ;;  %v11090_v40 = vshrl.u32 %v19978_v19, 16  ;;  %v11093_v32 = vshll.u32 %v19978_v19, 16  ;;  %v10954_v58 = vrot.slane %v10935_v49, 4  ;;  %v22029_v49 = vld [vmem:[#allocation73_spill] sm:$0xff] }
 0x9b7   : > { %15545 = vmatprep.mubr.msk.bf16.mxu1 %vm22012_vm3, %v20065_v23  ;;  %15567 = vmatprep.subr.bf16.mxu1 %v15977_v20  ;;  %v20071_v22 = vor.u32 %v10681_v24, %v10679_v29  ;;  %vm22025_vm10 = vcmask 1046528   ;;  %v10955_v33 = vrot.slane %v10936_v42, 4  ;;  %v11084_v21 = vrot.slane %v11082_v26, 4  ;;  %v15981_v29 = vld [vmem:[#allocation4 + $0x60] sm:$0xff]   ;;  %v15982_v26 = vld [vmem:[#allocation4 + $0x88] sm:$0xff]  }
 0x9b8   : > { %v10821_v60 = vsel %vm22025_vm10, %v10818_v25, %v10820_v45  ;;  %15581 = vmatprep.subr.bf16.mxu0 %v15978_v38  ;;  %vm22026_vm9 = vmmov %vm22025_vm10  ;;  %v11087_v28 = vrot.slane %v11085_v41, 5  ;;  %v11092_v7 = vrot.slane %v11090_v40, 4  ;;  %v11095_v51 = vrot.slane %v11093_v32, 5  ;;  %v22032_v41 = vld [vmem:[#allocation44_spill] sm:$0xff] }
 0x9b9   : > { %v10823_v35 = vsel %vm22026_vm9, %v10820_v45, %v10822_v37  ;;  %15558 = vmatmul.mubr.msk.bf16.vlgmr.msra.gmra.mxu0 %vm22027_vm5, %v10821_v60  ;;  %v10687_v50 = vrot.slane %v10685_v12, 1  ;;  %vm22030_vm13 = vnez %v22029_v49  ;;  %vm22031_vm3 = vcmask 1043456   ;;  %vm22034_vm9 = vmmov %vm22027_vm5  ;;  %v22035_v60 = vld [vmem:[#allocation78_spill] sm:$0xff] }
 0x9ba   : > { %15561 = vmatprep.mubr.msk.bf16.mxu0 %vm22028_vm12, %v10823_v35  ;;  %15568 = vmatpush3.bf16.msra.mxu1 %v15977_v20  ;;  %v10802_v25 = vsel %vm22030_vm13, 0, %v20011_v0  ;;  %v10956_v42 = vsel %vm22031_vm3, %v10954_v58, %v10955_v33  ;;  %vm22033_vm10 = vnez %v22032_v41  ;;  %v11088_v20 = vor.u32 %v11087_v28, %v11084_v21  ;;  %v15984_v21 = vld [vmem:[#allocation4 + $0xb8] sm:$0xff]   ;;  %vm22038_vm3 = vmmov %vm22027_vm5 }
 0x9bb   : > { %15582 = vmatpush3.bf16.msra.mxu0 %v15978_v38  ;;  %15569 = vmatprep.subr.bf16.mxu1 %v15979_v46  ;;  %v10688_v45 = vsel %vm22024_vm4, %v20071_v22, %v10687_v50  ;;  %v10937_v24 = vsel %vm22033_vm10, 0, %v20014_v61  ;;  %v11096_v38 = vor.u32 %v11095_v51, %v11092_v7  ;;  %v11099_v12 = vshrl.u32 %v20014_v61, 16  ;;  %v15983_v51 = vld [vmem:[#allocation4 + $0x80] sm:$0xff]  }
 0x9bc   : > { %15583 = vmatprep.subr.bf16.mxu0 %v15980_v3  ;;  %v11102_v40 = vshll.u32 %v20014_v61, 16  ;;  %v10824_v32 = vrot.slane %v10802_v25, 1  ;;  %vm22036_vm12 = vnez %v22035_v60  ;;  %v11108_v35 = vshrl.u32 %v20017_v8, 16 }
 0x9bd   : > { %15546 = vmatmul.mubr.msk.bf16.gmra.mxu1 %vm22034_vm9, %v10688_v45  ;;  %v10938_v58 = vsel %vm22036_vm12, 0, %v20017_v8  ;;  %v11111_v50 = vshll.u32 %v20017_v8, 16  ;;  %vm22037_vm4 = vcmask 1046528   ;;  %v10957_v7 = vrot.slane %v10937_v24, 4  ;;  %v15986_v24 = vld [vmem:[#allocation4 + $0xd8] sm:$0xff]  }
 0x9be   : > { %15570 = vmatpush3.bf16.msra.mxu1 %v15979_v46  ;;  %15573 = vmatprep.mubr.msk.bf16.mxu1 %vm22027_vm5, %v10956_v42  ;;  %v10825_v28 = vsel %vm22037_vm4, %v10822_v37, %v10824_v32  ;;  %vm22039_vm9 = vsmask.f32 3328  ;;  %v10959_v25 = vrot.slane %v10938_v58, 4  ;;  %v11101_v45 = vrot.slane %v11099_v12, 4  ;;  %vm22040_vm5 = vmmov %vm22038_vm3  ;;  %v22045_v12 = vld [vmem:[#allocation17_spill] sm:$0xff] }
 0x9bf   : > { %15584 = vmatpush3.bf16.msra.mxu0 %v15980_v3  ;;  %15571 = vmatprep.subr.bf16.mxu1 %v15981_v29  ;;  %v11097_v46 = vsel %vm22039_vm9, %v11088_v20, %v11096_v38  ;;  %v11104_v42 = vrot.slane %v11102_v40, 5  ;;  %v11110_v2 = vrot.slane %v11108_v35, 4  ;;  %v11113_v17 = vrot.slane %v11111_v50, 5  ;;  %v15985_v3 = vld [vmem:[#allocation4 + $0xb0] sm:$0xff]   ;;  %vm22042_vm4 = vmmov %vm22038_vm3 }
 0x9c0   : > { %15585 = vmatprep.subr.bf16.mxu0 %v15982_v26  ;;  %vm22041_vm12 = vcmask 1043456   ;;  %vm22044_vm9 = vmmov %vm22042_vm4  ;;  %v11117_v50 = vshrl.u32 %v20011_v0, 16 }
 0x9c1   : > { %15562 = vmatmul.mubr.msk.bf16.gmra.mxu0 %vm22038_vm3, %v10825_v28  ;;  %v10958_v37 = vsel %vm22041_vm12, %v10955_v33, %v10957_v7  ;;  %vm22043_vm3 = vmmov %vm22041_vm12  ;;  %v11105_v20 = vor.u32 %v11104_v42, %v11101_v45  ;;  %v22049_v33 = vld [vmem:[#allocation68_spill] sm:$0xff]  ;;  %v11120_v28 = vshll.u32 %v20011_v0, 16 }
 0x9c2   : > { %15572 = vmatpush3.bf16.msra.mxu1 %v15981_v29  ;;  %15589 = vmatprep.mubr.msk.bf16.mxu0 %vm22040_vm5, %v11097_v46  ;;  %v10960_v32 = vsel %vm22043_vm3, %v10957_v7, %v10959_v25  ;;  %v11114_v29 = vor.u32 %v11113_v17, %v11110_v2  ;;  %vm22046_vm5 = vnez %v22045_v12  ;;  %vm22050_vm12 = vnez %v22049_v33  ;;  %v15987_v17 = vld [vmem:[#allocation4 + $0xa8] sm:$0xff]   ;;  %v15988_v2 = vld [vmem:[#allocation4 + $0xd0] sm:$0xff]   ;;  %vm22052_vm3 = vmmov %vm22044_vm9 }
 0x9c3   : > { %15586 = vmatpush3.bf16.msra.mxu0 %v15982_v26  ;;  %15597 = vmatprep.subr.bf16.mxu1 %v15984_v21  ;;  %v11234_v40 = vsel %vm22046_vm5, 0, %v19982_v34  ;;  %v22047_v26 = vld [vmem:[#allocation55_spill] sm:$0xff]  ;;  %v10939_v35 = vsel %vm22050_vm12, 0, %v20011_v0  ;;  %v11119_v45 = vrot.slane %v11117_v50, 4  ;;  %v11122_v42 = vrot.slane %v11120_v28, 5  ;;  %v15992_v50 = vld [vmem:[#allocation4 + $0xf8] sm:$0xff]  }
 0x9c4   : > { %15587 = vmatprep.subr.bf16.mxu0 %v15983_v51  ;;  %vm22048_vm10 = vcmp.ne.s16.totalorder %v22047_v26, 0  ;;  %v11253_v34 = vrot.slane %v11234_v40, 5  ;;  %v10961_v46 = vrot.slane %v10939_v35, 4  ;;  %vm22055_vm12 = vcmask 1043456   ;;  %v22058_v40 = vld [vmem:[#allocation61_spill] sm:$0xff]  ;;  %v22063_v28 = vld [vmem:[#allocation20_spill] sm:$0xff] }
 0x9c5   : > { %15574 = vmatmul.mubr.msk.bf16.vlgmr.msra.gmra.mxu1 %vm22042_vm4, %v10958_v37  ;;  %v11235_v58 = vsel %vm22048_vm10, 0, %v19978_v19  ;;  %vm22051_vm4 = vsmask.f32 3328  ;;  %v15989_v37 = vld [vmem:[#allocation4 + $0xa0] sm:$0xff]   ;;  %vm22057_vm5 = vcmask 1042432  }
 0x9c6   : > { %15577 = vmatprep.mubr.msk.bf16.mxu1 %vm22044_vm9, %v10960_v32  ;;  %15598 = vmatpush3.bf16.msra.mxu1 %v15984_v21  ;;  %v11106_v21 = vsel %vm22051_vm4, %v11096_v38, %v11105_v20  ;;  %v11254_v7 = vrot.slane %v11235_v58, 5  ;;  %vm22053_vm10 = vmmov %vm22051_vm4  ;;  %v10962_v32 = vsel %vm22055_vm12, %v10959_v25, %v10961_v46  ;;  %v11123_v25 = vor.u32 %v11122_v42, %v11119_v45  ;;  %v15991_v35 = vld [vmem:[#allocation4 + $0xc0] sm:$0xff]   ;;  %v15993_v46 = vld [vmem:[#allocation4 + $0xf0] sm:$0xff]  }
 0x9c7   : > { %15588 = vmatpush3.bf16.msra.mxu0 %v15983_v51  ;;  %15599 = vmatprep.subr.bf16.mxu1 %v15985_v3  ;;  %v11115_v51 = vsel %vm22053_vm10, %v11105_v20, %v11114_v29  ;;  %vm22054_vm9 = vmmov %vm22052_vm3  ;;  %vm22065_vm12 = vsmask.f32 3328  ;;  %v13971_v12 = vld [vmem:[%s20628_s9] ss:$0 sm:$0xff] }
 0x9c8   : > { %15613 = vmatprep.subr.bf16.mxu0 %v15986_v24  ;;  %vm22056_vm4 = vmmov %vm22052_vm3  ;;  %v11255_v38 = vsel %vm22057_vm5, %v11253_v34, %v11254_v7  ;;  %vm22064_vm5 = vcmp.ne.s16.totalorder %v22063_v28, 0  ;;  %v11124_v34 = vsel %vm22065_vm12, %v11114_v29, %v11123_v25 }
 0x9c9   : > { %vm22060_vm10 = vmmov %vm22056_vm4 }
 0x9ca   : > { %15590 = vmatmul.mubr.msk.bf16.vlgmr.msra.gmra.mxu0 %vm22052_vm3, %v11106_v21  ;;  %15600 = vmatpush3.bf16.msra.mxu1 %v15985_v3  ;;  %vm22059_vm3 = vcmp.ne.s16.totalorder %v22058_v40, 0  ;;  %v11493_v21 = vsel %vm22064_vm5, 0, %v19978_v19 }
 0x9cb   : > { %15593 = vmatprep.mubr.msk.bf16.mxu0 %vm22054_vm9, %v11115_v51  ;;  %15614 = vmatpush3.bf16.msra.mxu0 %v15986_v24  ;;  %v11236_v3 = vsel %vm22059_vm3, 0, %v20014_v61  ;;  %v22061_v24 = vld [vmem:[#allocation53_spill] sm:$0xff]  ;;  %vm22067_vm3 = vmmov %vm22056_vm4  ;;  %v11509_v45 = vshll.u32 %v11493_v21, 16  ;;  %v11507_v25 = vshrl.u32 %v11493_v21, 16  ;;  %v15998_v21 = vld [vmem:[#allocation4 + $0x108] sm:$0xff]  }
 0x9cc   : > { %15601 = vmatprep.subr.bf16.mxu1 %v15987_v17  ;;  %15615 = vmatprep.subr.bf16.mxu0 %v15988_v2  ;;  %vm22062_vm9 = vcmp.ne.s16.totalorder %v22061_v24, 0  ;;  %v11256_v58 = vrot.slane %v11236_v3, 5  ;;  %vm22071_vm12 = vmmov %vm22067_vm3  ;;  %v15995_v3 = vld [vmem:[#allocation4 + $0xe8] sm:$0xff]  }
 0x9cd   : > { %15578 = vmatmul.mubr.msk.bf16.gmra.mxu1 %vm22056_vm4, %v10962_v32  ;;  %v11237_v20 = vsel %vm22062_vm9, 0, %v20017_v8  ;;  %v15994_v32 = vld [vmem:[#allocation4 + $0x118] sm:$0xff]   ;;  %vm22069_vm9 = vmmov %vm22067_vm3 }
 0x9ce   : > { %15602 = vmatpush3.bf16.msra.mxu1 %v15987_v17  ;;  %15605 = vmatprep.mubr.msk.bf16.mxu1 %vm22060_vm10, %v11255_v38  ;;  %v11258_v17 = vrot.slane %v11237_v20, 5  ;;  %vm22068_vm10 = vcmask 1042432   ;;  %v11511_v38 = vrot.slane %v11509_v45, 1  ;;  %v11372_v20 = vsel %vm19360_vm6, 0, %v20014_v61 }
 0x9cf   : > { %15616 = vmatpush3.bf16.msra.mxu0 %v15988_v2  ;;  %15603 = vmatprep.subr.bf16.mxu1 %v15989_v37  ;;  %v11371_v2 = vsel %vm19797_vm11, 0, %v19978_v19  ;;  %v11257_v42 = vsel %vm22068_vm10, %v11254_v7, %v11256_v58  ;;  %vm22070_vm5 = vmmov %vm22068_vm10  ;;  %v15996_v7 = vld [vmem:[#allocation4 + $0x110] sm:$0xff]  }
 0x9d0   : > { %15617 = vmatprep.subr.bf16.mxu0 %v15990_v13  ;;  %v11259_v29 = vsel %vm22070_vm5, %v11256_v58, %v11258_v17  ;;  %v11373_v58 = vsel %vm19523_vm14, 0, %v20017_v8 }
 0x9d2   : > { %15594 = vmatmul.mubr.msk.bf16.gmra.mxu0 %vm22056_vm4, %v11124_v34  ;;  %15604 = vmatpush3.bf16.msra.mxu1 %v15989_v37  ;;  %v11238_v37 = vsel %vm19638_vm2, 0, %v20011_v0  ;;  %vm22073_vm4 = vmmov %vm22067_vm3  ;;  %v15997_v34 = vld [vmem:[#allocation4 + $0xe0] sm:$0xff]  }
 0x9d3   : > { %15618 = vmatpush3.bf16.msra.mxu0 %v15990_v13  ;;  %15621 = vmatprep.mubr.msk.bf16.mxu0 %vm22067_vm3, %v11371_v2  ;;  %v22074_v2 = vld [vmem:[#allocation30_spill] sm:$0xff]  ;;  %vm22096_vm2 = vmmov %vm22067_vm3 }
 0x9d4   : > { %15619 = vmatprep.subr.bf16.mxu0 %v15991_v35  ;;  %15629 = vmatprep.subr.bf16.mxu1 %v15992_v50  ;;  %vm22075_vm10 = vcmp.ne.s16.totalorder %v22074_v2, 0 }
 0x9d5   : > { %15606 = vmatmul.mubr.msk.bf16.vlgmr.msra.gmra.mxu1 %vm22069_vm9, %v11257_v42  ;;  %v11648_v45 = vsel %vm22075_vm10, 0, %v20014_v61  ;;  %vm22076_vm9 = vmmov %vm22070_vm5 }
 0x9d6   : > { %15609 = vmatprep.mubr.msk.bf16.mxu1 %vm22071_vm12, %v11259_v29  ;;  %15630 = vmatpush3.bf16.msra.mxu1 %v15992_v50  ;;  %v11512_v50 = vor.u32 %v11511_v38, %v11507_v25  ;;  %v22077_v29 = vld [vmem:[#allocation71_spill] sm:$0xff]  ;;  %vm22079_vm12 = vmmov %vm22067_vm3  ;;  %v11665_v61 = vrot.slane %v11648_v45, 1  ;;  %v15999_v25 = vld [vmem:[#allocation4 + $0x100] sm:$0xff]  }
 0x9d7   : > { %15620 = vmatpush3.bf16.msra.mxu0 %v15991_v35  ;;  %15631 = vmatprep.subr.bf16.mxu1 %v15993_v46  ;;  %v11260_v35 = vrot.slane %v11238_v37, 5  ;;  %vm22078_vm5 = vcmp.ne.s16.totalorder %v22077_v29, 0  ;;  %v11647_v37 = vsel %vm19656_vm7, 0, %v19978_v19  ;;  %vm22088_vm7 = vsmask.f32 7424 }
 0x9d8   : > { %15645 = vmatprep.subr.bf16.mxu0 %v15994_v32  ;;  %v11664_v38 = vrot.slane %v11647_v37, 1 }
 0x9d9   : > { %v11261_v42 = vsel %vm22076_vm9, %v11258_v17, %v11260_v35  ;;  %vm22084_vm9 = vmmov %vm22067_vm3 }
 0x9da   : > { %15622 = vmatmul.mubr.msk.bf16.vlgmr.msra.gmra.mxu0 %vm22073_vm4, %v11372_v20  ;;  %15632 = vmatpush3.bf16.msra.mxu1 %v15993_v46  ;;  %v11496_v20 = vsel %vm22078_vm5, 0, %v20011_v0  ;;  %vm22080_vm4 = vsmask.f32 7424  ;;  %vm22085_vm5 = vcmask 1046528  }
 0x9db   : > { %15625 = vmatprep.mubr.msk.bf16.mxu0 %vm22067_vm3, %v11373_v58  ;;  %15646 = vmatpush3.bf16.msra.mxu0 %v15994_v32  ;;  %v11517_v46 = vsel %vm22080_vm4, %v11512_v50, %v20045_v11  ;;  %v11530_v17 = vshll.u32 %v11496_v20, 16  ;;  %v22082_v58 = vld [vmem:[#allocation13_spill] sm:$0xff]  ;;  %v11666_v11 = vsel %vm22085_vm5, %v11664_v38, %v11665_v61  ;;  %vm22087_vm4 = vmmov %vm22067_vm3 }
 0x9dc   : > { %15633 = vmatprep.subr.bf16.mxu1 %v15995_v3  ;;  %15647 = vmatprep.subr.bf16.mxu0 %v15996_v7  ;;  %vm22083_vm10 = vnez %v22082_v58  ;;  %vm22091_vm5 = vmmov %vm22067_vm3  ;;  %v16003_v38 = vld [vmem:[#allocation6] sm:$0xff]  }
 0x9dd   : > { %15610 = vmatmul.mubr.msk.bf16.gmra.mxu1 %vm22079_vm12, %v11261_v42  ;;  %v11374_v35 = vsel %vm22083_vm10, 0, %v20011_v0  ;;  %vm22086_vm12 = vcmp.ne.s16.totalorder %v22010_v63, 0  ;;  %v11534_v42 = vshrl.u32 %v11496_v20, 16  ;;  %v16000_v20 = vld [vmem:[#allocation6 + $0x18] sm:$0xff]  }
 0x9de   : > { %15634 = vmatpush3.bf16.msra.mxu1 %v15995_v3  ;;  %15637 = vmatprep.mubr.msk.bf16.mxu1 %vm22067_vm3, %v11517_v46  ;;  %v11649_v19 = vsel %vm22086_vm12, 0, %v20017_v8  ;;  %v11532_v3 = vrot.slane %v11530_v17, 1  ;;  %vm22092_vm12 = vcmask 1046528   ;;  %v16001_v17 = vld [vmem:[#allocation6 + $0x10] sm:$0xff]  }
 0x9df   : > { %15648 = vmatpush3.bf16.msra.mxu0 %v15996_v7  ;;  %15635 = vmatprep.subr.bf16.mxu1 %v15997_v34  ;;  %v11667_v50 = vrot.slane %v11649_v19, 1  ;;  %vm22094_vm10 = vmmov %vm22092_vm12  ;;  %v16007_v19 = vld [vmem:[#allocation6 + $0x28] sm:$0xff]  }
 0x9e0   : > { %15649 = vmatprep.subr.bf16.mxu0 %v15998_v21  ;;  %v11533_v7 = vsel %vm22088_vm7, %v20071_v22, %v11532_v3  ;;  %v11536_v8 = vor.u32 %v11534_v42, %v11532_v3  ;;  %v22095_v22 = vld [vmem:[#allocation18_spill] sm:$0xff]  ;;  %v16009_v3 = vld [vmem:[#allocation6 + $0x20] sm:$0xff]  }
 0x9e1   : > { %v11668_v46 = vsel %vm22092_vm12, %v11665_v61, %v11667_v50  ;;  %v16002_v61 = vld [vmem:[#allocation6 + $0x8] sm:$0xff]  }
 0x9e2   : > { %15626 = vmatmul.mubr.msk.bf16.gmra.mxu0 %vm22084_vm9, %v11374_v35  ;;  %15636 = vmatpush3.bf16.msra.mxu1 %v15997_v34  ;;  %v22089_v34 = vld [vmem:[#allocation46_spill] sm:$0xff]  ;;  %v11537_v37 = vsel %vm22088_vm7, %v11536_v8, %v22095_v22  ;;  %v16005_v35 = vld [vmem:[#allocation6 + $0x30] sm:$0xff]  }
 0x9e3   : > { %15650 = vmatpush3.bf16.msra.mxu0 %v15998_v21  ;;  %15653 = vmatprep.mubr.msk.bf16.mxu0 %vm22087_vm4, %v11666_v11  ;;  %vm22090_vm9 = vcmp.ne.s16.totalorder %v22089_v34, 0  ;;  %vm22093_vm4 = vmmov %vm22067_vm3  ;;  %v20193_v11 = vld [vmem:[#allocation6 + $0x58] sm:$0xff]  }
 0x9e4   : > { %15651 = vmatprep.subr.bf16.mxu0 %v15999_v25  ;;  %v11650_v45 = vsel %vm22090_vm9, 0, %v20011_v0  ;;  %vm22097_vm9 = vmmov %vm22094_vm10  ;;  %15661 = vmatprep.subr.bf16.mxu1 %v16000_v20  ;;  %22099 = vst [vmem:[#allocation37_spill] sm:$0xff] %v20193_v11 }
 0x9e5   : > { %15638 = vmatmul.mubr.msk.bf16.vlgmr.msra.gmra.mxu1 %vm22067_vm3, %v20065_v23  ;;  %v11669_v21 = vrot.slane %v11650_v45, 1 }
 0x9e6   : > { %15641 = vmatprep.mubr.msk.bf16.mxu1 %vm22091_vm5, %v11533_v7  ;;  %vm22098_vm5 = vmmov %vm22096_vm2  ;;  %15662 = vmatpush3.bf16.msra.mxu1 %v16000_v20  ;;  %v20196_v7 = vld [vmem:[#allocation6 + $0x78] sm:$0xff]  }
 0x9e7   : > { %15652 = vmatpush3.bf16.msra.mxu0 %v15999_v25  ;;  %v11670_v23 = vsel %vm22094_vm10, %v11667_v50, %v11669_v21  ;;  %v11671_v0 = vsel %vm22097_vm9, %v11669_v21, %v22095_v22  ;;  %15663 = vmatprep.subr.bf16.mxu1 %v16001_v17  ;;  %v16004_v25 = vld [vmem:[#allocation6 + $0x38] sm:$0xff]   ;;  %22100 = vst [vmem:[#allocation24_spill] sm:$0xff] %v20196_v7  ;;  %vm22109_vm10 = vmmov %vm22067_vm3 }
 0x9e8   : > { %15677 = vmatprep.subr.bf16.mxu0 %v16004_v25 }
 0x9ea   : > { %15654 = vmatmul.mubr.msk.bf16.vlgmr.msra.gmra.mxu0 %vm22093_vm4, %v11668_v46  ;;  %15664 = vmatpush3.bf16.msra.mxu1 %v16001_v17 }
 0x9eb   : > { %15657 = vmatprep.mubr.msk.bf16.mxu0 %vm22067_vm3, %v11670_v23  ;;  %15665 = vmatprep.subr.bf16.mxu1 %v16002_v61 }
 0x9ec   : > { %15678 = vmatpush3.bf16.msra.mxu0 %v16004_v25 }
 0x9ed   : > { %15642 = vmatmul.mubr.msk.bf16.gmra.mxu1 %vm22096_vm2, %v11537_v37  ;;  %15679 = vmatprep.subr.bf16.mxu0 %v16005_v35  ;;  %vm22105_vm2 = vsmask.f32 4352 }
 0x9ee   : > { %15666 = vmatpush3.bf16.msra.mxu1 %v16002_v61  ;;  %vm22120_vm9 = vmmov %vm22105_vm2 }
 0x9ef   : > { %15667 = vmatprep.subr.bf16.mxu1 %v16003_v38 }
 0x9f0   : > { %15680 = vmatpush3.bf16.msra.mxu0 %v16005_v35 }
 0x9f1   : > { %15681 = vmatprep.subr.bf16.mxu0 %v16007_v19 }
 0x9f2   : > { %15658 = vmatmul.mubr.msk.bf16.gmra.mxu0 %vm22098_vm5, %v11671_v0  ;;  %15668 = vmatpush3.bf16.msra.mxu1 %v16003_v38  ;;  %vm22121_vm5 = vmmov %vm22105_vm2 }
 0x9f3   : > { %15693 = vmatprep.subr.bf16.mxu1 %v20193_v11 }
 0x9f4   : > { %15682 = vmatpush3.bf16.msra.mxu0 %v16007_v19 }
 0x9f5   : > { %15683 = vmatprep.subr.bf16.mxu0 %v16009_v3 }
 0x9f8   : > { %15684 = vmatpush3.bf16.msra.mxu0 %v16009_v3 }
 0x9f9   : > { %15709 = vmatprep.subr.bf16.mxu0 %v20196_v7 }
 0xa68   : > { %v15527_v50 = vpop.f32.mrf.mxu0 }
 0xa69   : > { %v10633_v7 = vadd.f32 %v15527_v50, %v13971_v12 }
 0xa6a   : > { %v10594_v45 = vpop.f32.mrf.mxu0 }
 0xa6b   : > { %v10631_v15 = vadd.f32 %v13971_v12, %v10594_v45 }
 0xa6c   : > { %v15528_v42 = vpop.f32.mrf.mxu0 }
 0xa6d   : > { %v10634_v59 = vadd.f32 %v15528_v42, %v13971_v12 }
 0xa6e   : > { %v10597_v8 = vpop.f32.mrf.mxu0 }
 0xa6f   : > { %v10632_v14 = vadd.f32 %v13971_v12, %v10597_v8 }
 0xa71   : > { %v20199_v21 = vpop.f32.mrf.mxu0 }
 0xa73   : > { %v20201_v46 = vpop.f32.mrf.mxu0 }
 0xa75   : > { %v20203_v23 = vpop.f32.mrf.mxu0  ;;  %v15543_v37 = vpop.f32.mrf.mxu1 }
 0xa76   : > { %v10792_v63 = vadd.f32 %v15543_v37, %v10633_v7 }
 0xa77   : > { %v20205_v0 = vpop.f32.mrf.mxu0  ;;  %v10759_v20 = vpop.f32.mrf.mxu1 }
 0xa78   : > { %v10790_v55 = vadd.f32 %v10759_v20, %v10631_v15 }
 0xa79   : > { %v15544_v17 = vpop.f32.mrf.mxu1  ;;  %v15559_v61 = vpop.f32.mrf.mxu0 }
 0xa7a   : > { %v10793_v57 = vadd.f32 %v15544_v17, %v10634_v59  ;;  %v10929_v11 = vadd.f32 %v15559_v61, %v10792_v63  ;;  %v10637_v59 = vadd.f32 %v20199_v21, %v13971_v12  ;;  %v10635_v63 = vadd.f32 %v13971_v12, %v20201_v46 }
 0xa7b   : > { %v10762_v38 = vpop.f32.mrf.mxu1  ;;  %v10896_v25 = vpop.f32.mrf.mxu0  ;;  %v10636_v17 = vadd.f32 %v13971_v12, %v20205_v0 }
 0xa7c   : > { %v10791_v31 = vadd.f32 %v10762_v38, %v10632_v14  ;;  %v10927_v56 = vadd.f32 %v10896_v25, %v10790_v55 }
 0xa7d   : > { %v20207_v35 = vpop.f32.mrf.mxu1  ;;  %v15560_v19 = vpop.f32.mrf.mxu0 }
 0xa7e   : > { %v10930_v50 = vadd.f32 %v15560_v19, %v10793_v57 }
 0xa7f   : > { %v20209_v3 = vpop.f32.mrf.mxu1  ;;  %v10899_v4 = vpop.f32.mrf.mxu0 }
 0xa80   : > { %v10928_v7 = vadd.f32 %v10899_v4, %v10791_v31 }
 0xa81   : > { %v20211_v9 = vpop.f32.mrf.mxu1  ;;  %v20213_v5 = vpop.f32.mrf.mxu0 }
 0xa83   : > { %v20215_v53 = vpop.f32.mrf.mxu1  ;;  %v20217_v30 = vpop.f32.mrf.mxu0 }
 0xa85   : > { %v20219_v47 = vpop.f32.mrf.mxu0  ;;  %v15575_v39 = vpop.f32.mrf.mxu1 }
 0xa86   : > { %v11066_v62 = vadd.f32 %v15575_v39, %v10929_v11  ;;  %v10638_v11 = vadd.f32 %v20203_v23, %v13971_v12 }
 0xa87   : > { %v20221_v48 = vpop.f32.mrf.mxu0  ;;  %v11033_v10 = vpop.f32.mrf.mxu1 }
 0xa88   : > { %v11064_v42 = vadd.f32 %v11033_v10, %v10927_v56  ;;  %v10796_v10 = vadd.f32 %v20207_v35, %v10637_v59 }
 0xa89   : > { %v15576_v52 = vpop.f32.mrf.mxu1 }
 0xa8a   : > { %v15591_v16 = vpop.f32.mrf.mxu0  ;;  %v11067_v37 = vadd.f32 %v15576_v52, %v10930_v50 }
 0xa8b   : > { %v11036_v36 = vpop.f32.mrf.mxu1 }
 0xa8c   : > { %v11195_v43 = vpop.f32.mrf.mxu0  ;;  %v11065_v20 = vadd.f32 %v11036_v36, %v10928_v7  ;;  %v10797_v36 = vadd.f32 %v20211_v9, %v10638_v11 }
 0xa8d   : > { %v20223_v22 = vpop.f32.mrf.mxu1  ;;  %v11226_v14 = vadd.f32 %v11195_v43, %v11064_v42  ;;  %v10933_v43 = vadd.f32 %v20213_v5, %v10796_v10 }
 0xa8e   : > { %v15592_v34 = vpop.f32.mrf.mxu0 }
 0xa8f   : > { %v20225_v58 = vpop.f32.mrf.mxu1  ;;  %v11229_v55 = vadd.f32 %v15592_v34, %v11067_v37 }
 0xa90   : > { %v11198_v32 = vpop.f32.mrf.mxu0 }
 0xa91   : > { %v20227_v29 = vpop.f32.mrf.mxu1  ;;  %v11227_v4 = vadd.f32 %v11198_v32, %v11065_v20  ;;  %v10934_v32 = vadd.f32 %v20219_v47, %v10797_v36 }
 0xa92   : > { %v20229_v2 = vpop.f32.mrf.mxu0 }
 0xa93   : > { %v20231_v13 = vpop.f32.mrf.mxu1 }
 0xa94   : > { %v20233_v51 = vpop.f32.mrf.mxu0 }
 0xa95   : > { %v15607_v28 = vpop.f32.mrf.mxu1 }
 0xa96   : > { %v20235_v24 = vpop.f32.mrf.mxu0 }
 0xa97   : > { %v11332_v40 = vpop.f32.mrf.mxu1 }
 0xa98   : > { %v20237_v33 = vpop.f32.mrf.mxu0 }
 0xa99   : > { %v15608_v26 = vpop.f32.mrf.mxu1 }
 0xa9a   : > { %v15623_v60 = vpop.f32.mrf.mxu0  ;;  %v11366_v56 = vadd.f32 %v15608_v26, %v11229_v55 }
 0xa9b   : > { %v11335_v41 = vpop.f32.mrf.mxu1 }
 0xa9c   : > { %v11454_v49 = vpop.f32.mrf.mxu0  ;;  %v11364_v12 = vadd.f32 %v11335_v41, %v11227_v4  ;;  %v11071_v41 = vadd.f32 %v20227_v29, %v10934_v32 }
 0xa9d   : > { %v20242_v44 = vpop.f32.mrf.mxu1 }
 0xa9e   : > { %22101 = vst [vmem:[#allocation36_spill] sm:$0xff] %v20242_v44  ;;  %v15624_v27 = vpop.f32.mrf.mxu0 }
 0xa9f   : > { %v20244_v54 = vpop.f32.mrf.mxu1  ;;  %v11488_v23 = vadd.f32 %v15624_v27, %v11366_v56 }
 0xaa0   : > { %22102 = vst [vmem:[#allocation21_spill] sm:$0xff] %v20244_v54  ;;  %v11457_v1 = vpop.f32.mrf.mxu0  ;;  %v11228_v54 = vadd.f32 %v15591_v16, %v11066_v62  ;;  %v10794_v16 = vadd.f32 %v20209_v3, %v10635_v63  ;;  %v11363_v62 = vadd.f32 %v11332_v40, %v11226_v14 }
 0xaa1   : > { %v20246_v18 = vpop.f32.mrf.mxu1  ;;  %v11486_v5 = vadd.f32 %v11457_v1, %v11364_v12 }
 0xaa2   : > { %v20248_v6 = vpop.f32.mrf.mxu0  ;;  %v11365_v57 = vadd.f32 %v15607_v28, %v11228_v54  ;;  %v10795_v54 = vadd.f32 %v20215_v53, %v10636_v17  ;;  %v10931_v28 = vadd.f32 %v20217_v30, %v10794_v16  ;;  %v11485_v46 = vadd.f32 %v11454_v49, %v11363_v62 }
 0xaa3   : > { %v20250_v44 = vpop.f32.mrf.mxu1 }
 0xaa4   : > { %v20252_v45 = vpop.f32.mrf.mxu0  ;;  %v11487_v31 = vadd.f32 %v15623_v60, %v11365_v57  ;;  %v10932_v26 = vadd.f32 %v20221_v48, %v10795_v54  ;;  %v11070_v60 = vadd.f32 %v20223_v22, %v10933_v43  ;;  %v11068_v9 = vadd.f32 %v20225_v58, %v10931_v28 }
 0xaa5   : > { %v15639_v8 = vpop.f32.mrf.mxu1  ;;  %v11233_v58 = vadd.f32 %v20235_v24, %v11071_v41  ;;  %v22103_v50 = vld [vmem:[#allocation36_spill] sm:$0xff] }
 0xaa6   : > { %v20256_v15 = vpop.f32.mrf.mxu0  ;;  %v11641_v0 = vadd.f32 %v15639_v8, %v11487_v31  ;;  %v11232_v27 = vadd.f32 %v20229_v2, %v11070_v60  ;;  %v11069_v49 = vadd.f32 %v20231_v13, %v10932_v26  ;;  %v11230_v47 = vadd.f32 %v20233_v51, %v11068_v9 }
 0xaa7   : > { %v11608_v39 = vpop.f32.mrf.mxu1  ;;  %v22104_v42 = vld [vmem:[#allocation21_spill] sm:$0xff]  ;;  %v11370_v51 = vadd.f32 %v20246_v18, %v11233_v58  ;;  %v22112_v58 = vld [vmem:[#allocation66_spill] sm:$0xff] }
 0xaa8   : > { %v11473_v52 = vpop.f32.mrf.mxu0  ;;  %v11639_v38 = vadd.f32 %v11608_v39, %v11485_v46  ;;  %v11231_v1 = vadd.f32 %v20237_v33, %v11069_v49  ;;  %v11369_v7 = vadd.f32 %v22103_v50, %v11232_v27  ;;  %v11367_v37 = vadd.f32 %v22104_v42, %v11230_v47 }
 0xaa9   : > { %v15640_v21 = vpop.f32.mrf.mxu1  ;;  %v11492_v11 = vadd.f32 %v20256_v15, %v11370_v51  ;;  %vm22113_vm4 = vcmp.ne.s16.totalorder %v22112_v58, 0 }
 0xaaa   : > { %v15655_v34 = vpop.f32.mrf.mxu0  ;;  %v11642_v53 = vadd.f32 %v15640_v21, %v11488_v23  ;;  %v11491_v63 = vadd.f32 %v20248_v6, %v11369_v7  ;;  %v11368_v20 = vadd.f32 %v20250_v44, %v11231_v1  ;;  %v11489_v14 = vadd.f32 %v20252_v45, %v11367_v37 }
 0xaab   : > { %v11611_v61 = vpop.f32.mrf.mxu1  ;;  %v11775_v25 = vadd.f32 %v15655_v34, %v11641_v0 }
 0xaac   : > { %v11742_v40 = vpop.f32.mrf.mxu0  ;;  %v11640_v48 = vadd.f32 %v11611_v61, %v11486_v5  ;;  %v11490_v17 = vadd.f32 %v11473_v52, %v11368_v20  ;;  %v22116_v20 = vld [vmem:[#allocation59_spill] sm:$0xff] }
 0xaad   : > { %v15643_v30 = vpop.f32.mrf.mxu1  ;;  %v11773_v19 = vadd.f32 %v11742_v40, %v11639_v38  ;;  %v11783_v8 = vmax.f32 %v11775_v25, 0.0 }
 0xaae   : > { %v15656_v35 = vpop.f32.mrf.mxu0  ;;  %v11645_v10 = vadd.f32 %v15643_v30, %v11491_v63  ;;  %v16010_v63 = vld [vmem:[#allocation6 + $0x48] sm:$0xff]  }
 0xaaf   : > { %v11776_v22 = vadd.f32 %v15656_v35, %v11642_v53  ;;  %v11624_v3 = vpop.f32.mrf.mxu1  ;;  %v11781_v55 = vmax.f32 %v11773_v19, 0.0  ;;  %v16008_v35 = vld [vmem:[#allocation6 + $0x50] sm:$0xff]  }
 0xab0   : > { %v11745_v29 = vpop.f32.mrf.mxu0  ;;  %v11643_v16 = vadd.f32 %v11624_v3, %v11489_v14 }
 0xab1   : > { %v11784_v2 = vmax.f32 %v11776_v22, 0.0  ;;  %v11774_v59 = vadd.f32 %v11745_v29, %v11640_v48  ;;  %v15644_v13 = vpop.f32.mrf.mxu1  ;;  %v22110_v22 = vld [vmem:[#allocation69_spill] sm:$0xff] }
 0xab2   : > { %v15659_v24 = vpop.f32.mrf.mxu0  ;;  %v11646_v31 = vadd.f32 %v15644_v13, %v11492_v11  ;;  %vm22111_vm12 = vcmp.ne.s16.totalorder %v22110_v22, 0 }
 0xab3   : > { %v11790_v33 = vpack.c.bf16 %v11784_v2, %v11783_v8  ;;  %v11782_v57 = vmax.f32 %v11774_v59, 0.0  ;;  %v11627_v39 = vpop.f32.mrf.mxu1  ;;  %v11779_v6 = vadd.f32 %v15659_v24, %v11645_v10  ;;  %v22115_v8 = vld [vmem:[#allocation37_spill] sm:$0xff]  ;;  %v22118_v24 = vld [vmem:[#allocation64_spill] sm:$0xff] }
 0xab4   : > { %v11758_v4 = vpop.f32.mrf.mxu0  ;;  %v11644_v21 = vadd.f32 %v11627_v39, %v11490_v17  ;;  %vm22119_vm7 = vcmp.ne.s16.totalorder %v22118_v24, 0 }
 0xab5   : > { %v11802_v62 = vshrl.u32 %v11790_v33, 16  ;;  %v11805_v56 = vshll.u32 %v11790_v33, 16  ;;  %v11789_v18 = vpack.c.bf16 %v11782_v57, %v11781_v55  ;;  %v11777_v44 = vadd.f32 %v11758_v4, %v11643_v16 }
 0xab6   : > { %v15660_v36 = vpop.f32.mrf.mxu0  ;;  %v11787_v23 = vmax.f32 %v11779_v6, 0.0 }
 0xab7   : > { %v11804_v45 = vrot.slane %v11802_v62, 3  ;;  %v11807_v43 = vrot.slane %v11805_v56, 4  ;;  %v11794_v54 = vshrl.u32 %v11789_v18, 16  ;;  %v11797_v28 = vshll.u32 %v11789_v18, 16 }
 0xab8   : > { %v11780_v34 = vadd.f32 %v15660_v36, %v11646_v31  ;;  %v11761_v12 = vpop.f32.mrf.mxu0  ;;  %v11785_v26 = vmax.f32 %v11777_v44, 0.0  ;;  %v22124_v31 = vld [vmem:[#allocation85_spill] sm:$0xff] }
 0xab9   : > { %v11796_v46 = vrot.slane %v11794_v54, 3  ;;  %v11799_v15 = vrot.slane %v11797_v28, 4  ;;  %v11778_v52 = vadd.f32 %v11761_v12, %v11644_v21  ;;  %v11808_v61 = vor.u32 %v11807_v43, %v11804_v45  ;;  %v22126_v21 = vld [vmem:[#allocation23_spill] sm:$0xff]  ;;  %v16011_v36 = vld [vmem:[#allocation6 + $0x40] sm:$0xff]   ;;  %v22131_v28 = vld [vmem:[#allocation60_spill] sm:$0xff] }
 0xaba   : > { %v11788_v0 = vmax.f32 %v11780_v34, 0.0 }
 0xabb   : > { %v11800_v32 = vor.u32 %v11799_v15, %v11796_v46  ;;  %v11786_v60 = vmax.f32 %v11778_v52, 0.0  ;;  %v22135_v15 = vld [vmem:[#allocation57_spill] sm:$0xff] }
 0xabc   : > { %v11792_v9 = vpack.c.bf16 %v11788_v0, %v11787_v23 }
 0xabd   : > { %v20284_v40 = vsel %vm22105_vm2, %v11800_v32, %v11808_v61  ;;  %v20288_v38 = vsel %vm19415_vm8, 0, %v11800_v32  ;;  %v11791_v53 = vpack.c.bf16 %v11786_v60, %v11785_v26  ;;  %vm22122_vm2 = vsmask.f32 7424  ;;  %v22138_v32 = vld [vmem:[#allocation16_spill] sm:$0xff] }
 0xabe   : > { %v11820_v25 = vshrl.u32 %v11792_v9, 16  ;;  %v11823_v30 = vshll.u32 %v11792_v9, 16  ;;  %v11836_v27 = vsel %vm19356_vm1, 0, %v20288_v38  ;;  %v11837_v47 = vsel %vm19360_vm6, 0, %v20284_v40  ;;  %vm22114_vm1 = vmmov %vm22067_vm3  ;;  %v16013_v9 = vld [vmem:[#allocation6 + $0x70] sm:$0xff]  }
 0xabf   : > { %v11811_v48 = vshrl.u32 %v11791_v53, 16  ;;  %v11814_v19 = vshll.u32 %v11791_v53, 16  ;;  %15669 = vmatprep.mubr.msk.bf16.mxu1 %vm22109_vm10, %v11836_v27  ;;  %v11963_v3 = vsel %vm22111_vm12, 0, %v20288_v38  ;;  %v11964_v1 = vsel %vm22113_vm4, 0, %v20284_v40  ;;  %vm22128_vm12 = vmmov %vm22114_vm1  ;;  %v16014_v27 = vld [vmem:[#allocation6 + $0x98] sm:$0xff]  }
 0xac0   : > { %v11822_v50 = vrot.slane %v11820_v25, 3  ;;  %v11825_v7 = vrot.slane %v11823_v30, 4  ;;  %15670 = vmatmul.mubr.msk.bf16.vlgmr.msra.gmra.mxu1 %vm22114_vm1, %v11837_v47  ;;  %v11980_v42 = vshll.u32 %v11963_v3, 16  ;;  %v11978_v2 = vshrl.u32 %v11963_v3, 16  ;;  %vm22129_vm4 = vmmov %vm22114_vm1  ;;  %v22144_v3 = vld [vmem:[#allocation24_spill] sm:$0xff] }
 0xac1   : > { %v11813_v37 = vrot.slane %v11811_v48, 3  ;;  %v11816_v29 = vrot.slane %v11814_v19, 4  ;;  %15694 = vmatpush3.bf16.msra.mxu1 %v22115_v8  ;;  %v11985_v59 = vshll.u32 %v11964_v1, 16  ;;  %vm22117_vm3 = vcmp.ne.s16.totalorder %v22116_v20, 0  ;;  %v22170_v19 = vld [vmem:[#allocation55_spill] sm:$0xff] }
 0xac2   : > { %v11826_v13 = vor.u32 %v11825_v7, %v11822_v50  ;;  %15695 = vmatprep.subr.bf16.mxu1 %v16008_v35  ;;  %v11982_v51 = vrot.slane %v11980_v42, 1  ;;  %v12122_v14 = vsel %vm22117_vm3, 0, %v20288_v38  ;;  %v12123_v55 = vsel %vm22119_vm7, 0, %v20284_v40  ;;  %vm22133_vm7 = vmmov %vm22129_vm4  ;;  %v16015_v42 = vld [vmem:[#allocation6 + $0x68] sm:$0xff]  }
 0xac3   : > { %v11817_v33 = vor.u32 %v11816_v29, %v11813_v37  ;;  %v11987_v39 = vrot.slane %v11985_v59, 1  ;;  %v12141_v11 = vrot.slane %v12122_v14, 1  ;;  %v12142_v17 = vrot.slane %v12123_v55, 1 }
 0xac4   : > { %v11983_v57 = vor.u32 %v11982_v51, %v11978_v2  ;;  %v20313_v10 = vsel %vm19415_vm8, %v11826_v13, 0  ;;  %vm22125_vm10 = vnez %v22124_v31  ;;  %vm22127_vm8 = vcmp.ne.s16.totalorder %v22126_v21, 0 }
 0xac5   : > { %v20316_v16 = vsel %vm22120_vm9, %v11808_v61, %v11817_v33  ;;  %v20319_v4 = vsel %vm22121_vm5, %v11817_v33, %v11826_v13  ;;  %15696 = vmatpush3.bf16.msra.mxu1 %v16008_v35  ;;  %v11989_v45 = vshrl.u32 %v11964_v1, 16  ;;  %vm22130_vm1 = vmmov %vm22127_vm8  ;;  %vm22132_vm3 = vcmp.ne.s16.totalorder %v22131_v28, 0  ;;  %v16016_v13 = vld [vmem:[#allocation6 + $0x90] sm:$0xff]   ;;  %v22180_v33 = vld [vmem:[#allocation61_spill] sm:$0xff] }
 0xac6   : > { %v11988_v62 = vsel %vm22122_vm2, %v11983_v57, %v11987_v39  ;;  %v11838_v18 = vsel %vm19523_vm14, 0, %v20316_v16  ;;  %v11839_v6 = vsel %vm22125_vm10, 0, %v20319_v4  ;;  %15697 = vmatprep.subr.bf16.mxu1 %v16010_v63  ;;  %v11965_v44 = vsel %vm22127_vm8, 0, %v20316_v16  ;;  %vm22137_vm2 = vmmov %vm22129_vm4 }
 0xac7   : > { %15685 = vmatprep.mubr.msk.bf16.mxu0 %vm22128_vm12, %v11988_v62  ;;  %15673 = vmatprep.mubr.msk.bf16.mxu1 %vm22129_vm4, %v11838_v18  ;;  %v11993_v43 = vshll.u32 %v11965_v44, 16  ;;  %v11966_v54 = vsel %vm22130_vm1, 0, %v20319_v4  ;;  %v12124_v34 = vsel %vm22132_vm3, 0, %v20316_v16  ;;  %vm22134_vm9 = vcmask 1046528   ;;  %vm22142_vm12 = vmmov %vm22137_vm2  ;;  %v16018_v62 = vld [vmem:[#allocation6 + $0x88] sm:$0xff]   ;;  %v22154_v18 = vld [vmem:[#allocation44_spill] sm:$0xff] }
 0xac8   : > { %15674 = vmatmul.mubr.msk.bf16.gmra.mxu1 %vm22133_vm7, %v11839_v6  ;;  %v12143_v12 = vsel %vm22134_vm9, %v12141_v11, %v12142_v17  ;;  %v12001_v46 = vshll.u32 %v11966_v54, 16  ;;  %vm22136_vm5 = vcmp.ne.s16.totalorder %v22135_v15, 0  ;;  %v11991_v23 = vor.u32 %v11989_v45, %v11987_v39  ;;  %vm22146_vm4 = vmmov %vm22137_vm2  ;;  %v16017_v39 = vld [vmem:[#allocation6 + $0x60] sm:$0xff]  }
 0xac9   : > { %v20344_v52 = vsel %vm22136_vm5, 0, %v20319_v4  ;;  %15698 = vmatpush3.bf16.msra.mxu1 %v16010_v63  ;;  %15701 = vmatprep.mubr.msk.bf16.mxu1 %vm22137_vm2, %v12143_v12  ;;  %v20347_v0 = vrot.slane %v11993_v43, 1  ;;  %v11997_v61 = vshrl.u32 %v11965_v44, 16  ;;  %vm22139_vm10 = vcmp.ne.s16.totalorder %v22138_v32, 0  ;;  %vm22149_vm3 = vmmov %vm22137_vm2  ;;  %v22158_v43 = vld [vmem:[#allocation78_spill] sm:$0xff] }
 0xaca   : > { %v11967_v26 = vsel %vm22139_vm10, 0, %v20313_v10  ;;  %15699 = vmatprep.subr.bf16.mxu1 %v16011_v36  ;;  %v12144_v60 = vrot.slane %v12124_v34, 1  ;;  %v12259_v53 = vsel %vm19420_vm15, 0, %v20288_v38  ;;  %vm22141_vm8 = vsmask.f32 7424  ;;  %vm22150_vm7 = vmmov %vm22137_vm2 }
 0xacb   : > { %v11996_v25 = vsel %vm22141_vm8, %v11991_v23, %v20347_v0  ;;  %v11999_v30 = vor.u32 %v11997_v61, %v20347_v0  ;;  %v12003_v41 = vrot.slane %v12001_v46, 1  ;;  %v12146_v47 = vrot.slane %v20344_v52, 1  ;;  %vm22145_vm15 = vmmov %vm22141_vm8  ;;  %v16020_v46 = vld [vmem:[#allocation6 + $0xb8] sm:$0xff]   ;;  %v16019_v23 = vld [vmem:[#allocation6 + $0x80] sm:$0xff]  }
 0xacc   : > { %15686 = vmatmul.mubr.msk.bf16.vlgmr.msra.gmra.mxu0 %vm22142_vm12, %v11996_v25  ;;  %v12005_v35 = vshrl.u32 %v11966_v54, 16  ;;  %v12009_v48 = vshll.u32 %v11967_v26, 16  ;;  %v12260_v22 = vsel %vm19424_vm0, 0, %v20284_v40  ;;  %v12406_v1 = vshrl.u32 %v20288_v38, 16  ;;  %vm22147_vm0 = vmmov %vm22134_vm9 }
 0xacd   : > { %15700 = vmatpush3.bf16.msra.mxu1 %v16011_v36  ;;  %15710 = vmatpush3.bf16.msra.mxu0 %v22144_v3  ;;  %v20365_v58 = vsel %vm22145_vm15, %v11999_v30, %v12003_v41  ;;  %v12409_v50 = vshll.u32 %v20288_v38, 16  ;;  %v12414_v7 = vshrl.u32 %v20284_v40, 16  ;;  %v12278_v37 = vrot.slane %v12259_v53, 4  ;;  %vm22148_vm1 = vmmov %vm22147_vm0  ;;  %v16021_v53 = vld [vmem:[#allocation6 + $0xb0] sm:$0xff]   ;;  %v16022_v30 = vld [vmem:[#allocation6 + $0xd8] sm:$0xff]  }
 0xace   : > { %15689 = vmatprep.mubr.msk.bf16.mxu0 %vm22146_vm4, %v20365_v58  ;;  %15711 = vmatprep.subr.bf16.mxu0 %v16013_v9  ;;  %v12417_v29 = vshll.u32 %v20284_v40, 16  ;;  %v20373_v8 = vor.u32 %v12005_v35, %v12003_v41  ;;  %v12145_v2 = vsel %vm22147_vm0, %v12142_v17, %v12144_v60  ;;  %v12147_v59 = vsel %vm22148_vm1, %v12144_v60, %v12146_v47  ;;  %vm22152_vm9 = vmmov %vm22141_vm8  ;;  %v22168_v35 = vld [vmem:[#allocation17_spill] sm:$0xff]  ;;  %v22172_v3 = vld [vmem:[#allocation68_spill] sm:$0xff] }
 0xacf   : > { %15725 = vmatprep.subr.bf16.mxu1 %v16014_v27  ;;  %v12279_v51 = vrot.slane %v12260_v22, 4  ;;  %v12408_v63 = vrot.slane %v12406_v1, 4  ;;  %v12411_v20 = vrot.slane %v12409_v50, 5  ;;  %v12416_v14 = vrot.slane %v12414_v7, 4  ;;  %vm22156_vm10 = vmmov %vm22149_vm3 }
 0xad0   : > { %15702 = vmatmul.mubr.msk.bf16.vlgmr.msra.gmra.mxu1 %vm22149_vm3, %v12145_v2  ;;  %v12419_v24 = vrot.slane %v12417_v29, 5  ;;  %v12011_v55 = vrot.slane %v12009_v48, 1  ;;  %v12126_v57 = vsel %vm22030_vm13, 0, %v20313_v10  ;;  %vm22153_vm5 = vcmask 1043456   ;;  %vm22157_vm13 = vmmov %vm22149_vm3 }
 0xad1   : > { %15705 = vmatprep.mubr.msk.bf16.mxu1 %vm22150_vm7, %v12147_v59  ;;  %15712 = vmatpush3.bf16.msra.mxu0 %v16013_v9  ;;  %v12280_v17 = vsel %vm22153_vm5, %v12278_v37, %v12279_v51  ;;  %vm22155_vm2 = vnez %v22154_v18  ;;  %v12412_v6 = vor.u32 %v12411_v20, %v12408_v63  ;;  %v12423_v44 = vshrl.u32 %v20316_v16, 16  ;;  %vm22160_vm12 = vmmov %vm22147_vm0  ;;  %v16024_v37 = vld [vmem:[#allocation6 + $0xd0] sm:$0xff]   ;;  %v16025_v20 = vld [vmem:[#allocation6 + $0xa0] sm:$0xff]  }
 0xad2   : > { %15726 = vmatpush3.bf16.msra.mxu1 %v16014_v27  ;;  %15713 = vmatprep.subr.bf16.mxu0 %v16015_v42  ;;  %v12012_v11 = vsel %vm22152_vm9, %v20373_v8, %v12011_v55  ;;  %v12261_v31 = vsel %vm22155_vm2, 0, %v20316_v16  ;;  %v12420_v21 = vor.u32 %v12419_v24, %v12416_v14  ;;  %v12426_v36 = vshll.u32 %v20316_v16, 16  ;;  %vm22161_vm15 = vmmov %vm22149_vm3  ;;  %v16026_v24 = vld [vmem:[#allocation6 + $0xc8] sm:$0xff]   ;;  %v16027_v18 = vld [vmem:[#allocation6 + $0xc0] sm:$0xff]  }
 0xad3   : > { %15727 = vmatprep.subr.bf16.mxu1 %v16016_v13  ;;  %v12148_v45 = vrot.slane %v12126_v57, 1  ;;  %vm22159_vm8 = vnez %v22158_v43  ;;  %v12432_v34 = vshrl.u32 %v20319_v4, 16  ;;  %v12435_v12 = vshll.u32 %v20319_v4, 16  ;;  %vm22163_vm0 = vmmov %vm22149_vm3 }
 0xad4   : > { %15690 = vmatmul.mubr.msk.bf16.gmra.mxu0 %vm22156_vm10, %v12012_v11  ;;  %v12262_v54 = vsel %vm22159_vm8, 0, %v20319_v4  ;;  %v12281_v52 = vrot.slane %v12261_v31, 4  ;;  %vm22162_vm4 = vsmask.f32 3328  ;;  %v12425_v26 = vrot.slane %v12423_v44, 4  ;;  %vm22164_vm1 = vmmov %vm22153_vm5  ;;  %v16028_v31 = vld [vmem:[#allocation6 + $0xf8] sm:$0xff]  }
 0xad5   : > { %15714 = vmatpush3.bf16.msra.mxu0 %v16015_v42  ;;  %15717 = vmatprep.mubr.msk.bf16.mxu0 %vm22157_vm13, %v12280_v17  ;;  %v12149_v15 = vsel %vm22160_vm12, %v12146_v47, %v12148_v45  ;;  %v12421_v61 = vsel %vm22162_vm4, %v12412_v6, %v12420_v21  ;;  %v12283_v32 = vrot.slane %v12262_v54, 4  ;;  %v12428_v60 = vrot.slane %v12426_v36, 5  ;;  %vm22165_vm3 = vmmov %vm22163_vm0  ;;  %v16023_v42 = vld [vmem:[#allocation6 + $0xa8] sm:$0xff]   ;;  %v22185_v6 = vld [vmem:[#allocation20_spill] sm:$0xff] }
 0xad6   : > { %15728 = vmatpush3.bf16.msra.mxu1 %v16016_v13  ;;  %15715 = vmatprep.subr.bf16.mxu0 %v16017_v39  ;;  %v12434_v9 = vrot.slane %v12432_v34, 4  ;;  %v12437_v5 = vrot.slane %v12435_v12, 5  ;;  %v12282_v25 = vsel %vm22164_vm1, %v12279_v51, %v12281_v52  ;;  %vm22166_vm7 = vmmov %vm22164_vm1  ;;  %vm22169_vm5 = vnez %v22168_v35  ;;  %v16029_v54 = vld [vmem:[#allocation6 + $0xf0] sm:$0xff]  }
 0xad7   : > { %15729 = vmatprep.subr.bf16.mxu1 %v16018_v62  ;;  %v12284_v41 = vsel %vm22166_vm7, %v12281_v52, %v12283_v32  ;;  %v12429_v27 = vor.u32 %v12428_v60, %v12425_v26  ;;  %vm22167_vm9 = vmmov %vm22163_vm0  ;;  %v12558_v48 = vsel %vm22169_vm5, 0, %v20288_v38  ;;  %vm22171_vm2 = vcmp.ne.s16.totalorder %v22170_v19, 0  ;;  %v22195_v52 = vld [vmem:[#allocation74_spill] sm:$0xff]  ;;  %v16032_v26 = vld [vmem:[#allocation6 + $0x110] sm:$0xff]  }
 0xad8   : > { %15706 = vmatmul.mubr.msk.bf16.gmra.mxu1 %vm22161_vm15, %v12149_v15  ;;  %v12438_v47 = vor.u32 %v12437_v5, %v12434_v9  ;;  %v12559_v22 = vsel %vm22171_vm2, 0, %v20284_v40  ;;  %vm22173_vm10 = vnez %v22172_v3  ;;  %v12441_v50 = vshrl.u32 %v20313_v10, 16  ;;  %vm22174_vm13 = vmmov %vm22162_vm4  ;;  %v22201_v35 = vld [vmem:[#allocation71_spill] sm:$0xff]  ;;  %v22205_v19 = vld [vmem:[#allocation90_spill] sm:$0xff] }
 0xad9   : > { %15716 = vmatpush3.bf16.msra.mxu0 %v16017_v39  ;;  %15733 = vmatprep.mubr.msk.bf16.mxu1 %vm22163_vm0, %v12421_v61  ;;  %v12263_v1 = vsel %vm22173_vm10, 0, %v20313_v10  ;;  %v12444_v7 = vshll.u32 %v20313_v10, 16  ;;  %v12430_v29 = vsel %vm22174_vm13, %v12420_v21, %v12429_v27  ;;  %v12577_v38 = vrot.slane %v12558_v48, 5  ;;  %vm22175_vm8 = vmmov %vm22163_vm0  ;;  %v22183_v39 = vld [vmem:[#allocation53_spill] sm:$0xff] }
 0xada   : > { %15730 = vmatpush3.bf16.msra.mxu1 %v16018_v62  ;;  %15741 = vmatprep.subr.bf16.mxu0 %v16020_v46  ;;  %v12578_v2 = vrot.slane %v12559_v22, 5  ;;  %vm22176_vm12 = vmmov %vm22162_vm4  ;;  %v12285_v13 = vrot.slane %v12263_v1, 4  ;;  %v12443_v51 = vrot.slane %v12441_v50, 4  ;;  %vm22186_vm5 = vcmp.ne.s16.totalorder %v22185_v6, 0  ;;  %v16035_v50 = vld [vmem:[#allocation6 + $0x100] sm:$0xff]  }
 0xadb   : > { %15731 = vmatprep.subr.bf16.mxu1 %v16019_v23  ;;  %v12439_v59 = vsel %vm22176_vm12, %v12429_v27, %v12438_v47  ;;  %vm22177_vm15 = vmmov %vm22163_vm0  ;;  %v12446_v63 = vrot.slane %v12444_v7, 5  ;;  %v12817_v21 = vsel %vm22186_vm5, 0, %v20284_v40  ;;  %v12695_v43 = vsel %vm19797_vm11, 0, %v20284_v40  ;;  %v22208_v7 = vld [vmem:[#allocation13_spill] sm:$0xff] }
 0xadc   : > { %15718 = vmatmul.mubr.msk.bf16.vlgmr.msra.gmra.mxu0 %vm22165_vm3, %v12282_v25  ;;  %vm22178_vm4 = vmmov %vm22164_vm1  ;;  %vm22179_vm1 = vcmask 1042432   ;;  %vm22181_vm3 = vcmp.ne.s16.totalorder %v22180_v33, 0  ;;  %v12833_v34 = vshll.u32 %v12817_v21, 16  ;;  %vm22196_vm11 = vnez %v22195_v52  ;;  %v16039_v33 = vld [vmem:[%s20631_s12] sm:$0xff]  }
 0xadd   : > { %15721 = vmatprep.mubr.msk.bf16.mxu0 %vm22167_vm9, %v12284_v41  ;;  %15742 = vmatpush3.bf16.msra.mxu0 %v16020_v46  ;;  %v12286_v14 = vsel %vm22178_vm4, %v12283_v32, %v12285_v13  ;;  %v12579_v55 = vsel %vm22179_vm1, %v12577_v38, %v12578_v2  ;;  %v12560_v57 = vsel %vm22181_vm3, 0, %v20316_v16  ;;  %vm22182_vm7 = vmmov %vm22163_vm0  ;;  %vm22184_vm9 = vcmp.ne.s16.totalorder %v22183_v39, 0  ;;  %v16030_v46 = vld [vmem:[#allocation6 + $0x118] sm:$0xff]   ;;  %v16031_v32 = vld [vmem:[#allocation6 + $0xe8] sm:$0xff]  }
 0xade   : > { %15732 = vmatpush3.bf16.msra.mxu1 %v16019_v23  ;;  %15743 = vmatprep.subr.bf16.mxu0 %v16021_v53  ;;  %v12561_v11 = vsel %vm22184_vm9, 0, %v20319_v4  ;;  %v12447_v17 = vor.u32 %v12446_v63, %v12443_v51  ;;  %v12580_v62 = vrot.slane %v12560_v57, 5  ;;  %vm22187_vm2 = vmmov %vm22176_vm12  ;;  %v12562_v23 = vsel %vm22196_vm11, 0, %v20313_v10  ;;  %v22198_v41 = vld [vmem:[#allocation30_spill] sm:$0xff] }
 0xadf   : > { %15757 = vmatprep.subr.bf16.mxu1 %v16022_v30  ;;  %v12582_v36 = vrot.slane %v12561_v11, 5  ;;  %vm22188_vm10 = vmmov %vm22163_vm0  ;;  %v12835_v61 = vrot.slane %v12833_v34, 1  ;;  %v12696_v60 = vsel %vm19360_vm6, 0, %v20316_v16  ;;  %v12831_v9 = vshrl.u32 %v12817_v21, 16 }
 0xae0   : > { %v12448_v44 = vsel %vm22187_vm2, %v12438_v47, %v12447_v17  ;;  %vm22190_vm13 = vmmov %vm22163_vm0  ;;  %v12697_v5 = vsel %vm19523_vm14, 0, %v20319_v4  ;;  %vm22199_vm3 = vcmp.ne.s16.totalorder %v22198_v41, 0  ;;  %v16034_v47 = vld [vmem:[#allocation6 + $0x108] sm:$0xff]   ;;  %vm22202_vm6 = vcmp.ne.s16.totalorder %v22201_v35, 0 }
 0xae1   : > { %15734 = vmatmul.mubr.msk.bf16.vlgmr.msra.gmra.mxu1 %vm22175_vm8, %v12430_v29  ;;  %15744 = vmatpush3.bf16.msra.mxu0 %v16021_v53  ;;  %vm22191_vm8 = vmmov %vm22179_vm1  ;;  %v12584_v53 = vrot.slane %v12562_v23, 5  ;;  %v12836_v25 = vor.u32 %v12835_v61, %v12831_v9  ;;  %v12972_v27 = vsel %vm22199_vm3, 0, %v20316_v16  ;;  %v12820_v56 = vsel %vm22202_vm6, 0, %v20313_v10 }
 0xae2   : > { %15737 = vmatprep.mubr.msk.bf16.mxu1 %vm22177_vm15, %v12439_v59  ;;  %15758 = vmatpush3.bf16.msra.mxu1 %v16022_v30  ;;  %v12581_v12 = vsel %vm22191_vm8, %v12578_v2, %v12580_v62  ;;  %vm22192_vm12 = vmmov %vm22163_vm0  ;;  %v16033_v30 = vld [vmem:[#allocation6 + $0xe0] sm:$0xff]   ;;  %vm22204_vm9 = vsmask.f32 7424  ;;  %vm22206_vm5 = vnez %v22205_v19  ;;  %v12989_v16 = vrot.slane %v12972_v27, 1  ;;  %v22216_v2 = vld [vmem:[#allocation46_spill] sm:$0xff] }
 0xae3   : > { %15745 = vmatprep.subr.bf16.mxu0 %v16023_v42  ;;  %15759 = vmatprep.subr.bf16.mxu1 %v16024_v37  ;;  %vm22193_vm15 = vmmov %vm22179_vm1  ;;  %v12841_v48 = vsel %vm22204_vm9, %v12836_v25, %v20347_v0  ;;  %v12971_v22 = vsel %vm22206_vm5, 0, %v20284_v40  ;;  %v12854_v3 = vshll.u32 %v12820_v56, 16  ;;  %v12858_v13 = vshrl.u32 %v12820_v56, 16 }
 0xae4   : > { %15722 = vmatmul.mubr.msk.bf16.gmra.mxu0 %vm22163_vm0, %v12286_v14  ;;  %v12583_v15 = vsel %vm22193_vm15, %v12580_v62, %v12582_v36  ;;  %vm22194_vm4 = vmmov %vm22163_vm0  ;;  %v12988_v1 = vrot.slane %v12971_v22, 1  ;;  %v16155_v14 = vmov 0.0  }
 0xae5   : > { %15746 = vmatpush3.bf16.msra.mxu0 %v16023_v42  ;;  %15749 = vmatprep.mubr.msk.bf16.mxu0 %vm22182_vm7, %v12579_v55  ;;  %vm22197_vm1 = vmmov %vm22163_vm0  ;;  %v16038_v55 = vld [vmem:[%s20631_s12 + $0x8] sm:$0xff]  }
 0xae6   : > { %15760 = vmatpush3.bf16.msra.mxu1 %v16024_v37  ;;  %15747 = vmatprep.subr.bf16.mxu0 %v16025_v20  ;;  %vm22200_vm7 = vmmov %vm22191_vm8  ;;  %vm22211_vm8 = vcmask 1046528   ;;  %v12856_v37 = vrot.slane %v12854_v3, 1 }
 0xae7   : > { %15761 = vmatprep.subr.bf16.mxu1 %v16026_v24  ;;  %v12585_v49 = vsel %vm22200_vm7, %v12582_v36, %v12584_v53  ;;  %vm22203_vm14 = vmmov %vm22163_vm0  ;;  %v12990_v0 = vsel %vm22211_vm8, %v12988_v1, %v12989_v16 }
 0xae8   : > { %vm22207_vm2 = vmmov %vm22163_vm0 }
 0xae9   : > { %15738 = vmatmul.mubr.msk.bf16.gmra.mxu1 %vm22188_vm10, %v12448_v44  ;;  %15748 = vmatpush3.bf16.msra.mxu0 %v16025_v20  ;;  %vm22209_vm10 = vnez %v22208_v7  ;;  %vm22213_vm15 = vmmov %vm22163_vm0  ;;  %v16036_v20 = vld [vmem:[%s20631_s12 + $0x18] sm:$0xff]   ;;  %v14044_v7 = vld [vmem:[%s20630_s11] ss:$0 sm:$0xff] }
 0xaea   : > { %15762 = vmatpush3.bf16.msra.mxu1 %v16026_v24  ;;  %15765 = vmatprep.mubr.msk.bf16.mxu1 %vm22190_vm13, %v12695_v43  ;;  %v12698_v42 = vsel %vm22209_vm10, 0, %v20313_v10  ;;  %vm22210_vm13 = vmmov %vm22163_vm0  ;;  %v16037_v24 = vld [vmem:[%s20631_s12 + $0x10] sm:$0xff]  }
 0xaeb   : > { %15763 = vmatprep.subr.bf16.mxu1 %v16027_v18  ;;  %15773 = vmatprep.subr.bf16.mxu0 %v16028_v31  ;;  %vm22215_vm11 = vmmov %vm22204_vm9 }
 0xaec   : > { %15750 = vmatmul.mubr.msk.bf16.vlgmr.msra.gmra.mxu0 %vm22192_vm12, %v12581_v12  ;;  %vm22212_vm12 = vcmp.ne.s16.totalorder %v22131_v28, 0  ;;  %v12857_v29 = vsel %vm22215_vm11, %v20373_v8, %v12856_v37  ;;  %vm22218_vm3 = vmmov %vm22211_vm8  ;;  %v22222_v8 = vld [vmem:[#allocation18_spill] sm:$0xff] }
 0xaed   : > { %15753 = vmatprep.mubr.msk.bf16.mxu0 %vm22194_vm4, %v12583_v15  ;;  %15774 = vmatpush3.bf16.msra.mxu0 %v16028_v31  ;;  %v12973_v40 = vsel %vm22212_vm12, 0, %v20319_v4  ;;  %vm22214_vm4 = vmmov %vm22163_vm0  ;;  %v12860_v4 = vor.u32 %v12858_v13, %v12856_v37 }
 0xaee   : > { %15764 = vmatpush3.bf16.msra.mxu1 %v16027_v18  ;;  %15775 = vmatprep.subr.bf16.mxu0 %v16029_v54  ;;  %v12991_v38 = vrot.slane %v12973_v40, 1  ;;  %vm22219_vm7 = vmmov %vm22197_vm1 }
 0xaef   : > { %15789 = vmatprep.subr.bf16.mxu1 %v16030_v46  ;;  %vm22220_vm6 = vmmov %vm22218_vm3  ;;  %v12861_v63 = vsel %vm22204_vm9, %v12860_v4, %v22222_v8 }
 0xaf0   : > { %v12992_v51 = vsel %vm22218_vm3, %v12989_v16, %v12991_v38  ;;  %vm22223_vm5 = vmmov %vm22197_vm1 }
 0xaf1   : > { %15766 = vmatmul.mubr.msk.bf16.vlgmr.msra.gmra.mxu1 %vm22163_vm0, %v12696_v60  ;;  %15776 = vmatpush3.bf16.msra.mxu0 %v16029_v54  ;;  %vm22217_vm0 = vcmp.ne.s16.totalorder %v22216_v2, 0  ;;  %vm22225_vm10 = vmmov %vm22197_vm1 }
 0xaf2   : > { %15769 = vmatprep.mubr.msk.bf16.mxu1 %vm22197_vm1, %v12697_v5  ;;  %15790 = vmatpush3.bf16.msra.mxu1 %v16030_v46  ;;  %v12974_v59 = vsel %vm22217_vm0, 0, %v20313_v10  ;;  %vm22237_vm8 = vmmov %vm22197_vm1 }
 0xaf3   : > { %15777 = vmatprep.subr.bf16.mxu0 %v16031_v32  ;;  %15791 = vmatprep.subr.bf16.mxu1 %v16032_v26  ;;  %v12993_v28 = vrot.slane %v12974_v59, 1  ;;  %vm22238_vm12 = vmmov %vm22197_vm1 }
 0xaf4   : > { %15754 = vmatmul.mubr.msk.bf16.gmra.mxu0 %vm22203_vm14, %v12585_v49  ;;  %vm22221_vm14 = vmmov %vm22197_vm1 }
 0xaf5   : > { %15778 = vmatpush3.bf16.msra.mxu0 %v16031_v32  ;;  %15781 = vmatprep.mubr.msk.bf16.mxu0 %vm22207_vm2, %v12841_v48  ;;  %vm22224_vm2 = vmmov %vm22218_vm3 }
 0xaf6   : > { %15792 = vmatpush3.bf16.msra.mxu1 %v16032_v26  ;;  %15779 = vmatprep.subr.bf16.mxu0 %v16033_v30  ;;  %v12995_v10 = vsel %vm22224_vm2, %v12993_v28, %v22222_v8  ;;  %vm22249_vm11 = vmmov %vm22197_vm1 }
 0xaf7   : > { %15793 = vmatprep.subr.bf16.mxu1 %v16034_v47  ;;  %vm22250_vm0 = vmmov %vm22197_vm1 }
 0xaf8   : > { %vm22252_vm3 = vmmov %vm22250_vm0 }
 0xaf9   : > { %15770 = vmatmul.mubr.msk.bf16.gmra.mxu1 %vm22210_vm13, %v12698_v42  ;;  %15780 = vmatpush3.bf16.msra.mxu0 %v16033_v30  ;;  %vm22226_vm13 = vmmov 0  }
 0xafa   : > { %15794 = vmatpush3.bf16.msra.mxu1 %v16034_v47  ;;  %15797 = vmatprep.mubr.msk.bf16.mxu1 %vm22213_vm15, %v12990_v0  ;;  %vm22241_vm15 = vmmov %vm22197_vm1 }
 0xafb   : > { %15795 = vmatprep.subr.bf16.mxu1 %v16035_v50  ;;  %15805 = vmatprep.subr.bf16.mxu0 %v16155_v14 }
 0xafc   : > { %15782 = vmatmul.mubr.msk.bf16.vlgmr.msra.gmra.mxu0 %vm22214_vm4, %v20365_v58  ;;  %v12994_v58 = vsel %vm22220_vm6, %v12991_v38, %v12993_v28  ;;  %vm22244_vm4 = vmmov %vm22197_vm1 }
 0xafd   : > { %15785 = vmatprep.mubr.msk.bf16.mxu0 %vm22197_vm1, %v12857_v29  ;;  %15806 = vmatpush3.bf16.msra.mxu0 %v16036_v20  ;;  %vm22251_vm1 = vmmov %vm22250_vm0 }
 0xafe   : > { %15796 = vmatpush3.bf16.msra.mxu1 %v16035_v50  ;;  %15807 = vmatprep.subr.bf16.mxu0 %v16155_v14 }
 0xb01   : > { %15798 = vmatmul.mubr.msk.bf16.vlgmr.msra.gmra.mxu1 %vm22219_vm7, %v12992_v51  ;;  %15808 = vmatpush3.bf16.msra.mxu0 %v16037_v24  ;;  %vm22253_vm7 = vmmov %vm22250_vm0 }
 0xb02   : > { %15801 = vmatprep.mubr.msk.bf16.mxu1 %vm22221_vm14, %v12994_v58  ;;  %15809 = vmatprep.subr.bf16.mxu0 %v16155_v14 }
 0xb04   : > { %15786 = vmatmul.mubr.msk.bf16.gmra.mxu0 %vm22223_vm5, %v12861_v63 }
 0xb05   : > { %15813 = vmatprep.mubr.msk.bf16.mxu0 %vm22226_vm13, %v16155_v14  ;;  %15810 = vmatpush3.bf16.msra.mxu0 %v16038_v55 }
 0xb06   : > { %15811 = vmatprep.subr.bf16.mxu0 %v16155_v14 }
 0xb09   : > { %15802 = vmatmul.mubr.msk.bf16.gmra.mxu1 %vm22225_vm10, %v12995_v10  ;;  %15812 = vmatpush3.bf16.msra.mxu0 %v16039_v33 }
 0xb80   : > { %v15671_v57 = vpop.f32.mrf.mxu1 }
 0xb81   : > { %v11957_v37 = vadd.f32 %v15671_v57, %v14044_v7 }
 0xb82   : > { %v11918_v39 = vpop.f32.mrf.mxu1 }
 0xb83   : > { %v11955_v38 = vadd.f32 %v14044_v7, %v11918_v39 }
 0xb84   : > { %v15672_v11 = vpop.f32.mrf.mxu1 }
 0xb85   : > { %v11958_v4 = vadd.f32 %v15672_v11, %v14044_v7 }
 0xb86   : > { %v11921_v17 = vpop.f32.mrf.mxu1 }
 0xb87   : > { %v11956_v63 = vadd.f32 %v14044_v7, %v11921_v17 }
 0xb88   : > { %v20508_v62 = vpop.f32.mrf.mxu1 }
 0xb89   : > { %v11961_v11 = vadd.f32 %v20508_v62, %v14044_v7 }
 0xb8a   : > { %v20510_v18 = vpop.f32.mrf.mxu1 }
 0xb8c   : > { %v20512_v31 = vpop.f32.mrf.mxu1  ;;  %v15687_v6 = vpop.f32.mrf.mxu0 }
 0xb8d   : > { %v12116_v59 = vadd.f32 %v15687_v6, %v11957_v37 }
 0xb8e   : > { %v20514_v21 = vpop.f32.mrf.mxu1  ;;  %v12083_v44 = vpop.f32.mrf.mxu0 }
 0xb8f   : > { %v12114_v28 = vadd.f32 %v12083_v44, %v11955_v38  ;;  %v11962_v38 = vadd.f32 %v20512_v31, %v14044_v7  ;;  %v11960_v62 = vadd.f32 %v14044_v7, %v20514_v21 }
 0xb90   : > { %v15688_v36 = vpop.f32.mrf.mxu0  ;;  %v15703_v45 = vpop.f32.mrf.mxu1 }
 0xb91   : > { %v12253_v58 = vadd.f32 %v15703_v45, %v12116_v59  ;;  %v12117_v10 = vadd.f32 %v15688_v36, %v11958_v4  ;;  %v11959_v45 = vadd.f32 %v14044_v7, %v20510_v18 }
 0xb92   : > { %v12086_v43 = vpop.f32.mrf.mxu0  ;;  %v12220_v54 = vpop.f32.mrf.mxu1 }
 0xb93   : > { %v12251_v20 = vadd.f32 %v12220_v54, %v12114_v28  ;;  %v12115_v33 = vadd.f32 %v12086_v43, %v11956_v63 }
 0xb94   : > { %v15691_v34 = vpop.f32.mrf.mxu0  ;;  %v15704_v12 = vpop.f32.mrf.mxu1 }
 0xb95   : > { %v12254_v57 = vadd.f32 %v15704_v12, %v12117_v10 }
 0xb96   : > { %v20516_v46 = vpop.f32.mrf.mxu0  ;;  %v12223_v15 = vpop.f32.mrf.mxu1 }
 0xb97   : > { %v12252_v37 = vadd.f32 %v12223_v15, %v12115_v33  ;;  %v12118_v43 = vadd.f32 %v20516_v46, %v11959_v45 }
 0xb98   : > { %v20518_v52 = vpop.f32.mrf.mxu0  ;;  %v20520_v23 = vpop.f32.mrf.mxu1 }
 0xb9a   : > { %v20522_v61 = vpop.f32.mrf.mxu0  ;;  %v20524_v32 = vpop.f32.mrf.mxu1 }
 0xb9b   : > { %v12119_v46 = vadd.f32 %v20522_v61, %v11960_v62 }
 0xb9c   : > { %v20526_v26 = vpop.f32.mrf.mxu1  ;;  %v15719_v60 = vpop.f32.mrf.mxu0 }
 0xb9d   : > { %v12390_v24 = vadd.f32 %v15719_v60, %v12253_v58  ;;  %v12120_v60 = vadd.f32 %v15691_v34, %v11961_v11 }
 0xb9e   : > { %v20528_v9 = vpop.f32.mrf.mxu1  ;;  %v12357_v5 = vpop.f32.mrf.mxu0 }
 0xb9f   : > { %v12388_v39 = vadd.f32 %v12357_v5, %v12251_v20  ;;  %v12257_v18 = vadd.f32 %v20520_v23, %v12120_v60 }
 0xba0   : > { %v15720_v53 = vpop.f32.mrf.mxu0 }
 0xba1   : > { %v15735_v25 = vpop.f32.mrf.mxu1  ;;  %v12391_v17 = vadd.f32 %v15720_v53, %v12254_v57 }
 0xba2   : > { %v12360_v30 = vpop.f32.mrf.mxu0  ;;  %v12552_v6 = vadd.f32 %v15735_v25, %v12390_v24  ;;  %v12121_v25 = vadd.f32 %v20518_v52, %v11962_v38 }
 0xba3   : > { %v12519_v41 = vpop.f32.mrf.mxu1  ;;  %v12389_v12 = vadd.f32 %v12360_v30, %v12252_v37  ;;  %v22231_v37 = vld [vmem:[#allocation29_spill] sm:$0xff] }
 0xba4   : > { %v20530_v27 = vpop.f32.mrf.mxu0  ;;  %v12550_v36 = vadd.f32 %v12519_v41, %v12388_v39  ;;  %v12255_v41 = vadd.f32 %v20524_v32, %v12118_v43  ;;  %v12258_v30 = vadd.f32 %v20526_v26, %v12121_v25  ;;  %v12256_v32 = vadd.f32 %v20528_v9, %v12119_v46  ;;  %v22228_v39 = vld [vmem:[#allocation43_spill] sm:$0xff] }
 0xba5   : > { %v15736_v49 = vpop.f32.mrf.mxu1  ;;  %v22233_v43 = vld [vmem:[#allocation27_spill] sm:$0xff] }
 0xba6   : > { %v20532_v47 = vpop.f32.mrf.mxu0  ;;  %v12553_v5 = vadd.f32 %v15736_v49, %v12391_v17  ;;  %v12394_v49 = vadd.f32 %v20530_v27, %v12257_v18  ;;  %v22232_v17 = vmax.f32 %v22231_v37, 0.0  ;;  %v22235_v18 = vld [vmem:[#allocation42_spill] sm:$0xff] }
 0xba7   : > { %v12522_v35 = vpop.f32.mrf.mxu1  ;;  %v12392_v52 = vadd.f32 %v20532_v47, %v12255_v41 }
 0xba8   : > { %v20534_v56 = vpop.f32.mrf.mxu0  ;;  %v12551_v31 = vadd.f32 %v12522_v35, %v12389_v12  ;;  %v22234_v12 = vmax.f32 %v22233_v43, 0.0  ;;  %v22254_v43 = vld [vmem:[#allocation9_spill] sm:$0xff] }
 0xba9   : > { %v20536_v48 = vpop.f32.mrf.mxu1  ;;  %v12395_v35 = vadd.f32 %v20534_v56, %v12258_v30 }
 0xbaa   : > { %v20538_v19 = vpop.f32.mrf.mxu0 }
 0xbab   : > { %v20540_v22 = vpop.f32.mrf.mxu1  ;;  %v12393_v47 = vadd.f32 %v20538_v19, %v12256_v32  ;;  %v22242_v32 = vld [vmem:[#allocation26_spill] sm:$0xff] }
 0xbac   : > { %v15751_v16 = vpop.f32.mrf.mxu0  ;;  %v12554_v26 = vadd.f32 %v20540_v22, %v12392_v52 }
 0xbad   : > { %v20542_v3 = vpop.f32.mrf.mxu1  ;;  %v12689_v59 = vadd.f32 %v15751_v16, %v12552_v6 }
 0xbae   : > { %v12656_v1 = vpop.f32.mrf.mxu0 }
 0xbaf   : > { %v20544_v50 = vpop.f32.mrf.mxu1  ;;  %v12687_v28 = vadd.f32 %v12656_v1, %v12550_v36 }
 0xbb0   : > { %22227 = vst [vmem:[#allocation33_spill] sm:$0xff] %v20544_v50  ;;  %v15752_v42 = vpop.f32.mrf.mxu0 }
 0xbb1   : > { %v15767_v0 = vpop.f32.mrf.mxu1  ;;  %v12690_v34 = vadd.f32 %v15752_v42, %v12553_v5  ;;  %v12556_v42 = vadd.f32 %v20536_v48, %v12394_v49  ;;  %v22229_v48 = vmax.f32 %v22228_v39, 0.0 }
 0xbb2   : > { %v12659_v40 = vpop.f32.mrf.mxu0  ;;  %v12811_v15 = vadd.f32 %v15767_v0, %v12689_v59 }
 0xbb3   : > { %v12778_v29 = vpop.f32.mrf.mxu1  ;;  %v12688_v7 = vadd.f32 %v12659_v40, %v12551_v31  ;;  %v12557_v40 = vadd.f32 %v20542_v3, %v12395_v35  ;;  %v22243_v35 = vmax.f32 %v22242_v32, 0.0 }
 0xbb4   : > { %v20549_v2 = vpop.f32.mrf.mxu0  ;;  %v12809_v16 = vadd.f32 %v12778_v29, %v12687_v28 }
 0xbb5   : > { %v15768_v13 = vpop.f32.mrf.mxu1 }
 0xbb6   : > { %v20551_v51 = vpop.f32.mrf.mxu0  ;;  %v12812_v23 = vadd.f32 %v15768_v13, %v12690_v34  ;;  %v12693_v13 = vadd.f32 %v20549_v2, %v12556_v42 }
 0xbb7   : > { %v12781_v8 = vpop.f32.mrf.mxu1  ;;  %v12691_v9 = vadd.f32 %v20551_v51, %v12554_v26  ;;  %v22230_v22 = vld [vmem:[#allocation33_spill] sm:$0xff] }
 0xbb8   : > { %v20553_v14 = vpop.f32.mrf.mxu0  ;;  %v12810_v20 = vadd.f32 %v12781_v8, %v12688_v7  ;;  %v12555_v8 = vadd.f32 %v22230_v22, %v12393_v47  ;;  %v22247_v47 = vld [vmem:[#allocation25_spill] sm:$0xff] }
 0xbb9   : > { %v20555_v55 = vpop.f32.mrf.mxu1  ;;  %v12694_v19 = vadd.f32 %v20553_v14, %v12557_v40  ;;  %v22248_v40 = vmax.f32 %v22247_v47, 0.0 }
 0xbba   : > { %v20557_v50 = vpop.f32.mrf.mxu0  ;;  %v12815_v3 = vadd.f32 %v20555_v55, %v12693_v13 }
 0xbbb   : > { %v12794_v44 = vpop.f32.mrf.mxu1  ;;  %v12692_v51 = vadd.f32 %v20557_v50, %v12555_v8 }
 0xbbc   : > { %v15783_v54 = vpop.f32.mrf.mxu0  ;;  %v12813_v2 = vadd.f32 %v12794_v44, %v12691_v9 }
 0xbbd   : > { %v15772_v4 = vpop.f32.mrf.mxu1  ;;  %v12965_v1 = vadd.f32 %v15783_v54, %v12811_v15  ;;  %v22236_v15 = vmax.f32 %v22235_v18, 0.0 }
 0xbbe   : > { %v12932_v58 = vpop.f32.mrf.mxu0 }
 0xbbf   : > { %v12797_v53 = vpop.f32.mrf.mxu1  ;;  %v12963_v0 = vadd.f32 %v12932_v58, %v12809_v16  ;;  %v12816_v58 = vadd.f32 %v15772_v4, %v12694_v19 }
 0xbc0   : > { %v15784_v63 = vpop.f32.mrf.mxu0  ;;  %v12814_v31 = vadd.f32 %v12797_v53, %v12692_v51 }
 0xbc1   : > { %v15799_v21 = vpop.f32.mrf.mxu1  ;;  %v12966_v27 = vadd.f32 %v15784_v63, %v12812_v23 }
 0xbc2   : > { %v12935_v10 = vpop.f32.mrf.mxu0  ;;  %v13099_v29 = vadd.f32 %v15799_v21, %v12965_v1  ;;  %v22239_v21 = vld [vmem:[#allocation39_spill] sm:$0xff] }
 0xbc3   : > { %v13066_v61 = vpop.f32.mrf.mxu1  ;;  %v12964_v56 = vadd.f32 %v12935_v10, %v12810_v20  ;;  %v22240_v52 = vmax.f32 %v22239_v21, 0.0 }
 0xbc4   : > { %v13097_v24 = vadd.f32 %v13066_v61, %v12963_v0  ;;  %v15787_v33 = vpop.f32.mrf.mxu0  ;;  %v13107_v36 = vadd.f32 %v13099_v29, %v22232_v17 }
 0xbc5   : > { %v15800_v57 = vpop.f32.mrf.mxu1  ;;  %v12969_v62 = vadd.f32 %v15787_v33, %v12815_v3 }
 0xbc6   : > { %v13105_v11 = vadd.f32 %v13097_v24, %v22229_v48  ;;  %v13100_v6 = vadd.f32 %v15800_v57, %v12966_v27  ;;  %v12948_v45 = vpop.f32.mrf.mxu0  ;;  %v13115_v14 = vmax.f32 %v13107_v36, 0.0  ;;  %v22245_v27 = vld [vmem:[#allocation28_spill] sm:$0xff] }
 0xbc7   : > { %v13069_v54 = vpop.f32.mrf.mxu1  ;;  %v12967_v25 = vadd.f32 %v12948_v45, %v12813_v2  ;;  %v22246_v24 = vmax.f32 %v22245_v27, 0.0 }
 0xbc8   : > { %v13098_v38 = vadd.f32 %v13069_v54, %v12964_v56  ;;  %v15788_v60 = vpop.f32.mrf.mxu0  ;;  %v13113_v59 = vmax.f32 %v13105_v11, 0.0  ;;  %v13108_v5 = vadd.f32 %v13100_v6, %v22234_v12  ;;  %v13124_v10 = vsel %vm22241_vm15, %v13115_v14, 0.0 }
 0xbc9   : > { %v15803_v28 = vpop.f32.mrf.mxu1  ;;  %v12970_v16 = vadd.f32 %v15788_v60, %v12816_v58  ;;  %v13222_v12 = vsub.s32 0, %v22254_v43 }
 0xbca   : > { %v13106_v41 = vadd.f32 %v13098_v38, %v22236_v15  ;;  %v12951_v34 = vpop.f32.mrf.mxu0  ;;  %v13103_v63 = vadd.f32 %v15803_v28, %v12969_v62  ;;  %v13121_v50 = vsel %vm22237_vm8, %v13113_v59, 0.0  ;;  %v13116_v30 = vmax.f32 %v13108_v5, 0.0  ;;  %v13152_v59 = vld [vmem:[%s20632_s13] sm:$0x1] }
 0xbcb   : > { %v13082_v55 = vpop.f32.mrf.mxu1  ;;  %v12968_v4 = vadd.f32 %v12951_v34, %v12814_v31 }
 0xbcc   : > { %v13114_v44 = vmax.f32 %v13106_v41, 0.0  ;;  %v13101_v46 = vadd.f32 %v13082_v55, %v12967_v25  ;;  %v13111_v42 = vadd.f32 %v13103_v63, %v22243_v35  ;;  %v13126_v20 = vsel %vm22244_vm4, %v13116_v30, 0.0 }
 0xbcd   : > { %v15804_v49 = vpop.f32.mrf.mxu1 }
 0xbce   : > { %v13122_v1 = vsel %vm22238_vm12, %v13114_v44, 0.0  ;;  %v13109_v7 = vadd.f32 %v13101_v46, %v22240_v52  ;;  %v13104_v23 = vadd.f32 %v15804_v49, %v12970_v16  ;;  %v13119_v9 = vmax.f32 %v13111_v42, 0.0 }
 0xbcf   : > { %v13123_v0 = vadd.f32 %v13122_v1, %v13121_v50  ;;  %v13085_v53 = vpop.f32.mrf.mxu1 }
 0xbd0   : > { %v13117_v29 = vmax.f32 %v13109_v7, 0.0  ;;  %v13102_v61 = vadd.f32 %v13085_v53, %v12968_v4  ;;  %v13112_v33 = vadd.f32 %v13104_v23, %v22246_v24  ;;  %v13132_v22 = vsel %vm22251_vm1, %v13119_v9, 0.0 }
 0xbd1   : > { %v13125_v26 = vadd.f32 %v13124_v10, %v13123_v0 }
 0xbd2   : > { %v13110_v13 = vadd.f32 %v13102_v61, %v22248_v40  ;;  %v13128_v56 = vsel %vm22249_vm11, %v13117_v29, 0.0  ;;  %v13120_v11 = vmax.f32 %v13112_v33, 0.0 }
 0xbd3   : > { %v13127_v57 = vadd.f32 %v13126_v20, %v13125_v26 }
 0xbd4   : > { %v13118_v39 = vmax.f32 %v13110_v13, 0.0  ;;  %v13134_v37 = vsel %vm22252_vm3, %v13120_v11, 0.0 }
 0xbd5   : > { %v13129_v48 = vadd.f32 %v13128_v56, %v13127_v57 }
 0xbd6   : > { %v13130_v6 = vsel %vm22250_vm0, %v13118_v39, 0.0 }
 0xbd7   : > { %v13131_v45 = vadd.f32 %v13130_v6, %v13129_v48 }
 0xbd9   : > { %v13133_v8 = vadd.f32 %v13132_v22, %v13131_v45 }
 0xbdb   : > { %v13135_v17 = vadd.f32 %v13134_v37, %v13133_v8 }
 0xbdd   : > { %v13136_v36 = vrot.slane %v13135_v17, 4 }
 0xbdf   : > { %v13137_v54 = vadd.f32 %v13136_v36, %v13135_v17 }
 0xbe1   : > { %v13138_v19 = vrot.slane %v13137_v54, 2 }
 0xbe3   : > { %v13139_v3 = vadd.f32 %v13138_v19, %v13137_v54 }
 0xbe5   : > { %v13140_v2 = vrot.slane %v13139_v3, 1 }
 0xbe7   : > { %v13141_v38 = vadd.f32 %v13140_v2, %v13139_v3 }
 0xbe9   : > { %v13142_v60 = vmul.f32 0.015625, %v13141_v38 }
 0xbeb   : > { %v13143_v51 = vpack.c.bf16 %v13142_v60, %v13142_v60 }
 0xbed   : > { %15814 = vmatmul.mubr.msk.bf16.vlgmr.msra.gmra.mxu0 %vm22253_vm7, %v13143_v51 }
 0xcad   : > { %v13214_v5 = vpop.f32.mrf.mxu0 }
 0xcae   : > { %v13215_v28 = vadd.f32 %v13214_v5, %v13152_v59 }
 0xcaf   : > { %v15815_v58 = vpop.f32.mrf.mxu0 }
 0xcb0   : > { %v13223_v62 = vrot.slane %v13215_v28, %v13222_v12 }
 0xcb1   : > { %v13217_v25 = vpop.f32.mrf.mxu0 }
 0xcb2   : > { %13224 = vst [vmem:[%s509_s20] sm:$0xff] %v13223_v62 }
 0xcb3   : > { %v15816_v18 = vpop.f32.mrf.mxu0 }
 0xcb4 PF: > { %s26_s29 = sadd.s32 1, %s16143_s29  }
 0xcb5   : > { %p23_p2 = scmp.ge.s32.totalorder %s26_s29, 4  }
 0xcb7   :  { %25 = sbr.rel (!%p23_p2) target bundleno = 2 (0x2), region = 159 }
 0xcbc   :  { %13244 = vsyncpa [#allocation3], 1 }
 0xcbd   :  { %13246 = vsyncpa [#allocation3 + $0x1], 1 }
 0xcbe   :  { %13247 = vsyncpa [#allocation5], 1 }

</bundles_post_ra>
